<compile_context>
chip_gen: v5e
topology: v5e:2x2
jax: 0.10.0
libtpu: 0.0.40
codegen_flags: <defaults>
</compile_context>

<pallas_src>
import numpy as np

import jax
import jax.numpy as jnp
from jax.experimental import pallas as pl
from jax.experimental.pallas import tpu as pltpu


# ----------------------- parameter pre-lowering (numpy, runs once) -----------------------

def _conv_matrix(w, H, W, stride, padding):
    """Unrolled matrix for PyTorch Conv2d.  w:(Cout,Cin,k,k).

    Returns M:(Cin*H*W, Cout*oH*oW) with  out.ravel() = x.ravel() @ M  (per sample, NCHW ravel).
    """
    Cout, Cin, k, _ = w.shape
    oH = (H + 2 * padding - k) // stride + 1
    oW = (W + 2 * padding - k) // stride + 1
    M = np.zeros((Cin, H, W, Cout, oH, oW), np.float32)
    for ki in range(k):
        for kj in range(k):
            tap = np.asarray(w[:, :, ki, kj], np.float32).T        # (Cin, Cout)
            for oh in range(oH):
                ih = oh * stride + ki - padding
                if not 0 <= ih < H:
                    continue
                for ow in range(oW):
                    iw = ow * stride + kj - padding
                    if not 0 <= iw < W:
                        continue
                    M[:, ih, iw, :, oh, ow] += tap
    return M.reshape(Cin * H * W, Cout * oH * oW), oH, oW


def _conv_transpose_matrix(w, H, W, stride, padding):
    """Unrolled matrix for PyTorch ConvTranspose2d.  w:(Cin,Cout,k,k).  Direct formulation
    (no zero-dilation): out[oh,ow] += x[ih,iw] * w[...,ki,kj]  where oh = ih*s + ki - p."""
    Cin, Cout, k, _ = w.shape
    oH = (H - 1) * stride - 2 * padding + k
    oW = (W - 1) * stride - 2 * padding + k
    M = np.zeros((Cin, H, W, Cout, oH, oW), np.float32)
    for ki in range(k):
        for kj in range(k):
            tap = np.asarray(w[:, :, ki, kj], np.float32)          # (Cin, Cout)
            for ih in range(H):
                oh = ih * stride + ki - padding
                if not 0 <= oh < oH:
                    continue
                for iw in range(W):
                    ow = iw * stride + kj - padding
                    if not 0 <= ow < oW:
                        continue
                    M[:, ih, iw, :, oh, ow] += tap
    return M.reshape(Cin * H * W, Cout * oH * oW), oH, oW


def _maxpool_gathers(C, H, W, k, stride):
    """0/1 selection matrices for MaxPool2d(k, stride): pooled = max_d (x.ravel() @ G[d])."""
    oH = (H - k) // stride + 1
    oW = (W - k) // stride + 1
    G = np.zeros((k * k, C, H, W, C, oH, oW), np.float32)
    c = np.arange(C)
    d = 0
    for di in range(k):
        for dj in range(k):
            for oh in range(oH):
                for ow in range(oW):
                    G[d, c, oh * stride + di, ow * stride + dj, c, oh, ow] = 1.0
            d += 1
    return G.reshape(k * k, C * H * W, C * oH * oW), oH, oW


def build_forward_constants(params, input_channel, ndim):
    """Pre-lower all layers to matmul operands (done once, like weight repacking).

    Conv+ReLU+MaxPool stages are folded:  relu(x@W+b)@G[d] == relu(x@(W@G[d]) + b@G[d])  and
    max_d relu(y_d) == relu(max_d y_d), so each pooled conv becomes k*k folded matmuls + one
    max-tree + one ReLU.  The fold is exact (G is a 0/1 column selection).
    """
    p = {k: np.asarray(v, np.float32) for k, v in params.items()}
    S = ndim

    # ---- encoder: Conv2d(C,16,3,s3,p1) + ReLU + MaxPool(2,2)  (folded) ----
    m1, H, W = _conv_matrix(p["e1_w"], S, S, stride=3, padding=1)
    b1 = np.repeat(p["e1_b"], H * W)
    g1, H, W = _maxpool_gathers(p["e1_w"].shape[0], H, W, 2, 2)
    w1d = np.einsum("ij,djk->dik", m1, g1)                 # (4, Cin*S*S, 16*pH*pW)  exact fold
    b1d = np.einsum("j,djk->dk", b1, g1)                   # (4, 16*pH*pW)

    # ---- encoder: Conv2d(16,8,3,s2,p1) + ReLU + MaxPool(2,1)  (folded) ----
    m2, H, W = _conv_matrix(p["e2_w"], H, W, stride=2, padding=1)
    b2 = np.repeat(p["e2_b"], H * W)
    g2, H, W = _maxpool_gathers(p["e2_w"].shape[0], H, W, 2, 1)
    w2d = np.einsum("ij,djk->dik", m2, g2)
    b2d = np.einsum("j,djk->dk", b2, g2)

    # ---- decoder ----
    w3, H, W = _conv_transpose_matrix(p["d1_w"], H, W, stride=2, padding=0)                   # T(8,16,3,s2)
    b3 = np.repeat(p["d1_b"], H * W)
    w4, H, W = _conv_transpose_matrix(p["d2_w"], H, W, stride=3, padding=1 - int(ndim / 32))  # T(16,8,5,s3)
    b4 = np.repeat(p["d2_b"], H * W)
    w5, H, W = _conv_transpose_matrix(p["d3_w"], H, W, stride=2, padding=1)                   # T(8,C,2,s2,p1)
    b5 = np.repeat(p["d3_b"], H * W)
    if (H, W) != (S, S):
        raise ValueError(f"decoder output {H}x{W} != input {S}x{S} "
                         f"(the module geometry only closes for supported ndim, e.g. 16)")

    consts = {
        # MXU operands -> bf16 (selection fold is exact, values identical to original weights)
        "w1d": jnp.asarray(w1d, jnp.bfloat16),
        "w2d": jnp.asarray(w2d, jnp.bfloat16),
        "w3": jnp.asarray(w3, jnp.bfloat16),
        "w4": jnp.asarray(w4, jnp.bfloat16),
        "w5": jnp.asarray(w5, jnp.bfloat16),
        # VPU operands -> f32, kept >=2-D for clean broadcasting on TPU
        "b1d": jnp.asarray(b1d[:, None, :], jnp.float32),   # (4,1,Dp1)
        "b2d": jnp.asarray(b2d[:, None, :], jnp.float32),   # (4,1,Dp2)
        "b3": jnp.asarray(b3[None, :], jnp.float32),
        "b4": jnp.asarray(b4[None, :], jnp.float32),
        "b5": jnp.asarray(b5[None, :], jnp.float32),
    }
    return consts


# ------------------------------------ Pallas kernel ------------------------------------

def _autoencoder_kernel(x_ref, w1d, b1d, w2d, b2d, w3, b3, w4, b4, w5, b5, o_ref):
    def mm(hb, w_ref):                                   # bf16 MXU matmul, f32 accumulation
        return jnp.dot(hb, w_ref[...], preferred_element_type=jnp.float32)

    def conv_relu_pool(h, wd_ref, bd_ref):
        # relu(max_d (h @ WG[d] + bG[d]))  == Conv + bias + ReLU + MaxPool (exact fold)
        hb = h.astype(jnp.bfloat16)
        out = jnp.dot(hb, wd_ref[0], preferred_element_type=jnp.float32) + bd_ref[0]
        for d in range(1, wd_ref.shape[0]):
            out = jnp.maximum(
                out, jnp.dot(hb, wd_ref[d], preferred_element_type=jnp.float32) + bd_ref[d])
        return jnp.maximum(out, 0.0)

    h = x_ref[...]                                                     # bf16 (BN, Cin*H*W)
    h = conv_relu_pool(h, w1d, b1d)                                    # Conv1+ReLU+Pool(2,2)
    h = conv_relu_pool(h, w2d, b2d)                                    # Conv2+ReLU+Pool(2,1)
    h = jnp.maximum(mm(h.astype(jnp.bfloat16), w3) + b3[...], 0.0)     # ConvT1 + ReLU
    h = jnp.maximum(mm(h.astype(jnp.bfloat16), w4) + b4[...], 0.0)     # ConvT2 + ReLU
    h = jnp.tanh(mm(h.astype(jnp.bfloat16), w5) + b5[...])             # ConvT3 + Tanh
    o_ref[...] = h.astype(o_ref.dtype)


_CONST_ORDER = ("w1d", "b1d", "w2d", "b2d", "w3", "b3", "w4", "b4", "w5", "b5")


def _const_spec(a):
    """Whole-array block, constant index_map; single-buffered (never re-fetched)."""
    nd = a.ndim
    idx = lambda i, _nd=nd: (0,) * _nd
    try:
        return pl.BlockSpec(a.shape, idx, pipeline_mode=pl.Buffered(1))
    except Exception:   # older jax without pipeline_mode / Buffered(1): fall back to default
        return pl.BlockSpec(a.shape, idx)


def autoencoder_forward(consts, x):
    """x: (N, C, H, W) float32 -> (N, C, H, W) float32, single fused Pallas kernel."""
    N, C, H, W = x.shape
    Din = C * H * W
    Dout = consts["w5"].shape[1]
    assert Dout == Din
    # bf16 in the wrapper: halves input DMA, first MXU operand already in the right dtype.
    x2 = x.reshape(N, Din).astype(jnp.bfloat16)

    # Batch tiling: sublane-aligned (multiple of 8), up to 128 rows per grid step.  Once the
    # batch is big enough, keep >=2 grid steps so dimension_semantics=("parallel",) can shard
    # the batch axis across v7x's two TensorCores.  Pad the batch instead of asserting.
    Npad = -(-N // 8) * 8
    if Npad >= 32:
        BN = min(128, -(-(Npad // 2) // 8) * 8)
    else:
        BN = Npad
    Ntile = -(-Npad // BN) * BN
    if Ntile != N:
        x2 = jnp.pad(x2, ((0, Ntile - N), (0, 0)))
    grid = (Ntile // BN,)

    const_args = [consts[k] for k in _CONST_ORDER]
    in_specs = [pl.BlockSpec((BN, Din), lambda i: (i, 0))] + [_const_spec(a) for a in const_args]
    out_specs = pl.BlockSpec((BN, Dout), lambda i: (i, 0))

    # advisory cost estimate
    flops = 0
    for k in ("w1d", "w2d"):
        d, a, b = consts[k].shape
        flops += 2 * Ntile * d * a * b
    for k in ("w3", "w4", "w5"):
        a, b = consts[k].shape
        flops += 2 * Ntile * a * b
    bytes_accessed = int(x2.size * 2 + Ntile * Dout * 4 +
                         sum(int(np.prod(a.shape)) * a.dtype.itemsize for a in const_args))

    out = pl.pallas_call(
        _autoencoder_kernel,
        out_shape=jax.ShapeDtypeStruct((Ntile, Dout), jnp.float32),
        grid=grid,
        in_specs=in_specs,
        out_specs=out_specs,
        compiler_params=pltpu.CompilerParams(
            dimension_semantics=("parallel",),
            vmem_limit_bytes=32 * 1024 * 1024,   # explicit; safe on v5e/v6e/v7x at ndim=16
        ),
        cost_estimate=pl.CostEstimate(flops=int(flops),
                                      transcendentals=int(Ntile * Dout),
                                      bytes_accessed=bytes_accessed),
    )(x2, *const_args)
    return out[:N].reshape(N, C, H, W)


# ------------------------------------- parameters --------------------------------------

def init_params(key, input_channel):
    """Deterministic PyTorch-layout parameters (independent keys for weight & bias)."""
    specs = {
        # name: (weight_shape, fan_in, bias_size)   Conv2d: (Cout,Cin,k,k); ConvT: (Cin,Cout,k,k)
        "e1": ((16, input_channel, 3, 3), input_channel * 9, 16),
        "e2": ((8, 16, 3, 3), 16 * 9, 8),
        "d1": ((8, 16, 3, 3), 8 * 9, 16),
        "d2": ((16, 8, 5, 5), 16 * 25, 8),
        "d3": ((8, input_channel, 2, 2), 8 * 4, input_channel),
    }
    params = {}
    keys = jax.random.split(key, len(specs))
    for (name, (wshape, fan_in, bsize)), k in zip(specs.items(), keys):
        kw, kb = jax.random.split(k)
        bound = 1.0 / (fan_in ** 0.5)
        params[name + "_w"] = jax.random.uniform(kw, wshape, jnp.float32, -bound, bound)
        params[name + "_b"] = jax.random.uniform(kb, (bsize,), jnp.float32, -bound, bound)
    return params


# ---------------------------------------- main -----------------------------------------

if __name__ == "__main__":
    input_channel = 4
    ndim = 16          # spatial size; 2nd deconv padding = 1 - int(16/32) = 1
    batch = 2

    key = jax.random.PRNGKey(0)
    k_params, k_x = jax.random.split(key)
    params = init_params(k_params, input_channel)
    consts = build_forward_constants(params, input_channel, ndim)
    x = jax.random.normal(k_x, (batch, input_channel, ndim, ndim), jnp.float32)

    fwd = jax.jit(autoencoder_forward)
    out = jax.block_until_ready(fwd(consts, x))

    assert out.shape == (batch, input_channel, ndim, ndim), out.shape
    assert bool(jnp.all(jnp.isfinite(out)))
    assert bool(jnp.all(jnp.abs(out) <= 1.0))   # tanh output range

    print("KERNEL_OK")
</pallas_src>

<mosaic_0001>
module attributes {stable_mosaic.version = 11 : i64} {
  func.func @_autoencoder_kernel(%arg0: i32, %arg1: memref<8x1024xbf16, #tpu.memory_space<vmem>>, %arg2: memref<4x1024x144xbf16, #tpu.memory_space<vmem>>, %arg3: memref<4x1x144xf32, #tpu.memory_space<vmem>>, %arg4: memref<4x144x8xbf16, #tpu.memory_space<vmem>>, %arg5: memref<4x1x8xf32, #tpu.memory_space<vmem>>, %arg6: memref<8x144xbf16, #tpu.memory_space<vmem>>, %arg7: memref<1x144xf32, #tpu.memory_space<vmem>>, %arg8: memref<144x648xbf16, #tpu.memory_space<vmem>>, %arg9: memref<1x648xf32, #tpu.memory_space<vmem>>, %arg10: memref<648x1024xbf16, #tpu.memory_space<vmem>>, %arg11: memref<1x1024xf32, #tpu.memory_space<vmem>>, %arg12: memref<8x1024xf32, #tpu.memory_space<vmem>>) attributes {dimension_semantics = [#tpu.dimension_semantics<parallel>], iteration_bounds = array<i64: 1>, scalar_prefetch = 0 : i64, scratch_operands = 0 : i64, tpu.core_type = #tpu.core_type<tc>, window_params = [{transform_indices = @transform_0, window_bounds = array<i64: 8, 1024>}, {pipeline_mode = #tpu.pipeline_mode<synchronous>, transform_indices = @transform_1, window_bounds = array<i64: 4, 1024, 144>}, {pipeline_mode = #tpu.pipeline_mode<synchronous>, transform_indices = @transform_2, window_bounds = array<i64: 4, 1, 144>}, {pipeline_mode = #tpu.pipeline_mode<synchronous>, transform_indices = @transform_3, window_bounds = array<i64: 4, 144, 8>}, {pipeline_mode = #tpu.pipeline_mode<synchronous>, transform_indices = @transform_4, window_bounds = array<i64: 4, 1, 8>}, {pipeline_mode = #tpu.pipeline_mode<synchronous>, transform_indices = @transform_5, window_bounds = array<i64: 8, 144>}, {pipeline_mode = #tpu.pipeline_mode<synchronous>, transform_indices = @transform_6, window_bounds = array<i64: 1, 144>}, {pipeline_mode = #tpu.pipeline_mode<synchronous>, transform_indices = @transform_7, window_bounds = array<i64: 144, 648>}, {pipeline_mode = #tpu.pipeline_mode<synchronous>, transform_indices = @transform_8, window_bounds = array<i64: 1, 648>}, {pipeline_mode = #tpu.pipeline_mode<synchronous>, transform_indices = @transform_9, window_bounds = array<i64: 648, 1024>}, {pipeline_mode = #tpu.pipeline_mode<synchronous>, transform_indices = @transform_10, window_bounds = array<i64: 1, 1024>}, {transform_indices = @transform_11, window_bounds = array<i64: 8, 1024>}]} {
    %c0 = arith.constant 0 : index
    %c0_0 = arith.constant 0 : index
    %0 = vector.load %arg1[%c0, %c0_0] : memref<8x1024xbf16, #tpu.memory_space<vmem>>, vector<8x1024xbf16>
    %c0_1 = arith.constant 0 : index
    %c0_2 = arith.constant 0 : index
    %c0_3 = arith.constant 0 : index
    %1 = vector.load %arg2[%c0_1, %c0_2, %c0_3] : memref<4x1024x144xbf16, #tpu.memory_space<vmem>>, vector<1x1024x144xbf16>
    %2 = vector.shape_cast %1 : vector<1x1024x144xbf16> to vector<1024x144xbf16>
    %cst = arith.constant dense<0.000000e+00> : vector<8x144xf32>
    %3 = tpu.matmul %0, %2, %cst {dimension_numbers = #tpu.dot_dimension_numbers<[1], [0], [0], [1], [0, 0, 1, 1], [], []>} : vector<8x1024xbf16>, vector<1024x144xbf16>, vector<8x144xf32> -> vector<8x144xf32>
    %c0_4 = arith.constant 0 : index
    %c0_5 = arith.constant 0 : index
    %c0_6 = arith.constant 0 : index
    %4 = vector.load %arg3[%c0_4, %c0_5, %c0_6] : memref<4x1x144xf32, #tpu.memory_space<vmem>>, vector<1x1x144xf32>
    %5 = vector.shape_cast %4 : vector<1x1x144xf32> to vector<1x144xf32>
    %6 = vector.broadcast %5 : vector<1x144xf32> to vector<8x144xf32>
    %7 = arith.addf %3, %6 : vector<8x144xf32>
    %c1 = arith.constant 1 : index
    %c0_7 = arith.constant 0 : index
    %c0_8 = arith.constant 0 : index
    %8 = vector.load %arg2[%c1, %c0_7, %c0_8] : memref<4x1024x144xbf16, #tpu.memory_space<vmem>>, vector<1x1024x144xbf16>
    %9 = vector.shape_cast %8 : vector<1x1024x144xbf16> to vector<1024x144xbf16>
    %cst_9 = arith.constant dense<0.000000e+00> : vector<8x144xf32>
    %10 = tpu.matmul %0, %9, %cst_9 {dimension_numbers = #tpu.dot_dimension_numbers<[1], [0], [0], [1], [0, 0, 1, 1], [], []>} : vector<8x1024xbf16>, vector<1024x144xbf16>, vector<8x144xf32> -> vector<8x144xf32>
    %c1_10 = arith.constant 1 : index
    %c0_11 = arith.constant 0 : index
    %c0_12 = arith.constant 0 : index
    %11 = vector.load %arg3[%c1_10, %c0_11, %c0_12] : memref<4x1x144xf32, #tpu.memory_space<vmem>>, vector<1x1x144xf32>
    %12 = vector.shape_cast %11 : vector<1x1x144xf32> to vector<1x144xf32>
    %13 = vector.broadcast %12 : vector<1x144xf32> to vector<8x144xf32>
    %14 = arith.addf %10, %13 : vector<8x144xf32>
    %15 = arith.maximumf %7, %14 : vector<8x144xf32>
    %c2 = arith.constant 2 : index
    %c0_13 = arith.constant 0 : index
    %c0_14 = arith.constant 0 : index
    %16 = vector.load %arg2[%c2, %c0_13, %c0_14] : memref<4x1024x144xbf16, #tpu.memory_space<vmem>>, vector<1x1024x144xbf16>
    %17 = vector.shape_cast %16 : vector<1x1024x144xbf16> to vector<1024x144xbf16>
    %cst_15 = arith.constant dense<0.000000e+00> : vector<8x144xf32>
    %18 = tpu.matmul %0, %17, %cst_15 {dimension_numbers = #tpu.dot_dimension_numbers<[1], [0], [0], [1], [0, 0, 1, 1], [], []>} : vector<8x1024xbf16>, vector<1024x144xbf16>, vector<8x144xf32> -> vector<8x144xf32>
    %c2_16 = arith.constant 2 : index
    %c0_17 = arith.constant 0 : index
    %c0_18 = arith.constant 0 : index
    %19 = vector.load %arg3[%c2_16, %c0_17, %c0_18] : memref<4x1x144xf32, #tpu.memory_space<vmem>>, vector<1x1x144xf32>
    %20 = vector.shape_cast %19 : vector<1x1x144xf32> to vector<1x144xf32>
    %21 = vector.broadcast %20 : vector<1x144xf32> to vector<8x144xf32>
    %22 = arith.addf %18, %21 : vector<8x144xf32>
    %23 = arith.maximumf %15, %22 : vector<8x144xf32>
    %c3 = arith.constant 3 : index
    %c0_19 = arith.constant 0 : index
    %c0_20 = arith.constant 0 : index
    %24 = vector.load %arg2[%c3, %c0_19, %c0_20] : memref<4x1024x144xbf16, #tpu.memory_space<vmem>>, vector<1x1024x144xbf16>
    %25 = vector.shape_cast %24 : vector<1x1024x144xbf16> to vector<1024x144xbf16>
    %cst_21 = arith.constant dense<0.000000e+00> : vector<8x144xf32>
    %26 = tpu.matmul %0, %25, %cst_21 {dimension_numbers = #tpu.dot_dimension_numbers<[1], [0], [0], [1], [0, 0, 1, 1], [], []>} : vector<8x1024xbf16>, vector<1024x144xbf16>, vector<8x144xf32> -> vector<8x144xf32>
    %c3_22 = arith.constant 3 : index
    %c0_23 = arith.constant 0 : index
    %c0_24 = arith.constant 0 : index
    %27 = vector.load %arg3[%c3_22, %c0_23, %c0_24] : memref<4x1x144xf32, #tpu.memory_space<vmem>>, vector<1x1x144xf32>
    %28 = vector.shape_cast %27 : vector<1x1x144xf32> to vector<1x144xf32>
    %29 = vector.broadcast %28 : vector<1x144xf32> to vector<8x144xf32>
    %30 = arith.addf %26, %29 : vector<8x144xf32>
    %31 = arith.maximumf %23, %30 : vector<8x144xf32>
    %cst_25 = arith.constant 0.000000e+00 : f32
    %32 = vector.broadcast %cst_25 : f32 to vector<8x144xf32>
    %33 = arith.maximumf %31, %32 : vector<8x144xf32>
    %34 = arith.truncf %33 : vector<8x144xf32> to vector<8x144xbf16>
    %c0_26 = arith.constant 0 : index
    %c0_27 = arith.constant 0 : index
    %c0_28 = arith.constant 0 : index
    %35 = vector.load %arg4[%c0_26, %c0_27, %c0_28] : memref<4x144x8xbf16, #tpu.memory_space<vmem>>, vector<1x144x8xbf16>
    %36 = vector.shape_cast %35 : vector<1x144x8xbf16> to vector<144x8xbf16>
    %cst_29 = arith.constant dense<0.000000e+00> : vector<8x8xf32>
    %37 = tpu.matmul %34, %36, %cst_29 {dimension_numbers = #tpu.dot_dimension_numbers<[1], [0], [0], [1], [0, 0, 1, 1], [], []>} : vector<8x144xbf16>, vector<144x8xbf16>, vector<8x8xf32> -> vector<8x8xf32>
    %c0_30 = arith.constant 0 : index
    %c0_31 = arith.constant 0 : index
    %c0_32 = arith.constant 0 : index
    %38 = vector.load %arg5[%c0_30, %c0_31, %c0_32] : memref<4x1x8xf32, #tpu.memory_space<vmem>>, vector<1x1x8xf32>
    %39 = vector.shape_cast %38 : vector<1x1x8xf32> to vector<1x8xf32>
    %40 = vector.broadcast %39 : vector<1x8xf32> to vector<8x8xf32>
    %41 = arith.addf %37, %40 : vector<8x8xf32>
    %c1_33 = arith.constant 1 : index
    %c0_34 = arith.constant 0 : index
    %c0_35 = arith.constant 0 : index
    %42 = vector.load %arg4[%c1_33, %c0_34, %c0_35] : memref<4x144x8xbf16, #tpu.memory_space<vmem>>, vector<1x144x8xbf16>
    %43 = vector.shape_cast %42 : vector<1x144x8xbf16> to vector<144x8xbf16>
    %cst_36 = arith.constant dense<0.000000e+00> : vector<8x8xf32>
    %44 = tpu.matmul %34, %43, %cst_36 {dimension_numbers = #tpu.dot_dimension_numbers<[1], [0], [0], [1], [0, 0, 1, 1], [], []>} : vector<8x144xbf16>, vector<144x8xbf16>, vector<8x8xf32> -> vector<8x8xf32>
    %c1_37 = arith.constant 1 : index
    %c0_38 = arith.constant 0 : index
    %c0_39 = arith.constant 0 : index
    %45 = vector.load %arg5[%c1_37, %c0_38, %c0_39] : memref<4x1x8xf32, #tpu.memory_space<vmem>>, vector<1x1x8xf32>
    %46 = vector.shape_cast %45 : vector<1x1x8xf32> to vector<1x8xf32>
    %47 = vector.broadcast %46 : vector<1x8xf32> to vector<8x8xf32>
    %48 = arith.addf %44, %47 : vector<8x8xf32>
    %49 = arith.maximumf %41, %48 : vector<8x8xf32>
    %c2_40 = arith.constant 2 : index
    %c0_41 = arith.constant 0 : index
    %c0_42 = arith.constant 0 : index
    %50 = vector.load %arg4[%c2_40, %c0_41, %c0_42] : memref<4x144x8xbf16, #tpu.memory_space<vmem>>, vector<1x144x8xbf16>
    %51 = vector.shape_cast %50 : vector<1x144x8xbf16> to vector<144x8xbf16>
    %cst_43 = arith.constant dense<0.000000e+00> : vector<8x8xf32>
    %52 = tpu.matmul %34, %51, %cst_43 {dimension_numbers = #tpu.dot_dimension_numbers<[1], [0], [0], [1], [0, 0, 1, 1], [], []>} : vector<8x144xbf16>, vector<144x8xbf16>, vector<8x8xf32> -> vector<8x8xf32>
    %c2_44 = arith.constant 2 : index
    %c0_45 = arith.constant 0 : index
    %c0_46 = arith.constant 0 : index
    %53 = vector.load %arg5[%c2_44, %c0_45, %c0_46] : memref<4x1x8xf32, #tpu.memory_space<vmem>>, vector<1x1x8xf32>
    %54 = vector.shape_cast %53 : vector<1x1x8xf32> to vector<1x8xf32>
    %55 = vector.broadcast %54 : vector<1x8xf32> to vector<8x8xf32>
    %56 = arith.addf %52, %55 : vector<8x8xf32>
    %57 = arith.maximumf %49, %56 : vector<8x8xf32>
    %c3_47 = arith.constant 3 : index
    %c0_48 = arith.constant 0 : index
    %c0_49 = arith.constant 0 : index
    %58 = vector.load %arg4[%c3_47, %c0_48, %c0_49] : memref<4x144x8xbf16, #tpu.memory_space<vmem>>, vector<1x144x8xbf16>
    %59 = vector.shape_cast %58 : vector<1x144x8xbf16> to vector<144x8xbf16>
    %cst_50 = arith.constant dense<0.000000e+00> : vector<8x8xf32>
    %60 = tpu.matmul %34, %59, %cst_50 {dimension_numbers = #tpu.dot_dimension_numbers<[1], [0], [0], [1], [0, 0, 1, 1], [], []>} : vector<8x144xbf16>, vector<144x8xbf16>, vector<8x8xf32> -> vector<8x8xf32>
    %c3_51 = arith.constant 3 : index
    %c0_52 = arith.constant 0 : index
    %c0_53 = arith.constant 0 : index
    %61 = vector.load %arg5[%c3_51, %c0_52, %c0_53] : memref<4x1x8xf32, #tpu.memory_space<vmem>>, vector<1x1x8xf32>
    %62 = vector.shape_cast %61 : vector<1x1x8xf32> to vector<1x8xf32>
    %63 = vector.broadcast %62 : vector<1x8xf32> to vector<8x8xf32>
    %64 = arith.addf %60, %63 : vector<8x8xf32>
    %65 = arith.maximumf %57, %64 : vector<8x8xf32>
    %cst_54 = arith.constant 0.000000e+00 : f32
    %66 = vector.broadcast %cst_54 : f32 to vector<8x8xf32>
    %67 = arith.maximumf %65, %66 : vector<8x8xf32>
    %68 = arith.truncf %67 : vector<8x8xf32> to vector<8x8xbf16>
    %c0_55 = arith.constant 0 : index
    %c0_56 = arith.constant 0 : index
    %69 = vector.load %arg6[%c0_55, %c0_56] : memref<8x144xbf16, #tpu.memory_space<vmem>>, vector<8x144xbf16>
    %cst_57 = arith.constant dense<0.000000e+00> : vector<8x144xf32>
    %70 = tpu.matmul %68, %69, %cst_57 {dimension_numbers = #tpu.dot_dimension_numbers<[1], [0], [0], [1], [0, 0, 1, 1], [], []>} : vector<8x8xbf16>, vector<8x144xbf16>, vector<8x144xf32> -> vector<8x144xf32>
    %c0_58 = arith.constant 0 : index
    %c0_59 = arith.constant 0 : index
    %71 = vector.load %arg7[%c0_58, %c0_59] : memref<1x144xf32, #tpu.memory_space<vmem>>, vector<1x144xf32>
    %72 = vector.broadcast %71 : vector<1x144xf32> to vector<8x144xf32>
    %73 = arith.addf %70, %72 : vector<8x144xf32>
    %cst_60 = arith.constant 0.000000e+00 : f32
    %74 = vector.broadcast %cst_60 : f32 to vector<8x144xf32>
    %75 = arith.maximumf %73, %74 : vector<8x144xf32>
    %76 = arith.truncf %75 : vector<8x144xf32> to vector<8x144xbf16>
    %c0_61 = arith.constant 0 : index
    %c0_62 = arith.constant 0 : index
    %77 = vector.load %arg8[%c0_61, %c0_62] : memref<144x648xbf16, #tpu.memory_space<vmem>>, vector<144x648xbf16>
    %cst_63 = arith.constant dense<0.000000e+00> : vector<8x648xf32>
    %78 = tpu.matmul %76, %77, %cst_63 {dimension_numbers = #tpu.dot_dimension_numbers<[1], [0], [0], [1], [0, 0, 1, 1], [], []>} : vector<8x144xbf16>, vector<144x648xbf16>, vector<8x648xf32> -> vector<8x648xf32>
    %c0_64 = arith.constant 0 : index
    %c0_65 = arith.constant 0 : index
    %79 = vector.load %arg9[%c0_64, %c0_65] : memref<1x648xf32, #tpu.memory_space<vmem>>, vector<1x648xf32>
    %80 = vector.broadcast %79 : vector<1x648xf32> to vector<8x648xf32>
    %81 = arith.addf %78, %80 : vector<8x648xf32>
    %cst_66 = arith.constant 0.000000e+00 : f32
    %82 = vector.broadcast %cst_66 : f32 to vector<8x648xf32>
    %83 = arith.maximumf %81, %82 : vector<8x648xf32>
    %84 = arith.truncf %83 : vector<8x648xf32> to vector<8x648xbf16>
    %c0_67 = arith.constant 0 : index
    %c0_68 = arith.constant 0 : index
    %85 = vector.load %arg10[%c0_67, %c0_68] : memref<648x1024xbf16, #tpu.memory_space<vmem>>, vector<648x1024xbf16>
    %cst_69 = arith.constant dense<0.000000e+00> : vector<8x1024xf32>
    %86 = tpu.matmul %84, %85, %cst_69 {dimension_numbers = #tpu.dot_dimension_numbers<[1], [0], [0], [1], [0, 0, 1, 1], [], []>} : vector<8x648xbf16>, vector<648x1024xbf16>, vector<8x1024xf32> -> vector<8x1024xf32>
    %c0_70 = arith.constant 0 : index
    %c0_71 = arith.constant 0 : index
    %87 = vector.load %arg11[%c0_70, %c0_71] : memref<1x1024xf32, #tpu.memory_space<vmem>>, vector<1x1024xf32>
    %88 = vector.broadcast %87 : vector<1x1024xf32> to vector<8x1024xf32>
    %89 = arith.addf %86, %88 : vector<8x1024xf32>
    %90 = math.tanh %89 : vector<8x1024xf32>
    %c0_72 = arith.constant 0 : index
    %c0_73 = arith.constant 0 : index
    %91 = vector.load %arg12[%c0_72, %c0_73] : memref<8x1024xf32, #tpu.memory_space<vmem>>, vector<8x1024xf32>
    tpu.vector_store %arg12[%c0_72, %c0_73], %90 {strides = array<i32>} : memref<8x1024xf32, #tpu.memory_space<vmem>>, vector<8x1024xf32>,
    return
  }
  func.func @transform_0(%arg0: i32) -> (i32, i32) {
    %c0_i32 = arith.constant 0 : i32
    %c0_i32_0 = arith.constant 0 : i32
    return %arg0, %c0_i32 : i32, i32
  }
  func.func @transform_1(%arg0: i32) -> (i32, i32, i32) {
    %c0_i32 = arith.constant 0 : i32
    %c0_i32_0 = arith.constant 0 : i32
    %c0_i32_1 = arith.constant 0 : i32
    %c0_i32_2 = arith.constant 0 : i32
    return %c0_i32, %c0_i32_0, %c0_i32_1 : i32, i32, i32
  }
  func.func @transform_2(%arg0: i32) -> (i32, i32, i32) {
    %c0_i32 = arith.constant 0 : i32
    %c0_i32_0 = arith.constant 0 : i32
    %c0_i32_1 = arith.constant 0 : i32
    %c0_i32_2 = arith.constant 0 : i32
    return %c0_i32, %c0_i32_0, %c0_i32_1 : i32, i32, i32
  }
  func.func @transform_3(%arg0: i32) -> (i32, i32, i32) {
    %c0_i32 = arith.constant 0 : i32
    %c0_i32_0 = arith.constant 0 : i32
    %c0_i32_1 = arith.constant 0 : i32
    %c0_i32_2 = arith.constant 0 : i32
    return %c0_i32, %c0_i32_0, %c0_i32_1 : i32, i32, i32
  }
  func.func @transform_4(%arg0: i32) -> (i32, i32, i32) {
    %c0_i32 = arith.constant 0 : i32
    %c0_i32_0 = arith.constant 0 : i32
    %c0_i32_1 = arith.constant 0 : i32
    %c0_i32_2 = arith.constant 0 : i32
    return %c0_i32, %c0_i32_0, %c0_i32_1 : i32, i32, i32
  }
  func.func @transform_5(%arg0: i32) -> (i32, i32) {
    %c0_i32 = arith.constant 0 : i32
    %c0_i32_0 = arith.constant 0 : i32
    %c0_i32_1 = arith.constant 0 : i32
    return %c0_i32, %c0_i32_0 : i32, i32
  }
  func.func @transform_6(%arg0: i32) -> (i32, i32) {
    %c0_i32 = arith.constant 0 : i32
    %c0_i32_0 = arith.constant 0 : i32
    %c0_i32_1 = arith.constant 0 : i32
    return %c0_i32, %c0_i32_0 : i32, i32
  }
  func.func @transform_7(%arg0: i32) -> (i32, i32) {
    %c0_i32 = arith.constant 0 : i32
    %c0_i32_0 = arith.constant 0 : i32
    %c0_i32_1 = arith.constant 0 : i32
    return %c0_i32, %c0_i32_0 : i32, i32
  }
  func.func @transform_8(%arg0: i32) -> (i32, i32) {
    %c0_i32 = arith.constant 0 : i32
    %c0_i32_0 = arith.constant 0 : i32
    %c0_i32_1 = arith.constant 0 : i32
    return %c0_i32, %c0_i32_0 : i32, i32
  }
  func.func @transform_9(%arg0: i32) -> (i32, i32) {
    %c0_i32 = arith.constant 0 : i32
    %c0_i32_0 = arith.constant 0 : i32
    %c0_i32_1 = arith.constant 0 : i32
    return %c0_i32, %c0_i32_0 : i32, i32
  }
  func.func @transform_10(%arg0: i32) -> (i32, i32) {
    %c0_i32 = arith.constant 0 : i32
    %c0_i32_0 = arith.constant 0 : i32
    %c0_i32_1 = arith.constant 0 : i32
    return %c0_i32, %c0_i32_0 : i32, i32
  }
  func.func @transform_11(%arg0: i32) -> (i32, i32) {
    %c0_i32 = arith.constant 0 : i32
    %c0_i32_0 = arith.constant 0 : i32
    return %arg0, %c0_i32 : i32, i32
  }
}

</mosaic_0001>

<bundles_post_ra>
// kernel: autoencoder_forward.1
= control target key start
LH: loop header
LB: loop body
LE: loop exit
PB: predicated region body
PF: predicated region fallthrough
CT: control target
= control target key end

     0   :  { %vm4091_vm0 = vcmask 130048   ;;  %vm4454_vm1 = vcmask 1043456   ;;  %vm4450_vm2 = vcmask 64512   ;;  %s18630_s1 = inlined_call_operand.vmem [shape: bf16[4,1024,144], index: 1, kind: input, shape index: {}]   ;;  %s18631_s0 = inlined_call_operand.vmem [shape: bf16[8,1024], index: 0, kind: input, shape index: {}]   ;;  %s18632_s2 = inlined_call_operand.vmem [shape: f32[4,1,144], index: 2, kind: input, shape index: {}]   ;;  %s18633_s3 = inlined_call_operand.vmem [shape: bf16[4,144,8], index: 3, kind: input, shape index: {}]   ;;  %s18634_s4 = inlined_call_operand.vmem [shape: f32[4,1,8], index: 4, kind: input, shape index: {}]   ;;  %s18635_s5 = inlined_call_operand.vmem [shape: bf16[8,144], index: 5, kind: input, shape index: {}]   ;;  %s18636_s7 = inlined_call_operand.vmem [shape: bf16[144,648], index: 7, kind: input, shape index: {}]   ;;  %s18637_s6 = inlined_call_operand.vmem [shape: f32[1,144], index: 6, kind: input, shape index: {}]   ;;  %s18638_s9 = inlined_call_operand.vmem [shape: bf16[648,1024], index: 9, kind: input, shape index: {}]   ;;  %s18639_s8 = inlined_call_operand.vmem [shape: f32[1,648], index: 8, kind: input, shape index: {}]   ;;  %s18640_s10 = inlined_call_operand.vmem [shape: f32[1,1024], index: 10, kind: input, shape index: {}]   ;;  %s18641_s11 = inlined_call_operand.vmem [shape: f32[8,1024], index: 11, kind: output, shape index: {}]  }
   0x1   :  { %v7691_v0 = vld [vmem:[%s18630_s1 + $0x70] sm:$0xf]  ;;  %v11800_v1 = vld [vmem:[%s18630_s1 + $0x74] sm:$0xf0]  ;;  %v7683_v11 = vld [vmem:[%s18630_s1 + $0x60] sm:$0xf] }
   0x2   :  { %v7755_v2 = vld [vmem:[%s18630_s1 + $0xf0] sm:$0xf]  ;;  %v7692_v3 = vor.u32 %v11800_v1, %v7691_v0  ;;  %v11816_v4 = vld [vmem:[%s18630_s1 + $0xf4] sm:$0xf0]  ;;  %v11798_v13 = vld [vmem:[%s18630_s1 + $0x64] sm:$0xf0] }
   0x3   :  { %v7819_v5 = vld [vmem:[%s18630_s1 + $0x170] sm:$0xf]  ;;  %v11832_v6 = vld [vmem:[%s18630_s1 + $0x174] sm:$0xf0]  ;;  %v7756_v7 = vor.u32 %v11816_v4, %v7755_v2  ;;  %v7747_v14 = vld [vmem:[%s18630_s1 + $0xe0] sm:$0xf]  ;;  %v7684_v16 = vor.u32 %v11798_v13, %v7683_v11 }
   0x4   :  { %v7820_v8 = vor.u32 %v11832_v6, %v7819_v5  ;;  %v7883_v9 = vld [vmem:[%s18630_s1 + $0x1f0] sm:$0xf]  ;;  %v11848_v10 = vld [vmem:[%s18630_s1 + $0x1f4] sm:$0xf0]  ;;  %845 = vmatpush.bf16.msra.mxu0 %v7692_v3  ;;  %v11814_v15 = vld [vmem:[%s18630_s1 + $0xe4] sm:$0xf0] }
   0x5   :  { %v7884_v12 = vor.u32 %v11848_v10, %v7883_v9  ;;  %858 = vmatpush.bf16.msra.mxu1 %v7756_v7  ;;  %v7748_v17 = vor.u32 %v11814_v15, %v7747_v14  ;;  %v7811_v18 = vld [vmem:[%s18630_s1 + $0x160] sm:$0xf]  ;;  %v11830_v19 = vld [vmem:[%s18630_s1 + $0x164] sm:$0xf0]  ;;  %v7675_v23 = vld [vmem:[%s18630_s1 + $0x50] sm:$0xf] }
   0x6   :  { %871 = vmatpush.bf16.msra.mxu2 %v7820_v8  ;;  %v7875_v20 = vld [vmem:[%s18630_s1 + $0x1e0] sm:$0xf]  ;;  %v7812_v21 = vor.u32 %v11830_v19, %v7811_v18  ;;  %v11846_v22 = vld [vmem:[%s18630_s1 + $0x1e4] sm:$0xf0]  ;;  %v11796_v24 = vld [vmem:[%s18630_s1 + $0x54] sm:$0xf0] }
   0x7   :  { %884 = vmatpush.bf16.msra.mxu3 %v7884_v12  ;;  %v7876_v25 = vor.u32 %v11846_v22, %v7875_v20  ;;  %v7739_v26 = vld [vmem:[%s18630_s1 + $0xd0] sm:$0xf]  ;;  %v11812_v27 = vld [vmem:[%s18630_s1 + $0xd4] sm:$0xf0]  ;;  %v7676_v29 = vor.u32 %v11796_v24, %v7675_v23  ;;  %v7667_v35 = vld [vmem:[%s18630_s1 + $0x40] sm:$0xf] }
   0x8   :  { %v7803_v28 = vld [vmem:[%s18630_s1 + $0x150] sm:$0xf]  ;;  %846 = vmatpush.bf16.msra.mxu0 %v7684_v16  ;;  %v11828_v30 = vld [vmem:[%s18630_s1 + $0x154] sm:$0xf0]  ;;  %v7740_v33 = vor.u32 %v11812_v27, %v7739_v26  ;;  %v11794_v36 = vld [vmem:[%s18630_s1 + $0x44] sm:$0xf0] }
   0x9   :  { %v7867_v31 = vld [vmem:[%s18630_s1 + $0x1d0] sm:$0xf]  ;;  %v11844_v32 = vld [vmem:[%s18630_s1 + $0x1d4] sm:$0xf0]  ;;  %859 = vmatpush.bf16.msra.mxu1 %v7748_v17  ;;  %v7804_v34 = vor.u32 %v11828_v30, %v7803_v28  ;;  %v7731_v37 = vld [vmem:[%s18630_s1 + $0xc0] sm:$0xf]  ;;  %v7668_v44 = vor.u32 %v11794_v36, %v7667_v35 }
   0xa   :  { %872 = vmatpush.bf16.msra.mxu2 %v7812_v21  ;;  %v7868_v38 = vor.u32 %v11844_v32, %v7867_v31  ;;  %v11810_v39 = vld [vmem:[%s18630_s1 + $0xc4] sm:$0xf0]  ;;  %v7795_v40 = vld [vmem:[%s18630_s1 + $0x140] sm:$0xf]  ;;  %v7659_v47 = vld [vmem:[%s18630_s1 + $0x30] sm:$0xf] }
   0xb   :  { %885 = vmatpush.bf16.msra.mxu3 %v7876_v25  ;;  %v11826_v41 = vld [vmem:[%s18630_s1 + $0x144] sm:$0xf0]  ;;  %v7859_v42 = vld [vmem:[%s18630_s1 + $0x1c0] sm:$0xf]  ;;  %v7732_v45 = vor.u32 %v11810_v39, %v7731_v37  ;;  %v11792_v48 = vld [vmem:[%s18630_s1 + $0x34] sm:$0xf0] }
   0xc   :  { %v11842_v43 = vld [vmem:[%s18630_s1 + $0x1c4] sm:$0xf0]  ;;  %847 = vmatpush.bf16.msra.mxu0 %v7676_v29  ;;  %v7796_v46 = vor.u32 %v11826_v41, %v7795_v40  ;;  %v7723_v49 = vld [vmem:[%s18630_s1 + $0xb0] sm:$0xf]  ;;  %v11808_v51 = vld [vmem:[%s18630_s1 + $0xb4] sm:$0xf0]  ;;  %v7660_v56 = vor.u32 %v11792_v48, %v7659_v47 }
   0xd   :  { %860 = vmatpush.bf16.msra.mxu1 %v7740_v33  ;;  %v7860_v50 = vor.u32 %v11842_v43, %v7859_v42  ;;  %v7787_v52 = vld [vmem:[%s18630_s1 + $0x130] sm:$0xf]  ;;  %v11824_v53 = vld [vmem:[%s18630_s1 + $0x134] sm:$0xf0]  ;;  %v7724_v57 = vor.u32 %v11808_v51, %v7723_v49  ;;  %v7651_v59 = vld [vmem:[%s18630_s1 + $0x20] sm:$0xf] }
   0xe   :  { %873 = vmatpush.bf16.msra.mxu2 %v7804_v34  ;;  %v7851_v54 = vld [vmem:[%s18630_s1 + $0x1b0] sm:$0xf]  ;;  %v11840_v55 = vld [vmem:[%s18630_s1 + $0x1b4] sm:$0xf0]  ;;  %v7788_v58 = vor.u32 %v11824_v53, %v7787_v52  ;;  %v11790_v60 = vld [vmem:[%s18630_s1 + $0x24] sm:$0xf0] }
   0xf   :  { %886 = vmatpush.bf16.msra.mxu3 %v7868_v38  ;;  %v7715_v61 = vld [vmem:[%s18630_s1 + $0xa0] sm:$0xf]  ;;  %v7852_v62 = vor.u32 %v11840_v55, %v7851_v54  ;;  %v11806_v63 = vld [vmem:[%s18630_s1 + $0xa4] sm:$0xf0]  ;;  %v7652_v4 = vor.u32 %v11790_v60, %v7651_v59  ;;  %v7643_v7 = vld [vmem:[%s18630_s1 + $0x10] sm:$0xf] }
  0x10   :  { %848 = vmatpush.bf16.msra.mxu0 %v7668_v44  ;;  %v7779_v0 = vld [vmem:[%s18630_s1 + $0x120] sm:$0xf]  ;;  %v11822_v1 = vld [vmem:[%s18630_s1 + $0x124] sm:$0xf0]  ;;  %v7716_v5 = vor.u32 %v11806_v63, %v7715_v61  ;;  %v11788_v8 = vld [vmem:[%s18630_s1 + $0x14] sm:$0xf0] }
  0x11   :  { %861 = vmatpush.bf16.msra.mxu1 %v7732_v45  ;;  %v7843_v2 = vld [vmem:[%s18630_s1 + $0x1a0] sm:$0xf]  ;;  %v11838_v3 = vld [vmem:[%s18630_s1 + $0x1a4] sm:$0xf0]  ;;  %v7780_v6 = vor.u32 %v11822_v1, %v7779_v0  ;;  %v7707_v9 = vld [vmem:[%s18630_s1 + $0x90] sm:$0xf]  ;;  %v7644_v16 = vor.u32 %v11788_v8, %v7643_v7 }
  0x12   :  { %874 = vmatpush.bf16.msra.mxu2 %v7796_v46  ;;  %v7844_v10 = vor.u32 %v11838_v3, %v7843_v2  ;;  %v11804_v11 = vld [vmem:[%s18630_s1 + $0x94] sm:$0xf0]  ;;  %v7771_v12 = vld [vmem:[%s18630_s1 + $0x110] sm:$0xf]  ;;  %v7635_v17 = vld [vmem:[%s18630_s1] sm:$0xf] }
  0x13   :  { %887 = vmatpush.bf16.msra.mxu3 %v7860_v50  ;;  %v11820_v13 = vld [vmem:[%s18630_s1 + $0x114] sm:$0xf0]  ;;  %v7835_v14 = vld [vmem:[%s18630_s1 + $0x190] sm:$0xf]  ;;  %v11786_v18 = vld [vmem:[%s18630_s1 + $0x4] sm:$0xf0]  ;;  %v7708_v19 = vor.u32 %v11804_v11, %v7707_v9 }
  0x14   :  { %849 = vmatpush.bf16.msra.mxu0 %v7660_v56  ;;  %v11836_v15 = vld [vmem:[%s18630_s1 + $0x194] sm:$0xf0]  ;;  %v7772_v20 = vor.u32 %v11820_v13, %v7771_v12  ;;  %v7699_v21 = vld [vmem:[%s18630_s1 + $0x80] sm:$0xf]  ;;  %v11802_v22 = vld [vmem:[%s18630_s1 + $0x84] sm:$0xf0]  ;;  %v7636_v31 = vor.u32 %v11786_v18, %v7635_v17 }
  0x15   :  { %862 = vmatpush.bf16.msra.mxu1 %v7724_v57  ;;  %v7763_v23 = vld [vmem:[%s18630_s1 + $0x100] sm:$0xf]  ;;  %v7836_v24 = vor.u32 %v11836_v15, %v7835_v14  ;;  %v11818_v25 = vld [vmem:[%s18630_s1 + $0x104] sm:$0xf0]  ;;  %v7947_v28 = vld [vmem:[%s18630_s1 + $0x270] sm:$0xf]  ;;  %v7700_v35 = vor.u32 %v11802_v22, %v7699_v21 }
  0x16   :  { %875 = vmatpush.bf16.msra.mxu2 %v7788_v58  ;;  %v7827_v26 = vld [vmem:[%s18630_s1 + $0x180] sm:$0xf]  ;;  %v11834_v27 = vld [vmem:[%s18630_s1 + $0x184] sm:$0xf0]  ;;  %v11864_v29 = vld [vmem:[%s18630_s1 + $0x274] sm:$0xf0]  ;;  %v7764_v36 = vor.u32 %v11818_v25, %v7763_v23 }
  0x17   :  { %888 = vmatpush.bf16.msra.mxu3 %v7852_v62  ;;  %v8011_v30 = vld [vmem:[%s18630_s1 + $0x2f0] sm:$0xf]  ;;  %v11880_v32 = vld [vmem:[%s18630_s1 + $0x2f4] sm:$0xf0]  ;;  %v7828_v39 = vor.u32 %v11834_v27, %v7827_v26  ;;  %v7948_v40 = vor.u32 %v11864_v29, %v7947_v28  ;;  %v7939_v43 = vld [vmem:[%s18630_s1 + $0x260] sm:$0xf] }
  0x18   :  { %850 = vmatpush.bf16.msra.mxu0 %v7652_v4  ;;  %v8075_v33 = vld [vmem:[%s18630_s1 + $0x370] sm:$0xf]  ;;  %v11896_v34 = vld [vmem:[%s18630_s1 + $0x374] sm:$0xf0]  ;;  %v8012_v41 = vor.u32 %v11880_v32, %v8011_v30  ;;  %v11862_v44 = vld [vmem:[%s18630_s1 + $0x264] sm:$0xf0] }
  0x19   :  { %863 = vmatpush.bf16.msra.mxu1 %v7716_v5  ;;  %v8139_v37 = vld [vmem:[%s18630_s1 + $0x3f0] sm:$0xf]  ;;  %v11912_v38 = vld [vmem:[%s18630_s1 + $0x3f4] sm:$0xf0]  ;;  %v8076_v42 = vor.u32 %v11896_v34, %v8075_v33  ;;  %v8003_v45 = vld [vmem:[%s18630_s1 + $0x2e0] sm:$0xf]  ;;  %v7940_v52 = vor.u32 %v11862_v44, %v7939_v43 }
  0x1a   :  { %876 = vmatpush.bf16.msra.mxu2 %v7780_v6  ;;  %v8140_v46 = vor.u32 %v11912_v38, %v8139_v37  ;;  %v11878_v47 = vld [vmem:[%s18630_s1 + $0x2e4] sm:$0xf0]  ;;  %v8067_v48 = vld [vmem:[%s18630_s1 + $0x360] sm:$0xf]  ;;  %v7931_v53 = vld [vmem:[%s18630_s1 + $0x250] sm:$0xf] }
  0x1b   :  { %889 = vmatpush.bf16.msra.mxu3 %v7844_v10  ;;  %v11894_v49 = vld [vmem:[%s18630_s1 + $0x364] sm:$0xf0]  ;;  %v8131_v50 = vld [vmem:[%s18630_s1 + $0x3e0] sm:$0xf]  ;;  %v8004_v54 = vor.u32 %v11878_v47, %v8003_v45  ;;  %v11860_v56 = vld [vmem:[%s18630_s1 + $0x254] sm:$0xf0] }
  0x1c   :  { %851 = vmatpush.bf16.msra.mxu0 %v7644_v16  ;;  %v11910_v51 = vld [vmem:[%s18630_s1 + $0x3e4] sm:$0xf0]  ;;  %v8068_v55 = vor.u32 %v11894_v49, %v8067_v48  ;;  %v7995_v57 = vld [vmem:[%s18630_s1 + $0x2d0] sm:$0xf]  ;;  %v11876_v58 = vld [vmem:[%s18630_s1 + $0x2d4] sm:$0xf0]  ;;  %v7932_v0 = vor.u32 %v11860_v56, %v7931_v53 }
  0x1d   :  { %864 = vmatpush.bf16.msra.mxu1 %v7708_v19  ;;  %v8132_v59 = vor.u32 %v11910_v51, %v8131_v50  ;;  %v8059_v60 = vld [vmem:[%s18630_s1 + $0x350] sm:$0xf]  ;;  %v11892_v61 = vld [vmem:[%s18630_s1 + $0x354] sm:$0xf0]  ;;  %v7996_v1 = vor.u32 %v11876_v58, %v7995_v57  ;;  %v40_v2 = vld [vmem:[%s18631_s0 + $0x8] sm:$0xff] }
  0x1e   :  { %877 = vmatpush.bf16.msra.mxu2 %v7772_v20  ;;  %v8123_v62 = vld [vmem:[%s18630_s1 + $0x3d0] sm:$0xf]  ;;  %v11908_v63 = vld [vmem:[%s18630_s1 + $0x3d4] sm:$0xf0]  ;;  %v39_v3 = vld [vmem:[%s18631_s0] sm:$0xff]  ;;  %v8060_v4 = vor.u32 %v11892_v61, %v8059_v60  ;;  %v183_v8 = vunpack.c.l.b16 %v40_v2  ;;  %v184_v10 = vunpack.c.h.b16 %v40_v2 }
  0x1f   :  { %890 = vmatpush.bf16.msra.mxu3 %v7836_v24  ;;  %v7923_v5 = vld [vmem:[%s18630_s1 + $0x240] sm:$0xf]  ;;  %v11858_v6 = vld [vmem:[%s18630_s1 + $0x244] sm:$0xf0]  ;;  %v181_v9 = vunpack.c.l.b16 %v39_v3  ;;  %v8124_v11 = vor.u32 %v11908_v63, %v8123_v62  ;;  %v182_v15 = vunpack.c.h.b16 %v39_v3  ;;  %v7915_v25 = vld [vmem:[%s18630_s1 + $0x230] sm:$0xf] }
  0x20   :  { %852 = vmatpush.bf16.msra.mxu0 %v7636_v31  ;;  %v7987_v7 = vld [vmem:[%s18630_s1 + $0x2c0] sm:$0xf]  ;;  %v11874_v12 = vld [vmem:[%s18630_s1 + $0x2c4] sm:$0xf0]  ;;  %v13082_v18 = vpack.c.b16 %v183_v8, %v183_v8  ;;  %v13086_v20 = vpack.c.b16 %v184_v10, %v184_v10  ;;  %v7924_v21 = vor.u32 %v11858_v6, %v7923_v5  ;;  %v11856_v26 = vld [vmem:[%s18630_s1 + $0x234] sm:$0xf0] }
  0x21   :  { %865 = vmatpush.bf16.msra.mxu1 %v7700_v35  ;;  %v8051_v13 = vld [vmem:[%s18630_s1 + $0x340] sm:$0xf]  ;;  %v11890_v14 = vld [vmem:[%s18630_s1 + $0x344] sm:$0xf0]  ;;  %v13084_v19 = vpack.c.b16 %v181_v9, %v181_v9  ;;  %v13088_v22 = vpack.c.b16 %v182_v15, %v182_v15  ;;  %v7988_v23 = vor.u32 %v11874_v12, %v7987_v7  ;;  %v7979_v27 = vld [vmem:[%s18630_s1 + $0x2b0] sm:$0xf]  ;;  %v7916_v34 = vor.u32 %v11856_v26, %v7915_v25 }
  0x22   :  { %878 = vmatpush.bf16.msra.mxu2 %v7764_v36  ;;  %v8115_v16 = vld [vmem:[%s18630_s1 + $0x3c0] sm:$0xf]  ;;  %v11906_v17 = vld [vmem:[%s18630_s1 + $0x3c4] sm:$0xf0]  ;;  %v8052_v24 = vor.u32 %v11890_v14, %v8051_v13  ;;  %v11872_v29 = vld [vmem:[%s18630_s1 + $0x2b4] sm:$0xf0] }
  0x23   :  { %891 = vmatpush.bf16.msra.mxu3 %v7828_v39  ;;  %v8116_v28 = vor.u32 %v11906_v17, %v8115_v16  ;;  %v8043_v30 = vld [vmem:[%s18630_s1 + $0x330] sm:$0xf]  ;;  %v11888_v31 = vld [vmem:[%s18630_s1 + $0x334] sm:$0xf0]  ;;  %853 = vmatmul.bf16.vlgmr.msra.gmra.mxu0 %v13084_v19  ;;  %v7980_v35 = vor.u32 %v11872_v29, %v7979_v27  ;;  %v7907_v37 = vld [vmem:[%s18630_s1 + $0x220] sm:$0xf] }
  0x24   :  { %897 = vmatpush.bf16.msrb.mxu0 %v7948_v40  ;;  %v8107_v32 = vld [vmem:[%s18630_s1 + $0x3b0] sm:$0xf]  ;;  %v11904_v33 = vld [vmem:[%s18630_s1 + $0x3b4] sm:$0xf0]  ;;  %866 = vmatmul.bf16.vlgmr.msra.gmra.mxu1 %v13088_v22  ;;  %v8044_v36 = vor.u32 %v11888_v31, %v8043_v30  ;;  %v11854_v38 = vld [vmem:[%s18630_s1 + $0x224] sm:$0xf0] }
  0x25   :  { %910 = vmatpush.bf16.msrb.mxu1 %v8012_v41  ;;  %879 = vmatmul.bf16.vlgmr.msra.gmra.mxu2 %v13082_v18  ;;  %v7971_v39 = vld [vmem:[%s18630_s1 + $0x2a0] sm:$0xf]  ;;  %v8108_v40 = vor.u32 %v11904_v33, %v8107_v32  ;;  %v11870_v41 = vld [vmem:[%s18630_s1 + $0x2a4] sm:$0xf0]  ;;  %v7899_v49 = vld [vmem:[%s18630_s1 + $0x210] sm:$0xf] }
  0x26   :  { %923 = vmatpush.bf16.msrb.mxu2 %v8076_v42  ;;  %892 = vmatmul.bf16.vlgmr.msra.gmra.mxu3 %v13086_v20  ;;  %v8035_v42 = vld [vmem:[%s18630_s1 + $0x320] sm:$0xf]  ;;  %v11886_v43 = vld [vmem:[%s18630_s1 + $0x324] sm:$0xf0]  ;;  %v7972_v47 = vor.u32 %v11870_v41, %v7971_v39  ;;  %v11852_v50 = vld [vmem:[%s18630_s1 + $0x214] sm:$0xf0] }
  0x27   :  { %936 = vmatpush.bf16.msrb.mxu3 %v8140_v46  ;;  %v8099_v44 = vld [vmem:[%s18630_s1 + $0x3a0] sm:$0xf]  ;;  %v11902_v45 = vld [vmem:[%s18630_s1 + $0x3a4] sm:$0xf0]  ;;  %v7908_v46 = vor.u32 %v11854_v38, %v7907_v37  ;;  %v8036_v48 = vor.u32 %v11886_v43, %v8035_v42  ;;  %v7963_v51 = vld [vmem:[%s18630_s1 + $0x290] sm:$0xf] }
  0x28   :  { %898 = vmatpush.bf16.msrb.mxu0 %v7940_v52  ;;  %v8100_v52 = vor.u32 %v11902_v45, %v8099_v44  ;;  %v11868_v53 = vld [vmem:[%s18630_s1 + $0x294] sm:$0xf0]  ;;  %v8091_v56 = vld [vmem:[%s18630_s1 + $0x390] sm:$0xf]  ;;  %v7891_v58 = vld [vmem:[%s18630_s1 + $0x200] sm:$0xf] }
  0x29   :  { %911 = vmatpush.bf16.msrb.mxu1 %v8004_v54  ;;  %v8027_v54 = vld [vmem:[%s18630_s1 + $0x310] sm:$0xf]  ;;  %v11900_v57 = vld [vmem:[%s18630_s1 + $0x394] sm:$0xf0]  ;;  %v11850_v60 = vld [vmem:[%s18630_s1 + $0x204] sm:$0xf0]  ;;  %v7964_v63 = vor.u32 %v11868_v53, %v7963_v51 }
  0x2a   :  { %924 = vmatpush.bf16.msrb.mxu2 %v8068_v55  ;;  %v11884_v55 = vld [vmem:[%s18630_s1 + $0x314] sm:$0xf0]  ;;  %v7955_v61 = vld [vmem:[%s18630_s1 + $0x280] sm:$0xf]  ;;  %v11866_v62 = vld [vmem:[%s18630_s1 + $0x284] sm:$0xf0] }
  0x2b   :  { %937 = vmatpush.bf16.msrb.mxu3 %v8132_v59  ;;  %v7900_v59 = vor.u32 %v11852_v50, %v7899_v49  ;;  %v11882_v2 = vld [vmem:[%s18630_s1 + $0x304] sm:$0xf0]  ;;  %v42_v3 = vld [vmem:[%s18631_s0 + $0x18] sm:$0xff]  ;;  %v8083_v5 = vld [vmem:[%s18630_s1 + $0x380] sm:$0xf]  ;;  %v7956_v16 = vor.u32 %v11866_v62, %v7955_v61 }
  0x2c   :  { %899 = vmatpush.bf16.msrb.mxu0 %v7932_v0  ;;  %v8028_v0 = vor.u32 %v11884_v55, %v8027_v54  ;;  %v11898_v6 = vld [vmem:[%s18630_s1 + $0x384] sm:$0xf0]  ;;  %v41_v7 = vld [vmem:[%s18631_s0 + $0x10] sm:$0xff]  ;;  %v7693_v9 = vld [vmem:[%s18630_s1 + $0x78] sm:$0xf0]  ;;  %v187_v15 = vunpack.c.l.b16 %v42_v3  ;;  %v188_v25 = vunpack.c.h.b16 %v42_v3 }
  0x2d   :  { %912 = vmatpush.bf16.msrb.mxu1 %v7996_v1  ;;  %v8019_v1 = vld [vmem:[%s18630_s1 + $0x300] sm:$0xf]  ;;  %v11799_v8 = vld [vmem:[%s18630_s1 + $0x74] sm:$0xf]  ;;  %v7757_v12 = vld [vmem:[%s18630_s1 + $0xf8] sm:$0xf0]  ;;  %v8084_v26 = vor.u32 %v11898_v6, %v8083_v5 }
  0x2e   :  { %925 = vmatpush.bf16.msrb.mxu2 %v8060_v4  ;;  %v8092_v4 = vor.u32 %v11900_v57, %v8091_v56  ;;  %v11815_v10 = vld [vmem:[%s18630_s1 + $0xf4] sm:$0xf]  ;;  %v7821_v14 = vld [vmem:[%s18630_s1 + $0x178] sm:$0xf0]  ;;  %v8020_v17 = vor.u32 %v11882_v2, %v8019_v1  ;;  %v7696_v27 = vor.u32 %v11799_v8, %v7693_v9  ;;  %v11797_v31 = vld [vmem:[%s18630_s1 + $0x64] sm:$0xf]  ;;  %v13238_v38 = vpack.c.b16 %v187_v15, %v187_v15 }
  0x2f   :  { %938 = vmatpush.bf16.msrb.mxu3 %v8124_v11  ;;  %v7892_v11 = vor.u32 %v11850_v60, %v7891_v58  ;;  %v11831_v13 = vld [vmem:[%s18630_s1 + $0x174] sm:$0xf]  ;;  %v7760_v29 = vor.u32 %v11815_v10, %v7757_v12  ;;  %v7685_v32 = vld [vmem:[%s18630_s1 + $0x68] sm:$0xf0]  ;;  %v11813_v33 = vld [vmem:[%s18630_s1 + $0xe4] sm:$0xf]  ;;  %v13248_v42 = vpack.c.b16 %v188_v25, %v188_v25 }
  0x30   :  { %900 = vmatpush.bf16.msrb.mxu0 %v7924_v21  ;;  %v11847_v21 = vld [vmem:[%s18630_s1 + $0x1f4] sm:$0xf]  ;;  %v7824_v30 = vor.u32 %v11831_v13, %v7821_v14  ;;  %v7813_v37 = vld [vmem:[%s18630_s1 + $0x168] sm:$0xf0]  ;;  %v11845_v39 = vld [vmem:[%s18630_s1 + $0x1e4] sm:$0xf]  ;;  %v7688_v43 = vor.u32 %v11797_v31, %v7685_v32 }
  0x31   :  { %913 = vmatpush.bf16.msrb.mxu1 %v7988_v23  ;;  %v7885_v23 = vld [vmem:[%s18630_s1 + $0x1f8] sm:$0xf0]  ;;  %v11811_v49 = vld [vmem:[%s18630_s1 + $0xd4] sm:$0xf]  ;;  %v7669_v60 = vld [vmem:[%s18630_s1 + $0x48] sm:$0xf0] }
  0x32   :  { %926 = vmatpush.bf16.msrb.mxu2 %v8052_v24  ;;  %v185_v24 = vunpack.c.l.b16 %v41_v7  ;;  %v7741_v51 = vld [vmem:[%s18630_s1 + $0xd8] sm:$0xf0]  ;;  %v11843_v54 = vld [vmem:[%s18630_s1 + $0x1d4] sm:$0xf]  ;;  %v11809_v61 = vld [vmem:[%s18630_s1 + $0xc4] sm:$0xf] }
  0x33   :  { %939 = vmatpush.bf16.msrb.mxu3 %v8116_v28  ;;  %v186_v28 = vunpack.c.h.b16 %v41_v7  ;;  %v7805_v53 = vld [vmem:[%s18630_s1 + $0x158] sm:$0xf0]  ;;  %v7744_v57 = vor.u32 %v11811_v49, %v7741_v51  ;;  %v7797_v1 = vld [vmem:[%s18630_s1 + $0x148] sm:$0xf0]  ;;  %v11841_v2 = vld [vmem:[%s18630_s1 + $0x1c4] sm:$0xf] }
  0x34   :  { %901 = vmatpush.bf16.msrb.mxu0 %v7916_v34  ;;  %v7888_v34 = vor.u32 %v11847_v21, %v7885_v23  ;;  %v13246_v41 = vpack.c.b16 %v185_v24, %v185_v24  ;;  %v7869_v55 = vld [vmem:[%s18630_s1 + $0x1d8] sm:$0xf0]  ;;  %v7861_v3 = vld [vmem:[%s18630_s1 + $0x1c8] sm:$0xf0]  ;;  %v11791_v7 = vld [vmem:[%s18630_s1 + $0x34] sm:$0xf] }
  0x35   :  { %914 = vmatpush.bf16.msrb.mxu1 %v7980_v35  ;;  %v7749_v35 = vld [vmem:[%s18630_s1 + $0xe8] sm:$0xf0]  ;;  %v13250_v44 = vpack.c.b16 %v186_v28, %v186_v28  ;;  %v7872_v62 = vor.u32 %v11843_v54, %v7869_v55  ;;  %v7661_v8 = vld [vmem:[%s18630_s1 + $0x38] sm:$0xf0]  ;;  %v11807_v9 = vld [vmem:[%s18630_s1 + $0xb4] sm:$0xf]  ;;  %v7864_v10 = vor.u32 %v11841_v2, %v7861_v3 }
  0x36   :  { %927 = vmatpush.bf16.msrb.mxu2 %v8044_v36  ;;  %v11829_v36 = vld [vmem:[%s18630_s1 + $0x164] sm:$0xf]  ;;  %v7752_v45 = vor.u32 %v11813_v33, %v7749_v35  ;;  %v11823_v12 = vld [vmem:[%s18630_s1 + $0x134] sm:$0xf]  ;;  %v7789_v13 = vld [vmem:[%s18630_s1 + $0x138] sm:$0xf0] }
  0x37   :  { %940 = vmatpush.bf16.msrb.mxu3 %v8108_v40  ;;  %v7877_v40 = vld [vmem:[%s18630_s1 + $0x1e8] sm:$0xf0]  ;;  %v11839_v14 = vld [vmem:[%s18630_s1 + $0x1b4] sm:$0xf]  ;;  %v7853_v15 = vld [vmem:[%s18630_s1 + $0x1b8] sm:$0xf0]  ;;  %v7792_v21 = vor.u32 %v11823_v12, %v7789_v13 }
  0x38   :  { %902 = vmatpush.bf16.msrb.mxu0 %v7908_v46  ;;  %v7816_v46 = vor.u32 %v11829_v36, %v7813_v37  ;;  %v7880_v50 = vor.u32 %v11845_v39, %v7877_v40  ;;  %v11789_v23 = vld [vmem:[%s18630_s1 + $0x24] sm:$0xf]  ;;  %v7653_v24 = vld [vmem:[%s18630_s1 + $0x28] sm:$0xf0]  ;;  %v11787_v35 = vld [vmem:[%s18630_s1 + $0x14] sm:$0xf] }
  0x39   :  { %915 = vmatpush.bf16.msrb.mxu1 %v7972_v47  ;;  %v11795_v47 = vld [vmem:[%s18630_s1 + $0x54] sm:$0xf]  ;;  %v11805_v25 = vld [vmem:[%s18630_s1 + $0xa4] sm:$0xf]  ;;  %v7845_v31 = vld [vmem:[%s18630_s1 + $0x1a8] sm:$0xf0]  ;;  %v7656_v32 = vor.u32 %v11789_v23, %v7653_v24 }
  0x3a   :  { %928 = vmatpush.bf16.msrb.mxu2 %v8036_v48  ;;  %v7677_v48 = vld [vmem:[%s18630_s1 + $0x58] sm:$0xf0]  ;;  %v11821_v28 = vld [vmem:[%s18630_s1 + $0x124] sm:$0xf]  ;;  %v11803_v37 = vld [vmem:[%s18630_s1 + $0x94] sm:$0xf] }
  0x3b   :  { %941 = vmatpush.bf16.msrb.mxu3 %v8100_v52  ;;  %v11827_v52 = vld [vmem:[%s18630_s1 + $0x154] sm:$0xf]  ;;  %v7680_v56 = vor.u32 %v11795_v47, %v7677_v48  ;;  %v7645_v36 = vld [vmem:[%s18630_s1 + $0x18] sm:$0xf0]  ;;  %v11785_v49 = vld [vmem:[%s18630_s1 + $0x4] sm:$0xf] }
  0x3c   :  { %903 = vmatpush.bf16.msrb.mxu0 %v7900_v59  ;;  %v7808_v58 = vor.u32 %v11827_v52, %v7805_v53  ;;  %v11793_v59 = vld [vmem:[%s18630_s1 + $0x44] sm:$0xf]  ;;  %v7709_v40 = vld [vmem:[%s18630_s1 + $0x98] sm:$0xf0]  ;;  %v7648_v48 = vor.u32 %v11787_v35, %v7645_v36  ;;  %v7701_v54 = vld [vmem:[%s18630_s1 + $0x88] sm:$0xf0] }
  0x3d   :  { %916 = vmatpush.bf16.msrb.mxu1 %v7964_v63  ;;  %v7733_v63 = vld [vmem:[%s18630_s1 + $0xc8] sm:$0xf0]  ;;  %v7837_v47 = vld [vmem:[%s18630_s1 + $0x198] sm:$0xf0]  ;;  %v7712_v51 = vor.u32 %v11803_v37, %v7709_v40  ;;  %v11801_v53 = vld [vmem:[%s18630_s1 + $0x84] sm:$0xf] }
  0x3e   :  { %929 = vmatpush.bf16.msrb.mxu2 %v8028_v0  ;;  %v11825_v0 = vld [vmem:[%s18630_s1 + $0x144] sm:$0xf]  ;;  %v7736_v5 = vor.u32 %v11809_v61, %v7733_v63  ;;  %v7949_v61 = vld [vmem:[%s18630_s1 + $0x278] sm:$0xf0]  ;;  %v7704_v3 = vor.u32 %v11801_v53, %v7701_v54  ;;  %v7941_v12 = vld [vmem:[%s18630_s1 + $0x268] sm:$0xf0] }
  0x3f   :  { %942 = vmatpush.bf16.msrb.mxu3 %v8092_v4  ;;  %v7672_v4 = vor.u32 %v11793_v59, %v7669_v60  ;;  %v7800_v6 = vor.u32 %v11825_v0, %v7797_v1  ;;  %v11817_v55 = vld [vmem:[%s18630_s1 + $0x104] sm:$0xf]  ;;  %v7829_v59 = vld [vmem:[%s18630_s1 + $0x188] sm:$0xf0]  ;;  %v11863_v60 = vld [vmem:[%s18630_s1 + $0x274] sm:$0xf] }
  0x40   :  { %904 = vmatpush.bf16.msrb.mxu0 %v7892_v11  ;;  %v7725_v11 = vld [vmem:[%s18630_s1 + $0xb8] sm:$0xf0]  ;;  %v11895_v1 = vld [vmem:[%s18630_s1 + $0x374] sm:$0xf]  ;;  %v11877_v13 = vld [vmem:[%s18630_s1 + $0x2e4] sm:$0xf] }
  0x41   :  { %917 = vmatpush.bf16.msrb.mxu1 %v7956_v16  ;;  %v7664_v16 = vor.u32 %v11791_v7, %v7661_v8  ;;  %v8013_v0 = vld [vmem:[%s18630_s1 + $0x2f8] sm:$0xf0]  ;;  %v7952_v8 = vor.u32 %v11863_v60, %v7949_v61  ;;  %v8133_v23 = vld [vmem:[%s18630_s1 + $0x3e8] sm:$0xf0]  ;;  %v11857_v40 = vld [vmem:[%s18630_s1 + $0x244] sm:$0xf] }
  0x42   :  { %930 = vmatpush.bf16.msrb.mxu2 %v8020_v17  ;;  %v7728_v17 = vor.u32 %v11807_v9, %v7725_v11  ;;  %v8077_v2 = vld [vmem:[%s18630_s1 + $0x378] sm:$0xf0]  ;;  %v11861_v11 = vld [vmem:[%s18630_s1 + $0x264] sm:$0xf]  ;;  %v11887_v60 = vld [vmem:[%s18630_s1 + $0x334] sm:$0xf] }
  0x43   :  { %943 = vmatpush.bf16.msrb.mxu3 %v8084_v26  ;;  %905 = vmatmul.bf16.vlgmr.msrb.gmra.mxu0 %v13246_v41  ;;  %v7856_v26 = vor.u32 %v11839_v14, %v7853_v15  ;;  %v8005_v15 = vld [vmem:[%s18630_s1 + $0x2e8] sm:$0xf0]  ;;  %v7944_v24 = vor.u32 %v11861_v11, %v7941_v12  ;;  %v8125_v35 = vld [vmem:[%s18630_s1 + $0x3d8] sm:$0xf0] }
  0x44   :  { %949 = vmatpush.bf16.msra.mxu0 %v7696_v27  ;;  %918 = vmatmul.bf16.vlgmr.msrb.gmra.mxu1 %v13250_v44  ;;  %v7717_v27 = vld [vmem:[%s18630_s1 + $0xa8] sm:$0xf0]  ;;  %v8045_v61 = vld [vmem:[%s18630_s1 + $0x338] sm:$0xf0] }
  0x45   :  { %962 = vmatpush.bf16.msra.mxu1 %v7760_v29  ;;  %931 = vmatmul.bf16.vlgmr.msrb.gmra.mxu2 %v13238_v38  ;;  %v7781_v29 = vld [vmem:[%s18630_s1 + $0x128] sm:$0xf0]  ;;  %v7720_v33 = vor.u32 %v11805_v25, %v7717_v27  ;;  %v8008_v25 = vor.u32 %v11877_v13, %v8005_v15  ;;  %v11859_v27 = vld [vmem:[%s18630_s1 + $0x254] sm:$0xf] }
  0x46   :  { %975 = vmatpush.bf16.msra.mxu2 %v7824_v30  ;;  %944 = vmatmul.bf16.vlgmr.msrb.gmra.mxu3 %v13248_v42  ;;  %v11837_v30 = vld [vmem:[%s18630_s1 + $0x1a4] sm:$0xf]  ;;  %v8101_v11 = vld [vmem:[%s18630_s1 + $0x3a8] sm:$0xf0]  ;;  %v11851_v15 = vld [vmem:[%s18630_s1 + $0x214] sm:$0xf] }
  0x47   :  { %988 = vmatpush.bf16.msra.mxu3 %v7888_v34  ;;  %v7784_v34 = vor.u32 %v11821_v28, %v7781_v29  ;;  %v7848_v39 = vor.u32 %v11837_v30, %v7845_v31  ;;  %v7933_v28 = vld [vmem:[%s18630_s1 + $0x258] sm:$0xf0]  ;;  %v11875_v29 = vld [vmem:[%s18630_s1 + $0x2d4] sm:$0xf] }
  0x48   :  { %950 = vmatpush.bf16.msra.mxu0 %v7688_v43  ;;  %v11819_v43 = vld [vmem:[%s18630_s1 + $0x114] sm:$0xf]  ;;  %v7997_v31 = vld [vmem:[%s18630_s1 + $0x2d8] sm:$0xf0]  ;;  %v7936_v36 = vor.u32 %v11859_v27, %v7933_v28 }
  0x49   :  { %963 = vmatpush.bf16.msra.mxu1 %v7752_v45  ;;  %v7773_v45 = vld [vmem:[%s18630_s1 + $0x118] sm:$0xf0]  ;;  %v8000_v37 = vor.u32 %v11875_v29, %v7997_v31  ;;  %v11849_v29 = vld [vmem:[%s18630_s1 + $0x204] sm:$0xf] }
  0x4a   :  { %976 = vmatpush.bf16.msra.mxu2 %v7816_v46  ;;  %v11835_v46 = vld [vmem:[%s18630_s1 + $0x194] sm:$0xf]  ;;  %v7776_v52 = vor.u32 %v11819_v43, %v7773_v45  ;;  %v7925_v43 = vld [vmem:[%s18630_s1 + $0x248] sm:$0xf0]  ;;  %v11873_v45 = vld [vmem:[%s18630_s1 + $0x2c4] sm:$0xf] }
  0x4b   :  { %989 = vmatpush.bf16.msra.mxu3 %v7880_v50  ;;  %v7637_v50 = vld [vmem:[%s18630_s1 + $0x8] sm:$0xf0]  ;;  %v8093_v27 = vld [vmem:[%s18630_s1 + $0x398] sm:$0xf0] }
  0x4c   :  { %951 = vmatpush.bf16.msra.mxu0 %v7680_v56  ;;  %v7840_v56 = vor.u32 %v11835_v46, %v7837_v47  ;;  %v7640_v63 = vor.u32 %v11785_v49, %v7637_v50  ;;  %v7989_v47 = vld [vmem:[%s18630_s1 + $0x2c8] sm:$0xf0]  ;;  %v11905_v50 = vld [vmem:[%s18630_s1 + $0x3c4] sm:$0xf] }
  0x4d   :  { %964 = vmatpush.bf16.msra.mxu1 %v7744_v57  ;;  %v7765_v57 = vld [vmem:[%s18630_s1 + $0x108] sm:$0xf0]  ;;  %v7992_v53 = vor.u32 %v11873_v45, %v7989_v47  ;;  %v11928_v45 = vld [vmem:[%s18630_s1 + $0x474] sm:$0xf0] }
  0x4e   :  { %977 = vmatpush.bf16.msra.mxu2 %v7808_v58  ;;  %v11833_v58 = vld [vmem:[%s18630_s1 + $0x184] sm:$0xf]  ;;  %v8053_v49 = vld [vmem:[%s18630_s1 + $0x348] sm:$0xf0] }
  0x4f   :  { %990 = vmatpush.bf16.msra.mxu3 %v7872_v62  ;;  %v11879_v62 = vld [vmem:[%s18630_s1 + $0x2f4] sm:$0xf]  ;;  %v7832_v7 = vor.u32 %v11833_v58, %v7829_v59  ;;  %v7981_v59 = vld [vmem:[%s18630_s1 + $0x2b8] sm:$0xf0] }
  0x50   :  { %952 = vmatpush.bf16.msra.mxu0 %v7672_v4  ;;  %v7768_v4 = vor.u32 %v11817_v55, %v7765_v57  ;;  %v8016_v9 = vor.u32 %v11879_v62, %v8013_v0  ;;  %v11855_v55 = vld [vmem:[%s18630_s1 + $0x234] sm:$0xf] }
  0x51   :  { %965 = vmatpush.bf16.msra.mxu1 %v7736_v5  ;;  %v11911_v5 = vld [vmem:[%s18630_s1 + $0x3f4] sm:$0xf] }
  0x52   :  { %978 = vmatpush.bf16.msra.mxu2 %v7800_v6  ;;  %v8141_v6 = vld [vmem:[%s18630_s1 + $0x3f8] sm:$0xf0]  ;;  %v11871_v57 = vld [vmem:[%s18630_s1 + $0x2b4] sm:$0xf] }
  0x53   :  { %991 = vmatpush.bf16.msra.mxu3 %v7864_v10  ;;  %v8080_v10 = vor.u32 %v11895_v1, %v8077_v2  ;;  %v8144_v14 = vor.u32 %v11911_v5, %v8141_v6  ;;  %v11903_v62 = vld [vmem:[%s18630_s1 + $0x3b4] sm:$0xf]  ;;  %v7984_v1 = vor.u32 %v11871_v57, %v7981_v59  ;;  %v8048_v2 = vor.u32 %v11887_v60, %v8045_v61  ;;  %v11869_v5 = vld [vmem:[%s18630_s1 + $0x2a4] sm:$0xf]  ;;  %v8324_v59 = vld [vmem:[%s18630_s1 + $0x460] sm:$0xf] }
  0x54   :  { %953 = vmatpush.bf16.msra.mxu0 %v7664_v16  ;;  %v11893_v16 = vld [vmem:[%s18630_s1 + $0x364] sm:$0xf]  ;;  %v11926_v60 = vld [vmem:[%s18630_s1 + $0x464] sm:$0xf0]  ;;  %v8388_v61 = vld [vmem:[%s18630_s1 + $0x4e0] sm:$0xf] }
  0x55   :  { %966 = vmatpush.bf16.msra.mxu1 %v7728_v17  ;;  %v8069_v17 = vld [vmem:[%s18630_s1 + $0x368] sm:$0xf0] }
  0x56   :  { %979 = vmatpush.bf16.msra.mxu2 %v7792_v21  ;;  %v11909_v21 = vld [vmem:[%s18630_s1 + $0x3e4] sm:$0xf] }
  0x57   :  { %992 = vmatpush.bf16.msra.mxu3 %v7856_v26  ;;  %v8072_v26 = vor.u32 %v11893_v16, %v8069_v17  ;;  %v8136_v30 = vor.u32 %v11909_v21, %v8133_v23  ;;  %v7901_v16 = vld [vmem:[%s18630_s1 + $0x218] sm:$0xf0]  ;;  %v11867_v17 = vld [vmem:[%s18630_s1 + $0x294] sm:$0xf] }
  0x58   :  { %954 = vmatpush.bf16.msra.mxu0 %v7656_v32  ;;  %v11891_v32 = vld [vmem:[%s18630_s1 + $0x354] sm:$0xf]  ;;  %v7965_v23 = vld [vmem:[%s18630_s1 + $0x298] sm:$0xf0]  ;;  %v7904_v28 = vor.u32 %v11851_v15, %v7901_v16  ;;  %v11972_v15 = vld [vmem:[%s18630_s1 + $0x5d4] sm:$0xf0] }
  0x59   :  { %967 = vmatpush.bf16.msra.mxu1 %v7720_v33  ;;  %v8061_v33 = vld [vmem:[%s18630_s1 + $0x358] sm:$0xf0]  ;;  %v7968_v31 = vor.u32 %v11867_v17, %v7965_v23  ;;  %v8308_v23 = vld [vmem:[%s18630_s1 + $0x440] sm:$0xf] }
  0x5a   :  { %980 = vmatpush.bf16.msra.mxu2 %v7784_v34  ;;  %v11907_v34 = vld [vmem:[%s18630_s1 + $0x3d4] sm:$0xf] }
  0x5b   :  { %993 = vmatpush.bf16.msra.mxu3 %v7848_v39  ;;  %v8064_v39 = vor.u32 %v11891_v32, %v8061_v33  ;;  %v8128_v46 = vor.u32 %v11907_v34, %v8125_v35  ;;  %v11865_v33 = vld [vmem:[%s18630_s1 + $0x284] sm:$0xf]  ;;  %v7957_v34 = vld [vmem:[%s18630_s1 + $0x288] sm:$0xf0] }
  0x5c   :  { %955 = vmatpush.bf16.msra.mxu0 %v7648_v48  ;;  %v11889_v48 = vld [vmem:[%s18630_s1 + $0x344] sm:$0xf] }
  0x5d   :  { %968 = vmatpush.bf16.msra.mxu1 %v7712_v51  ;;  %v8117_v51 = vld [vmem:[%s18630_s1 + $0x3c8] sm:$0xf0]  ;;  %v8056_v54 = vor.u32 %v11889_v48, %v8053_v49  ;;  %v11881_v35 = vld [vmem:[%s18630_s1 + $0x304] sm:$0xf]  ;;  %v11944_v48 = vld [vmem:[%s18630_s1 + $0x4f4] sm:$0xf0] }
  0x5e   :  { %981 = vmatpush.bf16.msra.mxu2 %v7776_v52  ;;  %v7928_v52 = vor.u32 %v11857_v40, %v7925_v43  ;;  %v8120_v58 = vor.u32 %v11905_v50, %v8117_v51  ;;  %v8085_v40 = vld [vmem:[%s18630_s1 + $0x388] sm:$0xf0]  ;;  %v8332_v43 = vld [vmem:[%s18630_s1 + $0x470] sm:$0xf]  ;;  %v11960_v50 = vld [vmem:[%s18630_s1 + $0x574] sm:$0xf0]  ;;  %v7960_v51 = vor.u32 %v11865_v33, %v7957_v34 }
  0x5f   :  { %994 = vmatpush.bf16.msra.mxu3 %v7840_v56  ;;  %v7917_v56 = vld [vmem:[%s18630_s1 + $0x238] sm:$0xf0]  ;;  %v8460_v49 = vld [vmem:[%s18630_s1 + $0x570] sm:$0xf] }
  0x60   :  { %956 = vmatpush.bf16.msra.mxu0 %v7640_v63  ;;  %v8109_v63 = vld [vmem:[%s18630_s1 + $0x3b8] sm:$0xf0]  ;;  %v7920_v0 = vor.u32 %v11855_v55, %v7917_v56  ;;  %v8333_v56 = vor.u32 %v11928_v45, %v8332_v43  ;;  %v8428_v43 = vld [vmem:[%s18630_s1 + $0x530] sm:$0xf]  ;;  %v11952_v45 = vld [vmem:[%s18630_s1 + $0x534] sm:$0xf0] }
  0x61   :  { %969 = vmatpush.bf16.msra.mxu1 %v7704_v3  ;;  %v11853_v3 = vld [vmem:[%s18630_s1 + $0x224] sm:$0xf]  ;;  %v8112_v6 = vor.u32 %v11903_v62, %v8109_v63  ;;  %v11942_v63 = vld [vmem:[%s18630_s1 + $0x4e4] sm:$0xf0] }
  0x62   :  { %982 = vmatpush.bf16.msra.mxu2 %v7768_v4  ;;  %v7909_v4 = vld [vmem:[%s18630_s1 + $0x228] sm:$0xf0] }
  0x63   :  { %995 = vmatpush.bf16.msra.mxu3 %v7832_v7  ;;  %957 = vmatmul.bf16.vlgmr.msra.gmra.mxu0 %v13084_v19  ;;  %v7973_v7 = vld [vmem:[%s18630_s1 + $0x2a8] sm:$0xf0]  ;;  %v7912_v12 = vor.u32 %v11853_v3, %v7909_v4  ;;  %v11974_v3 = vld [vmem:[%s18630_s1 + $0x5e4] sm:$0xf0]  ;;  %v8325_v4 = vor.u32 %v11926_v60, %v8324_v59 }
  0x64   :  { %1001 = vmatpush.bf16.msrb.mxu0 %v7952_v8  ;;  %970 = vmatmul.bf16.vlgmr.msra.gmra.mxu1 %v13088_v22  ;;  %v11885_v8 = vld [vmem:[%s18630_s1 + $0x324] sm:$0xf]  ;;  %v7976_v13 = vor.u32 %v11869_v5, %v7973_v7  ;;  %v8389_v5 = vor.u32 %v11942_v63, %v8388_v61  ;;  %v8316_v7 = vld [vmem:[%s18630_s1 + $0x450] sm:$0xf]  ;;  %v11966_v59 = vld [vmem:[%s18630_s1 + $0x5a4] sm:$0xf0] }
  0x65   :  { %1014 = vmatpush.bf16.msrb.mxu1 %v8016_v9  ;;  %983 = vmatmul.bf16.vlgmr.msra.gmra.mxu2 %v13082_v18  ;;  %v8037_v9 = vld [vmem:[%s18630_s1 + $0x328] sm:$0xf0]  ;;  %v8284_v63 = vld [vmem:[%s18630_s1 + $0x410] sm:$0xf] }
  0x66   :  { %1027 = vmatpush.bf16.msrb.mxu2 %v8080_v10  ;;  %996 = vmatmul.bf16.vlgmr.msra.gmra.mxu3 %v13086_v20  ;;  %v11901_v10 = vld [vmem:[%s18630_s1 + $0x3a4] sm:$0xf] }
  0x67   :  { %1040 = vmatpush.bf16.msrb.mxu3 %v8144_v14  ;;  %v8040_v14 = vor.u32 %v11885_v8, %v8037_v9  ;;  %v8104_v21 = vor.u32 %v11901_v10, %v8101_v11  ;;  %v11924_v8 = vld [vmem:[%s18630_s1 + $0x454] sm:$0xf0]  ;;  %v8380_v9 = vld [vmem:[%s18630_s1 + $0x4d0] sm:$0xf] }
  0x68   :  { %1002 = vmatpush.bf16.msrb.mxu0 %v7944_v24  ;;  %v11883_v24 = vld [vmem:[%s18630_s1 + $0x314] sm:$0xf]  ;;  %v11940_v11 = vld [vmem:[%s18630_s1 + $0x4d4] sm:$0xf0]  ;;  %v8317_v16 = vor.u32 %v11924_v8, %v8316_v7 }
  0x69   :  { %1015 = vmatpush.bf16.msrb.mxu1 %v8008_v25  ;;  %v8029_v25 = vld [vmem:[%s18630_s1 + $0x318] sm:$0xf0]  ;;  %v8381_v17 = vor.u32 %v11940_v11, %v8380_v9  ;;  %v11964_v7 = vld [vmem:[%s18630_s1 + $0x594] sm:$0xf0]  ;;  %v8276_v9 = vld [vmem:[%s18630_s1 + $0x400] sm:$0xf] }
  0x6a   :  { %1028 = vmatpush.bf16.msrb.mxu2 %v8072_v26  ;;  %v11899_v26 = vld [vmem:[%s18630_s1 + $0x394] sm:$0xf]  ;;  %v8032_v32 = vor.u32 %v11883_v24, %v8029_v25  ;;  %v11922_v24 = vld [vmem:[%s18630_s1 + $0x444] sm:$0xf0]  ;;  %v8372_v25 = vld [vmem:[%s18630_s1 + $0x4c0] sm:$0xf] }
  0x6b   :  { %1041 = vmatpush.bf16.msrb.mxu3 %v8136_v30  ;;  %v7893_v30 = vld [vmem:[%s18630_s1 + $0x208] sm:$0xf0] }
  0x6c   :  { %1003 = vmatpush.bf16.msrb.mxu0 %v7936_v36  ;;  %v8096_v36 = vor.u32 %v11899_v26, %v8093_v27  ;;  %v7896_v47 = vor.u32 %v11849_v29, %v7893_v30  ;;  %v11938_v27 = vld [vmem:[%s18630_s1 + $0x4c4] sm:$0xf0]  ;;  %v8500_v30 = vld [vmem:[%s18630_s1 + $0x5c0] sm:$0xf] }
  0x6d   :  { %1016 = vmatpush.bf16.msrb.mxu1 %v8000_v37  ;;  %v8021_v37 = vld [vmem:[%s18630_s1 + $0x308] sm:$0xf0]  ;;  %v11954_v29 = vld [vmem:[%s18630_s1 + $0x544] sm:$0xf0]  ;;  %v8373_v33 = vor.u32 %v11938_v27, %v8372_v25  ;;  %v11992_v25 = vld [vmem:[%s18630_s1 + $0x674] sm:$0xf0] }
  0x6e   :  { %1029 = vmatpush.bf16.msrb.mxu2 %v8064_v39  ;;  %v11897_v39 = vld [vmem:[%s18630_s1 + $0x384] sm:$0xf] }
  0x6f   :  { %1042 = vmatpush.bf16.msrb.mxu3 %v8128_v46  ;;  %v8396_v46 = vld [vmem:[%s18630_s1 + $0x4f0] sm:$0xf]  ;;  %v8088_v55 = vor.u32 %v11897_v39, %v8085_v40  ;;  %v11936_v40 = vld [vmem:[%s18630_s1 + $0x4b4] sm:$0xf0] }
  0x70   :  { %1004 = vmatpush.bf16.msrb.mxu0 %v7928_v52  ;;  %v8024_v52 = vor.u32 %v11881_v35, %v8021_v37  ;;  %v8397_v57 = vor.u32 %v11944_v48, %v8396_v46  ;;  %v8300_v35 = vld [vmem:[%s18630_s1 + $0x430] sm:$0xf] }
  0x71   :  { %1017 = vmatpush.bf16.msrb.mxu1 %v7992_v53  ;;  %v8524_v53 = vld [vmem:[%s18630_s1 + $0x5f0] sm:$0xf] }
  0x72   :  { %1030 = vmatpush.bf16.msrb.mxu2 %v8056_v54  ;;  %v11976_v54 = vld [vmem:[%s18630_s1 + $0x5f4] sm:$0xf0]  ;;  %v8364_v37 = vld [vmem:[%s18630_s1 + $0x4b0] sm:$0xf] }
  0x73   :  { %1043 = vmatpush.bf16.msrb.mxu3 %v8120_v58  ;;  %v8461_v58 = vor.u32 %v11960_v50, %v8460_v49  ;;  %v8525_v62 = vor.u32 %v11976_v54, %v8524_v53  ;;  %v8492_v46 = vld [vmem:[%s18630_s1 + $0x5b0] sm:$0xf]  ;;  %v8365_v49 = vor.u32 %v11936_v40, %v8364_v37  ;;  %v8429_v50 = vor.u32 %v11952_v45, %v8428_v43  ;;  %v8356_v53 = vld [vmem:[%s18630_s1 + $0x4a0] sm:$0xf]  ;;  %v11990_v43 = vld [vmem:[%s18630_s1 + $0x664] sm:$0xf0] }
  0x74   :  { %1005 = vmatpush.bf16.msrb.mxu0 %v7920_v0  ;;  %v8452_v0 = vld [vmem:[%s18630_s1 + $0x560] sm:$0xf] }
  0x75   :  { %1018 = vmatpush.bf16.msrb.mxu1 %v7984_v1  ;;  %v11958_v1 = vld [vmem:[%s18630_s1 + $0x564] sm:$0xf0]  ;;  %v8580_v40 = vld [vmem:[%s18630_s1 + $0x660] sm:$0xf] }
  0x76   :  { %1031 = vmatpush.bf16.msrb.mxu2 %v8048_v2  ;;  %v8516_v2 = vld [vmem:[%s18630_s1 + $0x5e0] sm:$0xf] }
  0x77   :  { %1044 = vmatpush.bf16.msrb.mxu3 %v8112_v6  ;;  %v8453_v6 = vor.u32 %v11958_v1, %v8452_v0  ;;  %v8517_v10 = vor.u32 %v11974_v3, %v8516_v2  ;;  %v11916_v0 = vld [vmem:[%s18630_s1 + $0x414] sm:$0xf0]  ;;  %v8348_v1 = vld [vmem:[%s18630_s1 + $0x490] sm:$0xf]  ;;  %v8644_v45 = vld [vmem:[%s18630_s1 + $0x6e0] sm:$0xf] }
  0x78   :  { %1006 = vmatpush.bf16.msrb.mxu0 %v7912_v12  ;;  %v8444_v12 = vld [vmem:[%s18630_s1 + $0x550] sm:$0xf]  ;;  %v11932_v3 = vld [vmem:[%s18630_s1 + $0x494] sm:$0xf0]  ;;  %v8285_v8 = vor.u32 %v11916_v0, %v8284_v63 }
  0x79   :  { %1019 = vmatpush.bf16.msrb.mxu1 %v7976_v13  ;;  %v11956_v13 = vld [vmem:[%s18630_s1 + $0x554] sm:$0xf0]  ;;  %v8349_v11 = vor.u32 %v11932_v3, %v8348_v1  ;;  %v8564_v3 = vld [vmem:[%s18630_s1 + $0x640] sm:$0xf] }
  0x7a   :  { %1032 = vmatpush.bf16.msrb.mxu2 %v8040_v14  ;;  %v8508_v14 = vld [vmem:[%s18630_s1 + $0x5d0] sm:$0xf]  ;;  %v12036_v63 = vld [vmem:[%s18630_s1 + $0x7d4] sm:$0xf0] }
  0x7b   :  { %1045 = vmatpush.bf16.msrb.mxu3 %v8104_v21  ;;  %v8445_v21 = vor.u32 %v11956_v13, %v8444_v12  ;;  %v8509_v26 = vor.u32 %v11972_v15, %v8508_v14  ;;  %v8340_v13 = vld [vmem:[%s18630_s1 + $0x480] sm:$0xf]  ;;  %v11930_v14 = vld [vmem:[%s18630_s1 + $0x484] sm:$0xf0] }
  0x7c   :  { %1007 = vmatpush.bf16.msrb.mxu0 %v7904_v28  ;;  %v8436_v28 = vld [vmem:[%s18630_s1 + $0x540] sm:$0xf] }
  0x7d   :  { %1020 = vmatpush.bf16.msrb.mxu1 %v7968_v31  ;;  %v11970_v31 = vld [vmem:[%s18630_s1 + $0x5c4] sm:$0xf0]  ;;  %v8437_v34 = vor.u32 %v11954_v29, %v8436_v28  ;;  %v8404_v15 = vld [vmem:[%s18630_s1 + $0x500] sm:$0xf]  ;;  %v12008_v28 = vld [vmem:[%s18630_s1 + $0x6f4] sm:$0xf0] }
  0x7e   :  { %1033 = vmatpush.bf16.msrb.mxu2 %v8032_v32  ;;  %v8309_v32 = vor.u32 %v11922_v24, %v8308_v23  ;;  %v8501_v39 = vor.u32 %v11970_v31, %v8500_v30  ;;  %v11962_v23 = vld [vmem:[%s18630_s1 + $0x584] sm:$0xf0]  ;;  %v8588_v24 = vld [vmem:[%s18630_s1 + $0x670] sm:$0xf]  ;;  %v12024_v30 = vld [vmem:[%s18630_s1 + $0x774] sm:$0xf0]  ;;  %v8341_v31 = vor.u32 %v11930_v14, %v8340_v13 }
  0x7f   :  { %1046 = vmatpush.bf16.msrb.mxu3 %v8096_v36  ;;  %v11920_v36 = vld [vmem:[%s18630_s1 + $0x434] sm:$0xf0]  ;;  %v8716_v29 = vld [vmem:[%s18630_s1 + $0x770] sm:$0xf] }
  0x80   :  { %1008 = vmatpush.bf16.msrb.mxu0 %v7896_v47  ;;  %v11968_v47 = vld [vmem:[%s18630_s1 + $0x5b4] sm:$0xf0]  ;;  %v8301_v48 = vor.u32 %v11920_v36, %v8300_v35  ;;  %v8589_v36 = vor.u32 %v11992_v25, %v8588_v24  ;;  %v8556_v13 = vld [vmem:[%s18630_s1 + $0x630] sm:$0xf] }
  0x81   :  { %1021 = vmatpush.bf16.msrb.mxu1 %v7960_v51  ;;  %v8292_v51 = vld [vmem:[%s18630_s1 + $0x420] sm:$0xf]  ;;  %v8493_v54 = vor.u32 %v11968_v47, %v8492_v46  ;;  %v12006_v47 = vld [vmem:[%s18630_s1 + $0x6e4] sm:$0xf0]  ;;  %v8684_v24 = vld [vmem:[%s18630_s1 + $0x730] sm:$0xf] }
  0x82   :  { %1034 = vmatpush.bf16.msrb.mxu2 %v8024_v52  ;;  %v11918_v52 = vld [vmem:[%s18630_s1 + $0x424] sm:$0xf0]  ;;  %v12016_v25 = vld [vmem:[%s18630_s1 + $0x734] sm:$0xf0] }
  0x83   :  { %1047 = vmatpush.bf16.msrb.mxu3 %v8088_v55  ;;  %1009 = vmatmul.bf16.vlgmr.msrb.gmra.mxu0 %v13246_v41  ;;  %v11934_v55 = vld [vmem:[%s18630_s1 + $0x4a4] sm:$0xf0]  ;;  %v8293_v60 = vor.u32 %v11918_v52, %v8292_v51  ;;  %v8581_v52 = vor.u32 %v11990_v43, %v8580_v40  ;;  %v8740_v43 = vld [vmem:[%s18630_s1 + $0x7a0] sm:$0xf] }
  0x84   :  { %1829 = vmatpush.bf16.msra.mxu0 %v8333_v56  ;;  %1022 = vmatmul.bf16.vlgmr.msrb.gmra.mxu1 %v13250_v44  ;;  %v8420_v56 = vld [vmem:[%s18630_s1 + $0x520] sm:$0xf]  ;;  %v8357_v61 = vor.u32 %v11934_v55, %v8356_v53  ;;  %v12038_v51 = vld [vmem:[%s18630_s1 + $0x7e4] sm:$0xf0]  ;;  %v8645_v53 = vor.u32 %v12006_v47, %v8644_v45  ;;  %v8572_v55 = vld [vmem:[%s18630_s1 + $0x650] sm:$0xf] }
  0x85   :  { %1842 = vmatpush.bf16.msra.mxu1 %v8397_v57  ;;  %1035 = vmatmul.bf16.vlgmr.msrb.gmra.mxu2 %v13238_v38  ;;  %v11950_v57 = vld [vmem:[%s18630_s1 + $0x524] sm:$0xf0] }
  0x86   :  { %1855 = vmatpush.bf16.msra.mxu2 %v8461_v58  ;;  %1048 = vmatmul.bf16.vlgmr.msrb.gmra.mxu3 %v13248_v42  ;;  %v8484_v58 = vld [vmem:[%s18630_s1 + $0x5a0] sm:$0xf]  ;;  %v12014_v40 = vld [vmem:[%s18630_s1 + $0x724] sm:$0xf0] }
  0x87   :  { %1868 = vmatpush.bf16.msra.mxu3 %v8525_v62  ;;  %v8421_v62 = vor.u32 %v11950_v57, %v8420_v56  ;;  %v8485_v2 = vor.u32 %v11966_v59, %v8484_v58  ;;  %v11988_v56 = vld [vmem:[%s18630_s1 + $0x654] sm:$0xf0]  ;;  %v8636_v57 = vld [vmem:[%s18630_s1 + $0x6d0] sm:$0xf]  ;;  %v12030_v45 = vld [vmem:[%s18630_s1 + $0x7a4] sm:$0xf0] }
  0x88   :  { %1830 = vmatpush.bf16.msra.mxu0 %v8325_v4  ;;  %v8412_v4 = vld [vmem:[%s18630_s1 + $0x510] sm:$0xf]  ;;  %v12004_v59 = vld [vmem:[%s18630_s1 + $0x6d4] sm:$0xf0]  ;;  %v8573_v0 = vor.u32 %v11988_v56, %v8572_v55  ;;  %v8741_v55 = vor.u32 %v12030_v45, %v8740_v43  ;;  %v8390_v43 = vld [vmem:[%s18630_s1 + $0x4e8] sm:$0xf0] }
  0x89   :  { %1843 = vmatpush.bf16.msra.mxu1 %v8389_v5  ;;  %v11948_v5 = vld [vmem:[%s18630_s1 + $0x514] sm:$0xf0]  ;;  %v8637_v1 = vor.u32 %v12004_v59, %v8636_v57  ;;  %v8668_v57 = vld [vmem:[%s18630_s1 + $0x710] sm:$0xf]  ;;  %v11957_v45 = vld [vmem:[%s18630_s1 + $0x564] sm:$0xf] }
  0x8a   :  { %1856 = vmatpush.bf16.msra.mxu2 %v8453_v6  ;;  %v8476_v6 = vld [vmem:[%s18630_s1 + $0x590] sm:$0xf]  ;;  %v8413_v12 = vor.u32 %v11948_v5, %v8412_v4  ;;  %v11986_v4 = vld [vmem:[%s18630_s1 + $0x644] sm:$0xf0]  ;;  %v8628_v5 = vld [vmem:[%s18630_s1 + $0x6c0] sm:$0xf] }
  0x8b   :  { %1869 = vmatpush.bf16.msra.mxu3 %v8517_v10  ;;  %v11914_v10 = vld [vmem:[%s18630_s1 + $0x404] sm:$0xf0]  ;;  %v11996_v56 = vld [vmem:[%s18630_s1 + $0x694] sm:$0xf0]  ;;  %v8732_v59 = vld [vmem:[%s18630_s1 + $0x790] sm:$0xf] }
  0x8c   :  { %1831 = vmatpush.bf16.msra.mxu0 %v8317_v16  ;;  %v8477_v16 = vor.u32 %v11964_v7, %v8476_v6  ;;  %v8277_v27 = vor.u32 %v11914_v10, %v8276_v9  ;;  %v12002_v7 = vld [vmem:[%s18630_s1 + $0x6c4] sm:$0xf0]  ;;  %v8756_v10 = vld [vmem:[%s18630_s1 + $0x7c0] sm:$0xf] }
  0x8d   :  { %1844 = vmatpush.bf16.msra.mxu1 %v8381_v17  ;;  %v11946_v17 = vld [vmem:[%s18630_s1 + $0x504] sm:$0xf0]  ;;  %v8629_v14 = vor.u32 %v12002_v7, %v8628_v5  ;;  %v8660_v5 = vld [vmem:[%s18630_s1 + $0x700] sm:$0xf] }
  0x8e   :  { %1857 = vmatpush.bf16.msra.mxu2 %v8445_v21  ;;  %v8468_v21 = vld [vmem:[%s18630_s1 + $0x580] sm:$0xf]  ;;  %v12018_v9 = vld [vmem:[%s18630_s1 + $0x744] sm:$0xf0] }
  0x8f   :  { %1870 = vmatpush.bf16.msra.mxu3 %v8509_v26  ;;  %v8652_v26 = vld [vmem:[%s18630_s1 + $0x6f0] sm:$0xf]  ;;  %v8469_v35 = vor.u32 %v11962_v23, %v8468_v21  ;;  %v12000_v21 = vld [vmem:[%s18630_s1 + $0x6b4] sm:$0xf0] }
  0x90   :  { %1832 = vmatpush.bf16.msra.mxu0 %v8309_v32  ;;  %v8405_v32 = vor.u32 %v11946_v17, %v8404_v15  ;;  %v8653_v37 = vor.u32 %v12008_v28, %v8652_v26  ;;  %v8620_v17 = vld [vmem:[%s18630_s1 + $0x6b0] sm:$0xf]  ;;  %v13913_v26 = vld [vmem:[%s18632_s2] sm:$0x3]  ;;  %v12032_v28 = vld [vmem:[%s18630_s1 + $0x7b4] sm:$0xf0] }
  0x91   :  { %1845 = vmatpush.bf16.msra.mxu1 %v8373_v33  ;;  %v8780_v33 = vld [vmem:[%s18630_s1 + $0x7f0] sm:$0xf] }
  0x92   :  { %1858 = vmatpush.bf16.msra.mxu2 %v8437_v34  ;;  %v12040_v34 = vld [vmem:[%s18630_s1 + $0x7f4] sm:$0xf0] }
  0x93   :  { %1871 = vmatpush.bf16.msra.mxu3 %v8501_v39  ;;  %v8717_v39 = vor.u32 %v12024_v30, %v8716_v29  ;;  %v8781_v46 = vor.u32 %v12040_v34, %v8780_v33  ;;  %v8548_v30 = vld [vmem:[%s18630_s1 + $0x620] sm:$0xf]  ;;  %v11982_v33 = vld [vmem:[%s18630_s1 + $0x624] sm:$0xf0] }
  0x94   :  { %1833 = vmatpush.bf16.msra.mxu0 %v8301_v48  ;;  %v8708_v48 = vld [vmem:[%s18630_s1 + $0x760] sm:$0xf] }
  0x95   :  { %1846 = vmatpush.bf16.msra.mxu1 %v8365_v49  ;;  %v12022_v49 = vld [vmem:[%s18630_s1 + $0x764] sm:$0xf0]  ;;  %v8612_v34 = vld [vmem:[%s18630_s1 + $0x6a0] sm:$0xf] }
  0x96   :  { %1859 = vmatpush.bf16.msra.mxu2 %v8429_v50  ;;  %v8772_v50 = vld [vmem:[%s18630_s1 + $0x7e0] sm:$0xf] }
  0x97   :  { %1872 = vmatpush.bf16.msra.mxu3 %v8493_v54  ;;  %v8709_v54 = vor.u32 %v12022_v49, %v8708_v48  ;;  %v8773_v58 = vor.u32 %v12038_v51, %v8772_v50  ;;  %v8540_v50 = vld [vmem:[%s18630_s1 + $0x610] sm:$0xf]  ;;  %v11980_v51 = vld [vmem:[%s18630_s1 + $0x614] sm:$0xf0] }
  0x98   :  { %1834 = vmatpush.bf16.msra.mxu0 %v8293_v60  ;;  %v8700_v60 = vld [vmem:[%s18630_s1 + $0x750] sm:$0xf] }
  0x99   :  { %1847 = vmatpush.bf16.msra.mxu1 %v8357_v61  ;;  %v12020_v61 = vld [vmem:[%s18630_s1 + $0x754] sm:$0xf0] }
  0x9a   :  { %1860 = vmatpush.bf16.msra.mxu2 %v8421_v62  ;;  %v8764_v62 = vld [vmem:[%s18630_s1 + $0x7d0] sm:$0xf] }
  0x9b   :  { %1873 = vmatpush.bf16.msra.mxu3 %v8485_v2  ;;  %v8701_v2 = vor.u32 %v12020_v61, %v8700_v60  ;;  %v8765_v6 = vor.u32 %v12036_v63, %v8764_v62  ;;  %v12028_v60 = vld [vmem:[%s18630_s1 + $0x794] sm:$0xf0]  ;;  %v8541_v62 = vor.u32 %v11980_v51, %v8540_v50  ;;  %v8532_v63 = vld [vmem:[%s18630_s1 + $0x600] sm:$0xf] }
  0x9c   :  { %1835 = vmatpush.bf16.msra.mxu0 %v8285_v8  ;;  %v8692_v8 = vld [vmem:[%s18630_s1 + $0x740] sm:$0xf]  ;;  %v8733_v7 = vor.u32 %v12028_v60, %v8732_v59  ;;  %v11955_v59 = vld [vmem:[%s18630_s1 + $0x554] sm:$0xf]  ;;  %v8446_v60 = vld [vmem:[%s18630_s1 + $0x558] sm:$0xf0] }
  0x9d   :  { %1848 = vmatpush.bf16.msra.mxu1 %v8349_v11  ;;  %v12034_v11 = vld [vmem:[%s18630_s1 + $0x7c4] sm:$0xf0]  ;;  %v8693_v15 = vor.u32 %v12018_v9, %v8692_v8  ;;  %v8724_v9 = vld [vmem:[%s18630_s1 + $0x780] sm:$0xf] }
  0x9e   :  { %1861 = vmatpush.bf16.msra.mxu2 %v8413_v12  ;;  %v8565_v12 = vor.u32 %v11986_v4, %v8564_v3  ;;  %v8757_v23 = vor.u32 %v12034_v11, %v8756_v10  ;;  %v8596_v3 = vld [vmem:[%s18630_s1 + $0x680] sm:$0xf]  ;;  %v11994_v4 = vld [vmem:[%s18630_s1 + $0x684] sm:$0xf0] }
  0x9f   :  { %1874 = vmatpush.bf16.msra.mxu3 %v8477_v16  ;;  %v11984_v16 = vld [vmem:[%s18630_s1 + $0x634] sm:$0xf0]  ;;  %v12010_v8 = vld [vmem:[%s18630_s1 + $0x704] sm:$0xf0] }
  0xa0   :  { %1836 = vmatpush.bf16.msra.mxu0 %v8277_v27  ;;  %v8748_v27 = vld [vmem:[%s18630_s1 + $0x7b0] sm:$0xf]  ;;  %v8557_v29 = vor.u32 %v11984_v16, %v8556_v13  ;;  %v854_v47 = vpop.f32.mrf.mxu0  ;;  %v12026_v10 = vld [vmem:[%s18630_s1 + $0x784] sm:$0xf0]  ;;  %v11927_v13 = vld [vmem:[%s18630_s1 + $0x474] sm:$0xf] }
  0xa1   :  { %1849 = vmatpush.bf16.msra.mxu1 %v8341_v31  ;;  %v8621_v31 = vor.u32 %v12000_v21, %v8620_v17  ;;  %v8398_v17 = vld [vmem:[%s18630_s1 + $0x4f8] sm:$0xf0]  ;;  %v11959_v21 = vld [vmem:[%s18630_s1 + $0x574] sm:$0xf] }
  0xa2   :  { %1862 = vmatpush.bf16.msra.mxu2 %v8405_v32  ;;  %v8685_v32 = vor.u32 %v12016_v25, %v8684_v24 }
  0xa3   :  { %1875 = vmatpush.bf16.msra.mxu3 %v8469_v35  ;;  %1837 = vmatmul.bf16.vlgmr.msra.gmra.mxu0 %v13084_v19  ;;  %v173_v35 = vperm.slane %v13913_v26, 0 }
  0xa4   :  { %1881 = vmatpush.bf16.msrb.mxu0 %v8589_v36  ;;  %1850 = vmatmul.bf16.vlgmr.msra.gmra.mxu1 %v13088_v22  ;;  %v8749_v36 = vor.u32 %v12032_v28, %v8748_v27  ;;  %v8597_v27 = vor.u32 %v11994_v4, %v8596_v3  ;;  %v8661_v28 = vor.u32 %v12010_v8, %v8660_v5  ;;  %v8310_v3 = vld [vmem:[%s18630_s1 + $0x448] sm:$0xf0]  ;;  %v11937_v4 = vld [vmem:[%s18630_s1 + $0x4c4] sm:$0xf] }
  0xa5   :  { %1894 = vmatpush.bf16.msrb.mxu1 %v8653_v37  ;;  %1863 = vmatmul.bf16.vlgmr.msra.gmra.mxu2 %v13082_v18  ;;  %v11998_v37 = vld [vmem:[%s18630_s1 + $0x6a4] sm:$0xf0]  ;;  %v8438_v8 = vld [vmem:[%s18630_s1 + $0x548] sm:$0xf0] }
  0xa6   :  { %1907 = vmatpush.bf16.msrb.mxu2 %v8717_v39  ;;  %1876 = vmatmul.bf16.vlgmr.msra.gmra.mxu3 %v13086_v20  ;;  %v8676_v39 = vld [vmem:[%s18630_s1 + $0x720] sm:$0xf]  ;;  %v8613_v48 = vor.u32 %v11998_v37, %v8612_v34  ;;  %v8326_v37 = vld [vmem:[%s18630_s1 + $0x468] sm:$0xf0] }
  0xa7   :  { %1920 = vmatpush.bf16.msrb.mxu3 %v8781_v46  ;;  %v8549_v46 = vor.u32 %v11982_v33, %v8548_v30  ;;  %v8677_v49 = vor.u32 %v12014_v40, %v8676_v39  ;;  %v8526_v30 = vld [vmem:[%s18630_s1 + $0x5f8] sm:$0xf0]  ;;  %v11941_v39 = vld [vmem:[%s18630_s1 + $0x4e4] sm:$0xf] }
  0xa8   :  { %1882 = vmatpush.bf16.msrb.mxu0 %v8581_v52  ;;  %v8604_v52 = vld [vmem:[%s18630_s1 + $0x690] sm:$0xf]  ;;  %v856_v25 = vpop.f32.mrf.mxu0 }
  0xa9   :  { %1895 = vmatpush.bf16.msrb.mxu1 %v8645_v53  ;;  %v855_v53 = vadd.f32 %v854_v47, %v173_v35  ;;  %v11973_v47 = vld [vmem:[%s18630_s1 + $0x5e4] sm:$0xf] }
  0xaa   :  { %1908 = vmatpush.bf16.msrb.mxu2 %v8709_v54  ;;  %v867_v54 = vpop.f32.mrf.mxu1 }
  0xab   :  { %1921 = vmatpush.bf16.msrb.mxu3 %v8773_v58  ;;  %v12012_v58 = vld [vmem:[%s18630_s1 + $0x714] sm:$0xf0]  ;;  %v868_v61 = vadd.f32 %v867_v54, %v855_v53  ;;  %v11923_v54 = vld [vmem:[%s18630_s1 + $0x454] sm:$0xf] }
  0xac   :  { %1883 = vmatpush.bf16.msrb.mxu0 %v8573_v0  ;;  %v11978_v0 = vld [vmem:[%s18630_s1 + $0x604] sm:$0xf0] }
  0xad   :  { %1896 = vmatpush.bf16.msrb.mxu1 %v8637_v1  ;;  %v8605_v1 = vor.u32 %v11996_v56, %v8604_v52  ;;  %v8533_v16 = vor.u32 %v11978_v0, %v8532_v63  ;;  %v8393_v52 = vor.u32 %v11941_v39, %v8390_v43  ;;  %v11939_v56 = vld [vmem:[%s18630_s1 + $0x4d4] sm:$0xf]  ;;  %v8358_v43 = vld [vmem:[%s18630_s1 + $0x4a8] sm:$0xf0] }
  0xae   :  { %1909 = vmatpush.bf16.msrb.mxu2 %v8701_v2  ;;  %v8669_v2 = vor.u32 %v12012_v58, %v8668_v57  ;;  %v8382_v58 = vld [vmem:[%s18630_s1 + $0x4d8] sm:$0xf0] }
  0xaf   :  { %1922 = vmatpush.bf16.msrb.mxu3 %v8765_v6  ;;  %v880_v6 = vpop.f32.mrf.mxu2  ;;  %v8385_v0 = vor.u32 %v11939_v56, %v8382_v58  ;;  %v11915_v56 = vld [vmem:[%s18630_s1 + $0x414] sm:$0xf] }
  0xb0   :  { %1884 = vmatpush.bf16.msrb.mxu0 %v8565_v12  ;;  %v881_v11 = vadd.f32 %v880_v6, %v868_v61  ;;  %v893_v12 = vpop.f32.mrf.mxu3  ;;  %v11971_v61 = vld [vmem:[%s18630_s1 + $0x5d4] sm:$0xf]  ;;  %v8374_v6 = vld [vmem:[%s18630_s1 + $0x4c8] sm:$0xf0] }
  0xb1   :  { %1897 = vmatpush.bf16.msrb.mxu1 %v8629_v14  ;;  %v8334_v14 = vld [vmem:[%s18630_s1 + $0x478] sm:$0xf0]  ;;  %v11931_v58 = vld [vmem:[%s18630_s1 + $0x494] sm:$0xf] }
  0xb2   :  { %1910 = vmatpush.bf16.msrb.mxu2 %v8693_v15  ;;  %v11943_v15 = vld [vmem:[%s18630_s1 + $0x4f4] sm:$0xf]  ;;  %v14012_v24 = vadd.f32 %v893_v12, %v881_v11  ;;  %v8337_v33 = vor.u32 %v11927_v13, %v8334_v14  ;;  %v8377_v13 = vor.u32 %v11937_v4, %v8374_v6  ;;  %v8278_v4 = vld [vmem:[%s18630_s1 + $0x408] sm:$0xf0] }
  0xb3   :  { %1923 = vmatpush.bf16.msrb.mxu3 %v8757_v23  ;;  %v8462_v23 = vld [vmem:[%s18630_s1 + $0x578] sm:$0xf0]  ;;  %v8401_v34 = vor.u32 %v11943_v15, %v8398_v17  ;;  %v11919_v15 = vld [vmem:[%s18630_s1 + $0x434] sm:$0xf] }
  0xb4   :  { %1885 = vmatpush.bf16.msrb.mxu0 %v8557_v29  ;;  %v11975_v29 = vld [vmem:[%s18630_s1 + $0x5f4] sm:$0xf]  ;;  %v8465_v35 = vor.u32 %v11959_v21, %v8462_v23 }
  0xb5   :  { %1898 = vmatpush.bf16.msrb.mxu1 %v8621_v31  ;;  %v869_v31 = vpop.f32.mrf.mxu1  ;;  %v8529_v40 = vor.u32 %v11975_v29, %v8526_v30  ;;  %v11935_v17 = vld [vmem:[%s18630_s1 + $0x4b4] sm:$0xf]  ;;  %v8430_v29 = vld [vmem:[%s18630_s1 + $0x538] sm:$0xf0] }
  0xb6   :  { %1911 = vmatpush.bf16.msrb.mxu2 %v8685_v32  ;;  %v8725_v32 = vor.u32 %v12026_v10, %v8724_v9  ;;  %v11969_v9 = vld [vmem:[%s18630_s1 + $0x5c4] sm:$0xf]  ;;  %v8502_v10 = vld [vmem:[%s18630_s1 + $0x5c8] sm:$0xf0]  ;;  %v11967_v30 = vld [vmem:[%s18630_s1 + $0x5b4] sm:$0xf] }
  0xb7   :  { %1924 = vmatpush.bf16.msrb.mxu3 %v8749_v36  ;;  %v11925_v36 = vld [vmem:[%s18630_s1 + $0x464] sm:$0xf]  ;;  %v8505_v25 = vor.u32 %v11969_v9, %v8502_v10 }
  0xb8   :  { %1886 = vmatpush.bf16.msrb.mxu0 %v8549_v46  ;;  %v8454_v46 = vld [vmem:[%s18630_s1 + $0x568] sm:$0xf0]  ;;  %v8329_v50 = vor.u32 %v11925_v36, %v8326_v37  ;;  %v895_v51 = vpop.f32.mrf.mxu3  ;;  %v11933_v37 = vld [vmem:[%s18630_s1 + $0x4a4] sm:$0xf] }
  0xb9   :  { %1899 = vmatpush.bf16.msrb.mxu1 %v8613_v48  ;;  %v8518_v48 = vld [vmem:[%s18630_s1 + $0x5e8] sm:$0xf0]  ;;  %v8457_v53 = vor.u32 %v11957_v45, %v8454_v46  ;;  %v11949_v45 = vld [vmem:[%s18630_s1 + $0x524] sm:$0xf] }
  0xba   :  { %1912 = vmatpush.bf16.msrb.mxu2 %v8677_v49  ;;  %v882_v49 = vpop.f32.mrf.mxu2  ;;  %v8521_v57 = vor.u32 %v11973_v47, %v8518_v48  ;;  %v8294_v36 = vld [vmem:[%s18630_s1 + $0x428] sm:$0xf0]  ;;  %v11945_v9 = vld [vmem:[%s18630_s1 + $0x504] sm:$0xf] }
  0xbb   :  { %1925 = vmatpush.bf16.msrb.mxu3 %v8741_v55  ;;  %v8318_v55 = vld [vmem:[%s18630_s1 + $0x458] sm:$0xf0]  ;;  %v8422_v46 = vld [vmem:[%s18630_s1 + $0x528] sm:$0xf0]  ;;  %v11965_v49 = vld [vmem:[%s18630_s1 + $0x5a4] sm:$0xf] }
  0xbc   :  { %1887 = vmatpush.bf16.msrb.mxu0 %v8541_v62  ;;  %v8510_v62 = vld [vmem:[%s18630_s1 + $0x5d8] sm:$0xf0]  ;;  %v8321_v63 = vor.u32 %v11923_v54, %v8318_v55  ;;  %v8361_v54 = vor.u32 %v11933_v37, %v8358_v43  ;;  %v8425_v55 = vor.u32 %v11949_v45, %v8422_v46  ;;  %v8582_v37 = vld [vmem:[%s18630_s1 + $0x668] sm:$0xf0]  ;;  %v12021_v45 = vld [vmem:[%s18630_s1 + $0x764] sm:$0xf] }
  0xbd   :  { %1900 = vmatpush.bf16.msrb.mxu1 %v8605_v1  ;;  %v8449_v1 = vor.u32 %v11955_v59, %v8446_v60  ;;  %v8513_v5 = vor.u32 %v11971_v61, %v8510_v62  ;;  %v8350_v61 = vld [vmem:[%s18630_s1 + $0x498] sm:$0xf0]  ;;  %v11947_v62 = vld [vmem:[%s18630_s1 + $0x514] sm:$0xf]  ;;  %v8646_v43 = vld [vmem:[%s18630_s1 + $0x6e8] sm:$0xf0] }
  0xbe   :  { %1913 = vmatpush.bf16.msrb.mxu2 %v8669_v2  ;;  %v11921_v2 = vld [vmem:[%s18630_s1 + $0x444] sm:$0xf]  ;;  %v8710_v46 = vld [vmem:[%s18630_s1 + $0x768] sm:$0xf0] }
  0xbf   :  { %1926 = vmatpush.bf16.msrb.mxu3 %v8733_v7  ;;  %v11953_v7 = vld [vmem:[%s18630_s1 + $0x544] sm:$0xf]  ;;  %v8313_v11 = vor.u32 %v11921_v2, %v8310_v3 }
  0xc0   :  { %1888 = vmatpush.bf16.msrb.mxu0 %v8533_v16  ;;  %v906_v12 = vpop.f32.mrf.mxu0  ;;  %v8441_v14 = vor.u32 %v11953_v7, %v8438_v8  ;;  %v8302_v16 = vld [vmem:[%s18630_s1 + $0x438] sm:$0xf0]  ;;  %v11913_v3 = vld [vmem:[%s18630_s1 + $0x404] sm:$0xf]  ;;  %v8342_v8 = vld [vmem:[%s18630_s1 + $0x488] sm:$0xf0] }
  0xc1   :  { %1901 = vmatpush.bf16.msrb.mxu1 %v8597_v27  ;;  %v907_v21 = vadd.f32 %v906_v12, %v14012_v24  ;;  %v919_v23 = vpop.f32.mrf.mxu1  ;;  %v8366_v27 = vld [vmem:[%s18630_s1 + $0x4b8] sm:$0xf0]  ;;  %v11929_v7 = vld [vmem:[%s18630_s1 + $0x484] sm:$0xf]  ;;  %v8406_v12 = vld [vmem:[%s18630_s1 + $0x508] sm:$0xf0] }
  0xc2   :  { %1914 = vmatpush.bf16.msrb.mxu2 %v8661_v28  ;;  %v11951_v28 = vld [vmem:[%s18630_s1 + $0x534] sm:$0xf]  ;;  %v8494_v24 = vld [vmem:[%s18630_s1 + $0x5b8] sm:$0xf0] }
  0xc3   :  { %1927 = vmatpush.bf16.msrb.mxu3 %v8725_v32  ;;  %1889 = vmatmul.bf16.vlgmr.msrb.gmra.mxu0 %v13246_v41  ;;  %v920_v31 = vadd.f32 %v919_v23, %v907_v21  ;;  %v8305_v32 = vor.u32 %v11919_v15, %v8302_v16  ;;  %v11991_v16 = vld [vmem:[%s18630_s1 + $0x674] sm:$0xf]  ;;  %v8281_v23 = vor.u32 %v11913_v3, %v8278_v4  ;;  %v12001_v3 = vld [vmem:[%s18630_s1 + $0x6c4] sm:$0xf]  ;;  %v174_v4 = vperm.slane %v13913_v26, 1 }
  0xc4   :  { %1933 = vmatpush.bf16.msra.mxu0 %v8337_v33  ;;  %1902 = vmatmul.bf16.vlgmr.msrb.gmra.mxu1 %v13250_v44  ;;  %v8369_v33 = vor.u32 %v11935_v17, %v8366_v27  ;;  %v8590_v17 = vld [vmem:[%s18630_s1 + $0x678] sm:$0xf0]  ;;  %v12007_v21 = vld [vmem:[%s18630_s1 + $0x6f4] sm:$0xf]  ;;  %v8758_v26 = vld [vmem:[%s18630_s1 + $0x7c8] sm:$0xf0] }
  0xc5   :  { %1946 = vmatpush.bf16.msra.mxu1 %v8401_v34  ;;  %1915 = vmatmul.bf16.vlgmr.msrb.gmra.mxu2 %v13238_v38  ;;  %v8433_v34 = vor.u32 %v11951_v28, %v8430_v29  ;;  %v12023_v27 = vld [vmem:[%s18630_s1 + $0x774] sm:$0xf]  ;;  %v8718_v28 = vld [vmem:[%s18630_s1 + $0x778] sm:$0xf0]  ;;  %v8345_v29 = vor.u32 %v11929_v7, %v8342_v8  ;;  %v12017_v7 = vld [vmem:[%s18630_s1 + $0x744] sm:$0xf] }
  0xc6   :  { %1959 = vmatpush.bf16.msra.mxu2 %v8465_v35  ;;  %1928 = vmatmul.bf16.vlgmr.msrb.gmra.mxu3 %v13248_v42  ;;  %v11917_v35 = vld [vmem:[%s18630_s1 + $0x424] sm:$0xf]  ;;  %v8694_v8 = vld [vmem:[%s18630_s1 + $0x748] sm:$0xf0] }
  0xc7   :  { %1972 = vmatpush.bf16.msra.mxu3 %v8529_v40  ;;  %v8497_v40 = vor.u32 %v11967_v30, %v8494_v24  ;;  %v8297_v51 = vor.u32 %v11917_v35, %v8294_v36  ;;  %v8409_v30 = vor.u32 %v11945_v9, %v8406_v12  ;;  %v12039_v24 = vld [vmem:[%s18630_s1 + $0x7f4] sm:$0xf]  ;;  %v8721_v35 = vor.u32 %v12023_v27, %v8718_v28  ;;  %v11989_v36 = vld [vmem:[%s18630_s1 + $0x664] sm:$0xf]  ;;  %v8686_v28 = vld [vmem:[%s18630_s1 + $0x738] sm:$0xf0] }
  0xc8   :  { %1934 = vmatpush.bf16.msra.mxu0 %v8329_v50  ;;  %v932_v39 = vpop.f32.mrf.mxu2  ;;  %v8486_v50 = vld [vmem:[%s18630_s1 + $0x5a8] sm:$0xf0]  ;;  %v12033_v9 = vld [vmem:[%s18630_s1 + $0x7c4] sm:$0xf]  ;;  %v12015_v27 = vld [vmem:[%s18630_s1 + $0x734] sm:$0xf] }
  0xc9   :  { %1947 = vmatpush.bf16.msra.mxu1 %v8393_v52  ;;  %v933_v47 = vadd.f32 %v932_v39, %v920_v31  ;;  %v945_v48 = vpop.f32.mrf.mxu3  ;;  %v921_v59 = vpop.f32.mrf.mxu1  ;;  %v8489_v60 = vor.u32 %v11965_v49, %v8486_v50  ;;  %v8782_v31 = vld [vmem:[%s18630_s1 + $0x7f8] sm:$0xf0]  ;;  %v12005_v39 = vld [vmem:[%s18630_s1 + $0x6e4] sm:$0xf]  ;;  %v8585_v49 = vor.u32 %v11989_v36, %v8582_v37 }
  0xca   :  { %1960 = vmatpush.bf16.msra.mxu2 %v8457_v53  ;;  %v908_v53 = vpop.f32.mrf.mxu0  ;;  %v8649_v50 = vor.u32 %v12005_v39, %v8646_v43  ;;  %v8702_v59 = vld [vmem:[%s18630_s1 + $0x758] sm:$0xf0]  ;;  %v11997_v36 = vld [vmem:[%s18630_s1 + $0x6a4] sm:$0xf] }
  0xcb   :  { %1973 = vmatpush.bf16.msra.mxu3 %v8521_v57  ;;  %v14145_v52 = vadd.f32 %v945_v48, %v933_v47  ;;  %v8286_v57 = vld [vmem:[%s18630_s1 + $0x418] sm:$0xf0]  ;;  %v12037_v47 = vld [vmem:[%s18630_s1 + $0x7e4] sm:$0xf]  ;;  %v8774_v48 = vld [vmem:[%s18630_s1 + $0x7e8] sm:$0xf0] }
  0xcc   :  { %1935 = vmatpush.bf16.msra.mxu0 %v8321_v63  ;;  %v8414_v63 = vld [vmem:[%s18630_s1 + $0x518] sm:$0xf0]  ;;  %v8289_v2 = vor.u32 %v11915_v56, %v8286_v57  ;;  %v11987_v53 = vld [vmem:[%s18630_s1 + $0x654] sm:$0xf]  ;;  %v8777_v56 = vor.u32 %v12037_v47, %v8774_v48  ;;  %v12013_v43 = vld [vmem:[%s18630_s1 + $0x724] sm:$0xf] }
  0xcd   :  { %1948 = vmatpush.bf16.msra.mxu1 %v8385_v0  ;;  %v11963_v0 = vld [vmem:[%s18630_s1 + $0x594] sm:$0xf]  ;;  %v8417_v6 = vor.u32 %v11947_v62, %v8414_v63  ;;  %v8638_v57 = vld [vmem:[%s18630_s1 + $0x6d8] sm:$0xf0]  ;;  %v11985_v63 = vld [vmem:[%s18630_s1 + $0x644] sm:$0xf] }
  0xce   :  { %1961 = vmatpush.bf16.msra.mxu2 %v8449_v1  ;;  %v8478_v1 = vld [vmem:[%s18630_s1 + $0x598] sm:$0xf0]  ;;  %v12029_v48 = vld [vmem:[%s18630_s1 + $0x7a4] sm:$0xf] }
  0xcf   :  { %1974 = vmatpush.bf16.msra.mxu3 %v8513_v5  ;;  %v8353_v5 = vor.u32 %v11931_v58, %v8350_v61  ;;  %v12019_v58 = vld [vmem:[%s18630_s1 + $0x754] sm:$0xf]  ;;  %v8766_v61 = vld [vmem:[%s18630_s1 + $0x7d8] sm:$0xf0] }
  0xd0   :  { %1936 = vmatpush.bf16.msra.mxu0 %v8313_v11  ;;  %v934_v10 = vpop.f32.mrf.mxu2  ;;  %v8481_v11 = vor.u32 %v11963_v0, %v8478_v1  ;;  %v8705_v1 = vor.u32 %v12019_v58, %v8702_v59  ;;  %v11995_v58 = vld [vmem:[%s18630_s1 + $0x694] sm:$0xf] }
  0xd1   :  { %1949 = vmatpush.bf16.msra.mxu1 %v8377_v13  ;;  %v11961_v13 = vld [vmem:[%s18630_s1 + $0x584] sm:$0xf]  ;;  %v947_v15 = vpop.f32.mrf.mxu3 }
  0xd2   :  { %1962 = vmatpush.bf16.msra.mxu2 %v8441_v14  ;;  %v8470_v14 = vld [vmem:[%s18630_s1 + $0x588] sm:$0xf0]  ;;  %v8558_v15 = vld [vmem:[%s18630_s1 + $0x638] sm:$0xf0] }
  0xd3   :  { %1975 = vmatpush.bf16.msra.mxu3 %v8505_v25  ;;  %v8654_v25 = vld [vmem:[%s18630_s1 + $0x6f8] sm:$0xf0] }
  0xd4   :  { %1937 = vmatpush.bf16.msra.mxu0 %v8305_v32  ;;  %v8473_v32 = vor.u32 %v11961_v13, %v8470_v14  ;;  %v8697_v13 = vor.u32 %v12017_v7, %v8694_v8  ;;  %v11983_v14 = vld [vmem:[%s18630_s1 + $0x634] sm:$0xf]  ;;  %v11993_v7 = vld [vmem:[%s18630_s1 + $0x684] sm:$0xf]  ;;  %v8598_v8 = vld [vmem:[%s18630_s1 + $0x688] sm:$0xf0] }
  0xd5   :  { %1950 = vmatpush.bf16.msra.mxu1 %v8369_v33  ;;  %v8593_v33 = vor.u32 %v11991_v16, %v8590_v17  ;;  %v11999_v16 = vld [vmem:[%s18630_s1 + $0x6b4] sm:$0xf] }
  0xd6   :  { %1963 = vmatpush.bf16.msra.mxu2 %v8433_v34  ;;  %v8657_v34 = vor.u32 %v12007_v21, %v8654_v25  ;;  %v8622_v25 = vld [vmem:[%s18630_s1 + $0x6b8] sm:$0xf0] }
  0xd7   :  { %1976 = vmatpush.bf16.msra.mxu3 %v8497_v40  ;;  %v8785_v40 = vor.u32 %v12039_v24, %v8782_v31  ;;  %v8561_v31 = vor.u32 %v11983_v14, %v8558_v15  ;;  %v8973_v15 = vld [vmem:[%s18630_s1 + $0x870] sm:$0xf] }
  0xd8   :  { %1938 = vmatpush.bf16.msra.mxu0 %v8297_v51  ;;  %v8713_v51 = vor.u32 %v12021_v45, %v8710_v46  ;;  %v8678_v45 = vld [vmem:[%s18630_s1 + $0x728] sm:$0xf0] }
  0xd9   :  { %1951 = vmatpush.bf16.msra.mxu1 %v8361_v54  ;;  %v8574_v54 = vld [vmem:[%s18630_s1 + $0x658] sm:$0xf0] }
  0xda   :  { %1964 = vmatpush.bf16.msra.mxu2 %v8425_v55  ;;  %v12003_v55 = vld [vmem:[%s18630_s1 + $0x6d4] sm:$0xf]  ;;  %v8577_v62 = vor.u32 %v11987_v53, %v8574_v54 }
  0xdb   :  { %1977 = vmatpush.bf16.msra.mxu3 %v8489_v60  ;;  %v12035_v60 = vld [vmem:[%s18630_s1 + $0x7d4] sm:$0xf]  ;;  %v8641_v0 = vor.u32 %v12003_v55, %v8638_v57  ;;  %v8681_v55 = vor.u32 %v12013_v43, %v8678_v45  ;;  %v8542_v57 = vld [vmem:[%s18630_s1 + $0x618] sm:$0xf0]  ;;  %v9093_v43 = vld [vmem:[%s18630_s1 + $0x960] sm:$0xf] }
  0xdc   :  { %1939 = vmatpush.bf16.msra.mxu0 %v8289_v2  ;;  %v8566_v2 = vld [vmem:[%s18630_s1 + $0x648] sm:$0xf0]  ;;  %v12086_v45 = vld [vmem:[%s18630_s1 + $0x964] sm:$0xf0] }
  0xdd   :  { %1952 = vmatpush.bf16.msra.mxu1 %v8353_v5  ;;  %v8769_v5 = vor.u32 %v12035_v60, %v8766_v61  ;;  %v8569_v10 = vor.u32 %v11985_v63, %v8566_v2  ;;  %v8606_v61 = vld [vmem:[%s18630_s1 + $0x698] sm:$0xf0] }
  0xde   :  { %1965 = vmatpush.bf16.msra.mxu2 %v8417_v6  ;;  %v8630_v6 = vld [vmem:[%s18630_s1 + $0x6c8] sm:$0xf0]  ;;  %v8670_v63 = vld [vmem:[%s18630_s1 + $0x718] sm:$0xf0] }
  0xdf   :  { %1978 = vmatpush.bf16.msra.mxu3 %v8481_v11  ;;  %v8633_v12 = vor.u32 %v12001_v3, %v8630_v6  ;;  %v11977_v3 = vld [vmem:[%s18630_s1 + $0x604] sm:$0xf] }
  0xe0   :  { %1940 = vmatpush.bf16.msra.mxu0 %v8281_v23  ;;  %v958_v11 = vpop.f32.mrf.mxu0  ;;  %v8761_v23 = vor.u32 %v12033_v9, %v8758_v26  ;;  %v12009_v9 = vld [vmem:[%s18630_s1 + $0x704] sm:$0xf] }
  0xe1   :  { %1953 = vmatpush.bf16.msra.mxu1 %v8345_v29  ;;  %v959_v17 = vadd.f32 %v958_v11, %v174_v4  ;;  %v971_v21 = vpop.f32.mrf.mxu1  ;;  %v12031_v29 = vld [vmem:[%s18630_s1 + $0x7b4] sm:$0xf]  ;;  %v8534_v4 = vld [vmem:[%s18630_s1 + $0x608] sm:$0xf0] }
  0xe2   :  { %1966 = vmatpush.bf16.msra.mxu2 %v8409_v30  ;;  %v8750_v30 = vld [vmem:[%s18630_s1 + $0x7b8] sm:$0xf0]  ;;  %v8662_v11 = vld [vmem:[%s18630_s1 + $0x708] sm:$0xf0] }
  0xe3   :  { %1979 = vmatpush.bf16.msra.mxu3 %v8473_v32  ;;  %1941 = vmatmul.bf16.vlgmr.msra.gmra.mxu0 %v13084_v19  ;;  %v972_v24 = vadd.f32 %v971_v21, %v959_v17  ;;  %v8625_v32 = vor.u32 %v11999_v16, %v8622_v25  ;;  %v8753_v39 = vor.u32 %v12031_v29, %v8750_v30  ;;  %v12056_v16 = vld [vmem:[%s18630_s1 + $0x874] sm:$0xf0]  ;;  %v9037_v17 = vld [vmem:[%s18630_s1 + $0x8f0] sm:$0xf] }
  0xe4   :  { %1985 = vmatpush.bf16.msrb.mxu0 %v8593_v33  ;;  %1954 = vmatmul.bf16.vlgmr.msra.gmra.mxu1 %v13088_v22  ;;  %v8689_v33 = vor.u32 %v12015_v27, %v8686_v28  ;;  %v8537_v21 = vor.u32 %v11977_v3, %v8534_v4  ;;  %v9101_v25 = vld [vmem:[%s18630_s1 + $0x970] sm:$0xf]  ;;  %v12088_v27 = vld [vmem:[%s18630_s1 + $0x974] sm:$0xf0]  ;;  %v8601_v28 = vor.u32 %v11993_v7, %v8598_v8  ;;  %v9013_v3 = vld [vmem:[%s18630_s1 + $0x8c0] sm:$0xf] }
  0xe5   :  { %1998 = vmatpush.bf16.msrb.mxu1 %v8657_v34  ;;  %1967 = vmatmul.bf16.vlgmr.msra.gmra.mxu2 %v13082_v18  ;;  %v11981_v34 = vld [vmem:[%s18630_s1 + $0x624] sm:$0xf]  ;;  %v8665_v29 = vor.u32 %v12009_v9, %v8662_v11  ;;  %v9165_v30 = vld [vmem:[%s18630_s1 + $0x9f0] sm:$0xf]  ;;  %v12082_v7 = vld [vmem:[%s18630_s1 + $0x944] sm:$0xf0] }
  0xe6   :  { %2011 = vmatpush.bf16.msrb.mxu2 %v8721_v35  ;;  %1980 = vmatmul.bf16.vlgmr.msra.gmra.mxu3 %v13086_v20  ;;  %v8550_v35 = vld [vmem:[%s18630_s1 + $0x628] sm:$0xf0]  ;;  %v9141_v8 = vld [vmem:[%s18630_s1 + $0x9c0] sm:$0xf]  ;;  %v12098_v9 = vld [vmem:[%s18630_s1 + $0x9c4] sm:$0xf0] }
  0xe7   :  { %2024 = vmatpush.bf16.msrb.mxu3 %v8785_v40  ;;  %v8614_v40 = vld [vmem:[%s18630_s1 + $0x6a8] sm:$0xf0] }
  0xe8   :  { %1986 = vmatpush.bf16.msrb.mxu0 %v8585_v49  ;;  %v984_v37 = vpop.f32.mrf.mxu2  ;;  %v8742_v49 = vld [vmem:[%s18630_s1 + $0x7a8] sm:$0xf0]  ;;  %v960_v53 = vpop.f32.mrf.mxu0  ;;  %v8617_v54 = vor.u32 %v11997_v36, %v8614_v40  ;;  %v12054_v36 = vld [vmem:[%s18630_s1 + $0x864] sm:$0xf0] }
  0xe9   :  { %1999 = vmatpush.bf16.msrb.mxu1 %v8649_v50  ;;  %v985_v46 = vadd.f32 %v984_v37, %v972_v24  ;;  %v997_v47 = vpop.f32.mrf.mxu3  ;;  %v8553_v50 = vor.u32 %v11981_v34, %v8550_v35  ;;  %v973_v59 = vpop.f32.mrf.mxu1  ;;  %v8745_v60 = vor.u32 %v12029_v48, %v8742_v49  ;;  %v12104_v24 = vld [vmem:[%s18630_s1 + $0x9f4] sm:$0xf0]  ;;  %v9102_v34 = vor.u32 %v12088_v27, %v9101_v25  ;;  %v8965_v35 = vld [vmem:[%s18630_s1 + $0x860] sm:$0xf]  ;;  %v12070_v40 = vld [vmem:[%s18630_s1 + $0x8e4] sm:$0xf0] }
  0xea   :  { %2012 = vmatpush.bf16.msrb.mxu2 %v8713_v51  ;;  %v9029_v37 = vld [vmem:[%s18630_s1 + $0x8e0] sm:$0xf]  ;;  %v8966_v48 = vor.u32 %v12054_v36, %v8965_v35  ;;  %v8957_v53 = vld [vmem:[%s18630_s1 + $0x850] sm:$0xf]  ;;  %v12084_v59 = vld [vmem:[%s18630_s1 + $0x954] sm:$0xf0] }
  0xeb   :  { %2025 = vmatpush.bf16.msrb.mxu3 %v8777_v56  ;;  %v14344_v51 = vadd.f32 %v997_v47, %v985_v46  ;;  %v11979_v56 = vld [vmem:[%s18630_s1 + $0x614] sm:$0xf]  ;;  %v9157_v46 = vld [vmem:[%s18630_s1 + $0x9e0] sm:$0xf]  ;;  %v12102_v47 = vld [vmem:[%s18630_s1 + $0x9e4] sm:$0xf0]  ;;  %v9030_v49 = vor.u32 %v12070_v40, %v9029_v37 }
  0xec   :  { %1987 = vmatpush.bf16.msrb.mxu0 %v8577_v62  ;;  %v12011_v62 = vld [vmem:[%s18630_s1 + $0x714] sm:$0xf]  ;;  %v8545_v2 = vor.u32 %v11979_v56, %v8542_v57  ;;  %v9158_v56 = vor.u32 %v12102_v47, %v9157_v46  ;;  %v12068_v57 = vld [vmem:[%s18630_s1 + $0x8d4] sm:$0xf0]  ;;  %v9069_v25 = vld [vmem:[%s18630_s1 + $0x930] sm:$0xf] }
  0xed   :  { %2000 = vmatpush.bf16.msrb.mxu1 %v8641_v0  ;;  %v12027_v0 = vld [vmem:[%s18630_s1 + $0x794] sm:$0xf]  ;;  %v8673_v6 = vor.u32 %v12011_v62, %v8670_v63  ;;  %v12080_v27 = vld [vmem:[%s18630_s1 + $0x934] sm:$0xf0]  ;;  %v12062_v37 = vld [vmem:[%s18630_s1 + $0x8a4] sm:$0xf0] }
  0xee   :  { %2013 = vmatpush.bf16.msrb.mxu2 %v8705_v1  ;;  %v8734_v1 = vld [vmem:[%s18630_s1 + $0x798] sm:$0xf0]  ;;  %v12078_v40 = vld [vmem:[%s18630_s1 + $0x924] sm:$0xf0]  ;;  %v9125_v46 = vld [vmem:[%s18630_s1 + $0x9a0] sm:$0xf] }
  0xef   :  { %2026 = vmatpush.bf16.msrb.mxu3 %v8769_v5  ;;  %v8609_v5 = vor.u32 %v11995_v58, %v8606_v61  ;;  %v9085_v58 = vld [vmem:[%s18630_s1 + $0x950] sm:$0xf]  ;;  %v12100_v61 = vld [vmem:[%s18630_s1 + $0x9d4] sm:$0xf0]  ;;  %v12094_v47 = vld [vmem:[%s18630_s1 + $0x9a4] sm:$0xf0] }
  0xf0   :  { %1988 = vmatpush.bf16.msrb.mxu0 %v8569_v10  ;;  %v986_v26 = vpop.f32.mrf.mxu2  ;;  %v8737_v10 = vor.u32 %v12027_v0, %v8734_v1  ;;  %v9086_v0 = vor.u32 %v12084_v59, %v9085_v58  ;;  %v8949_v1 = vld [vmem:[%s18630_s1 + $0x840] sm:$0xf]  ;;  %v9126_v59 = vor.u32 %v12094_v47, %v9125_v46  ;;  %v9213_v47 = vld [vmem:[%s18630_s1 + $0xa50] sm:$0xf] }
  0xf1   :  { %2001 = vmatpush.bf16.msrb.mxu1 %v8633_v12  ;;  %v12025_v12 = vld [vmem:[%s18630_s1 + $0x784] sm:$0xf]  ;;  %v999_v14 = vpop.f32.mrf.mxu3 }
  0xf2   :  { %2014 = vmatpush.bf16.msrb.mxu2 %v8697_v13  ;;  %v8726_v13 = vld [vmem:[%s18630_s1 + $0x788] sm:$0xf0]  ;;  %v12048_v14 = vld [vmem:[%s18630_s1 + $0x834] sm:$0xf0] }
  0xf3   :  { %2027 = vmatpush.bf16.msrb.mxu3 %v8761_v23  ;;  %v12072_v23 = vld [vmem:[%s18630_s1 + $0x8f4] sm:$0xf0] }
  0xf4   :  { %1989 = vmatpush.bf16.msrb.mxu0 %v8561_v31  ;;  %v8729_v31 = vor.u32 %v12025_v12, %v8726_v13  ;;  %v8941_v13 = vld [vmem:[%s18630_s1 + $0x830] sm:$0xf] }
  0xf5   :  { %2002 = vmatpush.bf16.msrb.mxu1 %v8625_v32  ;;  %v8974_v32 = vor.u32 %v12056_v16, %v8973_v15  ;;  %v9005_v15 = vld [vmem:[%s18630_s1 + $0x8b0] sm:$0xf] }
  0xf6   :  { %2015 = vmatpush.bf16.msrb.mxu2 %v8689_v33  ;;  %v9038_v33 = vor.u32 %v12072_v23, %v9037_v17  ;;  %v12064_v23 = vld [vmem:[%s18630_s1 + $0x8b4] sm:$0xf0] }
  0xf7   :  { %2028 = vmatpush.bf16.msrb.mxu3 %v8753_v39  ;;  %v9166_v39 = vor.u32 %v12104_v24, %v9165_v30  ;;  %v8942_v30 = vor.u32 %v12048_v14, %v8941_v13  ;;  %v9006_v24 = vor.u32 %v12064_v23, %v9005_v15  ;;  %v9229_v14 = vld [vmem:[%s18630_s1 + $0xa70] sm:$0xf]  ;;  %v12120_v15 = vld [vmem:[%s18630_s1 + $0xa74] sm:$0xf0] }
  0xf8   :  { %1990 = vmatpush.bf16.msrb.mxu0 %v8553_v50  ;;  %v9094_v50 = vor.u32 %v12086_v45, %v9093_v43  ;;  %v9357_v23 = vld [vmem:[%s18630_s1 + $0xb70] sm:$0xf] }
  0xf9   :  { %2003 = vmatpush.bf16.msrb.mxu1 %v8617_v54  ;;  %v12052_v54 = vld [vmem:[%s18630_s1 + $0x854] sm:$0xf0] }
  0xfa   :  { %2016 = vmatpush.bf16.msrb.mxu2 %v8681_v55  ;;  %v9021_v55 = vld [vmem:[%s18630_s1 + $0x8d0] sm:$0xf]  ;;  %v8958_v62 = vor.u32 %v12052_v54, %v8957_v53 }
  0xfb   :  { %2029 = vmatpush.bf16.msrb.mxu3 %v8745_v60  ;;  %v9149_v60 = vld [vmem:[%s18630_s1 + $0x9d0] sm:$0xf]  ;;  %v9022_v63 = vor.u32 %v12068_v57, %v9021_v55 }
  0xfc   :  { %1991 = vmatpush.bf16.msrb.mxu0 %v8545_v2  ;;  %v12050_v2 = vld [vmem:[%s18630_s1 + $0x844] sm:$0xf0]  ;;  %v9150_v4 = vor.u32 %v12100_v61, %v9149_v60  ;;  %v8925_v55 = vld [vmem:[%s18630_s1 + $0x810] sm:$0xf]  ;;  %v12060_v60 = vld [vmem:[%s18630_s1 + $0x894] sm:$0xf0] }
  0xfd   :  { %2004 = vmatpush.bf16.msrb.mxu1 %v8609_v5  ;;  %v12066_v5 = vld [vmem:[%s18630_s1 + $0x8c4] sm:$0xf0]  ;;  %v8950_v26 = vor.u32 %v12050_v2, %v8949_v1  ;;  %v8989_v57 = vld [vmem:[%s18630_s1 + $0x890] sm:$0xf]  ;;  %v8917_v2 = vld [vmem:[%s18630_s1 + $0x800] sm:$0xf] }
  0xfe   :  { %2017 = vmatpush.bf16.msrb.mxu2 %v8673_v6  ;;  %v9077_v6 = vld [vmem:[%s18630_s1 + $0x940] sm:$0xf]  ;;  %v9014_v11 = vor.u32 %v12066_v5, %v9013_v3  ;;  %v9053_v61 = vld [vmem:[%s18630_s1 + $0x910] sm:$0xf]  ;;  %v12042_v3 = vld [vmem:[%s18630_s1 + $0x804] sm:$0xf0] }
  0xff   :  { %2030 = vmatpush.bf16.msrb.mxu3 %v8737_v10  ;;  %v9078_v12 = vor.u32 %v12082_v7, %v9077_v6  ;;  %v8981_v6 = vld [vmem:[%s18630_s1 + $0x880] sm:$0xf]  ;;  %v12058_v7 = vld [vmem:[%s18630_s1 + $0x884] sm:$0xf0] }
 0x100   :  { %1992 = vmatpush.bf16.msrb.mxu0 %v8537_v21  ;;  %v1010_v10 = vpop.f32.mrf.mxu0  ;;  %v9142_v21 = vor.u32 %v12098_v9, %v9141_v8  ;;  %v9045_v8 = vld [vmem:[%s18630_s1 + $0x900] sm:$0xf] }
 0x101   :  { %2005 = vmatpush.bf16.msrb.mxu1 %v8601_v28  ;;  %v1011_v16 = vadd.f32 %v1010_v10, %v14344_v51  ;;  %v1023_v17 = vpop.f32.mrf.mxu1  ;;  %v9133_v28 = vld [vmem:[%s18630_s1 + $0x9b0] sm:$0xf]  ;;  %v12096_v51 = vld [vmem:[%s18630_s1 + $0x9b4] sm:$0xf0]  ;;  %v12074_v10 = vld [vmem:[%s18630_s1 + $0x904] sm:$0xf0] }
 0x102   :  { %2018 = vmatpush.bf16.msrb.mxu2 %v8665_v29  ;;  %v9134_v36 = vor.u32 %v12096_v51, %v9133_v28  ;;  %v9046_v28 = vor.u32 %v12074_v10, %v9045_v8  ;;  %v9421_v51 = vld [vmem:[%s18630_s1 + $0xbf0] sm:$0xf]  ;;  %v12146_v8 = vld [vmem:[%s18630_s1 + $0xb44] sm:$0xf0] }
 0x103   :  { %2031 = vmatpush.bf16.msrb.mxu3 %v8729_v31  ;;  %1993 = vmatmul.bf16.vlgmr.msrb.gmra.mxu0 %v13246_v41  ;;  %v1024_v29 = vadd.f32 %v1023_v17, %v1011_v16  ;;  %v9070_v31 = vor.u32 %v12080_v27, %v9069_v25  ;;  %v9293_v16 = vld [vmem:[%s18630_s1 + $0xaf0] sm:$0xf]  ;;  %v8918_v17 = vor.u32 %v12042_v3, %v8917_v2  ;;  %v12152_v25 = vld [vmem:[%s18630_s1 + $0xb74] sm:$0xf0]  ;;  %v12114_v2 = vld [vmem:[%s18630_s1 + $0xa44] sm:$0xf0] }
 0x104   :  { %2815 = vmatpush.bf16.msra.mxu0 %v8974_v32  ;;  %2006 = vmatmul.bf16.vlgmr.msrb.gmra.mxu1 %v13250_v44  ;;  %v8933_v32 = vld [vmem:[%s18630_s1 + $0x820] sm:$0xf]  ;;  %v8982_v27 = vor.u32 %v12058_v7, %v8981_v6  ;;  %v12130_v6 = vld [vmem:[%s18630_s1 + $0xac4] sm:$0xf0] }
 0x105   :  { %2828 = vmatpush.bf16.msra.mxu1 %v9038_v33  ;;  %2019 = vmatmul.bf16.vlgmr.msrb.gmra.mxu2 %v13238_v38  ;;  %v12046_v33 = vld [vmem:[%s18630_s1 + $0x824] sm:$0xf0]  ;;  %v9269_v3 = vld [vmem:[%s18630_s1 + $0xac0] sm:$0xf] }
 0x106   :  { %2841 = vmatpush.bf16.msra.mxu2 %v9102_v34  ;;  %2032 = vmatmul.bf16.vlgmr.msrb.gmra.mxu3 %v13248_v42  ;;  %v8997_v34 = vld [vmem:[%s18630_s1 + $0x8a0] sm:$0xf] }
 0x107   :  { %2854 = vmatpush.bf16.msra.mxu3 %v9166_v39  ;;  %v9061_v39 = vld [vmem:[%s18630_s1 + $0x920] sm:$0xf]  ;;  %v8998_v53 = vor.u32 %v12062_v37, %v8997_v34  ;;  %v12118_v34 = vld [vmem:[%s18630_s1 + $0xa64] sm:$0xf0] }
 0x108   :  { %2816 = vmatpush.bf16.msra.mxu0 %v8966_v48  ;;  %v1036_v35 = vpop.f32.mrf.mxu2  ;;  %v8934_v48 = vor.u32 %v12046_v33, %v8933_v32  ;;  %v9062_v54 = vor.u32 %v12078_v40, %v9061_v39  ;;  %v9358_v32 = vor.u32 %v12152_v25, %v9357_v23  ;;  %v9221_v33 = vld [vmem:[%s18630_s1 + $0xa60] sm:$0xf]  ;;  %v12134_v37 = vld [vmem:[%s18630_s1 + $0xae4] sm:$0xf0]  ;;  %v12128_v25 = vld [vmem:[%s18630_s1 + $0xab4] sm:$0xf0] }
 0x109   :  { %2829 = vmatpush.bf16.msra.mxu1 %v9030_v49  ;;  %v1037_v43 = vadd.f32 %v1036_v35, %v1024_v29  ;;  %v1049_v45 = vpop.f32.mrf.mxu3  ;;  %v1025_v58 = vpop.f32.mrf.mxu1  ;;  %v12168_v29 = vld [vmem:[%s18630_s1 + $0xbf4] sm:$0xf0]  ;;  %v9285_v35 = vld [vmem:[%s18630_s1 + $0xae0] sm:$0xf]  ;;  %v12150_v40 = vld [vmem:[%s18630_s1 + $0xb64] sm:$0xf0]  ;;  %v9222_v46 = vor.u32 %v12118_v34, %v9221_v33 }
 0x10a   :  { %2842 = vmatpush.bf16.msra.mxu2 %v9094_v50  ;;  %v1012_v50 = vpop.f32.mrf.mxu0  ;;  %v9349_v39 = vld [vmem:[%s18630_s1 + $0xb60] sm:$0xf]  ;;  %v12148_v58 = vld [vmem:[%s18630_s1 + $0xb54] sm:$0xf0]  ;;  %v12110_v34 = vld [vmem:[%s18630_s1 + $0xa24] sm:$0xf0] }
 0x10b   :  { %2855 = vmatpush.bf16.msra.mxu3 %v9158_v56  ;;  %v14543_v49 = vadd.f32 %v1049_v45, %v1037_v43  ;;  %v12044_v56 = vld [vmem:[%s18630_s1 + $0x814] sm:$0xf0]  ;;  %v9413_v43 = vld [vmem:[%s18630_s1 + $0xbe0] sm:$0xf]  ;;  %v12166_v45 = vld [vmem:[%s18630_s1 + $0xbe4] sm:$0xf0]  ;;  %v9350_v50 = vor.u32 %v12150_v40, %v9349_v39 }
 0x10c   :  { %2817 = vmatpush.bf16.msra.mxu0 %v8958_v62  ;;  %v12076_v62 = vld [vmem:[%s18630_s1 + $0x914] sm:$0xf0]  ;;  %v8926_v1 = vor.u32 %v12044_v56, %v8925_v55  ;;  %v9414_v56 = vor.u32 %v12166_v45, %v9413_v43  ;;  %v9333_v7 = vld [vmem:[%s18630_s1 + $0xb40] sm:$0xf]  ;;  %v12126_v39 = vld [vmem:[%s18630_s1 + $0xaa4] sm:$0xf0] }
 0x10d   :  { %2830 = vmatpush.bf16.msra.mxu1 %v9022_v63  ;;  %v9117_v63 = vld [vmem:[%s18630_s1 + $0x990] sm:$0xf]  ;;  %v9054_v5 = vor.u32 %v12076_v62, %v9053_v61  ;;  %v12132_v55 = vld [vmem:[%s18630_s1 + $0xad4] sm:$0xf0]  ;;  %v9189_v33 = vld [vmem:[%s18630_s1 + $0xa20] sm:$0xf] }
 0x10e   :  { %2843 = vmatpush.bf16.msra.mxu2 %v9086_v0  ;;  %v12092_v0 = vld [vmem:[%s18630_s1 + $0x994] sm:$0xf0]  ;;  %v9317_v40 = vld [vmem:[%s18630_s1 + $0xb20] sm:$0xf]  ;;  %v12142_v43 = vld [vmem:[%s18630_s1 + $0xb24] sm:$0xf0] }
 0x10f   :  { %2856 = vmatpush.bf16.msra.mxu3 %v9150_v4  ;;  %v8990_v4 = vor.u32 %v12060_v60, %v8989_v57  ;;  %v9341_v57 = vld [vmem:[%s18630_s1 + $0xb50] sm:$0xf]  ;;  %v12164_v61 = vld [vmem:[%s18630_s1 + $0xbd4] sm:$0xf0] }
 0x110   :  { %2818 = vmatpush.bf16.msra.mxu0 %v8950_v26  ;;  %v1038_v9 = vpop.f32.mrf.mxu2  ;;  %v9118_v26 = vor.u32 %v12092_v0, %v9117_v63  ;;  %v9405_v60 = vld [vmem:[%s18630_s1 + $0xbd0] sm:$0xf]  ;;  %v9205_v63 = vld [vmem:[%s18630_s1 + $0xa40] sm:$0xf] }
 0x111   :  { %2831 = vmatpush.bf16.msra.mxu1 %v9014_v11  ;;  %v9109_v11 = vld [vmem:[%s18630_s1 + $0x980] sm:$0xf]  ;;  %v1051_v13 = vpop.f32.mrf.mxu3  ;;  %v9206_v10 = vor.u32 %v12114_v2, %v9205_v63  ;;  %v12124_v63 = vld [vmem:[%s18630_s1 + $0xa94] sm:$0xf0]  ;;  %v9373_v2 = vld [vmem:[%s18630_s1 + $0xb90] sm:$0xf] }
 0x112   :  { %2844 = vmatpush.bf16.msra.mxu2 %v9078_v12  ;;  %v12090_v12 = vld [vmem:[%s18630_s1 + $0x984] sm:$0xf0]  ;;  %v9397_v9 = vld [vmem:[%s18630_s1 + $0xbc0] sm:$0xf]  ;;  %v9334_v13 = vor.u32 %v12146_v8, %v9333_v7 }
 0x113   :  { %2857 = vmatpush.bf16.msra.mxu3 %v9142_v21  ;;  %v12136_v21 = vld [vmem:[%s18630_s1 + $0xaf4] sm:$0xf0] }
 0x114   :  { %2819 = vmatpush.bf16.msra.mxu0 %v8942_v30  ;;  %v9110_v30 = vor.u32 %v12090_v12, %v9109_v11  ;;  %v9270_v12 = vor.u32 %v12130_v6, %v9269_v3  ;;  %v12156_v3 = vld [vmem:[%s18630_s1 + $0xb94] sm:$0xf0]  ;;  %v12106_v6 = vld [vmem:[%s18630_s1 + $0xa04] sm:$0xf0] }
 0x115   :  { %2832 = vmatpush.bf16.msra.mxu1 %v9006_v24  ;;  %v9230_v24 = vor.u32 %v12120_v15, %v9229_v14  ;;  %v9197_v14 = vld [vmem:[%s18630_s1 + $0xa30] sm:$0xf]  ;;  %v12112_v15 = vld [vmem:[%s18630_s1 + $0xa34] sm:$0xf0] }
 0x116   :  { %2845 = vmatpush.bf16.msra.mxu2 %v9070_v31  ;;  %v9294_v31 = vor.u32 %v12136_v21, %v9293_v16  ;;  %v9261_v16 = vld [vmem:[%s18630_s1 + $0xab0] sm:$0xf] }
 0x117   :  { %2858 = vmatpush.bf16.msra.mxu3 %v9134_v36  ;;  %v9422_v36 = vor.u32 %v12168_v29, %v9421_v51  ;;  %v9389_v51 = vld [vmem:[%s18630_s1 + $0xbb0] sm:$0xf]  ;;  %v12160_v29 = vld [vmem:[%s18630_s1 + $0xbb4] sm:$0xf0] }
 0x118   :  { %2820 = vmatpush.bf16.msra.mxu0 %v8934_v48  ;;  %v9286_v48 = vor.u32 %v12134_v37, %v9285_v35  ;;  %v9253_v35 = vld [vmem:[%s18630_s1 + $0xaa0] sm:$0xf]  ;;  %v9390_v37 = vor.u32 %v12160_v29, %v9389_v51  ;;  %v9103_v51 = vld [vmem:[%s18630_s1 + $0x978] sm:$0xf0] }
 0x119   :  { %2833 = vmatpush.bf16.msra.mxu1 %v8998_v53  ;;  %v12116_v53 = vld [vmem:[%s18630_s1 + $0xa54] sm:$0xf0] }
 0x11a   :  { %2846 = vmatpush.bf16.msra.mxu2 %v9062_v54  ;;  %v9277_v54 = vld [vmem:[%s18630_s1 + $0xad0] sm:$0xf]  ;;  %v9214_v62 = vor.u32 %v12116_v53, %v9213_v47  ;;  %v9381_v47 = vld [vmem:[%s18630_s1 + $0xba0] sm:$0xf] }
 0x11b   :  { %2859 = vmatpush.bf16.msra.mxu3 %v9126_v59  ;;  %v14663_v59 = vld [vmem:[%s18632_s2 + $0x2] sm:$0x3]  ;;  %v9278_v0 = vor.u32 %v12132_v55, %v9277_v54  ;;  %v9254_v55 = vor.u32 %v12126_v39, %v9253_v35  ;;  %v12069_v39 = vld [vmem:[%s18630_s1 + $0x8e4] sm:$0xf] }
 0x11c   :  { %2821 = vmatpush.bf16.msra.mxu0 %v8926_v1  ;;  %v9342_v1 = vor.u32 %v12148_v58, %v9341_v57  ;;  %v9181_v57 = vld [vmem:[%s18630_s1 + $0xa10] sm:$0xf]  ;;  %v12108_v58 = vld [vmem:[%s18630_s1 + $0xa14] sm:$0xf0] }
 0x11d   :  { %2834 = vmatpush.bf16.msra.mxu1 %v8990_v4  ;;  %v1185_v4 = vperm.slane %v14663_v59, 0 }
 0x11e   :  { %2847 = vmatpush.bf16.msra.mxu2 %v9054_v5  ;;  %v9406_v5 = vor.u32 %v12164_v61, %v9405_v60  ;;  %v9245_v60 = vld [vmem:[%s18630_s1 + $0xa90] sm:$0xf] }
 0x11f   :  { %2860 = vmatpush.bf16.msra.mxu3 %v9118_v26  ;;  %v12162_v26 = vld [vmem:[%s18630_s1 + $0xbc4] sm:$0xf0]  ;;  %v9246_v7 = vor.u32 %v12124_v63, %v9245_v60  ;;  %v9087_v63 = vld [vmem:[%s18630_s1 + $0x958] sm:$0xf0] }
 0x120   :  { %2822 = vmatpush.bf16.msra.mxu0 %v8918_v17  ;;  %v1838_v11 = vpop.f32.mrf.mxu0  ;;  %v9398_v23 = vor.u32 %v12162_v26, %v9397_v9  ;;  %v9237_v9 = vld [vmem:[%s18630_s1 + $0xa80] sm:$0xf]  ;;  %v12122_v26 = vld [vmem:[%s18630_s1 + $0xa84] sm:$0xf0] }
 0x121   :  { %2835 = vmatpush.bf16.msra.mxu1 %v8982_v27  ;;  %v1839_v17 = vadd.f32 %v1838_v11, %v1185_v4  ;;  %v1851_v21 = vpop.f32.mrf.mxu1  ;;  %v9325_v27 = vld [vmem:[%s18630_s1 + $0xb30] sm:$0xf]  ;;  %v9182_v4 = vor.u32 %v12108_v58, %v9181_v57  ;;  %v9238_v29 = vor.u32 %v12122_v26, %v9237_v9  ;;  %v8959_v57 = vld [vmem:[%s18630_s1 + $0x858] sm:$0xf0]  ;;  %v12067_v58 = vld [vmem:[%s18630_s1 + $0x8d4] sm:$0xf] }
 0x122   :  { %2848 = vmatpush.bf16.msra.mxu2 %v9046_v28  ;;  %v12144_v28 = vld [vmem:[%s18630_s1 + $0xb34] sm:$0xf0]  ;;  %v9015_v9 = vld [vmem:[%s18630_s1 + $0x8c8] sm:$0xf0]  ;;  %v12081_v26 = vld [vmem:[%s18630_s1 + $0x944] sm:$0xf] }
 0x123   :  { %2861 = vmatpush.bf16.msra.mxu3 %v9110_v30  ;;  %2823 = vmatmul.bf16.vlgmr.msra.gmra.mxu0 %v13084_v19  ;;  %v1852_v30 = vadd.f32 %v1851_v21, %v1839_v17  ;;  %v12055_v17 = vld [vmem:[%s18630_s1 + $0x874] sm:$0xf]  ;;  %v8975_v21 = vld [vmem:[%s18630_s1 + $0x878] sm:$0xf0] }
 0x124   :  { %2867 = vmatpush.bf16.msrb.mxu0 %v9230_v24  ;;  %2836 = vmatmul.bf16.vlgmr.msra.gmra.mxu1 %v13088_v22  ;;  %v9198_v24 = vor.u32 %v12112_v15, %v9197_v14  ;;  %v9365_v14 = vld [vmem:[%s18630_s1 + $0xb80] sm:$0xf]  ;;  %v12154_v15 = vld [vmem:[%s18630_s1 + $0xb84] sm:$0xf0] }
 0x125   :  { %2880 = vmatpush.bf16.msrb.mxu1 %v9294_v31  ;;  %2849 = vmatmul.bf16.vlgmr.msra.gmra.mxu2 %v13082_v18  ;;  %v9262_v31 = vor.u32 %v12128_v25, %v9261_v16 }
 0x126   :  { %2893 = vmatpush.bf16.msrb.mxu2 %v9358_v32  ;;  %2862 = vmatmul.bf16.vlgmr.msra.gmra.mxu3 %v13086_v20  ;;  %v9326_v32 = vor.u32 %v12144_v28, %v9325_v27  ;;  %v9039_v27 = vld [vmem:[%s18630_s1 + $0x8f8] sm:$0xf0]  ;;  %v12087_v28 = vld [vmem:[%s18630_s1 + $0x974] sm:$0xf] }
 0x127   :  { %2906 = vmatpush.bf16.msrb.mxu3 %v9422_v36  ;;  %v9106_v35 = vor.u32 %v12087_v28, %v9103_v51  ;;  %v9007_v51 = vld [vmem:[%s18630_s1 + $0x8b8] sm:$0xf0] }
 0x128   :  { %2868 = vmatpush.bf16.msrb.mxu0 %v9222_v46  ;;  %v1864_v36 = vpop.f32.mrf.mxu2  ;;  %v1840_v54 = vpop.f32.mrf.mxu0 }
 0x129   :  { %2881 = vmatpush.bf16.msrb.mxu1 %v9286_v48  ;;  %v1865_v45 = vadd.f32 %v1864_v36, %v1852_v30  ;;  %v1877_v46 = vpop.f32.mrf.mxu3  ;;  %v12158_v48 = vld [vmem:[%s18630_s1 + $0xba4] sm:$0xf0]  ;;  %v1853_v61 = vpop.f32.mrf.mxu1  ;;  %v12053_v36 = vld [vmem:[%s18630_s1 + $0x864] sm:$0xf] }
 0x12a   :  { %2894 = vmatpush.bf16.msrb.mxu2 %v9350_v50  ;;  %v9190_v50 = vor.u32 %v12110_v34, %v9189_v33  ;;  %v8978_v33 = vor.u32 %v12055_v17, %v8975_v21  ;;  %v9023_v61 = vld [vmem:[%s18630_s1 + $0x8d8] sm:$0xf0] }
 0x12b   :  { %2907 = vmatpush.bf16.msrb.mxu3 %v9414_v56  ;;  %v14747_v53 = vadd.f32 %v1877_v46, %v1865_v45  ;;  %v9318_v56 = vor.u32 %v12142_v43, %v9317_v40  ;;  %v9031_v43 = vld [vmem:[%s18630_s1 + $0x8e8] sm:$0xf0]  ;;  %v12085_v45 = vld [vmem:[%s18630_s1 + $0x964] sm:$0xf] }
 0x12c   :  { %2869 = vmatpush.bf16.msrb.mxu0 %v9214_v62  ;;  %v9382_v62 = vor.u32 %v12158_v48, %v9381_v47  ;;  %v9095_v46 = vld [vmem:[%s18630_s1 + $0x968] sm:$0xf0]  ;;  %v12101_v47 = vld [vmem:[%s18630_s1 + $0x9e4] sm:$0xf]  ;;  %v9034_v54 = vor.u32 %v12069_v39, %v9031_v43 }
 0x12d   :  { %2882 = vmatpush.bf16.msrb.mxu1 %v9278_v0  ;;  %v9309_v0 = vld [vmem:[%s18630_s1 + $0xb10] sm:$0xf]  ;;  %v9159_v48 = vld [vmem:[%s18630_s1 + $0x9e8] sm:$0xf0]  ;;  %v12061_v39 = vld [vmem:[%s18630_s1 + $0x8a4] sm:$0xf] }
 0x12e   :  { %2895 = vmatpush.bf16.msrb.mxu2 %v9342_v1  ;;  %v12140_v1 = vld [vmem:[%s18630_s1 + $0xb14] sm:$0xf0]  ;;  %v9162_v60 = vor.u32 %v12101_v47, %v9159_v48  ;;  %v12077_v47 = vld [vmem:[%s18630_s1 + $0x924] sm:$0xf]  ;;  %v9063_v48 = vld [vmem:[%s18630_s1 + $0x928] sm:$0xf0] }
 0x12f   :  { %2908 = vmatpush.bf16.msrb.mxu3 %v9406_v5  ;;  %v9173_v5 = vld [vmem:[%s18630_s1 + $0xa00] sm:$0xf]  ;;  %v9310_v8 = vor.u32 %v12140_v1, %v9309_v0  ;;  %v12099_v0 = vld [vmem:[%s18630_s1 + $0x9d4] sm:$0xf]  ;;  %v9151_v1 = vld [vmem:[%s18630_s1 + $0x9d8] sm:$0xf0] }
 0x130   :  { %2870 = vmatpush.bf16.msrb.mxu0 %v9206_v10  ;;  %v9301_v10 = vld [vmem:[%s18630_s1 + $0xb00] sm:$0xf]  ;;  %v1866_v11 = vpop.f32.mrf.mxu2  ;;  %v9174_v25 = vor.u32 %v12106_v6, %v9173_v5  ;;  %v12049_v5 = vld [vmem:[%s18630_s1 + $0x844] sm:$0xf]  ;;  %v8951_v6 = vld [vmem:[%s18630_s1 + $0x848] sm:$0xf0] }
 0x131   :  { %2883 = vmatpush.bf16.msrb.mxu1 %v9270_v12  ;;  %v9374_v12 = vor.u32 %v12156_v3, %v9373_v2  ;;  %v1879_v16 = vpop.f32.mrf.mxu3  ;;  %v9026_v3 = vor.u32 %v12067_v58, %v9023_v61  ;;  %v12097_v11 = vld [vmem:[%s18630_s1 + $0x9c4] sm:$0xf]  ;;  %v12043_v61 = vld [vmem:[%s18630_s1 + $0x814] sm:$0xf] }
 0x132   :  { %2896 = vmatpush.bf16.msrb.mxu2 %v9334_v13  ;;  %v12138_v13 = vld [vmem:[%s18630_s1 + $0xb04] sm:$0xf0] }
 0x133   :  { %2909 = vmatpush.bf16.msrb.mxu3 %v9398_v23  ;;  %v12071_v23 = vld [vmem:[%s18630_s1 + $0x8f4] sm:$0xf]  ;;  %v9302_v30 = vor.u32 %v12138_v13, %v9301_v10  ;;  %v9079_v10 = vld [vmem:[%s18630_s1 + $0x948] sm:$0xf0]  ;;  %v8954_v13 = vor.u32 %v12049_v5, %v8951_v6  ;;  %v9055_v5 = vld [vmem:[%s18630_s1 + $0x918] sm:$0xf0] }
 0x134   :  { %2871 = vmatpush.bf16.msrb.mxu0 %v9198_v24  ;;  %v12103_v24 = vld [vmem:[%s18630_s1 + $0x9f4] sm:$0xf]  ;;  %v9042_v34 = vor.u32 %v12071_v23, %v9039_v27  ;;  %v9082_v16 = vor.u32 %v12081_v26, %v9079_v10  ;;  %v8919_v26 = vld [vmem:[%s18630_s1 + $0x808] sm:$0xf0] }
 0x135   :  { %2884 = vmatpush.bf16.msrb.mxu1 %v9262_v31  ;;  %v9167_v31 = vld [vmem:[%s18630_s1 + $0x9f8] sm:$0xf0]  ;;  %v12047_v23 = vld [vmem:[%s18630_s1 + $0x834] sm:$0xf] }
 0x136   :  { %2897 = vmatpush.bf16.msrb.mxu2 %v9326_v32  ;;  %v9366_v32 = vor.u32 %v12154_v15, %v9365_v14  ;;  %v9170_v40 = vor.u32 %v12103_v24, %v9167_v31  ;;  %v12063_v27 = vld [vmem:[%s18630_s1 + $0x8b4] sm:$0xf]  ;;  %v9135_v31 = vld [vmem:[%s18630_s1 + $0x9b8] sm:$0xf0] }
 0x137   :  { %2910 = vmatpush.bf16.msrb.mxu3 %v9390_v37  ;;  %v8967_v37 = vld [vmem:[%s18630_s1 + $0x868] sm:$0xf0]  ;;  %v12095_v24 = vld [vmem:[%s18630_s1 + $0x9b4] sm:$0xf] }
 0x138   :  { %2872 = vmatpush.bf16.msrb.mxu0 %v9190_v50  ;;  %v8970_v50 = vor.u32 %v12053_v36, %v8967_v37  ;;  %v12045_v36 = vld [vmem:[%s18630_s1 + $0x824] sm:$0xf]  ;;  %v8935_v37 = vld [vmem:[%s18630_s1 + $0x828] sm:$0xf0]  ;;  %v12091_v6 = vld [vmem:[%s18630_s1 + $0x994] sm:$0xf] }
 0x139   :  { %2885 = vmatpush.bf16.msrb.mxu1 %v9254_v55  ;;  %v9098_v55 = vor.u32 %v12085_v45, %v9095_v46  ;;  %v8999_v46 = vld [vmem:[%s18630_s1 + $0x8a8] sm:$0xf0] }
 0x13a   :  { %2898 = vmatpush.bf16.msrb.mxu2 %v9318_v56  ;;  %v12051_v56 = vld [vmem:[%s18630_s1 + $0x854] sm:$0xf]  ;;  %v9002_v58 = vor.u32 %v12061_v39, %v8999_v46 }
 0x13b   :  { %2911 = vmatpush.bf16.msrb.mxu3 %v9382_v62  ;;  %v12083_v62 = vld [vmem:[%s18630_s1 + $0x954] sm:$0xf]  ;;  %v8962_v2 = vor.u32 %v12051_v56, %v8959_v57  ;;  %v8938_v56 = vor.u32 %v12045_v36, %v8935_v37 }
 0x13c   :  { %2873 = vmatpush.bf16.msrb.mxu0 %v9182_v4  ;;  %v9090_v4 = vor.u32 %v12083_v62, %v9087_v63  ;;  %v8927_v62 = vld [vmem:[%s18630_s1 + $0x818] sm:$0xf0]  ;;  %v12059_v63 = vld [vmem:[%s18630_s1 + $0x894] sm:$0xf] }
 0x13d   :  { %2886 = vmatpush.bf16.msrb.mxu1 %v9246_v7  ;;  %v12065_v7 = vld [vmem:[%s18630_s1 + $0x8c4] sm:$0xf] }
 0x13e   :  { %2899 = vmatpush.bf16.msrb.mxu2 %v9310_v8  ;;  %v9154_v8 = vor.u32 %v12099_v0, %v9151_v1  ;;  %v9018_v15 = vor.u32 %v12065_v7, %v9015_v9  ;;  %v9119_v7 = vld [vmem:[%s18630_s1 + $0x998] sm:$0xf0]  ;;  %v12041_v9 = vld [vmem:[%s18630_s1 + $0x804] sm:$0xf] }
 0x13f   :  { %2912 = vmatpush.bf16.msrb.mxu3 %v9374_v12  ;;  %v9143_v12 = vld [vmem:[%s18630_s1 + $0x9c8] sm:$0xf0] }
 0x140   :  { %2874 = vmatpush.bf16.msrb.mxu0 %v9174_v25  ;;  %v1890_v14 = vpop.f32.mrf.mxu0  ;;  %v8943_v25 = vld [vmem:[%s18630_s1 + $0x838] sm:$0xf0]  ;;  %v9146_v28 = vor.u32 %v12097_v11, %v9143_v12  ;;  %v12057_v12 = vld [vmem:[%s18630_s1 + $0x884] sm:$0xf] }
 0x141   :  { %2887 = vmatpush.bf16.msrb.mxu1 %v9238_v29  ;;  %v1891_v17 = vadd.f32 %v1890_v14, %v14747_v53  ;;  %v1903_v21 = vpop.f32.mrf.mxu1  ;;  %v12079_v53 = vld [vmem:[%s18630_s1 + $0x934] sm:$0xf]  ;;  %v9071_v29 = vld [vmem:[%s18630_s1 + $0x938] sm:$0xf0]  ;;  %v12073_v14 = vld [vmem:[%s18630_s1 + $0x904] sm:$0xf] }
 0x142   :  { %2900 = vmatpush.bf16.msrb.mxu2 %v9302_v30 }
 0x143   :  { %2913 = vmatpush.bf16.msrb.mxu3 %v9366_v32  ;;  %2875 = vmatmul.bf16.vlgmr.msrb.gmra.mxu0 %v13246_v41  ;;  %v1904_v30 = vadd.f32 %v1903_v21, %v1891_v17  ;;  %v8946_v32 = vor.u32 %v12047_v23, %v8943_v25  ;;  %v9047_v17 = vld [vmem:[%s18630_s1 + $0x908] sm:$0xf0]  ;;  %v12089_v21 = vld [vmem:[%s18630_s1 + $0x984] sm:$0xf] }
 0x144   :  { %2919 = vmatpush.bf16.msra.mxu0 %v8978_v33  ;;  %2888 = vmatmul.bf16.vlgmr.msrb.gmra.mxu1 %v13250_v44  ;;  %v9010_v33 = vor.u32 %v12063_v27, %v9007_v51  ;;  %v9111_v23 = vld [vmem:[%s18630_s1 + $0x988] sm:$0xf0]  ;;  %v12119_v27 = vld [vmem:[%s18630_s1 + $0xa74] sm:$0xf] }
 0x145   :  { %2932 = vmatpush.bf16.msra.mxu1 %v9042_v34  ;;  %2901 = vmatmul.bf16.vlgmr.msrb.gmra.mxu2 %v13238_v38  ;;  %v9074_v34 = vor.u32 %v12079_v53, %v9071_v29  ;;  %v12135_v51 = vld [vmem:[%s18630_s1 + $0xaf4] sm:$0xf]  ;;  %v8922_v53 = vor.u32 %v12041_v9, %v8919_v26  ;;  %v9295_v29 = vld [vmem:[%s18630_s1 + $0xaf8] sm:$0xf0] }
 0x146   :  { %2945 = vmatpush.bf16.msra.mxu2 %v9106_v35  ;;  %2914 = vmatmul.bf16.vlgmr.msrb.gmra.mxu3 %v13248_v42  ;;  %v9298_v37 = vor.u32 %v12135_v51, %v9295_v29  ;;  %v9199_v51 = vld [vmem:[%s18630_s1 + $0xa38] sm:$0xf0] }
 0x147   :  { %2958 = vmatpush.bf16.msra.mxu3 %v9170_v40  ;;  %v9138_v40 = vor.u32 %v12095_v24, %v9135_v31  ;;  %v9359_v24 = vld [vmem:[%s18630_s1 + $0xb78] sm:$0xf0] }
 0x148   :  { %2920 = vmatpush.bf16.msra.mxu0 %v8970_v50  ;;  %v1916_v35 = vpop.f32.mrf.mxu2  ;;  %v12093_v50 = vld [vmem:[%s18630_s1 + $0x9a4] sm:$0xf]  ;;  %v1892_v57 = vpop.f32.mrf.mxu0 }
 0x149   :  { %2933 = vmatpush.bf16.msra.mxu1 %v9034_v54  ;;  %v1917_v43 = vadd.f32 %v1916_v35, %v1904_v30  ;;  %v1929_v45 = vpop.f32.mrf.mxu3  ;;  %v9127_v54 = vld [vmem:[%s18630_s1 + $0x9a8] sm:$0xf0]  ;;  %v1905_v0 = vpop.f32.mrf.mxu1  ;;  %v12151_v30 = vld [vmem:[%s18630_s1 + $0xb74] sm:$0xf]  ;;  %v9114_v35 = vor.u32 %v12089_v21, %v9111_v23 }
 0x14a   :  { %2946 = vmatpush.bf16.msra.mxu2 %v9098_v55  ;;  %v9362_v39 = vor.u32 %v12151_v30, %v9359_v24 }
 0x14b   :  { %2959 = vmatpush.bf16.msra.mxu3 %v9162_v60  ;;  %v14946_v55 = vadd.f32 %v1929_v45, %v1917_v43  ;;  %v9066_v60 = vor.u32 %v12077_v47, %v9063_v48  ;;  %v9223_v43 = vld [vmem:[%s18630_s1 + $0xa68] sm:$0xf0]  ;;  %v12133_v45 = vld [vmem:[%s18630_s1 + $0xae4] sm:$0xf] }
 0x14c   :  { %2921 = vmatpush.bf16.msra.mxu0 %v8962_v2  ;;  %v9130_v2 = vor.u32 %v12093_v50, %v9127_v54  ;;  %v9287_v47 = vld [vmem:[%s18630_s1 + $0xae8] sm:$0xf0]  ;;  %v12149_v48 = vld [vmem:[%s18630_s1 + $0xb64] sm:$0xf] }
 0x14d   :  { %2934 = vmatpush.bf16.msra.mxu1 %v9026_v3  ;;  %v2037_v1 = vmax.f32 %v14145_v52, %v14946_v55  ;;  %v8991_v3 = vld [vmem:[%s18630_s1 + $0x898] sm:$0xf0]  ;;  %v9351_v50 = vld [vmem:[%s18630_s1 + $0xb68] sm:$0xf0]  ;;  %v12165_v54 = vld [vmem:[%s18630_s1 + $0xbe4] sm:$0xf] }
 0x14e   :  { %2947 = vmatpush.bf16.msra.mxu2 %v9090_v4  ;;  %v12075_v4 = vld [vmem:[%s18630_s1 + $0x914] sm:$0xf]  ;;  %v8994_v10 = vor.u32 %v12059_v63, %v8991_v3  ;;  %v9760_v52 = vld [vmem:[%s18630_s1 + $0xd98] sm:$0xf0] }
 0x14f   :  { %2960 = vmatpush.bf16.msra.mxu3 %v9154_v8  ;;  %v8930_v8 = vor.u32 %v12043_v61, %v8927_v62  ;;  %v9058_v11 = vor.u32 %v12075_v4, %v9055_v5  ;;  %v12115_v61 = vld [vmem:[%s18630_s1 + $0xa54] sm:$0xf]  ;;  %v9215_v62 = vld [vmem:[%s18630_s1 + $0xa58] sm:$0xf0] }
 0x150   :  { %2922 = vmatpush.bf16.msra.mxu0 %v8954_v13  ;;  %v8983_v13 = vld [vmem:[%s18630_s1 + $0x888] sm:$0xf0]  ;;  %v12131_v63 = vld [vmem:[%s18630_s1 + $0xad4] sm:$0xf]  ;;  %v9343_v4 = vld [vmem:[%s18630_s1 + $0xb58] sm:$0xf0] }
 0x151   :  { %2935 = vmatpush.bf16.msra.mxu1 %v9018_v15  ;;  %v1918_v15 = vpop.f32.mrf.mxu2  ;;  %v1931_v25 = vpop.f32.mrf.mxu3  ;;  %v8986_v31 = vor.u32 %v12057_v12, %v8983_v13  ;;  %v12147_v3 = vld [vmem:[%s18630_s1 + $0xb54] sm:$0xf]  ;;  %v1186_v12 = vperm.slane %v14663_v59, 1  ;;  %v9399_v59 = vld [vmem:[%s18630_s1 + $0xbc8] sm:$0xf0] }
 0x152   :  { %2948 = vmatpush.bf16.msra.mxu2 %v9082_v16  ;;  %v9122_v16 = vor.u32 %v12091_v6, %v9119_v7  ;;  %v12163_v5 = vld [vmem:[%s18630_s1 + $0xbd4] sm:$0xf]  ;;  %v9407_v6 = vld [vmem:[%s18630_s1 + $0xbd8] sm:$0xf0]  ;;  %v9218_v7 = vor.u32 %v12115_v61, %v9215_v62  ;;  %v9346_v26 = vor.u32 %v12147_v3, %v9343_v4  ;;  %v12145_v15 = vld [vmem:[%s18630_s1 + $0xb44] sm:$0xf] }
 0x153   :  { %2961 = vmatpush.bf16.msra.mxu3 %v9146_v28  ;;  %v9231_v28 = vld [vmem:[%s18630_s1 + $0xa78] sm:$0xf0]  ;;  %v9410_v13 = vor.u32 %v12163_v5, %v9407_v6  ;;  %v9383_v61 = vld [vmem:[%s18630_s1 + $0xba8] sm:$0xf0]  ;;  %v12107_v4 = vld [vmem:[%s18630_s1 + $0xa14] sm:$0xf] }
 0x154   :  { %2923 = vmatpush.bf16.msra.mxu0 %v8946_v32  ;;  %v9050_v32 = vor.u32 %v12073_v14, %v9047_v17  ;;  %v9234_v36 = vor.u32 %v12119_v27, %v9231_v28  ;;  %v9271_v14 = vld [vmem:[%s18630_s1 + $0xac8] sm:$0xf0]  ;;  %v12161_v17 = vld [vmem:[%s18630_s1 + $0xbc4] sm:$0xf]  ;;  %v12111_v28 = vld [vmem:[%s18630_s1 + $0xa34] sm:$0xf] }
 0x155   :  { %2936 = vmatpush.bf16.msra.mxu1 %v9010_v33  ;;  %v12167_v33 = vld [vmem:[%s18630_s1 + $0xbf4] sm:$0xf]  ;;  %v9402_v24 = vor.u32 %v12161_v17, %v9399_v59  ;;  %v9183_v5 = vld [vmem:[%s18630_s1 + $0xa18] sm:$0xf0]  ;;  %v12121_v59 = vld [vmem:[%s18630_s1 + $0xa84] sm:$0xf] }
 0x156   :  { %2949 = vmatpush.bf16.msra.mxu2 %v9074_v34  ;;  %v9423_v34 = vld [vmem:[%s18630_s1 + $0xbf8] sm:$0xf0]  ;;  %v12123_v6 = vld [vmem:[%s18630_s1 + $0xa94] sm:$0xf] }
 0x157   :  { %2962 = vmatpush.bf16.msra.mxu3 %v9138_v40  ;;  %v12117_v40 = vld [vmem:[%s18630_s1 + $0xa64] sm:$0xf]  ;;  %v9426_v46 = vor.u32 %v12167_v33, %v9423_v34  ;;  %v9327_v33 = vld [vmem:[%s18630_s1 + $0xb38] sm:$0xf0]  ;;  %v12159_v34 = vld [vmem:[%s18630_s1 + $0xbb4] sm:$0xf] }
 0x158   :  { %2924 = vmatpush.bf16.msra.mxu0 %v8938_v56  ;;  %v9415_v56 = vld [vmem:[%s18630_s1 + $0xbe8] sm:$0xf0]  ;;  %v9226_v57 = vor.u32 %v12117_v40, %v9223_v43  ;;  %v12109_v43 = vld [vmem:[%s18630_s1 + $0xa24] sm:$0xf] }
 0x159   :  { %2937 = vmatpush.bf16.msra.mxu1 %v9002_v58  ;;  %v9290_v58 = vor.u32 %v12133_v45, %v9287_v47  ;;  %v9418_v0 = vor.u32 %v12165_v54, %v9415_v56  ;;  %v9191_v45 = vld [vmem:[%s18630_s1 + $0xa28] sm:$0xf0]  ;;  %v12141_v54 = vld [vmem:[%s18630_s1 + $0xb24] sm:$0xf] }
 0x15a   :  { %2950 = vmatpush.bf16.msra.mxu2 %v9066_v60  ;;  %v9354_v60 = vor.u32 %v12149_v48, %v9351_v50  ;;  %v9255_v50 = vld [vmem:[%s18630_s1 + $0xaa8] sm:$0xf0]  ;;  %v9194_v62 = vor.u32 %v12109_v43, %v9191_v45 }
 0x15b   :  { %2963 = vmatpush.bf16.msra.mxu3 %v9130_v2  ;;  %v9279_v2 = vld [vmem:[%s18630_s1 + $0xad8] sm:$0xf0]  ;;  %v9319_v56 = vld [vmem:[%s18630_s1 + $0xb28] sm:$0xf0] }
 0x15c   :  { %2925 = vmatpush.bf16.msra.mxu0 %v8930_v8  ;;  %v12113_v8 = vld [vmem:[%s18630_s1 + $0xa44] sm:$0xf]  ;;  %v9282_v9 = vor.u32 %v12131_v63, %v9279_v2  ;;  %v9322_v3 = vor.u32 %v12141_v54, %v9319_v56  ;;  %v9670_v54 = vld [vmem:[%s18630_s1 + $0xce0] sm:$0xf] }
 0x15d   :  { %2938 = vmatpush.bf16.msra.mxu1 %v8994_v10  ;;  %v9207_v10 = vld [vmem:[%s18630_s1 + $0xa48] sm:$0xf0] }
 0x15e   :  { %2951 = vmatpush.bf16.msra.mxu2 %v9058_v11  ;;  %v12129_v11 = vld [vmem:[%s18630_s1 + $0xac4] sm:$0xf]  ;;  %v9210_v21 = vor.u32 %v12113_v8, %v9207_v10  ;;  %v9311_v10 = vld [vmem:[%s18630_s1 + $0xb18] sm:$0xf0] }
 0x15f   :  { %2964 = vmatpush.bf16.msra.mxu3 %v9122_v16  ;;  %v9335_v16 = vld [vmem:[%s18630_s1 + $0xb48] sm:$0xf0]  ;;  %v9274_v25 = vor.u32 %v12129_v11, %v9271_v14  ;;  %v12155_v11 = vld [vmem:[%s18630_s1 + $0xb94] sm:$0xf]  ;;  %v12105_v14 = vld [vmem:[%s18630_s1 + $0xa04] sm:$0xf] }
 0x160   :  { %2926 = vmatpush.bf16.msra.mxu0 %v8922_v53  ;;  %v1942_v23 = vpop.f32.mrf.mxu0  ;;  %v9338_v27 = vor.u32 %v12145_v15, %v9335_v16  ;;  %v12127_v53 = vld [vmem:[%s18630_s1 + $0xab4] sm:$0xf]  ;;  %v9175_v15 = vld [vmem:[%s18630_s1 + $0xa08] sm:$0xf0] }
 0x161   :  { %2939 = vmatpush.bf16.msra.mxu1 %v8986_v31  ;;  %v1943_v29 = vadd.f32 %v1942_v23, %v1186_v12  ;;  %v1955_v30 = vpop.f32.mrf.mxu1  ;;  %v9263_v31 = vld [vmem:[%s18630_s1 + $0xab8] sm:$0xf0]  ;;  %v12137_v23 = vld [vmem:[%s18630_s1 + $0xb04] sm:$0xf] }
 0x162   :  { %2952 = vmatpush.bf16.msra.mxu2 %v9050_v32  ;;  %v12143_v32 = vld [vmem:[%s18630_s1 + $0xb34] sm:$0xf]  ;;  %v9375_v12 = vld [vmem:[%s18630_s1 + $0xb98] sm:$0xf0] }
 0x163   :  { %2965 = vmatpush.bf16.msra.mxu3 %v9114_v35  ;;  %2927 = vmatmul.bf16.vlgmr.msra.gmra.mxu0 %v13084_v19  ;;  %v9391_v35 = vld [vmem:[%s18630_s1 + $0xbb8] sm:$0xf0]  ;;  %v9330_v40 = vor.u32 %v12143_v32, %v9327_v33  ;;  %v9178_v32 = vor.u32 %v12105_v14, %v9175_v15  ;;  %v12200_v33 = vld [vmem:[%s18630_s1 + $0xcf4] sm:$0xf0]  ;;  %v9590_v15 = vld [vmem:[%s18630_s1 + $0xc40] sm:$0xf] }
 0x164   :  { %2971 = vmatpush.bf16.msrb.mxu0 %v9234_v36  ;;  %2940 = vmatmul.bf16.vlgmr.msra.gmra.mxu1 %v13088_v22  ;;  %v1956_v36 = vadd.f32 %v1955_v30, %v1943_v29  ;;  %v9394_v48 = vor.u32 %v12159_v34, %v9391_v35  ;;  %v9614_v30 = vld [vmem:[%s18630_s1 + $0xc70] sm:$0xf]  ;;  %v12216_v35 = vld [vmem:[%s18630_s1 + $0xd74] sm:$0xf0] }
 0x165   :  { %2984 = vmatpush.bf16.msrb.mxu1 %v9298_v37  ;;  %2953 = vmatmul.bf16.vlgmr.msra.gmra.mxu2 %v13082_v18  ;;  %v9202_v37 = vor.u32 %v12111_v28, %v9199_v51  ;;  %v9303_v28 = vld [vmem:[%s18630_s1 + $0xb08] sm:$0xf0]  ;;  %v12153_v51 = vld [vmem:[%s18630_s1 + $0xb84] sm:$0xf]  ;;  %v9742_v34 = vld [vmem:[%s18630_s1 + $0xd70] sm:$0xf] }
 0x166   :  { %2997 = vmatpush.bf16.msrb.mxu2 %v9362_v39  ;;  %2966 = vmatmul.bf16.vlgmr.msra.gmra.mxu3 %v13086_v20  ;;  %v9266_v39 = vor.u32 %v12127_v53, %v9263_v31  ;;  %v9367_v53 = vld [vmem:[%s18630_s1 + $0xb88] sm:$0xf0]  ;;  %v9678_v31 = vld [vmem:[%s18630_s1 + $0xcf0] sm:$0xf] }
 0x167   :  { %3010 = vmatpush.bf16.msrb.mxu3 %v9426_v46  ;;  %v12125_v46 = vld [vmem:[%s18630_s1 + $0xaa4] sm:$0xf]  ;;  %v9370_v43 = vor.u32 %v12153_v51, %v9367_v53 }
 0x168   :  { %2972 = vmatpush.bf16.msrb.mxu0 %v9226_v57  ;;  %v1968_v47 = vpop.f32.mrf.mxu2  ;;  %v9258_v2 = vor.u32 %v12125_v46, %v9255_v50  ;;  %v9679_v46 = vor.u32 %v12200_v33, %v9678_v31  ;;  %v12182_v50 = vld [vmem:[%s18630_s1 + $0xc64] sm:$0xf0]  ;;  %v12176_v33 = vld [vmem:[%s18630_s1 + $0xc34] sm:$0xf0] }
 0x169   :  { %2985 = vmatpush.bf16.msrb.mxu1 %v9290_v58  ;;  %v1969_v57 = vadd.f32 %v1968_v47, %v1956_v36  ;;  %v1981_v58 = vpop.f32.mrf.mxu3  ;;  %v9743_v47 = vor.u32 %v12216_v35, %v9742_v34  ;;  %v9646_v34 = vld [vmem:[%s18630_s1 + $0xcb0] sm:$0xf] }
 0x16a   :  { %2998 = vmatpush.bf16.msrb.mxu2 %v9354_v60  ;;  %v12157_v60 = vld [vmem:[%s18630_s1 + $0xba4] sm:$0xf] }
 0x16b   :  { %3011 = vmatpush.bf16.msrb.mxu3 %v9418_v0  ;;  %v15147_v63 = vadd.f32 %v1981_v58, %v1969_v57  ;;  %v1944_v0 = vpop.f32.mrf.mxu0  ;;  %v9386_v8 = vor.u32 %v12157_v60, %v9383_v61  ;;  %v12198_v57 = vld [vmem:[%s18630_s1 + $0xce4] sm:$0xf0]  ;;  %v9734_v58 = vld [vmem:[%s18630_s1 + $0xd60] sm:$0xf] }
 0x16c   :  { %2973 = vmatpush.bf16.msrb.mxu0 %v9218_v7  ;;  %v1957_v7 = vpop.f32.mrf.mxu1  ;;  %v12214_v60 = vld [vmem:[%s18630_s1 + $0xd64] sm:$0xf0]  ;;  %v9798_v61 = vld [vmem:[%s18630_s1 + $0xde0] sm:$0xf] }
 0x16d   :  { %2986 = vmatpush.bf16.msrb.mxu1 %v9282_v9  ;;  %v9247_v9 = vld [vmem:[%s18630_s1 + $0xa98] sm:$0xf0] }
 0x16e   :  { %2999 = vmatpush.bf16.msrb.mxu2 %v9346_v26  ;;  %v12139_v26 = vld [vmem:[%s18630_s1 + $0xb14] sm:$0xf]  ;;  %v9250_v16 = vor.u32 %v12123_v6, %v9247_v9  ;;  %v9662_v6 = vld [vmem:[%s18630_s1 + $0xcd0] sm:$0xf] }
 0x16f   :  { %3012 = vmatpush.bf16.msrb.mxu3 %v9410_v13  ;;  %v9186_v13 = vor.u32 %v12107_v4, %v9183_v5  ;;  %v9314_v17 = vor.u32 %v12139_v26, %v9311_v10  ;;  %v9598_v4 = vld [vmem:[%s18630_s1 + $0xc50] sm:$0xf]  ;;  %v12180_v5 = vld [vmem:[%s18630_s1 + $0xc54] sm:$0xf0] }
 0x170   :  { %2974 = vmatpush.bf16.msrb.mxu0 %v9210_v21  ;;  %v9239_v21 = vld [vmem:[%s18630_s1 + $0xa88] sm:$0xf0]  ;;  %v9726_v9 = vld [vmem:[%s18630_s1 + $0xd50] sm:$0xf]  ;;  %v12212_v26 = vld [vmem:[%s18630_s1 + $0xd54] sm:$0xf0] }
 0x171   :  { %2987 = vmatpush.bf16.msrb.mxu1 %v9274_v25  ;;  %v1970_v25 = vpop.f32.mrf.mxu2  ;;  %v1983_v29 = vpop.f32.mrf.mxu3  ;;  %v9242_v36 = vor.u32 %v12121_v59, %v9239_v21  ;;  %v9790_v10 = vld [vmem:[%s18630_s1 + $0xdd0] sm:$0xf]  ;;  %v9727_v14 = vor.u32 %v12212_v26, %v9726_v9  ;;  %v12194_v21 = vld [vmem:[%s18630_s1 + $0xcc4] sm:$0xf0]  ;;  %v12172_v26 = vld [vmem:[%s18630_s1 + $0xc14] sm:$0xf0] }
 0x172   :  { %3000 = vmatpush.bf16.msrb.mxu2 %v9338_v27  ;;  %v9378_v27 = vor.u32 %v12155_v11, %v9375_v12  ;;  %v12228_v11 = vld [vmem:[%s18630_s1 + $0xdd4] sm:$0xf0]  ;;  %v9599_v12 = vor.u32 %v12180_v5, %v9598_v4  ;;  %v12210_v25 = vld [vmem:[%s18630_s1 + $0xd44] sm:$0xf0]  ;;  %v9566_v9 = vld [vmem:[%s18630_s1 + $0xc10] sm:$0xf] }
 0x173   :  { %3013 = vmatpush.bf16.msrb.mxu3 %v9402_v24  ;;  %v12184_v24 = vld [vmem:[%s18630_s1 + $0xc74] sm:$0xf0]  ;;  %v9791_v59 = vor.u32 %v12228_v11, %v9790_v10  ;;  %v9630_v10 = vld [vmem:[%s18630_s1 + $0xc90] sm:$0xf] }
 0x174   :  { %2975 = vmatpush.bf16.msrb.mxu0 %v9202_v37  ;;  %v9306_v37 = vor.u32 %v12137_v23, %v9303_v28  ;;  %v9615_v45 = vor.u32 %v12184_v24, %v9614_v30  ;;  %v9718_v23 = vld [vmem:[%s18630_s1 + $0xd40] sm:$0xf]  ;;  %v12226_v28 = vld [vmem:[%s18630_s1 + $0xdc4] sm:$0xf0] }
 0x175   :  { %2988 = vmatpush.bf16.msrb.mxu1 %v9266_v39  ;;  %v9806_v39 = vld [vmem:[%s18630_s1 + $0xdf0] sm:$0xf]  ;;  %v9719_v30 = vor.u32 %v12210_v25, %v9718_v23  ;;  %v9558_v23 = vld [vmem:[%s18630_s1 + $0xc00] sm:$0xf]  ;;  %v12170_v25 = vld [vmem:[%s18630_s1 + $0xc04] sm:$0xf0] }
 0x176   :  { %3001 = vmatpush.bf16.msrb.mxu2 %v9330_v40  ;;  %v12232_v40 = vld [vmem:[%s18630_s1 + $0xdf4] sm:$0xf0] }
 0x177   :  { %3014 = vmatpush.bf16.msrb.mxu3 %v9394_v48  ;;  %v9606_v48 = vld [vmem:[%s18630_s1 + $0xc60] sm:$0xf]  ;;  %v9807_v56 = vor.u32 %v12232_v40, %v9806_v39  ;;  %v9774_v40 = vld [vmem:[%s18630_s1 + $0xdb0] sm:$0xf] }
 0x178   :  { %2976 = vmatpush.bf16.msrb.mxu0 %v9194_v62  ;;  %v12230_v62 = vld [vmem:[%s18630_s1 + $0xde4] sm:$0xf0]  ;;  %v9607_v0 = vor.u32 %v12182_v50, %v9606_v48  ;;  %v9574_v50 = vld [vmem:[%s18630_s1 + $0xc20] sm:$0xf] }
 0x179   :  { %2989 = vmatpush.bf16.msrb.mxu1 %v9258_v2  ;;  %v9671_v2 = vor.u32 %v12198_v57, %v9670_v54  ;;  %v9799_v7 = vor.u32 %v12230_v62, %v9798_v61  ;;  %v12174_v54 = vld [vmem:[%s18630_s1 + $0xc24] sm:$0xf0]  ;;  %v9702_v62 = vld [vmem:[%s18630_s1 + $0xd20] sm:$0xf] }
 0x17a   :  { %3002 = vmatpush.bf16.msrb.mxu2 %v9322_v3  ;;  %v9735_v3 = vor.u32 %v12214_v60, %v9734_v58  ;;  %v12190_v61 = vld [vmem:[%s18630_s1 + $0xca4] sm:$0xf0]  ;;  %v9575_v5 = vor.u32 %v12174_v54, %v9574_v50 }
 0x17b   :  { %3015 = vmatpush.bf16.msrb.mxu3 %v9386_v8  ;;  %v12196_v8 = vld [vmem:[%s18630_s1 + $0xcd4] sm:$0xf0] }
 0x17c   :  { %2977 = vmatpush.bf16.msrb.mxu0 %v9186_v13  ;;  %v9663_v13 = vor.u32 %v12196_v8, %v9662_v6 }
 0x17d   :  { %2990 = vmatpush.bf16.msrb.mxu1 %v9250_v16  ;;  %v12178_v16 = vld [vmem:[%s18630_s1 + $0xc44] sm:$0xf0] }
 0x17e   :  { %3003 = vmatpush.bf16.msrb.mxu2 %v9314_v17  ;;  %v9654_v17 = vld [vmem:[%s18630_s1 + $0xcc0] sm:$0xf]  ;;  %v9591_v51 = vor.u32 %v12178_v16, %v9590_v15  ;;  %v9694_v15 = vld [vmem:[%s18630_s1 + $0xd10] sm:$0xf]  ;;  %v12204_v16 = vld [vmem:[%s18630_s1 + $0xd14] sm:$0xf0] }
 0x17f   :  { %3016 = vmatpush.bf16.msrb.mxu3 %v9378_v27  ;;  %v9782_v27 = vld [vmem:[%s18630_s1 + $0xdc0] sm:$0xf]  ;;  %v9655_v29 = vor.u32 %v12194_v21, %v9654_v17  ;;  %v9758_v17 = vld [vmem:[%s18630_s1 + $0xd90] sm:$0xf]  ;;  %v9567_v21 = vor.u32 %v12172_v26, %v9566_v9 }
 0x180   :  { %2978 = vmatpush.bf16.msrb.mxu0 %v9178_v32  ;;  %v1994_v53 = vpop.f32.mrf.mxu0  ;;  %v9582_v32 = vld [vmem:[%s18630_s1 + $0xc30] sm:$0xf]  ;;  %v9783_v35 = vor.u32 %v12226_v28, %v9782_v27  ;;  %v9695_v28 = vor.u32 %v12204_v16, %v9694_v15  ;;  %v12276_v16 = vld [vmem:[%s18630_s1 + $0xf54] sm:$0xf0] }
 0x181   :  { %2991 = vmatpush.bf16.msrb.mxu1 %v9242_v36  ;;  %v1995_v24 = vadd.f32 %v1994_v53, %v15147_v63  ;;  %v2007_v31 = vpop.f32.mrf.mxu1  ;;  %v12192_v36 = vld [vmem:[%s18630_s1 + $0xcb4] sm:$0xf0]  ;;  %v9710_v63 = vld [vmem:[%s18630_s1 + $0xd30] sm:$0xf]  ;;  %v12186_v53 = vld [vmem:[%s18630_s1 + $0xc84] sm:$0xf0] }
 0x182   :  { %3004 = vmatpush.bf16.msrb.mxu2 %v9306_v37  ;;  %v12208_v37 = vld [vmem:[%s18630_s1 + $0xd34] sm:$0xf0]  ;;  %v9982_v15 = vld [vmem:[%s18630_s1 + $0xf50] sm:$0xf] }
 0x183   :  { %3017 = vmatpush.bf16.msrb.mxu3 %v9370_v43  ;;  %2979 = vmatmul.bf16.vlgmr.msrb.gmra.mxu0 %v13246_v41  ;;  %v2008_v39 = vadd.f32 %v2007_v31, %v1995_v24  ;;  %v12224_v43 = vld [vmem:[%s18630_s1 + $0xdb4] sm:$0xf0]  ;;  %v12202_v31 = vld [vmem:[%s18630_s1 + $0xd04] sm:$0xf0] }
 0x184   :  { %3801 = vmatpush.bf16.msra.mxu0 %v9615_v45  ;;  %2992 = vmatmul.bf16.vlgmr.msrb.gmra.mxu1 %v13250_v44  ;;  %v9583_v45 = vor.u32 %v12176_v33, %v9582_v32  ;;  %v9775_v57 = vor.u32 %v12224_v43, %v9774_v40  ;;  %v9750_v32 = vld [vmem:[%s18630_s1 + $0xd80] sm:$0xf]  ;;  %v12218_v33 = vld [vmem:[%s18630_s1 + $0xd84] sm:$0xf0]  ;;  %v9998_v40 = vld [vmem:[%s18630_s1 + $0xf70] sm:$0xf] }
 0x185   :  { %3814 = vmatpush.bf16.msra.mxu1 %v9679_v46  ;;  %3005 = vmatmul.bf16.vlgmr.msrb.gmra.mxu2 %v13238_v38  ;;  %v9647_v46 = vor.u32 %v12192_v36, %v9646_v34  ;;  %v12248_v36 = vld [vmem:[%s18630_s1 + $0xe74] sm:$0xf0]  ;;  %v9751_v50 = vor.u32 %v12218_v33, %v9750_v32  ;;  %v12274_v32 = vld [vmem:[%s18630_s1 + $0xf44] sm:$0xf0]  ;;  %v10038_v33 = vld [vmem:[%s18630_s1 + $0xfc0] sm:$0xf] }
 0x186   :  { %3827 = vmatpush.bf16.msra.mxu2 %v9743_v47  ;;  %3018 = vmatmul.bf16.vlgmr.msrb.gmra.mxu3 %v13248_v42  ;;  %v9711_v47 = vor.u32 %v12208_v37, %v9710_v63  ;;  %v9934_v63 = vld [vmem:[%s18630_s1 + $0xef0] sm:$0xf]  ;;  %v9559_v37 = vor.u32 %v12170_v25, %v9558_v23  ;;  %v12280_v43 = vld [vmem:[%s18630_s1 + $0xf74] sm:$0xf0]  ;;  %v9846_v25 = vld [vmem:[%s18630_s1 + $0xe40] sm:$0xf] }
 0x187   :  { %3840 = vmatpush.bf16.msra.mxu3 %v9807_v56  ;;  %v9638_v56 = vld [vmem:[%s18630_s1 + $0xca0] sm:$0xf] }
 0x188   :  { %3802 = vmatpush.bf16.msra.mxu0 %v9607_v0  ;;  %v2020_v48 = vpop.f32.mrf.mxu2  ;;  %v12206_v0 = vld [vmem:[%s18630_s1 + $0xd24] sm:$0xf0]  ;;  %v1996_v6 = vpop.f32.mrf.mxu0 }
 0x189   :  { %3815 = vmatpush.bf16.msra.mxu1 %v9671_v2  ;;  %v2021_v58 = vadd.f32 %v2020_v48, %v2008_v39  ;;  %v2033_v60 = vpop.f32.mrf.mxu3  ;;  %v9766_v2 = vld [vmem:[%s18630_s1 + $0xda0] sm:$0xf]  ;;  %v9703_v8 = vor.u32 %v12206_v0, %v9702_v62  ;;  %v2009_v11 = vpop.f32.mrf.mxu1  ;;  %v12264_v39 = vld [vmem:[%s18630_s1 + $0xef4] sm:$0xf0]  ;;  %v12262_v0 = vld [vmem:[%s18630_s1 + $0xee4] sm:$0xf0] }
 0x18a   :  { %3828 = vmatpush.bf16.msra.mxu2 %v9735_v3  ;;  %v12222_v3 = vld [vmem:[%s18630_s1 + $0xda4] sm:$0xf0]  ;;  %v12296_v48 = vld [vmem:[%s18630_s1 + $0xff4] sm:$0xf0]  ;;  %v9918_v11 = vld [vmem:[%s18630_s1 + $0xed0] sm:$0xf] }
 0x18b   :  { %3841 = vmatpush.bf16.msra.mxu3 %v9799_v7  ;;  %v15346_v4 = vadd.f32 %v2033_v60, %v2021_v58  ;;  %v9639_v7 = vor.u32 %v12190_v61, %v9638_v56  ;;  %v9935_v56 = vor.u32 %v12264_v39, %v9934_v63  ;;  %v9862_v58 = vld [vmem:[%s18630_s1 + $0xe60] sm:$0xf]  ;;  %v12246_v60 = vld [vmem:[%s18630_s1 + $0xe64] sm:$0xf0]  ;;  %v9838_v39 = vld [vmem:[%s18630_s1 + $0xe30] sm:$0xf] }
 0x18c   :  { %3803 = vmatpush.bf16.msra.mxu0 %v9599_v12  ;;  %v9926_v61 = vld [vmem:[%s18630_s1 + $0xee0] sm:$0xf]  ;;  %v12294_v6 = vld [vmem:[%s18630_s1 + $0xfe4] sm:$0xf0] }
 0x18d   :  { %3816 = vmatpush.bf16.msra.mxu1 %v9663_v13  ;;  %v2038_v12 = vmax.f32 %v14543_v49, %v15346_v4  ;;  %v9767_v13 = vor.u32 %v12222_v3, %v9766_v2  ;;  %v9990_v2 = vld [vmem:[%s18630_s1 + $0xf60] sm:$0xf]  ;;  %v12278_v3 = vld [vmem:[%s18630_s1 + $0xf64] sm:$0xf0]  ;;  %v9927_v9 = vor.u32 %v12262_v0, %v9926_v61 }
 0x18e   :  { %3829 = vmatpush.bf16.msra.mxu2 %v9727_v14  ;;  %v12188_v14 = vld [vmem:[%s18630_s1 + $0xc94] sm:$0xf0]  ;;  %v9991_v26 = vor.u32 %v12278_v3, %v9990_v2  ;;  %v9830_v0 = vld [vmem:[%s18630_s1 + $0xe20] sm:$0xf]  ;;  %v12238_v2 = vld [vmem:[%s18630_s1 + $0xe24] sm:$0xf0] }
 0x18f   :  { %3842 = vmatpush.bf16.msra.mxu3 %v9791_v59  ;;  %v12220_v59 = vld [vmem:[%s18630_s1 + $0xd94] sm:$0xf0]  ;;  %v9631_v27 = vor.u32 %v12188_v14, %v9630_v10  ;;  %v9894_v3 = vld [vmem:[%s18630_s1 + $0xea0] sm:$0xf] }
 0x190   :  { %3804 = vmatpush.bf16.msra.mxu0 %v9591_v51  ;;  %v9622_v51 = vld [vmem:[%s18630_s1 + $0xc80] sm:$0xf]  ;;  %v9759_v24 = vor.u32 %v12220_v59, %v9758_v17  ;;  %v12244_v10 = vld [vmem:[%s18630_s1 + $0xe54] sm:$0xf0]  ;;  %v15468_v17 = vld [vmem:[%s18632_s2 + $0x4] sm:$0x3] }
 0x191   :  { %3817 = vmatpush.bf16.msra.mxu1 %v9655_v29  ;;  %v9686_v29 = vld [vmem:[%s18630_s1 + $0xd00] sm:$0xf]  ;;  %v2035_v34 = vpop.f32.mrf.mxu3  ;;  %v10046_v59 = vld [vmem:[%s18630_s1 + $0xfd0] sm:$0xf] }
 0x192   :  { %3830 = vmatpush.bf16.msra.mxu2 %v9719_v30  ;;  %v2022_v30 = vpop.f32.mrf.mxu2  ;;  %v12290_v34 = vld [vmem:[%s18630_s1 + $0xfc4] sm:$0xf0]  ;;  %v12297_v49 = vld [vmem:[%s18633_s3] sm:$0xff] }
 0x193   :  { %3843 = vmatpush.bf16.msra.mxu3 %v9783_v35  ;;  %v9870_v35 = vld [vmem:[%s18630_s1 + $0xe70] sm:$0xf]  ;;  %v12309_v4 = vld [vmem:[%s18633_s3 + $0x60] sm:$0xff] }
 0x194   :  { %3805 = vmatpush.bf16.msra.mxu0 %v9583_v45  ;;  %v9623_v45 = vor.u32 %v12186_v53, %v9622_v51  ;;  %v9871_v54 = vor.u32 %v12248_v36, %v9870_v35  ;;  %v12242_v51 = vld [vmem:[%s18630_s1 + $0xe44] sm:$0xf0]  ;;  %v9910_v53 = vld [vmem:[%s18630_s1 + $0xec0] sm:$0xf] }
 0x195   :  { %3818 = vmatpush.bf16.msra.mxu1 %v9647_v46  ;;  %v9687_v46 = vor.u32 %v12202_v31, %v9686_v29  ;;  %v2171_v29 = vperm.slane %v15468_v17, 0  ;;  %v9974_v31 = vld [vmem:[%s18630_s1 + $0xf40] sm:$0xf]  ;;  %v9847_v35 = vor.u32 %v12242_v51, %v9846_v25  ;;  %v12236_v25 = vld [vmem:[%s18630_s1 + $0xe14] sm:$0xf0] }
 0x196   :  { %3831 = vmatpush.bf16.msra.mxu2 %v9711_v47  ;;  %v10062_v47 = vld [vmem:[%s18630_s1 + $0xff0] sm:$0xf] }
 0x197   :  { %3844 = vmatpush.bf16.msra.mxu3 %v9775_v57  ;;  %v9999_v57 = vor.u32 %v12280_v43, %v9998_v40  ;;  %v10063_v62 = vor.u32 %v12296_v48, %v10062_v47  ;;  %v12240_v40 = vld [vmem:[%s18630_s1 + $0xe34] sm:$0xf0]  ;;  %v9902_v43 = vld [vmem:[%s18630_s1 + $0xeb0] sm:$0xf]  ;;  %v10039_v47 = vor.u32 %v12290_v34, %v10038_v33  ;;  %v9814_v33 = vld [vmem:[%s18630_s1 + $0xe00] sm:$0xf] }
 0x198   :  { %3806 = vmatpush.bf16.msra.mxu0 %v9575_v5  ;;  %v10054_v5 = vld [vmem:[%s18630_s1 + $0xfe0] sm:$0xf]  ;;  %v12256_v48 = vld [vmem:[%s18630_s1 + $0xeb4] sm:$0xf0]  ;;  %v12234_v34 = vld [vmem:[%s18630_s1 + $0xe04] sm:$0xf0] }
 0x199   :  { %3819 = vmatpush.bf16.msra.mxu1 %v9639_v7  ;;  %v9863_v7 = vor.u32 %v12246_v60, %v9862_v58  ;;  %v10055_v14 = vor.u32 %v12294_v6, %v10054_v5  ;;  %v9839_v60 = vor.u32 %v12240_v40, %v9838_v39  ;;  %v9903_v61 = vor.u32 %v12256_v48, %v9902_v43  ;;  %v9942_v39 = vld [vmem:[%s18630_s1 + $0xf00] sm:$0xf] }
 0x19a   :  { %3832 = vmatpush.bf16.msra.mxu2 %v9703_v8  ;;  %v9854_v8 = vld [vmem:[%s18630_s1 + $0xe50] sm:$0xf] }
 0x19b   :  { %3845 = vmatpush.bf16.msra.mxu3 %v9767_v13  ;;  %v12260_v13 = vld [vmem:[%s18630_s1 + $0xed4] sm:$0xf0]  ;;  %v9855_v23 = vor.u32 %v12244_v10, %v9854_v8  ;;  %v9958_v8 = vld [vmem:[%s18630_s1 + $0xf20] sm:$0xf] }
 0x19c   :  { %3807 = vmatpush.bf16.msra.mxu0 %v9567_v21  ;;  %v12292_v21 = vld [vmem:[%s18630_s1 + $0xfd4] sm:$0xf0] }
 0x19d   :  { %3820 = vmatpush.bf16.msra.mxu1 %v9631_v27  ;;  %v9919_v27 = vor.u32 %v12260_v13, %v9918_v11  ;;  %v10047_v30 = vor.u32 %v12292_v21, %v10046_v59  ;;  %v10022_v11 = vld [vmem:[%s18630_s1 + $0xfa0] sm:$0xf]  ;;  %v12286_v13 = vld [vmem:[%s18630_s1 + $0xfa4] sm:$0xf0] }
 0x19e   :  { %3833 = vmatpush.bf16.msra.mxu2 %v9695_v28  ;;  %v9983_v28 = vor.u32 %v12276_v16, %v9982_v15  ;;  %v10023_v51 = vor.u32 %v12286_v13, %v10022_v11  ;;  %v9672_v13 = vld [vmem:[%s18630_s1 + $0xce8] sm:$0xf0] }
 0x19f   :  { %3846 = vmatpush.bf16.msra.mxu3 %v9759_v24  ;;  %v12258_v24 = vld [vmem:[%s18630_s1 + $0xec4] sm:$0xf0] }
 0x1a0   :  { %3808 = vmatpush.bf16.msra.mxu0 %v9559_v37  ;;  %v2824_v36 = vpop.f32.mrf.mxu0  ;;  %v9911_v63 = vor.u32 %v12258_v24, %v9910_v53  ;;  %v9975_v37 = vor.u32 %v12274_v32, %v9974_v31  ;;  %v12252_v53 = vld [vmem:[%s18630_s1 + $0xe94] sm:$0xf0]  ;;  %v10014_v24 = vld [vmem:[%s18630_s1 + $0xf90] sm:$0xf] }
 0x1a1   :  { %3821 = vmatpush.bf16.msra.mxu1 %v9623_v45  ;;  %v2825_v45 = vadd.f32 %v2824_v36, %v2171_v29  ;;  %v9950_v29 = vld [vmem:[%s18630_s1 + $0xf10] sm:$0xf]  ;;  %v12284_v31 = vld [vmem:[%s18630_s1 + $0xf94] sm:$0xf0] }
 0x1a2   :  { %3834 = vmatpush.bf16.msra.mxu2 %v9687_v46  ;;  %v2837_v46 = vpop.f32.mrf.mxu1  ;;  %v10015_v43 = vor.u32 %v12284_v31, %v10014_v24  ;;  %v12211_v24 = vld [vmem:[%s18630_s1 + $0xd54] sm:$0xf]  ;;  %v9728_v31 = vld [vmem:[%s18630_s1 + $0xd58] sm:$0xf0] }
 0x1a3   :  { %3847 = vmatpush.bf16.msra.mxu3 %v9751_v50  ;;  %3809 = vmatmul.bf16.vlgmr.msra.gmra.mxu0 %v13084_v19  ;;  %v9966_v50 = vld [vmem:[%s18630_s1 + $0xf30] sm:$0xf]  ;;  %v2838_v58 = vadd.f32 %v2837_v46, %v2825_v45  ;;  %v12266_v45 = vld [vmem:[%s18630_s1 + $0xf04] sm:$0xf0]  ;;  %v10006_v46 = vld [vmem:[%s18630_s1 + $0xf80] sm:$0xf] }
 0x1a4   :  { %3853 = vmatpush.bf16.msrb.mxu0 %v9871_v54  ;;  %3822 = vmatmul.bf16.vlgmr.msra.gmra.mxu1 %v13088_v22  ;;  %v12272_v54 = vld [vmem:[%s18630_s1 + $0xf34] sm:$0xf0] }
 0x1a5   :  { %3866 = vmatpush.bf16.msrb.mxu1 %v9935_v56  ;;  %3835 = vmatmul.bf16.vlgmr.msra.gmra.mxu2 %v13082_v18  ;;  %v10030_v56 = vld [vmem:[%s18630_s1 + $0xfb0] sm:$0xf] }
 0x1a6   :  { %3879 = vmatpush.bf16.msrb.mxu2 %v9999_v57  ;;  %3848 = vmatmul.bf16.vlgmr.msra.gmra.mxu3 %v13086_v20  ;;  %v12288_v57 = vld [vmem:[%s18630_s1 + $0xfb4] sm:$0xf0] }
 0x1a7   :  { %3892 = vmatpush.bf16.msrb.mxu3 %v10063_v62  ;;  %v9967_v62 = vor.u32 %v12272_v54, %v9966_v50  ;;  %v10031_v6 = vor.u32 %v12288_v57, %v10030_v56  ;;  %v12183_v50 = vld [vmem:[%s18630_s1 + $0xc74] sm:$0xf]  ;;  %v9616_v54 = vld [vmem:[%s18630_s1 + $0xc78] sm:$0xf0]  ;;  %v9815_v57 = vor.u32 %v12234_v34, %v9814_v33 }
 0x1a8   :  { %3854 = vmatpush.bf16.msrb.mxu0 %v9863_v7  ;;  %v2850_v5 = vpop.f32.mrf.mxu2  ;;  %v12254_v7 = vld [vmem:[%s18630_s1 + $0xea4] sm:$0xf0]  ;;  %v2826_v16 = vpop.f32.mrf.mxu0  ;;  %v12199_v56 = vld [vmem:[%s18630_s1 + $0xcf4] sm:$0xf]  ;;  %v9792_v33 = vld [vmem:[%s18630_s1 + $0xdd8] sm:$0xf0] }
 0x1a9   :  { %3867 = vmatpush.bf16.msrb.mxu1 %v9927_v9  ;;  %v12270_v9 = vld [vmem:[%s18630_s1 + $0xf24] sm:$0xf0]  ;;  %v2863_v10 = vpop.f32.mrf.mxu3  ;;  %v9895_v59 = vor.u32 %v12254_v7, %v9894_v3  ;;  %v9808_v3 = vld [vmem:[%s18630_s1 + $0xdf8] sm:$0xf0]  ;;  %v9736_v16 = vld [vmem:[%s18630_s1 + $0xd68] sm:$0xf0] }
 0x1aa   :  { %3880 = vmatpush.bf16.msrb.mxu2 %v9991_v26  ;;  %v2851_v26 = vadd.f32 %v2850_v5, %v2838_v58  ;;  %v9959_v21 = vor.u32 %v12270_v9, %v9958_v8  ;;  %v9680_v58 = vld [vmem:[%s18630_s1 + $0xcf8] sm:$0xf0]  ;;  %v12181_v9 = vld [vmem:[%s18630_s1 + $0xc64] sm:$0xf] }
 0x1ab   :  { %3893 = vmatpush.bf16.msrb.mxu3 %v10055_v14  ;;  %v9831_v14 = vor.u32 %v12238_v2, %v9830_v0  ;;  %v9943_v0 = vor.u32 %v12266_v45, %v9942_v39  ;;  %v12231_v2 = vld [vmem:[%s18630_s1 + $0xdf4] sm:$0xf]  ;;  %v9683_v7 = vor.u32 %v12199_v56, %v9680_v58  ;;  %v12193_v39 = vld [vmem:[%s18630_s1 + $0xcc4] sm:$0xf] }
 0x1ac   :  { %3855 = vmatpush.bf16.msrb.mxu0 %v9855_v23  ;;  %v15552_v15 = vadd.f32 %v2863_v10, %v2851_v26  ;;  %v9822_v23 = vld [vmem:[%s18630_s1 + $0xe10] sm:$0xf]  ;;  %v9608_v26 = vld [vmem:[%s18630_s1 + $0xc68] sm:$0xf0]  ;;  %v12197_v10 = vld [vmem:[%s18630_s1 + $0xce4] sm:$0xf]  ;;  %v9811_v11 = vor.u32 %v12231_v2, %v9808_v3 }
 0x1ad   :  { %3868 = vmatpush.bf16.msrb.mxu1 %v9919_v27  ;;  %v9886_v27 = vld [vmem:[%s18630_s1 + $0xe90] sm:$0xf]  ;;  %v9823_v32 = vor.u32 %v12236_v25, %v9822_v23  ;;  %v9611_v23 = vor.u32 %v12181_v9, %v9608_v26  ;;  %v9675_v25 = vor.u32 %v12197_v10, %v9672_v13  ;;  %v12209_v45 = vld [vmem:[%s18630_s1 + $0xd44] sm:$0xf]  ;;  %v9648_v3 = vld [vmem:[%s18630_s1 + $0xcb8] sm:$0xf0] }
 0x1ae   :  { %3881 = vmatpush.bf16.msrb.mxu2 %v9983_v28  ;;  %v2839_v28 = vpop.f32.mrf.mxu1  ;;  %v12173_v13 = vld [vmem:[%s18630_s1 + $0xc24] sm:$0xf] }
 0x1af   :  { %3894 = vmatpush.bf16.msrb.mxu3 %v10047_v30  ;;  %v12268_v30 = vld [vmem:[%s18630_s1 + $0xf14] sm:$0xf0]  ;;  %v12179_v28 = vld [vmem:[%s18630_s1 + $0xc54] sm:$0xf] }
 0x1b0   :  { %3856 = vmatpush.bf16.msrb.mxu0 %v9847_v35  ;;  %v9887_v35 = vor.u32 %v12252_v53, %v9886_v27  ;;  %v9951_v36 = vor.u32 %v12268_v30, %v9950_v29  ;;  %v2852_v40 = vpop.f32.mrf.mxu2  ;;  %v12195_v53 = vld [vmem:[%s18630_s1 + $0xcd4] sm:$0xf]  ;;  %v9664_v30 = vld [vmem:[%s18630_s1 + $0xcd8] sm:$0xf0] }
 0x1b1   :  { %3869 = vmatpush.bf16.msrb.mxu1 %v9911_v63  ;;  %v9878_v63 = vld [vmem:[%s18630_s1 + $0xe80] sm:$0xf]  ;;  %v2865_v48 = vpop.f32.mrf.mxu3 }
 0x1b2   :  { %3882 = vmatpush.bf16.msrb.mxu2 %v9975_v37  ;;  %v12250_v37 = vld [vmem:[%s18630_s1 + $0xe84] sm:$0xf0]  ;;  %v9784_v48 = vld [vmem:[%s18630_s1 + $0xdc8] sm:$0xf0] }
 0x1b3   :  { %3895 = vmatpush.bf16.msrb.mxu3 %v10039_v47  ;;  %v12282_v47 = vld [vmem:[%s18630_s1 + $0xf84] sm:$0xf0] }
 0x1b4   :  { %3857 = vmatpush.bf16.msrb.mxu0 %v9839_v60  ;;  %v12215_v60 = vld [vmem:[%s18630_s1 + $0xd74] sm:$0xf]  ;;  %v10007_v5 = vor.u32 %v12282_v47, %v10006_v46  ;;  %v9720_v46 = vld [vmem:[%s18630_s1 + $0xd48] sm:$0xf0]  ;;  %v12225_v47 = vld [vmem:[%s18630_s1 + $0xdc4] sm:$0xf] }
 0x1b5   :  { %3870 = vmatpush.bf16.msrb.mxu1 %v9903_v61  ;;  %v9744_v61 = vld [vmem:[%s18630_s1 + $0xd78] sm:$0xf0]  ;;  %v9787_v2 = vor.u32 %v12225_v47, %v9784_v48 }
 0x1b6   :  { %3883 = vmatpush.bf16.msrb.mxu2 %v9967_v62  ;;  %v9879_v62 = vor.u32 %v12250_v37, %v9878_v63  ;;  %v9747_v8 = vor.u32 %v12215_v60, %v9744_v61  ;;  %v12177_v63 = vld [vmem:[%s18630_s1 + $0xc44] sm:$0xf]  ;;  %v9592_v37 = vld [vmem:[%s18630_s1 + $0xc48] sm:$0xf0]  ;;  %v12175_v61 = vld [vmem:[%s18630_s1 + $0xc34] sm:$0xf] }
 0x1b7   :  { %3896 = vmatpush.bf16.msrb.mxu3 %v10031_v6  ;;  %v9619_v6 = vor.u32 %v12183_v50, %v9616_v54  ;;  %v9595_v50 = vor.u32 %v12177_v63, %v9592_v37 }
 0x1b8   :  { %3858 = vmatpush.bf16.msrb.mxu0 %v9831_v14  ;;  %v12213_v14 = vld [vmem:[%s18630_s1 + $0xd64] sm:$0xf] }
 0x1b9   :  { %3871 = vmatpush.bf16.msrb.mxu1 %v9895_v59  ;;  %v12229_v59 = vld [vmem:[%s18630_s1 + $0xde4] sm:$0xf]  ;;  %v9739_v27 = vor.u32 %v12213_v14, %v9736_v16  ;;  %v9576_v14 = vld [vmem:[%s18630_s1 + $0xc28] sm:$0xf0] }
 0x1ba   :  { %3884 = vmatpush.bf16.msrb.mxu2 %v9959_v21  ;;  %v9800_v21 = vld [vmem:[%s18630_s1 + $0xde8] sm:$0xf0]  ;;  %v12189_v16 = vld [vmem:[%s18630_s1 + $0xca4] sm:$0xf] }
 0x1bb   :  { %3897 = vmatpush.bf16.msrb.mxu3 %v10023_v51  ;;  %v9600_v51 = vld [vmem:[%s18630_s1 + $0xc58] sm:$0xf0]  ;;  %v9803_v29 = vor.u32 %v12229_v59, %v9800_v21 }
 0x1bc   :  { %3859 = vmatpush.bf16.msrb.mxu0 %v9823_v32  ;;  %v12227_v32 = vld [vmem:[%s18630_s1 + $0xdd4] sm:$0xf]  ;;  %v9603_v34 = vor.u32 %v12179_v28, %v9600_v51  ;;  %v9704_v28 = vld [vmem:[%s18630_s1 + $0xd28] sm:$0xf0]  ;;  %v12221_v51 = vld [vmem:[%s18630_s1 + $0xda4] sm:$0xf] }
 0x1bd   :  { %3872 = vmatpush.bf16.msrb.mxu1 %v9887_v35  ;;  %v9667_v35 = vor.u32 %v12195_v53, %v9664_v30  ;;  %v9795_v40 = vor.u32 %v12227_v32, %v9792_v33  ;;  %v9768_v53 = vld [vmem:[%s18630_s1 + $0xda8] sm:$0xf0]  ;;  %v9579_v30 = vor.u32 %v12173_v13, %v9576_v14  ;;  %v12171_v33 = vld [vmem:[%s18630_s1 + $0xc14] sm:$0xf] }
 0x1be   :  { %3885 = vmatpush.bf16.msrb.mxu2 %v9951_v36  ;;  %v9731_v36 = vor.u32 %v12211_v24, %v9728_v31  ;;  %v9771_v37 = vor.u32 %v12221_v51, %v9768_v53  ;;  %v12277_v51 = vld [vmem:[%s18630_s1 + $0xf64] sm:$0xf]  ;;  %v9992_v53 = vld [vmem:[%s18630_s1 + $0xf68] sm:$0xf0] }
 0x1bf   :  { %3898 = vmatpush.bf16.msrb.mxu3 %v10015_v43  ;;  %v9656_v43 = vld [vmem:[%s18630_s1 + $0xcc8] sm:$0xf0] }
 0x1c0   :  { %3860 = vmatpush.bf16.msrb.mxu0 %v9815_v57  ;;  %v2876_v54 = vpop.f32.mrf.mxu0  ;;  %v9659_v56 = vor.u32 %v12193_v39, %v9656_v43  ;;  %v9723_v57 = vor.u32 %v12209_v45, %v9720_v46  ;;  %v9632_v39 = vld [vmem:[%s18630_s1 + $0xc98] sm:$0xf0]  ;;  %v12219_v45 = vld [vmem:[%s18630_s1 + $0xd94] sm:$0xf]  ;;  %v9560_v46 = vld [vmem:[%s18630_s1 + $0xc08] sm:$0xf0] }
 0x1c1   :  { %3873 = vmatpush.bf16.msrb.mxu1 %v9879_v62  ;;  %v2877_v58 = vadd.f32 %v2876_v54, %v15552_v15  ;;  %v2889_v60 = vpop.f32.mrf.mxu1  ;;  %v9584_v62 = vld [vmem:[%s18630_s1 + $0xc38] sm:$0xf0]  ;;  %v12207_v15 = vld [vmem:[%s18630_s1 + $0xd34] sm:$0xf]  ;;  %v9624_v54 = vld [vmem:[%s18630_s1 + $0xc88] sm:$0xf0] }
 0x1c2   :  { %3886 = vmatpush.bf16.msrb.mxu2 %v9943_v0  ;;  %v12191_v0 = vld [vmem:[%s18630_s1 + $0xcb4] sm:$0xf]  ;;  %v9587_v9 = vor.u32 %v12175_v61, %v9584_v62  ;;  %v9696_v43 = vld [vmem:[%s18630_s1 + $0xd18] sm:$0xf0]  ;;  %v12217_v61 = vld [vmem:[%s18630_s1 + $0xd84] sm:$0xf] }
 0x1c3   :  { %3899 = vmatpush.bf16.msrb.mxu3 %v10007_v5  ;;  %3861 = vmatmul.bf16.vlgmr.msrb.gmra.mxu0 %v13246_v41  ;;  %v9712_v5 = vld [vmem:[%s18630_s1 + $0xd38] sm:$0xf0]  ;;  %v9651_v26 = vor.u32 %v12191_v0, %v9648_v3  ;;  %v9752_v62 = vld [vmem:[%s18630_s1 + $0xd88] sm:$0xf0] }
 0x1c4   :  { %3905 = vmatpush.bf16.msra.mxu0 %v9619_v6  ;;  %3874 = vmatmul.bf16.vlgmr.msrb.gmra.mxu1 %v13250_v44  ;;  %v2890_v6 = vadd.f32 %v2889_v60, %v2877_v58  ;;  %v9715_v10 = vor.u32 %v12207_v15, %v9712_v5  ;;  %v9763_v58 = vor.u32 %v12219_v45, %v9760_v52  ;;  %v9688_v60 = vld [vmem:[%s18630_s1 + $0xd08] sm:$0xf0]  ;;  %v9872_v3 = vld [vmem:[%s18630_s1 + $0xe78] sm:$0xf0]  ;;  %v12263_v15 = vld [vmem:[%s18630_s1 + $0xef4] sm:$0xf] }
 0x1c5   :  { %3918 = vmatpush.bf16.msra.mxu1 %v9683_v7  ;;  %3887 = vmatmul.bf16.vlgmr.msrb.gmra.mxu2 %v13238_v38  ;;  %v12223_v7 = vld [vmem:[%s18630_s1 + $0xdb4] sm:$0xf]  ;;  %v9755_v13 = vor.u32 %v12217_v61, %v9752_v62  ;;  %v12241_v52 = vld [vmem:[%s18630_s1 + $0xe44] sm:$0xf]  ;;  %v9840_v62 = vld [vmem:[%s18630_s1 + $0xe38] sm:$0xf0] }
 0x1c6   :  { %3931 = vmatpush.bf16.msra.mxu2 %v9747_v8  ;;  %3900 = vmatmul.bf16.vlgmr.msrb.gmra.mxu3 %v13248_v42  ;;  %v9776_v8 = vld [vmem:[%s18630_s1 + $0xdb8] sm:$0xf0]  ;;  %v12239_v61 = vld [vmem:[%s18630_s1 + $0xe34] sm:$0xf] }
 0x1c7   :  { %3944 = vmatpush.bf16.msra.mxu3 %v9811_v11  ;;  %v9779_v59 = vor.u32 %v12223_v7, %v9776_v8  ;;  %v12279_v7 = vld [vmem:[%s18630_s1 + $0xf74] sm:$0xf]  ;;  %v10000_v8 = vld [vmem:[%s18630_s1 + $0xf78] sm:$0xf0] }
 0x1c8   :  { %3906 = vmatpush.bf16.msra.mxu0 %v9611_v23  ;;  %v2902_v11 = vpop.f32.mrf.mxu2  ;;  %v2878_v24 = vpop.f32.mrf.mxu0 }
 0x1c9   :  { %3919 = vmatpush.bf16.msra.mxu1 %v9675_v25  ;;  %v2903_v21 = vadd.f32 %v2902_v11, %v2890_v6  ;;  %v2915_v23 = vpop.f32.mrf.mxu3  ;;  %v9640_v25 = vld [vmem:[%s18630_s1 + $0xca8] sm:$0xf0]  ;;  %v9936_v6 = vld [vmem:[%s18630_s1 + $0xef8] sm:$0xf0] }
 0x1ca   :  { %3932 = vmatpush.bf16.msra.mxu2 %v9739_v27  ;;  %v12205_v27 = vld [vmem:[%s18630_s1 + $0xd24] sm:$0xf]  ;;  %v9643_v31 = vor.u32 %v12189_v16, %v9640_v25  ;;  %v10064_v11 = vld [vmem:[%s18630_s1 + $0xff8] sm:$0xf0]  ;;  %v9939_v16 = vor.u32 %v12263_v15, %v9936_v6  ;;  %v12271_v6 = vld [vmem:[%s18630_s1 + $0xf34] sm:$0xf] }
 0x1cb   :  { %3945 = vmatpush.bf16.msra.mxu3 %v9803_v29  ;;  %v2916_v29 = vadd.f32 %v2915_v23, %v2903_v21  ;;  %v9707_v32 = vor.u32 %v12205_v27, %v9704_v28  ;;  %v12245_v21 = vld [vmem:[%s18630_s1 + $0xe64] sm:$0xf]  ;;  %v9864_v23 = vld [vmem:[%s18630_s1 + $0xe68] sm:$0xf0] }
 0x1cc   :  { %3907 = vmatpush.bf16.msra.mxu0 %v9603_v34  ;;  %v9568_v34 = vld [vmem:[%s18630_s1 + $0xc18] sm:$0xf0]  ;;  %v12261_v25 = vld [vmem:[%s18630_s1 + $0xee4] sm:$0xf]  ;;  %v9928_v28 = vld [vmem:[%s18630_s1 + $0xee8] sm:$0xf0]  ;;  %v9867_v24 = vor.u32 %v12245_v21, %v9864_v23 }
 0x1cd   :  { %3920 = vmatpush.bf16.msra.mxu1 %v9667_v35  ;;  %v12187_v35 = vld [vmem:[%s18630_s1 + $0xc94] sm:$0xf]  ;;  %v15763_v63 = vmax.f32 %v2037_v1, %v2916_v29  ;;  %v9571_v55 = vor.u32 %v12171_v33, %v9568_v34  ;;  %v12169_v1 = vld [vmem:[%s18630_s1 + $0xc04] sm:$0xf]  ;;  %v9856_v34 = vld [vmem:[%s18630_s1 + $0xe58] sm:$0xf0] }
 0x1ce   :  { %3933 = vmatpush.bf16.msra.mxu2 %v9731_v36  ;;  %v2891_v36 = vpop.f32.mrf.mxu1  ;;  %v9635_v47 = vor.u32 %v12187_v35, %v9632_v39  ;;  %v9563_v5 = vor.u32 %v12169_v1, %v9560_v46  ;;  %v12293_v29 = vld [vmem:[%s18630_s1 + $0xfe4] sm:$0xf]  ;;  %v12243_v33 = vld [vmem:[%s18630_s1 + $0xe54] sm:$0xf]  ;;  %v9848_v46 = vld [vmem:[%s18630_s1 + $0xe48] sm:$0xf0] }
 0x1cf   :  { %3946 = vmatpush.bf16.msra.mxu3 %v9795_v40  ;;  %v12203_v40 = vld [vmem:[%s18630_s1 + $0xd14] sm:$0xf]  ;;  %v9859_v45 = vor.u32 %v12243_v33, %v9856_v34 }
 0x1d0   :  { %3908 = vmatpush.bf16.msra.mxu0 %v9595_v50  ;;  %v9699_v48 = vor.u32 %v12203_v40, %v9696_v43  ;;  %v12185_v50 = vld [vmem:[%s18630_s1 + $0xc84] sm:$0xf]  ;;  %v12259_v35 = vld [vmem:[%s18630_s1 + $0xed4] sm:$0xf]  ;;  %v9984_v40 = vld [vmem:[%s18630_s1 + $0xf58] sm:$0xf0] }
 0x1d1   :  { %3921 = vmatpush.bf16.msra.mxu1 %v9659_v56  ;;  %v12201_v56 = vld [vmem:[%s18630_s1 + $0xd04] sm:$0xf]  ;;  %v2917_v0 = vpop.f32.mrf.mxu3  ;;  %v12275_v39 = vld [vmem:[%s18630_s1 + $0xf54] sm:$0xf] }
 0x1d2   :  { %3934 = vmatpush.bf16.msra.mxu2 %v9723_v57  ;;  %v2904_v57 = vpop.f32.mrf.mxu2  ;;  %v12291_v43 = vld [vmem:[%s18630_s1 + $0xfd4] sm:$0xf]  ;;  %v9987_v1 = vor.u32 %v12275_v39, %v9984_v40 }
 0x1d3   :  { %3947 = vmatpush.bf16.msra.mxu3 %v9787_v2  ;;  %v12247_v2 = vld [vmem:[%s18630_s1 + $0xe74] sm:$0xf] }
 0x1d4   :  { %3909 = vmatpush.bf16.msra.mxu0 %v9587_v9  ;;  %v9627_v9 = vor.u32 %v12185_v50, %v9624_v54  ;;  %v9875_v14 = vor.u32 %v12247_v2, %v9872_v3  ;;  %v9976_v50 = vld [vmem:[%s18630_s1 + $0xf48] sm:$0xf0]  ;;  %v12289_v54 = vld [vmem:[%s18630_s1 + $0xfc4] sm:$0xf]  ;;  %v12255_v0 = vld [vmem:[%s18630_s1 + $0xeb4] sm:$0xf] }
 0x1d5   :  { %3922 = vmatpush.bf16.msra.mxu1 %v9651_v26  ;;  %v9691_v26 = vor.u32 %v12201_v56, %v9688_v60  ;;  %v9851_v56 = vor.u32 %v12241_v52, %v9848_v46  ;;  %v12283_v52 = vld [vmem:[%s18630_s1 + $0xf94] sm:$0xf] }
 0x1d6   :  { %3935 = vmatpush.bf16.msra.mxu2 %v9715_v10  ;;  %v12295_v10 = vld [vmem:[%s18630_s1 + $0xff4] sm:$0xf] }
 0x1d7   :  { %3948 = vmatpush.bf16.msra.mxu3 %v9779_v59  ;;  %v10003_v59 = vor.u32 %v12279_v7, %v10000_v8  ;;  %v10067_v27 = vor.u32 %v12295_v10, %v10064_v11  ;;  %v9968_v7 = vld [vmem:[%s18630_s1 + $0xf38] sm:$0xf0]  ;;  %v12287_v8 = vld [vmem:[%s18630_s1 + $0xfb4] sm:$0xf]  ;;  %v9843_v10 = vor.u32 %v12239_v61, %v9840_v62 }
 0x1d8   :  { %3910 = vmatpush.bf16.msra.mxu0 %v9579_v30  ;;  %v10056_v30 = vld [vmem:[%s18630_s1 + $0xfe8] sm:$0xf0] }
 0x1d9   :  { %3923 = vmatpush.bf16.msra.mxu1 %v9643_v31  ;;  %v9931_v31 = vor.u32 %v12261_v25, %v9928_v28  ;;  %v10059_v36 = vor.u32 %v12293_v29, %v10056_v30  ;;  %v9896_v25 = vld [vmem:[%s18630_s1 + $0xea8] sm:$0xf0]  ;;  %v12285_v29 = vld [vmem:[%s18630_s1 + $0xfa4] sm:$0xf] }
 0x1da   :  { %3936 = vmatpush.bf16.msra.mxu2 %v9707_v32  ;;  %v9995_v32 = vor.u32 %v12277_v51, %v9992_v53  ;;  %v9960_v28 = vld [vmem:[%s18630_s1 + $0xf28] sm:$0xf0] }
 0x1db   :  { %3949 = vmatpush.bf16.msra.mxu3 %v9771_v37  ;;  %v9920_v37 = vld [vmem:[%s18630_s1 + $0xed8] sm:$0xf0]  ;;  %v10024_v30 = vld [vmem:[%s18630_s1 + $0xfa8] sm:$0xf0] }
 0x1dc   :  { %3911 = vmatpush.bf16.msra.mxu0 %v9571_v55  ;;  %v9923_v55 = vor.u32 %v12259_v35, %v9920_v37  ;;  %v12235_v35 = vld [vmem:[%s18630_s1 + $0xe14] sm:$0xf]  ;;  %v10027_v40 = vor.u32 %v12285_v29, %v10024_v30  ;;  %v12308_v30 = vld [vmem:[%s18633_s3 + $0x58] sm:$0xff] }
 0x1dd   :  { %3924 = vmatpush.bf16.msra.mxu1 %v9635_v47  ;;  %v9912_v47 = vld [vmem:[%s18630_s1 + $0xec8] sm:$0xf0]  ;;  %v12251_v37 = vld [vmem:[%s18630_s1 + $0xe94] sm:$0xf] }
 0x1de   :  { %3937 = vmatpush.bf16.msra.mxu2 %v9699_v48  ;;  %v12273_v48 = vld [vmem:[%s18630_s1 + $0xf44] sm:$0xf] }
 0x1df   :  { %3950 = vmatpush.bf16.msra.mxu3 %v9763_v58  ;;  %v9979_v60 = vor.u32 %v12273_v48, %v9976_v50 }
 0x1e0   :  { %3912 = vmatpush.bf16.msra.mxu0 %v9563_v5  ;;  %v2928_v57 = vpop.f32.mrf.mxu0  ;;  %v9904_v5 = vld [vmem:[%s18630_s1 + $0xeb8] sm:$0xf0] }
 0x1e1   :  { %3925 = vmatpush.bf16.msra.mxu1 %v9627_v9  ;;  %v2941_v3 = vpop.f32.mrf.mxu1  ;;  %v10032_v9 = vld [vmem:[%s18630_s1 + $0xfb8] sm:$0xf0]  ;;  %v9907_v11 = vor.u32 %v12255_v0, %v9904_v5  ;;  %v12302_v5 = vld [vmem:[%s18633_s3 + $0x28] sm:$0xff] }
 0x1e2   :  { %3938 = vmatpush.bf16.msra.mxu2 %v9691_v26  ;;  %v10035_v23 = vor.u32 %v12287_v8, %v10032_v9  ;;  %v12312_v9 = vld [vmem:[%s18633_s3 + $0x78] sm:$0xff] }
 0x1e3   :  { %3951 = vmatpush.bf16.msra.mxu3 %v9755_v13  ;;  %3913 = vmatmul.bf16.vlgmr.msra.gmra.mxu0 %v13084_v19  ;;  %v12257_v19 = vld [vmem:[%s18630_s1 + $0xec4] sm:$0xf]  ;;  %v9971_v13 = vor.u32 %v12271_v6, %v9968_v7 }
 0x1e4   :  { %3957 = vmatpush.bf16.msrb.mxu0 %v9875_v14  ;;  %3926 = vmatmul.bf16.vlgmr.msra.gmra.mxu1 %v13088_v22  ;;  %v9915_v58 = vor.u32 %v12257_v19, %v9912_v47  ;;  %v12237_v14 = vld [vmem:[%s18630_s1 + $0xe24] sm:$0xf] }
 0x1e5   :  { %3970 = vmatpush.bf16.msrb.mxu1 %v9939_v16  ;;  %3939 = vmatmul.bf16.vlgmr.msra.gmra.mxu2 %v13082_v18  ;;  %v10048_v18 = vld [vmem:[%s18630_s1 + $0xfd8] sm:$0xf0]  ;;  %v9832_v16 = vld [vmem:[%s18630_s1 + $0xe28] sm:$0xf0]  ;;  %v12249_v47 = vld [vmem:[%s18630_s1 + $0xe84] sm:$0xf] }
 0x1e6   :  { %3983 = vmatpush.bf16.msrb.mxu2 %v10003_v59  ;;  %3952 = vmatmul.bf16.vlgmr.msra.gmra.mxu3 %v13086_v20  ;;  %v2172_v20 = vperm.slane %v15468_v17, 1  ;;  %v10051_v22 = vor.u32 %v12291_v43, %v10048_v18  ;;  %v10040_v17 = vld [vmem:[%s18630_s1 + $0xfc8] sm:$0xf0]  ;;  %v12253_v59 = vld [vmem:[%s18630_s1 + $0xea4] sm:$0xf] }
 0x1e7   :  { %3996 = vmatpush.bf16.msrb.mxu3 %v10067_v27  ;;  %v10043_v15 = vor.u32 %v12289_v54, %v10040_v17  ;;  %v12269_v27 = vld [vmem:[%s18630_s1 + $0xf24] sm:$0xf]  ;;  %v9899_v33 = vor.u32 %v12253_v59, %v9896_v25  ;;  %v9888_v43 = vld [vmem:[%s18630_s1 + $0xe98] sm:$0xf0]  ;;  %v12267_v18 = vld [vmem:[%s18630_s1 + $0xf14] sm:$0xf] }
 0x1e8   :  { %3958 = vmatpush.bf16.msrb.mxu0 %v9867_v24  ;;  %v2929_v2 = vadd.f32 %v2928_v57, %v2172_v20  ;;  %v2954_v21 = vpop.f32.mrf.mxu2  ;;  %v9835_v24 = vor.u32 %v12237_v14, %v9832_v16  ;;  %v9963_v34 = vor.u32 %v12269_v27, %v9960_v28  ;;  %v9891_v46 = vor.u32 %v12251_v37, %v9888_v43  ;;  %v12233_v20 = vld [vmem:[%s18630_s1 + $0xe04] sm:$0xf]  ;;  %v9880_v54 = vld [vmem:[%s18630_s1 + $0xe88] sm:$0xf0]  ;;  %v12299_v59 = vld [vmem:[%s18633_s3 + $0x10] sm:$0xff] }
 0x1e9   :  { %3971 = vmatpush.bf16.msrb.mxu1 %v9931_v31  ;;  %v2967_v53 = vpop.f32.mrf.mxu3  ;;  %v2943_v39 = vpop.f32.mrf.mxu1  ;;  %v12265_v17 = vld [vmem:[%s18630_s1 + $0xf04] sm:$0xf]  ;;  %v9883_v62 = vor.u32 %v12249_v47, %v9880_v54  ;;  %v12310_v25 = vld [vmem:[%s18633_s3 + $0x68] sm:$0xff]  ;;  %v12328_v43 = vld [vmem:[%s18633_s3 + $0xf8] sm:$0xff] }
 0x1ea   :  { %3984 = vmatpush.bf16.msrb.mxu2 %v9995_v32  ;;  %v2942_v26 = vadd.f32 %v2941_v3, %v2929_v2  ;;  %v2930_v32 = vpop.f32.mrf.mxu0  ;;  %v12304_v3 = vld [vmem:[%s18633_s3 + $0x38] sm:$0xff]  ;;  %v12313_v6 = vld [vmem:[%s18633_s3 + $0x80] sm:$0xff]  ;;  %v12298_v27 = vld [vmem:[%s18633_s3 + $0x8] sm:$0xff] }
 0x1eb   :  { %3997 = vmatpush.bf16.msrb.mxu3 %v10059_v36  ;;  %v9824_v36 = vld [vmem:[%s18630_s1 + $0xe18] sm:$0xf0] }
 0x1ec   :  { %3959 = vmatpush.bf16.msrb.mxu0 %v9859_v45  ;;  %v2955_v51 = vadd.f32 %v2954_v21, %v2942_v26  ;;  %v9952_v45 = vld [vmem:[%s18630_s1 + $0xf18] sm:$0xf0] }
 0x1ed   :  { %3972 = vmatpush.bf16.msrb.mxu1 %v9923_v55  ;;  %v10016_v55 = vld [vmem:[%s18630_s1 + $0xf98] sm:$0xf0]  ;;  %v9955_v19 = vor.u32 %v12267_v18, %v9952_v45 }
 0x1ee   :  { %3985 = vmatpush.bf16.msrb.mxu2 %v9987_v1  ;;  %v2968_v31 = vadd.f32 %v2967_v53, %v2955_v51  ;;  %v9827_v1 = vor.u32 %v12235_v35, %v9824_v36  ;;  %v10019_v50 = vor.u32 %v12283_v52, %v10016_v55  ;;  %v12307_v35 = vld [vmem:[%s18633_s3 + $0x50] sm:$0xff]  ;;  %v12329_v36 = vld [vmem:[%s18633_s3 + $0x100] sm:$0xff] }
 0x1ef   :  { %3998 = vmatpush.bf16.msrb.mxu3 %v10051_v22  ;;  %v9816_v22 = vld [vmem:[%s18630_s1 + $0xe08] sm:$0xf0]  ;;  %v12327_v52 = vld [vmem:[%s18633_s3 + $0xf0] sm:$0xff] }
 0x1f0   :  { %3960 = vmatpush.bf16.msrb.mxu0 %v9851_v56  ;;  %v2956_v48 = vpop.f32.mrf.mxu2  ;;  %v9944_v56 = vld [vmem:[%s18630_s1 + $0xf08] sm:$0xf0]  ;;  %v9819_v61 = vor.u32 %v12233_v20, %v9816_v22  ;;  %v12324_v22 = vld [vmem:[%s18633_s3 + $0xd8] sm:$0xff] }
 0x1f1   :  { %3973 = vmatpush.bf16.msrb.mxu1 %v9915_v58  ;;  %v2969_v57 = vpop.f32.mrf.mxu3  ;;  %v12281_v58 = vld [vmem:[%s18630_s1 + $0xf84] sm:$0xf]  ;;  %v9947_v0 = vor.u32 %v12265_v17, %v9944_v56 }
 0x1f2   :  { %3986 = vmatpush.bf16.msrb.mxu2 %v9979_v60  ;;  %v10008_v60 = vld [vmem:[%s18630_s1 + $0xf88] sm:$0xf0] }
 0x1f3   :  { %3999 = vmatpush.bf16.msrb.mxu3 %v10043_v15  ;;  %v10011_v2 = vor.u32 %v12281_v58, %v10008_v60  ;;  %v12303_v15 = vld [vmem:[%s18633_s3 + $0x30] sm:$0xff] }
 0x1f4   :  { %3961 = vmatpush.bf16.msrb.mxu0 %v9843_v10 }
 0x1f5   :  { %3974 = vmatpush.bf16.msrb.mxu1 %v9907_v11 }
 0x1f6   :  { %3987 = vmatpush.bf16.msrb.mxu2 %v9971_v13  ;;  %v12311_v13 = vld [vmem:[%s18633_s3 + $0x70] sm:$0xff] }
 0x1f7   :  { %4000 = vmatpush.bf16.msrb.mxu3 %v10035_v23 }
 0x1f8   :  { %3962 = vmatpush.bf16.msrb.mxu0 %v9835_v24  ;;  %v12330_v24 = vld [vmem:[%s18633_s3 + $0x108] sm:$0xff] }
 0x1f9   :  { %3975 = vmatpush.bf16.msrb.mxu1 %v9899_v33  ;;  %v16061_v33 = vld [vmem:[%s18632_s2 + $0x6] sm:$0x3] }
 0x1fa   :  { %3988 = vmatpush.bf16.msrb.mxu2 %v9963_v34  ;;  %v3157_v39 = vperm.slane %v16061_v33, 0 }
 0x1fb   :  { %4001 = vmatpush.bf16.msrb.mxu3 %v10027_v40  ;;  %v12306_v40 = vld [vmem:[%s18633_s3 + $0x48] sm:$0xff] }
 0x1fc   :  { %3963 = vmatpush.bf16.msrb.mxu0 %v9827_v1  ;;  %v12326_v1 = vld [vmem:[%s18633_s3 + $0xe8] sm:$0xff] }
 0x1fd   :  { %3976 = vmatpush.bf16.msrb.mxu1 %v9891_v46 }
 0x1fe   :  { %3989 = vmatpush.bf16.msrb.mxu2 %v9955_v19  ;;  %v12325_v19 = vld [vmem:[%s18633_s3 + $0xe0] sm:$0xff] }
 0x1ff   :  { %4002 = vmatpush.bf16.msrb.mxu3 %v10019_v50 }
 0x200   :  { %3964 = vmatpush.bf16.msrb.mxu0 %v9819_v61  ;;  %v2980_v7 = vpop.f32.mrf.mxu0 }
 0x201   :  { %3977 = vmatpush.bf16.msrb.mxu1 %v9883_v62  ;;  %v2993_v8 = vpop.f32.mrf.mxu1 }
 0x202   :  { %3990 = vmatpush.bf16.msrb.mxu2 %v9947_v0 }
 0x203   :  { %4003 = vmatpush.bf16.msrb.mxu3 %v10011_v2  ;;  %3965 = vmatmul.bf16.vlgmr.msrb.gmra.mxu0 %v13246_v41  ;;  %v12301_v41 = vld [vmem:[%s18633_s3 + $0x20] sm:$0xff] }
 0x204   :  { %4095 = vmatpush.bf16.msra.mxu0 %v12304_v3  ;;  %3978 = vmatmul.bf16.vlgmr.msrb.gmra.mxu1 %v13250_v44  ;;  %v2981_v44 = vadd.f32 %v2980_v7, %v2968_v31  ;;  %v12322_v7 = vld [vmem:[%s18633_s3 + $0xc8] sm:$0xff] }
 0x205   :  { %3991 = vmatmul.bf16.vlgmr.msrb.gmra.mxu2 %v13238_v38 }
 0x206   :  { %4004 = vmatmul.bf16.vlgmr.msrb.gmra.mxu3 %v13248_v42  ;;  %4199 = vmatpush.bf16.msra.mxu2 %v12313_v6  ;;  %v2994_v38 = vadd.f32 %v2993_v8, %v2981_v44  ;;  %v12300_v42 = vld [vmem:[%s18633_s3 + $0x18] sm:$0xff]  ;;  %v12305_v6 = vld [vmem:[%s18633_s3 + $0x40] sm:$0xff] }
 0x207   :  { %4115 = vmatpush.bf16.msra.mxu1 %v12305_v6  ;;  %v12369_v6 = vld [vmem:[%s18636_s7 + $0x124] sm:$0xf] }
 0x208   :  { %4096 = vmatpush.bf16.msra.mxu0 %v12303_v15  ;;  %v3006_v26 = vpop.f32.mrf.mxu2  ;;  %v2982_v16 = vpop.f32.mrf.mxu0 }
 0x209   :  { %v3007_v10 = vadd.f32 %v3006_v26, %v2994_v38  ;;  %v3019_v11 = vpop.f32.mrf.mxu3  ;;  %v2995_v21 = vpop.f32.mrf.mxu1 }
 0x20a   :  { %4200 = vmatpush.bf16.msra.mxu2 %v12312_v9  ;;  %v12318_v21 = vld [vmem:[%s18633_s3 + $0xa8] sm:$0xff] }
 0x20b   :  { %v3020_v14 = vadd.f32 %v3019_v11, %v3007_v10  ;;  %4304 = vmatpush.bf16.msrb.mxu1 %v12322_v7  ;;  %v12314_v10 = vld [vmem:[%s18633_s3 + $0x88] sm:$0xff]  ;;  %v12319_v11 = vld [vmem:[%s18633_s3 + $0xb0] sm:$0xff]  ;;  %v10423_v7 = vld [vmem:[%s18636_s7 + $0x138] sm:$0xf0] }
 0x20c   :  { %4097 = vmatpush.bf16.msra.mxu0 %v12302_v5  ;;  %4219 = vmatpush.bf16.msra.mxu3 %v12314_v10  ;;  %v10399_v10 = vld [vmem:[%s18636_s7 + $0x108] sm:$0xf0] }
 0x20d   :  { %v16035_v23 = vmax.f32 %v2038_v12, %v3020_v14  ;;  %v12331_v12 = vld [vmem:[%s18633_s3 + $0x110] sm:$0xff]  ;;  %v3158_v14 = vperm.slane %v16061_v33, 1 }
 0x20e   :  { %4201 = vmatpush.bf16.msra.mxu2 %v12311_v13  ;;  %v12332_v13 = vld [vmem:[%s18633_s3 + $0x118] sm:$0xff] }
 0x210   :  { %4098 = vmatpush.bf16.msra.mxu0 %v12301_v41  ;;  %v3008_v28 = vpop.f32.mrf.mxu2 }
 0x211   :  { %v3021_v51 = vpop.f32.mrf.mxu3  ;;  %v12323_v28 = vld [vmem:[%s18633_s3 + $0xd0] sm:$0xff] }
 0x212   :  { %4202 = vmatpush.bf16.msra.mxu2 %v12310_v25  ;;  %4324 = vmatpush.bf16.msrb.mxu3 %v12323_v28  ;;  %v12360_v28 = vld [vmem:[%s18636_s7 + $0xd4] sm:$0xf0] }
 0x214   :  { %4099 = vmatpush.bf16.msra.mxu0 %v12300_v42  ;;  %v12320_v42 = vld [vmem:[%s18633_s3 + $0xb8] sm:$0xff] }
 0x216   :  { %4203 = vmatpush.bf16.msra.mxu2 %v12309_v4 }
 0x218   :  { %4100 = vmatpush.bf16.msra.mxu0 %v12299_v59 }
 0x21a   :  { %4204 = vmatpush.bf16.msra.mxu2 %v12308_v30 }
 0x21c   :  { %4101 = vmatpush.bf16.msra.mxu0 %v12298_v27  ;;  %v12317_v27 = vld [vmem:[%s18633_s3 + $0xa0] sm:$0xff] }
 0x21e   :  { %4205 = vmatpush.bf16.msra.mxu2 %v12307_v35 }
 0x220   :  { %4102 = vmatpush.bf16.msra.mxu0 %v12297_v49  ;;  %v3810_v53 = vpop.f32.mrf.mxu0  ;;  %v12316_v49 = vld [vmem:[%s18633_s3 + $0x98] sm:$0xff] }
 0x221   :  { %v3823_v29 = vpop.f32.mrf.mxu1  ;;  %v3811_v55 = vadd.f32 %v3810_v53, %v3157_v39 }
 0x222   :  { %4206 = vmatpush.bf16.msra.mxu2 %v12306_v40 }
 0x223   :  { %v3824_v46 = vadd.f32 %v3823_v29, %v3811_v55 }
 0x224   :  { %4409 = vmatpush.bf16.msrb.mxu0 %v12331_v12  ;;  %v12315_v12 = vld [vmem:[%s18633_s3 + $0x90] sm:$0xff] }
 0x226   :  { %4429 = vmatpush.bf16.msrb.mxu2 %v12332_v13 }
 0x228   :  { %v3836_v31 = vpop.f32.mrf.mxu2  ;;  %4410 = vmatpush.bf16.msrb.mxu0 %v12330_v24  ;;  %v3812_v34 = vpop.f32.mrf.mxu0 }
 0x229   :  { %v3849_v32 = vpop.f32.mrf.mxu3  ;;  %v3825_v37 = vpop.f32.mrf.mxu1  ;;  %v3837_v20 = vadd.f32 %v3836_v31, %v3824_v46 }
 0x22b   :  { %v3850_v47 = vadd.f32 %v3849_v32, %v3837_v20  ;;  %v4438_v20 = vld [vmem:[%s18635_s5] sm:$0xff] }
 0x22c   :  { %4411 = vmatpush.bf16.msrb.mxu0 %v12329_v36 }
 0x230   :  { %v3838_v18 = vpop.f32.mrf.mxu2  ;;  %4412 = vmatpush.bf16.msrb.mxu0 %v12328_v43 }
 0x231   :  { %v3851_v45 = vpop.f32.mrf.mxu3 }
 0x234   :  { %4413 = vmatpush.bf16.msrb.mxu0 %v12327_v52 }
 0x238   :  { %4414 = vmatpush.bf16.msrb.mxu0 %v12326_v1 }
 0x23c   :  { %4415 = vmatpush.bf16.msrb.mxu0 %v12325_v19 }
 0x240   :  { %v3862_v48 = vpop.f32.mrf.mxu0  ;;  %4416 = vmatpush.bf16.msrb.mxu0 %v12324_v22  ;;  %v4446_v22 = vunpack.c.l.b16 %v4438_v20 }
 0x241   :  { %v3863_v50 = vadd.f32 %v3862_v48, %v3850_v47  ;;  %v3875_v54 = vpop.f32.mrf.mxu1  ;;  %v4447_v47 = vunpack.c.h.b16 %v4438_v20  ;;  %v10301_v20 = vld [vmem:[%s18636_s7 + $0x30] sm:$0xf] }
 0x242   :  { %v4448_v48 = vpack.c.b16 %v4446_v22, %v4446_v22  ;;  %v12342_v22 = vld [vmem:[%s18636_s7 + $0x44] sm:$0xf0] }
 0x243   :  { %v3876_v17 = vadd.f32 %v3875_v54, %v3863_v50  ;;  %v4449_v50 = vpack.c.b16 %v4447_v47, %v4447_v47 }
 0x244   :  { %v4456_v54 = vsel %vm4454_vm1, %v4448_v48, 0  ;;  %v12339_v48 = vld [vmem:[%s18636_s7 + $0x34] sm:$0xf] }
 0x248   :  { %v3888_v56 = vpop.f32.mrf.mxu2  ;;  %v3864_v61 = vpop.f32.mrf.mxu0 }
 0x249   :  { %v3889_v57 = vadd.f32 %v3888_v56, %v3876_v17  ;;  %v3901_v58 = vpop.f32.mrf.mxu3  ;;  %v3877_v62 = vpop.f32.mrf.mxu1  ;;  %v4459_v17 = vsel %vm4454_vm1, %v4449_v50, 0  ;;  %v12707_v56 = vld [vmem:[%s18634_s4] ss:$0 sm:$0xff]  ;;  %v12378_v61 = vld [vmem:[%s18636_s7 + $0x164] sm:$0xf0] }
 0x24a   :  { %v12375_v62 = vld [vmem:[%s18636_s7 + $0x154] sm:$0xf]  ;;  %v10303_v50 = vld [vmem:[%s18636_s7 + $0x48] sm:$0xf0] }
 0x24b   :  { %v3902_v60 = vadd.f32 %v3901_v58, %v3889_v57  ;;  %v12708_v57 = vld [vmem:[%s18634_s4 + $0x1] ss:$0 sm:$0xff] }
 0x24d   :  { %v4009_v0 = vmax.f32 %v15763_v63, %v3902_v60  ;;  %v12321_v63 = vld [vmem:[%s18633_s3 + $0xc0] sm:$0xff]  ;;  %v10445_v60 = vld [vmem:[%s18636_s7 + $0x150] sm:$0xf] }
 0x24e   :  { %4305 = vmatpush.bf16.msrb.mxu1 %v12321_v63 }
 0x24f   :  { %v4011_v2 = vmax.f32 %v4009_v0, 0.0  ;;  %v10446_v0 = vor.u32 %v12378_v61, %v10445_v60  ;;  %v10306_v61 = vor.u32 %v12339_v48, %v10303_v50  ;;  %v10333_v48 = vld [vmem:[%s18636_s7 + $0x68] sm:$0xf]  ;;  %v12349_v50 = vld [vmem:[%s18636_s7 + $0x7c] sm:$0xf0] }
 0x250   :  { %v3890_v3 = vpop.f32.mrf.mxu2 }
 0x251   :  { %v4013_v15 = vpack.c.bf16 %v4011_v2, %v4011_v2  ;;  %v3903_v5 = vpop.f32.mrf.mxu3  ;;  %v10447_v2 = vld [vmem:[%s18636_s7 + $0x168] sm:$0xf0]  ;;  %v10421_v3 = vld [vmem:[%s18636_s7 + $0x120] sm:$0xf] }
 0x252   :  { %4306 = vmatpush.bf16.msrb.mxu1 %v12320_v42  ;;  %v10450_v5 = vor.u32 %v12375_v62, %v10447_v2  ;;  %v12366_v42 = vld [vmem:[%s18636_s7 + $0x104] sm:$0xf0]  ;;  %v10277_v62 = vld [vmem:[%s18636_s7] sm:$0xf]  ;;  %v12379_v2 = vld [vmem:[%s18636_s7 + $0x16c] sm:$0xf0] }
 0x253   :  { %4103 = vmatmul.bf16.vlgmr.msra.gmra.mxu0 %v4013_v15  ;;  %4207 = vmatmul.bf16.vlgmr.msra.gmra.mxu2 %v4013_v15 }
 0x254   :  { %4832 = vmatpush.bf16.msra.mxu2 %v10446_v0  ;;  %4858 = vmatpush.bf16.msra.mxu0 %v10450_v5  ;;  %v12336_v0 = vld [vmem:[%s18636_s7 + $0x14] sm:$0xf0]  ;;  %v10279_v5 = vld [vmem:[%s18636_s7 + $0x18] sm:$0xf0] }
 0x256   :  { %4307 = vmatpush.bf16.msrb.mxu1 %v12319_v11 }
 0x25a   :  { %4308 = vmatpush.bf16.msrb.mxu1 %v12318_v21  ;;  %v10373_v21 = vld [vmem:[%s18636_s7 + $0xc0] sm:$0xf] }
 0x25e   :  { %4309 = vmatpush.bf16.msrb.mxu1 %v12317_v27 }
 0x260   :  { %v3914_v41 = vpop.f32.mrf.mxu0 }
 0x261   :  { %v3927_v44 = vpop.f32.mrf.mxu1  ;;  %v3915_v25 = vadd.f32 %v3914_v41, %v3158_v14 }
 0x262   :  { %4310 = vmatpush.bf16.msrb.mxu1 %v12316_v49  ;;  %v12384_v49 = vld [vmem:[%s18636_s7 + $0x194] sm:$0xf0] }
 0x263   :  { %4417 = vmatmul.bf16.vlgmr.msrb.gmra.mxu0 %v4013_v15  ;;  %v3928_v51 = vadd.f32 %v3927_v44, %v3915_v25 }
 0x266   :  { %4311 = vmatpush.bf16.msrb.mxu1 %v12315_v12  ;;  %v10375_v12 = vld [vmem:[%s18636_s7 + $0xd8] sm:$0xf0] }
 0x268   :  { %v3940_v8 = vpop.f32.mrf.mxu2  ;;  %v3916_v9 = vpop.f32.mrf.mxu0 }
 0x269   :  { %v3953_v38 = vpop.f32.mrf.mxu3  ;;  %v3929_v26 = vpop.f32.mrf.mxu1  ;;  %v3941_v4 = vadd.f32 %v3940_v8, %v3928_v51  ;;  %v10426_v8 = vor.u32 %v12369_v6, %v10423_v7  ;;  %v10469_v51 = vld [vmem:[%s18636_s7 + $0x180] sm:$0xf]  ;;  %v12376_v6 = vld [vmem:[%s18636_s7 + $0x15c] sm:$0xf]  ;;  %v10278_v7 = vor.u32 %v12336_v0, %v10277_v62  ;;  %v10309_v62 = vld [vmem:[%s18636_s7 + $0x38] sm:$0xf] }
 0x26a   :  { %v12363_v26 = vld [vmem:[%s18636_s7 + $0xf4] sm:$0xf]  ;;  %v12343_v0 = vld [vmem:[%s18636_s7 + $0x4c] sm:$0xf0] }
 0x26b   :  { %v3954_v53 = vadd.f32 %v3953_v38, %v3941_v4  ;;  %v10397_v38 = vld [vmem:[%s18636_s7 + $0xf0] sm:$0xf]  ;;  %4859 = vmatpush.bf16.msra.mxu0 %v10426_v8  ;;  %v10402_v27 = vor.u32 %v12363_v26, %v10399_v10  ;;  %v12357_v4 = vld [vmem:[%s18636_s7 + $0xc4] sm:$0xf]  ;;  %v10429_v10 = vld [vmem:[%s18636_s7 + $0x128] sm:$0xf] }
 0x26f   :  { %4860 = vmatpush.bf16.msra.mxu0 %v10402_v27  ;;  %v12370_v27 = vld [vmem:[%s18636_s7 + $0x12c] sm:$0xf] }
 0x270   :  { %v3942_v16 = vpop.f32.mrf.mxu2 }
 0x271   :  { %v3955_v59 = vpop.f32.mrf.mxu3 }
 0x272   :  { %v10398_v59 = vor.u32 %v12366_v42, %v10397_v38 }
 0x280   :  { %v3966_v29 = vpop.f32.mrf.mxu0 }
 0x281   :  { %v3979_v30 = vpop.f32.mrf.mxu1  ;;  %v3967_v24 = vadd.f32 %v3966_v29, %v3954_v53  ;;  %v10470_v53 = vor.u32 %v12384_v49, %v10469_v51  ;;  %v10374_v29 = vor.u32 %v12360_v28, %v10373_v21  ;;  %v12367_v21 = vld [vmem:[%s18636_s7 + $0x10c] sm:$0xf0]  ;;  %v10431_v28 = vld [vmem:[%s18636_s7 + $0x140] sm:$0xf0]  ;;  %v12371_v51 = vld [vmem:[%s18636_s7 + $0x134] sm:$0xf] }
 0x282   :  { %v10434_v49 = vor.u32 %v12370_v27, %v10431_v28 }
 0x283   :  { %v3980_v31 = vadd.f32 %v3979_v30, %v3967_v24  ;;  %v10378_v30 = vor.u32 %v12357_v4, %v10375_v12  ;;  %v10349_v24 = vld [vmem:[%s18636_s7 + $0x90] sm:$0xf]  ;;  %v10439_v4 = vld [vmem:[%s18636_s7 + $0x148] sm:$0xf0] }
 0x284   :  { %v10442_v12 = vor.u32 %v12371_v51, %v10439_v4  ;;  %v10461_v51 = vld [vmem:[%s18636_s7 + $0x160] sm:$0xf]  ;;  %v12380_v4 = vld [vmem:[%s18636_s7 + $0x174] sm:$0xf0] }
 0x285   :  { %4861 = vmatpush.bf16.msra.mxu0 %v10378_v30  ;;  %v10381_v30 = vld [vmem:[%s18636_s7 + $0xc8] sm:$0xf] }
 0x288   :  { %v3992_v32 = vpop.f32.mrf.mxu2  ;;  %v3968_v35 = vpop.f32.mrf.mxu0 }
 0x289   :  { %v3993_v33 = vadd.f32 %v3992_v32, %v3980_v31  ;;  %v4005_v34 = vpop.f32.mrf.mxu3  ;;  %v3981_v36 = vpop.f32.mrf.mxu1  ;;  %v12354_v31 = vld [vmem:[%s18636_s7 + $0xa4] sm:$0xf0] }
 0x28b   :  { %v4006_v37 = vadd.f32 %v4005_v34, %v3993_v33  ;;  %v12351_v33 = vld [vmem:[%s18636_s7 + $0x94] sm:$0xf]  ;;  %v10351_v34 = vld [vmem:[%s18636_s7 + $0xa8] sm:$0xf0] }
 0x28d   :  { %v4010_v39 = vmax.f32 %v16035_v23, %v4006_v37  ;;  %v10350_v37 = vor.u32 %v12354_v31, %v10349_v24  ;;  %v12361_v31 = vld [vmem:[%s18636_s7 + $0xdc] sm:$0xf0] }
 0x28f   :  { %v4012_v40 = vmax.f32 %v4010_v39, 0.0  ;;  %v12710_v39 = vld [vmem:[%s18634_s4 + $0x2] ss:$0 sm:$0xff] }
 0x290   :  { %v3994_v43 = vpop.f32.mrf.mxu2 }
 0x291   :  { %v4014_v18 = vpack.c.bf16 %v4012_v40, %v4012_v40  ;;  %v4007_v45 = vpop.f32.mrf.mxu3  ;;  %v10354_v40 = vor.u32 %v12351_v33, %v10351_v34  ;;  %v10325_v43 = vld [vmem:[%s18636_s7 + $0x60] sm:$0xf]  ;;  %v12364_v33 = vld [vmem:[%s18636_s7 + $0xfc] sm:$0xf]  ;;  %v10407_v34 = vld [vmem:[%s18636_s7 + $0x110] sm:$0xf0] }
 0x292   :  { %v12345_v45 = vld [vmem:[%s18636_s7 + $0x64] sm:$0xf] }
 0x293   :  { %10104 = vmatmul.msk.bf16.vlgmr.msra.gmra.mxu1 %vm4091_vm0, %v4014_v18  ;;  %10160 = vmatmul.msk.bf16.vlgmr.msra.gmra.mxu3 %vm4091_vm0, %v4014_v18 }
 0x294   :  { %10272 = vmatmul.msk.bf16.vlgmr.msrb.gmra.mxu2 %vm4091_vm0, %v4014_v18  ;;  %4468 = vmatpush.bf16.msra.mxu3 %v4456_v54 }
 0x295   :  { %4481 = vmatpush.bf16.msra.mxu1 %v4459_v17  ;;  %4862 = vmatpush.bf16.msra.mxu0 %v10354_v40 }
 0x2a3   :  { %4312 = vmatmul.bf16.vlgmr.msrb.gmra.mxu1 %v4013_v15  ;;  %10216 = vmatmul.msk.bf16.vlgmr.msrb.gmra.mxu3 %vm4091_vm0, %v4014_v18  ;;  %v12372_v15 = vld [vmem:[%s18636_s7 + $0x134] sm:$0xf0] }
 0x2a4   :  { %v10422_v41 = vor.u32 %v12372_v15, %v10421_v3  ;;  %4852 = vmatpush.bf16.msrb.mxu3 %v10470_v53  ;;  %v12348_v18 = vld [vmem:[%s18636_s7 + $0x74] sm:$0xf0]  ;;  %v12333_v15 = vld [vmem:[%s18636_s7 + $0x4] sm:$0xf] }
 0x2a5   :  { %v12381_v53 = vld [vmem:[%s18636_s7 + $0x184] sm:$0xf] }
 0x2a6   :  { %4833 = vmatpush.bf16.msra.mxu2 %v10422_v41  ;;  %v10455_v41 = vld [vmem:[%s18636_s7 + $0x170] sm:$0xf0] }
 0x2aa   :  { %4834 = vmatpush.bf16.msra.mxu2 %v10398_v59  ;;  %v10405_v59 = vld [vmem:[%s18636_s7 + $0xf8] sm:$0xf] }
 0x2ae   :  { %4835 = vmatpush.bf16.msra.mxu2 %v10374_v29  ;;  %v10471_v29 = vld [vmem:[%s18636_s7 + $0x198] sm:$0xf0] }
 0x2af   :  { %v10474_v24 = vor.u32 %v12381_v53, %v10471_v29  ;;  %v10479_v53 = vld [vmem:[%s18636_s7 + $0x1a0] sm:$0xf0] }
 0x2b1   :  { %4878 = vmatpush.bf16.msrb.mxu1 %v10474_v24  ;;  %v10462_v24 = vor.u32 %v12380_v4, %v10461_v51  ;;  %v10915_v4 = vld [vmem:[%s18638_s9 + $0x340] sm:$0xf] }
 0x2b2   :  { %4836 = vmatpush.bf16.msra.mxu2 %v10350_v37  ;;  %v10415_v37 = vld [vmem:[%s18636_s7 + $0x118] sm:$0xf0] }
 0x2d0   :  { %v4104_v52 = vpop.f32.mrf.mxu0 }
 0x2d1   :  { %v4105_v44 = vadd.f32 %v12707_v56, %v4104_v52  ;;  %v10327_v52 = vld [vmem:[%s18636_s7 + $0x78] sm:$0xf0] }
 0x2d6   :  { %v4208_v55 = vpop.f32.mrf.mxu2 }
 0x2d7   :  { %v4209_v63 = vadd.f32 %v12708_v57, %v4208_v55  ;;  %v12709_v55 = vld [vmem:[%s18634_s4 + $0x3] ss:$0 sm:$0xff]  ;;  %v10302_v57 = vor.u32 %v12342_v22, %v10301_v20  ;;  %v10391_v22 = vld [vmem:[%s18636_s7 + $0xe8] sm:$0xf0] }
 0x2d8   :  { %v4106_v1 = vpop.f32.mrf.mxu0 }
 0x2d9   :  { %v10326_v1 = vor.u32 %v12348_v18, %v10325_v43  ;;  %v12385_v43 = vld [vmem:[%s18636_s7 + $0x19c] sm:$0xf0]  ;;  %v10357_v18 = vld [vmem:[%s18636_s7 + $0x98] sm:$0xf] }
 0x2db   :  { %4837 = vmatpush.bf16.msra.mxu2 %v10326_v1  ;;  %v12358_v1 = vld [vmem:[%s18636_s7 + $0xcc] sm:$0xf] }
 0x2de   :  { %v4210_v46 = vpop.f32.mrf.mxu2 }
 0x2df   :  { %4838 = vmatpush.bf16.msra.mxu2 %v10302_v57  ;;  %v12353_v57 = vld [vmem:[%s18636_s7 + $0xa4] sm:$0xf] }
 0x2e0   :  { %v16131_v19 = vpop.f32.mrf.mxu0 }
 0x2e1   :  { %v4419_v54 = vadd.f32 %v12709_v55, %v16131_v19  ;;  %v10453_v19 = vld [vmem:[%s18636_s7 + $0x158] sm:$0xf] }
 0x2e2   :  { %v10454_v42 = vor.u32 %v12379_v2, %v10453_v19  ;;  %v10310_v19 = vor.u32 %v12343_v0, %v10309_v62  ;;  %v12346_v2 = vld [vmem:[%s18636_s7 + $0x6c] sm:$0xf]  ;;  %v12575_v62 = vld [vmem:[%s18638_s9 + $0x5dc] sm:$0xf0] }
 0x2e3   :  { %4839 = vmatpush.bf16.msra.mxu2 %v10278_v7  ;;  %v10285_v7 = vld [vmem:[%s18636_s7 + $0x8] sm:$0xf] }
 0x2e8   :  { %v4420_v23 = vpop.f32.mrf.mxu0 }
 0x2e9   :  { %v10330_v23 = vor.u32 %v12345_v45, %v10327_v52  ;;  %v12355_v45 = vld [vmem:[%s18636_s7 + $0xac] sm:$0xf0] }
 0x2ea   :  { %v10358_v55 = vor.u32 %v12355_v45, %v10357_v18  ;;  %v10413_v45 = vld [vmem:[%s18636_s7 + $0x100] sm:$0xf] }
 0x2eb   :  { %4863 = vmatpush.bf16.msra.mxu0 %v10330_v23  ;;  %v12359_v23 = vld [vmem:[%s18636_s7 + $0xd4] sm:$0xf] }
 0x2ef   :  { %4864 = vmatpush.bf16.msra.mxu0 %v10306_v61 }
 0x310   :  { %v4117_v58 = vpop.f32.mrf.mxu1 }
 0x311   :  { %v4118_v11 = vadd.f32 %v4117_v58, %v4105_v44  ;;  %v12377_v44 = vld [vmem:[%s18636_s7 + $0x164] sm:$0xf] }
 0x316   :  { %v4221_v9 = vpop.f32.mrf.mxu3 }
 0x317   :  { %v4222_v13 = vadd.f32 %v4221_v9, %v4209_v63  ;;  %v4431_v14 = vpop.f32.mrf.mxu2  ;;  %v10463_v63 = vld [vmem:[%s18636_s7 + $0x178] sm:$0xf0]  ;;  %v10282_v9 = vor.u32 %v12333_v15, %v10279_v5  ;;  %v12347_v15 = vld [vmem:[%s18636_s7 + $0x74] sm:$0xf] }
 0x318   :  { %v4119_v16 = vpop.f32.mrf.mxu1  ;;  %v4432_v58 = vadd.f32 %v4431_v14, %v4419_v54  ;;  %v10466_v14 = vor.u32 %v12377_v44, %v10463_v63  ;;  %v10334_v54 = vor.u32 %v12349_v50, %v10333_v48  ;;  %v10365_v48 = vld [vmem:[%s18636_s7 + $0xa0] sm:$0xf]  ;;  %v12356_v50 = vld [vmem:[%s18636_s7 + $0xb4] sm:$0xf0] }
 0x319   :  { %v4225_v25 = vmax.f32 %v4118_v11, %v4222_v13  ;;  %v12373_v11 = vld [vmem:[%s18636_s7 + $0x13c] sm:$0xf0]  ;;  %v10458_v13 = vor.u32 %v12376_v6, %v10455_v41  ;;  %4865 = vmatpush.bf16.msra.mxu0 %v10282_v9  ;;  %v10343_v6 = vld [vmem:[%s18636_s7 + $0x88] sm:$0xf0] }
 0x31a   :  { %v10430_v16 = vor.u32 %v12373_v11, %v10429_v10  ;;  %v12337_v41 = vld [vmem:[%s18636_s7 + $0x1c] sm:$0xf0]  ;;  %v10346_v44 = vor.u32 %v12347_v15, %v10343_v6  ;;  %v12334_v11 = vld [vmem:[%s18636_s7 + $0xc] sm:$0xf] }
 0x31b   :  { %4910 = vmatpush.bf16.msrb.mxu2 %v10458_v13  ;;  %v10286_v63 = vor.u32 %v12337_v41, %v10285_v7  ;;  %v10287_v13 = vld [vmem:[%s18636_s7 + $0x20] sm:$0xf0]  ;;  %v11203_v15 = vld [vmem:[%s18638_s9 + $0x580] sm:$0xf]  ;;  %v10293_v7 = vld [vmem:[%s18636_s7 + $0x10] sm:$0xf] }
 0x31c   :  { %v12338_v41 = vld [vmem:[%s18636_s7 + $0x24] sm:$0xf0] }
 0x31d   :  { %4962 = vmatpush.bf16.msrb.mxu0 %v10466_v14  ;;  %v12335_v14 = vld [vmem:[%s18636_s7 + $0x14] sm:$0xf] }
 0x31e   :  { %v4223_v32 = vpop.f32.mrf.mxu3 }
 0x31f   :  { %v4433_v35 = vpop.f32.mrf.mxu2  ;;  %4911 = vmatpush.bf16.msrb.mxu2 %v10434_v49  ;;  %v10382_v32 = vor.u32 %v12361_v31, %v10381_v30 }
 0x320   :  { %v4313_v36 = vpop.f32.mrf.mxu1  ;;  %v12365_v35 = vld [vmem:[%s18636_s7 + $0x104] sm:$0xf] }
 0x321   :  { %v4314_v46 = vadd.f32 %v12710_v39, %v4313_v36  ;;  %4963 = vmatpush.bf16.msrb.mxu0 %v10442_v12  ;;  %v10410_v36 = vor.u32 %v12364_v33, %v10407_v34  ;;  %v10477_v39 = vld [vmem:[%s18636_s7 + $0x188] sm:$0xf]  ;;  %v10418_v40 = vor.u32 %v12365_v35, %v10415_v37  ;;  %v12382_v12 = vld [vmem:[%s18636_s7 + $0x18c] sm:$0xf]  ;;  %v10437_v33 = vld [vmem:[%s18636_s7 + $0x130] sm:$0xf] }
 0x322   :  { %v10478_v52 = vor.u32 %v12385_v43, %v10477_v39  ;;  %v10482_v31 = vor.u32 %v12382_v12, %v10479_v53  ;;  %v12374_v34 = vld [vmem:[%s18636_s7 + $0x144] sm:$0xf0]  ;;  %v12383_v37 = vld [vmem:[%s18636_s7 + $0x194] sm:$0xf]  ;;  %v10487_v39 = vld [vmem:[%s18636_s7 + $0x1a8] sm:$0xf0] }
 0x323   :  { %4912 = vmatpush.bf16.msrb.mxu2 %v10410_v36  ;;  %v10438_v43 = vor.u32 %v12374_v34, %v10437_v33  ;;  %v12495_v12 = vld [vmem:[%s18638_s9 + $0x35c] sm:$0xf0] }
 0x324   :  { %v11107_v53 = vld [vmem:[%s18638_s9 + $0x4c0] sm:$0xf]  ;;  %v10916_v33 = vor.u32 %v12495_v12, %v10915_v4 }
 0x325   :  { %4964 = vmatpush.bf16.msrb.mxu0 %v10418_v40  ;;  %v11427_v4 = vld [vmem:[%s18638_s9 + $0x740] sm:$0xf] }
 0x326   :  { %v4326_v47 = vpop.f32.mrf.mxu3  ;;  %v12623_v12 = vld [vmem:[%s18638_s9 + $0x75c] sm:$0xf0] }
 0x327   :  { %v4327_v17 = vadd.f32 %v4326_v47, %v4314_v46  ;;  %v10383_v46 = vld [vmem:[%s18636_s7 + $0xe0] sm:$0xf0]  ;;  %v10394_v47 = vor.u32 %v12359_v23, %v10391_v22  ;;  %v10389_v23 = vld [vmem:[%s18636_s7 + $0xd0] sm:$0xf] }
 0x328   :  { %v4315_v56 = vpop.f32.mrf.mxu1  ;;  %v10386_v20 = vor.u32 %v12358_v1, %v10383_v46 }
 0x329   :  { %v4330_v60 = vmax.f32 %v4225_v25, %v4327_v17  ;;  %v10406_v25 = vor.u32 %v12367_v21, %v10405_v59  ;;  %4965 = vmatpush.bf16.msrb.mxu0 %v10394_v47  ;;  %v12352_v17 = vld [vmem:[%s18636_s7 + $0x9c] sm:$0xf]  ;;  %v10359_v56 = vld [vmem:[%s18636_s7 + $0xb0] sm:$0xf0]  ;;  %v10295_v59 = vld [vmem:[%s18636_s7 + $0x28] sm:$0xf0] }
 0x32a   :  { %4913 = vmatpush.bf16.msrb.mxu2 %v10386_v20  ;;  %v4439_v21 = vld [vmem:[%s18637_s6] sm:$0x3]  ;;  %v12362_v20 = vld [vmem:[%s18636_s7 + $0xe4] sm:$0xf0] }
 0x32b   :  { %v4435_v3 = vmax.f32 %v4330_v60, %v4432_v58  ;;  %v10362_v58 = vor.u32 %v12352_v17, %v10359_v56  ;;  %v10367_v60 = vld [vmem:[%s18636_s7 + $0xb8] sm:$0xf0]  ;;  %v4442_v27 = vperm.slane %v4439_v21, 1  ;;  %v4441_v30 = vperm.slane %v4439_v21, 0  ;;  %v12386_v17 = vld [vmem:[%s18636_s7 + $0x1a4] sm:$0xf0] }
 0x32c   :  { %v10370_v61 = vor.u32 %v12353_v57, %v10367_v60  ;;  %v10390_v47 = vor.u32 %v12362_v20, %v10389_v23  ;;  %v10366_v56 = vor.u32 %v12356_v50, %v10365_v48  ;;  %v12350_v60 = vld [vmem:[%s18636_s7 + $0x84] sm:$0xf0]  ;;  %v12551_v21 = vld [vmem:[%s18638_s9 + $0x51c] sm:$0xf0] }
 0x32d   :  { %v4436_v8 = vmax.f32 %v4435_v3, 0.0  ;;  %v10335_v3 = vld [vmem:[%s18636_s7 + $0x80] sm:$0xf0]  ;;  %v10595_v23 = vld [vmem:[%s18638_s9 + $0xc0] sm:$0xf] }
 0x32e   :  { %v4328_v38 = vpop.f32.mrf.mxu3  ;;  %4914 = vmatpush.bf16.msrb.mxu2 %v10362_v58  ;;  %4966 = vmatpush.bf16.msrb.mxu0 %v10370_v61  ;;  %v10338_v5 = vor.u32 %v12346_v2, %v10335_v3  ;;  %v10341_v58 = vld [vmem:[%s18636_s7 + $0x70] sm:$0xf]  ;;  %v11235_v61 = vld [vmem:[%s18638_s9 + $0x5c0] sm:$0xf]  ;;  %v12344_v2 = vld [vmem:[%s18636_s7 + $0x54] sm:$0xf0] }
 0x32f   :  { %v4437_v26 = vpack.c.bf16 %v4436_v8, %v4436_v8  ;;  %v12340_v8 = vld [vmem:[%s18636_s7 + $0x3c] sm:$0xf]  ;;  %v10311_v38 = vld [vmem:[%s18636_s7 + $0x50] sm:$0xf0]  ;;  %v10342_v0 = vor.u32 %v12350_v60, %v10341_v58  ;;  %v11236_v3 = vor.u32 %v12575_v62, %v11235_v61  ;;  %v12415_v20 = vld [vmem:[%s18638_s9 + $0xdc] sm:$0xf0] }
 0x330   :  { %v10314_v9 = vor.u32 %v12340_v8, %v10311_v38  ;;  %v12511_v8 = vld [vmem:[%s18638_s9 + $0x3dc] sm:$0xf0] }
 0x331   :  { %10273 = vmatmul.msk.bf16.vlgmr.msra.gmra.mxu3 %vm4450_vm2, %v4437_v26  ;;  %10274 = vmatmul.msk.bf16.vlgmr.msra.gmra.mxu1 %vm4450_vm2, %v4437_v26  ;;  %v10319_v26 = vld [vmem:[%s18636_s7 + $0x58] sm:$0xf0]  ;;  %v11171_v38 = vld [vmem:[%s18638_s9 + $0x540] sm:$0xf] }
 0x332   :  { %4884 = vmatpush.bf16.msra.mxu3 %v10454_v42  ;;  %4904 = vmatpush.bf16.msra.mxu1 %v10478_v52  ;;  %v12341_v42 = vld [vmem:[%s18636_s7 + $0x44] sm:$0xf]  ;;  %v12368_v52 = vld [vmem:[%s18636_s7 + $0x114] sm:$0xf0]  ;;  %v10563_v48 = vld [vmem:[%s18638_s9 + $0x80] sm:$0xf] }
 0x333   :  { %4915 = vmatpush.bf16.msrb.mxu2 %v10338_v5  ;;  %4967 = vmatpush.bf16.msrb.mxu0 %v10346_v44  ;;  %v10322_v10 = vor.u32 %v12341_v42, %v10319_v26  ;;  %v10414_v46 = vor.u32 %v12368_v52, %v10413_v45  ;;  %v12567_v5 = vld [vmem:[%s18638_s9 + $0x59c] sm:$0xf0] }
 0x334   :  { %v11204_v44 = vor.u32 %v12567_v5, %v11203_v15  ;;  %v12559_v42 = vld [vmem:[%s18638_s9 + $0x55c] sm:$0xf0] }
 0x335   :  { %v10723_v26 = vld [vmem:[%s18638_s9 + $0x1c0] sm:$0xf] }
 0x336   :  { %4885 = vmatpush.bf16.msra.mxu3 %v10430_v16  ;;  %v10290_v16 = vor.u32 %v12334_v11, %v10287_v13  ;;  %v11172_v13 = vor.u32 %v12559_v42, %v11171_v38  ;;  %v12407_v50 = vld [vmem:[%s18638_s9 + $0x9c] sm:$0xf0] }
 0x337   :  { %4916 = vmatpush.bf16.msrb.mxu2 %v10314_v9  ;;  %4968 = vmatpush.bf16.msrb.mxu0 %v10322_v10  ;;  %v10294_v9 = vor.u32 %v12338_v41, %v10293_v7  ;;  %v12447_v10 = vld [vmem:[%s18638_s9 + $0x1dc] sm:$0xf0]  ;;  %v10725_v41 = vld [vmem:[%s18638_s9 + $0x1e0] sm:$0xf0] }
 0x338   :  { %v10851_v58 = vld [vmem:[%s18638_s9 + $0x2c0] sm:$0xf] }
 0x339   :  { %v11491_v60 = vld [vmem:[%s18638_s9 + $0x7c0] sm:$0xf] }
 0x33a   :  { %4886 = vmatpush.bf16.msra.mxu3 %v10406_v25  ;;  %v10298_v25 = vor.u32 %v12335_v14, %v10295_v59  ;;  %v10947_v14 = vld [vmem:[%s18638_s9 + $0x380] sm:$0xf] }
 0x33b   :  { %4917 = vmatpush.bf16.msrb.mxu2 %v10290_v16  ;;  %v12503_v16 = vld [vmem:[%s18638_s9 + $0x39c] sm:$0xf0] }
 0x33c   :  { %4969 = vmatpush.bf16.msrb.mxu0 %v10298_v25  ;;  %v11139_v59 = vld [vmem:[%s18638_s9 + $0x500] sm:$0xf]  ;;  %v10724_v25 = vor.u32 %v12447_v10, %v10723_v26  ;;  %v10948_v51 = vor.u32 %v12503_v16, %v10947_v14  ;;  %v12435_v14 = vld [vmem:[%s18638_s9 + $0x184] sm:$0xf] }
 0x33d   :  { %v12639_v62 = vld [vmem:[%s18638_s9 + $0x7dc] sm:$0xf0]  ;;  %v10693_v16 = vld [vmem:[%s18638_s9 + $0x1a0] sm:$0xf0] }
 0x33e   :  { %4887 = vmatpush.bf16.msra.mxu3 %v10382_v32  ;;  %v10499_v15 = vld [vmem:[%s18638_s9] sm:$0xf] }
 0x33f   :  { %v12391_v5 = vld [vmem:[%s18638_s9 + $0x1c] sm:$0xf0] }
 0x340   :  { %v10500_v7 = vor.u32 %v12391_v5, %v10499_v15  ;;  %v10819_v42 = vld [vmem:[%s18638_s9 + $0x280] sm:$0xf] }
 0x341   :  { %v11459_v26 = vld [vmem:[%s18638_s9 + $0x780] sm:$0xf] }
 0x342   :  { %4888 = vmatpush.bf16.msra.mxu3 %v10358_v55  ;;  %v10490_v55 = vor.u32 %v12383_v37, %v10487_v39  ;;  %v11075_v37 = vld [vmem:[%s18638_s9 + $0x480] sm:$0xf] }
 0x343   :  { %v12535_v39 = vld [vmem:[%s18638_s9 + $0x49c] sm:$0xf0] }
 0x344   :  { %v11076_v52 = vor.u32 %v12535_v39, %v11075_v37  ;;  %v11395_v37 = vld [vmem:[%s18638_s9 + $0x700] sm:$0xf] }
 0x345   :  { %v11587_v15 = vld [vmem:[%s18638_s9 + $0x880] sm:$0xf] }
 0x346   :  { %4889 = vmatpush.bf16.msra.mxu3 %v10334_v54  ;;  %v10485_v54 = vld [vmem:[%s18636_s7 + $0x190] sm:$0xf]  ;;  %v12663_v5 = vld [vmem:[%s18638_s9 + $0x89c] sm:$0xf0] }
 0x347   :  { %v10486_v57 = vor.u32 %v12386_v17, %v10485_v54  ;;  %v10564_v54 = vor.u32 %v12407_v50, %v10563_v48  ;;  %v10531_v17 = vld [vmem:[%s18638_s9 + $0x40] sm:$0xf]  ;;  %v10597_v48 = vld [vmem:[%s18638_s9 + $0xe0] sm:$0xf0] }
 0x348   :  { %v16733_v50 = vld [vmem:[%s18638_s9 + $0xa00] sm:$0xff] }
 0x34a   :  { %4890 = vmatpush.bf16.msra.mxu3 %v10310_v19  ;;  %v10317_v19 = vld [vmem:[%s18636_s7 + $0x40] sm:$0xf] }
 0x34b   :  { %v10318_v6 = vor.u32 %v12344_v2, %v10317_v19  ;;  %v12519_v19 = vld [vmem:[%s18638_s9 + $0x41c] sm:$0xf0]  ;;  %v11492_v2 = vor.u32 %v12639_v62, %v11491_v60 }
 0x34c   :  { %v12599_v60 = vld [vmem:[%s18638_s9 + $0x69c] sm:$0xf0] }
 0x34e   :  { %4891 = vmatpush.bf16.msra.mxu3 %v10286_v63  ;;  %v10979_v63 = vld [vmem:[%s18638_s9 + $0x3c0] sm:$0xf] }
 0x34f   :  { %v10980_v11 = vor.u32 %v12511_v8, %v10979_v63  ;;  %v12703_v63 = vld [vmem:[%s18638_s9 + $0x9dc] sm:$0xf0] }
 0x3ae   :  { %v4483_v28 = vpop.f32.mrf.mxu1 }
 0x3af   :  { %v4484_v49 = vadd.f32 %v4483_v28, %v4442_v27  ;;  %v10691_v27 = vld [vmem:[%s18638_s9 + $0x180] sm:$0xf] }
 0x3b0   :  { %v12439_v28 = vld [vmem:[%s18638_s9 + $0x19c] sm:$0xf0] }
 0x3b1   :  { %v4488_v29 = vmax.f32 %v4484_v49, 0.0  ;;  %v11140_v49 = vor.u32 %v12551_v21, %v11139_v59  ;;  %v10696_v59 = vor.u32 %v12435_v14, %v10693_v16  ;;  %v11715_v21 = vld [vmem:[%s18638_s9 + $0x980] sm:$0xf]  ;;  %v12507_v14 = vld [vmem:[%s18638_s9 + $0x3c4] sm:$0xf] }
 0x3b2   :  { %v10981_v16 = vld [vmem:[%s18638_s9 + $0x3e0] sm:$0xf0] }
 0x3b3   :  { %v16426_v32 = vpack.c.bf16 %v4488_v29, %v4488_v29  ;;  %v12543_v29 = vld [vmem:[%s18638_s9 + $0x4dc] sm:$0xf0] }
 0x3b4   :  { %v4470_v35 = vpop.f32.mrf.mxu3  ;;  %v11108_v34 = vor.u32 %v12543_v29, %v11107_v53  ;;  %v11428_v53 = vor.u32 %v12623_v12, %v11427_v4  ;;  %v12427_v29 = vld [vmem:[%s18638_s9 + $0x144] sm:$0xf] }
 0x3b5   :  { %v4471_v36 = vadd.f32 %v4470_v35, %v4441_v30  ;;  %10491 = vmatmul.msk.bf16.vlgmr.msrb.gmra.mxu3 %vm4091_vm0, %v16426_v32  ;;  %10492 = vmatmul.msk.bf16.vlgmr.msrb.gmra.mxu1 %vm4091_vm0, %v16426_v32  ;;  %v10692_v30 = vor.u32 %v12439_v28, %v10691_v27  ;;  %v10883_v35 = vld [vmem:[%s18638_s9 + $0x300] sm:$0xf]  ;;  %v12499_v4 = vld [vmem:[%s18638_s9 + $0x384] sm:$0xf] }
 0x3b6   :  { %v4485_v40 = vpop.f32.mrf.mxu1  ;;  %4936 = vmatpush.bf16.msrb.mxu1 %v10462_v24  ;;  %4930 = vmatpush.bf16.msrb.mxu3 %v10482_v31  ;;  %v10659_v24 = vld [vmem:[%s18638_s9 + $0x140] sm:$0xf] }
 0x3b7   :  { %v4487_v18 = vmax.f32 %v4471_v36, 0.0  ;;  %v12431_v31 = vld [vmem:[%s18638_s9 + $0x15c] sm:$0xf0] }
 0x3b8   :  { %v12487_v36 = vld [vmem:[%s18638_s9 + $0x31c] sm:$0xf0]  ;;  %v10660_v40 = vor.u32 %v12431_v31, %v10659_v24 }
 0x3b9   :  { %v16450_v1 = vpack.c.bf16 %v4487_v18, %v4487_v18  ;;  %v12423_v18 = vld [vmem:[%s18638_s9 + $0x11c] sm:$0xf0]  ;;  %v10884_v45 = vor.u32 %v12487_v36, %v10883_v35 }
 0x3ba   :  { %4937 = vmatpush.bf16.msrb.mxu1 %v10438_v43  ;;  %v10627_v43 = vld [vmem:[%s18638_s9 + $0x100] sm:$0xf] }
 0x3bb   :  { %4840 = vmatmul.bf16.vlgmr.msra.gmra.mxu2 %v16450_v1  ;;  %4866 = vmatmul.bf16.vlgmr.msra.gmra.mxu0 %v16450_v1  ;;  %v10787_v28 = vld [vmem:[%s18638_s9 + $0x240] sm:$0xf] }
 0x3bc   :  { %v4472_v22 = vpop.f32.mrf.mxu3  ;;  %4982 = vmatpush.bf16.msra.mxu2 %v10490_v55  ;;  %v11043_v55 = vld [vmem:[%s18638_s9 + $0x440] sm:$0xf]  ;;  %7028 = vmatpush.bf16.msra.mxu0 %v11492_v2 }
 0x3bd   :  { %v11683_v31 = vld [vmem:[%s18638_s9 + $0x940] sm:$0xf] }
 0x3be   :  { %4938 = vmatpush.bf16.msrb.mxu1 %v10414_v46  ;;  %v10628_v46 = vor.u32 %v12423_v18, %v10627_v43  ;;  %v10755_v35 = vld [vmem:[%s18638_s9 + $0x200] sm:$0xf]  ;;  %v12419_v18 = vld [vmem:[%s18638_s9 + $0x104] sm:$0xf] }
 0x3bf   :  { %v12455_v36 = vld [vmem:[%s18638_s9 + $0x21c] sm:$0xf0] }
 0x3c0   :  { %v10756_v39 = vor.u32 %v12455_v36, %v10755_v35 }
 0x3c2   :  { %4939 = vmatpush.bf16.msrb.mxu1 %v10390_v47  ;;  %v10596_v47 = vor.u32 %v12415_v20, %v10595_v23  ;;  %v11363_v23 = vld [vmem:[%s18638_s9 + $0x6c0] sm:$0xf] }
 0x3c3   :  { %v12607_v20 = vld [vmem:[%s18638_s9 + $0x6dc] sm:$0xf0] }
 0x3c5   :  { %4892 = vmatmul.bf16.vlgmr.msra.gmra.mxu3 %v16450_v1  ;;  %10493 = vmatmul.msk.bf16.vlgmr.msra.gmra.mxu1 %vm4091_vm0, %v16426_v32 }
 0x3c6   :  { %4940 = vmatpush.bf16.msrb.mxu1 %v10366_v56  ;;  %4956 = vmatpush.bf16.msra.mxu3 %v10486_v57  ;;  %v12399_v56 = vld [vmem:[%s18638_s9 + $0x5c] sm:$0xf0] }
 0x3c7   :  { %v10532_v57 = vor.u32 %v12399_v56, %v10531_v17  ;;  %v11619_v17 = vld [vmem:[%s18638_s9 + $0x8c0] sm:$0xf] }
 0x3c8   :  { %v12671_v56 = vld [vmem:[%s18638_s9 + $0x8dc] sm:$0xf0] }
 0x3ca   :  { %4941 = vmatpush.bf16.msrb.mxu1 %v10342_v0  ;;  %v11011_v0 = vld [vmem:[%s18638_s9 + $0x400] sm:$0xf] }
 0x3cb   :  { %4918 = vmatmul.bf16.vlgmr.msrb.gmra.mxu2 %v16450_v1  ;;  %4970 = vmatmul.bf16.vlgmr.msrb.gmra.mxu0 %v16450_v1 }
 0x3cc   :  { %7015 = vmatpush.bf16.msrb.mxu2 %v11236_v3  ;;  %v11012_v3 = vor.u32 %v12519_v19, %v11011_v0  ;;  %v12403_v0 = vld [vmem:[%s18638_s9 + $0x84] sm:$0xf] }
 0x3cd   :  { %v10565_v19 = vld [vmem:[%s18638_s9 + $0xa0] sm:$0xf0] }
 0x3ce   :  { %4942 = vmatpush.bf16.msrb.mxu1 %v10318_v6  ;;  %v12443_v6 = vld [vmem:[%s18638_s9 + $0x1c4] sm:$0xf] }
 0x3cf   :  { %v10728_v8 = vor.u32 %v12443_v6, %v10725_v41  ;;  %v11299_v6 = vld [vmem:[%s18638_s9 + $0x640] sm:$0xf] }
 0x3d0   :  { %7016 = vmatpush.bf16.msrb.mxu2 %v11204_v44  ;;  %v11747_v44 = vld [vmem:[%s18638_s9 + $0x9c0] sm:$0xf] }
 0x3d1   :  { %v11748_v38 = vor.u32 %v12703_v63, %v11747_v44  ;;  %v12591_v41 = vld [vmem:[%s18638_s9 + $0x65c] sm:$0xf0]  ;;  %v12395_v63 = vld [vmem:[%s18638_s9 + $0x44] sm:$0xf] }
 0x3d2   :  { %4943 = vmatpush.bf16.msrb.mxu1 %v10294_v9  ;;  %v12471_v9 = vld [vmem:[%s18638_s9 + $0x29c] sm:$0xf0]  ;;  %v11300_v44 = vor.u32 %v12591_v41, %v11299_v6  ;;  %v12555_v6 = vld [vmem:[%s18638_s9 + $0x544] sm:$0xf] }
 0x3d3   :  { %v10820_v10 = vor.u32 %v12471_v9, %v10819_v42  ;;  %v11555_v42 = vld [vmem:[%s18638_s9 + $0x840] sm:$0xf] }
 0x3d4   :  { %7017 = vmatpush.bf16.msrb.mxu2 %v11172_v13  ;;  %v12655_v9 = vld [vmem:[%s18638_s9 + $0x85c] sm:$0xf0] }
 0x3d5   :  { %10494 = vmatmul.msk.bf16.vlgmr.msrb.gmra.mxu3 %vm4091_vm0, %v16426_v32  ;;  %4944 = vmatmul.bf16.vlgmr.msrb.gmra.mxu1 %v16450_v1  ;;  %v12527_v1 = vld [vmem:[%s18638_s9 + $0x45c] sm:$0xf0] }
 0x3d6   :  { %7002 = vmatpush.bf16.msra.mxu1 %v10980_v11  ;;  %6989 = vmatpush.bf16.msrb.mxu3 %v10724_v25  ;;  %v11044_v22 = vor.u32 %v12527_v1, %v11043_v55  ;;  %v12631_v11 = vld [vmem:[%s18638_s9 + $0x79c] sm:$0xf0] }
 0x3d7   :  { %v11460_v13 = vor.u32 %v12631_v11, %v11459_v26  ;;  %v12695_v25 = vld [vmem:[%s18638_s9 + $0x99c] sm:$0xf0]  ;;  %v11556_v26 = vor.u32 %v12655_v9, %v11555_v42  ;;  %v12459_v42 = vld [vmem:[%s18638_s9 + $0x244] sm:$0xf] }
 0x3d8   :  { %7018 = vmatpush.bf16.msrb.mxu2 %v11140_v49  ;;  %v11716_v27 = vor.u32 %v12695_v25, %v11715_v21  ;;  %v11651_v55 = vld [vmem:[%s18638_s9 + $0x900] sm:$0xf]  ;;  %v12387_v21 = vld [vmem:[%s18638_s9 + $0x4] sm:$0xf] }
 0x3d9   :  { %7029 = vmatpush.bf16.msra.mxu0 %v11460_v13  ;;  %v12679_v1 = vld [vmem:[%s18638_s9 + $0x91c] sm:$0xf0]  ;;  %v10501_v25 = vld [vmem:[%s18638_s9 + $0x20] sm:$0xf0] }
 0x3da   :  { %7003 = vmatpush.bf16.msra.mxu1 %v10948_v51  ;;  %6990 = vmatpush.bf16.msrb.mxu3 %v10692_v30  ;;  %v12463_v51 = vld [vmem:[%s18638_s9 + $0x25c] sm:$0xf0]  ;;  %v10661_v30 = vld [vmem:[%s18638_s9 + $0x160] sm:$0xf0] }
 0x3db   :  { %10496 = vmatmul.msk.bf16.vlgmr.msra.gmra.mxu2 %vm4091_vm0, %v16426_v32  ;;  %v10788_v49 = vor.u32 %v12463_v51, %v10787_v28  ;;  %v10664_v24 = vor.u32 %v12427_v29, %v10661_v30  ;;  %v12583_v11 = vld [vmem:[%s18638_s9 + $0x61c] sm:$0xf0]  ;;  %v10949_v29 = vld [vmem:[%s18638_s9 + $0x3a0] sm:$0xf0] }
 0x3dc   :  { %7019 = vmatpush.bf16.msrb.mxu2 %v11108_v34  ;;  %v11523_v28 = vld [vmem:[%s18638_s9 + $0x800] sm:$0xf]  ;;  %v10952_v30 = vor.u32 %v12499_v4, %v10949_v29  ;;  %v10789_v9 = vld [vmem:[%s18638_s9 + $0x260] sm:$0xf0] }
 0x3dd   :  { %7030 = vmatpush.bf16.msra.mxu0 %v11428_v53  ;;  %v12647_v51 = vld [vmem:[%s18638_s9 + $0x81c] sm:$0xf0] }
 0x3de   :  { %7004 = vmatpush.bf16.msra.mxu1 %v10916_v33  ;;  %6991 = vmatpush.bf16.msrb.mxu3 %v10660_v40  ;;  %v12687_v33 = vld [vmem:[%s18638_s9 + $0x95c] sm:$0xf0] }
 0x3df   :  { %v11684_v34 = vor.u32 %v12687_v33, %v11683_v31  ;;  %v12615_v40 = vld [vmem:[%s18638_s9 + $0x71c] sm:$0xf0]  ;;  %v12491_v31 = vld [vmem:[%s18638_s9 + $0x344] sm:$0xf] }
 0x3e0   :  { %7020 = vmatpush.bf16.msrb.mxu2 %v11076_v52  ;;  %v11396_v43 = vor.u32 %v12615_v40, %v11395_v37  ;;  %v16809_v53 = vld [vmem:[%s18639_s8] sm:$0x3f] }
 0x3e1   :  { %v10917_v33 = vld [vmem:[%s18638_s9 + $0x360] sm:$0xf0]  ;;  %v4549_v41 = vperm.slane %v16809_v53, 2 }
 0x3e2   :  { %7005 = vmatpush.bf16.msra.mxu1 %v10884_v45  ;;  %6992 = vmatpush.bf16.msrb.mxu3 %v10628_v46  ;;  %v10629_v45 = vld [vmem:[%s18638_s9 + $0x120] sm:$0xf0]  ;;  %v11652_v46 = vor.u32 %v12679_v1, %v11651_v55 }
 0x3e3   :  { %v10632_v52 = vor.u32 %v12419_v18, %v10629_v45  ;;  %7031 = vmatpush.bf16.msra.mxu0 %v11396_v43  ;;  %v10885_v40 = vld [vmem:[%s18638_s9 + $0x320] sm:$0xf0] }
 0x3e4   :  { %7021 = vmatpush.bf16.msrb.mxu2 %v11044_v22  ;;  %v11364_v22 = vor.u32 %v12607_v20, %v11363_v23  ;;  %v12571_v55 = vld [vmem:[%s18638_s9 + $0x5c4] sm:$0xf] }
 0x3e5   :  { %10495 = vmatmul.msk.bf16.vlgmr.msra.gmra.mxu3 %vm4091_vm0, %v16426_v32  ;;  %v12479_v32 = vld [vmem:[%s18638_s9 + $0x2dc] sm:$0xf0]  ;;  %v11237_v1 = vld [vmem:[%s18638_s9 + $0x5e0] sm:$0xf0] }
 0x3e6   :  { %6993 = vmatpush.bf16.msrb.mxu3 %v10596_v47  ;;  %v10852_v61 = vor.u32 %v12479_v32, %v10851_v58  ;;  %v12411_v47 = vld [vmem:[%s18638_s9 + $0xc4] sm:$0xf]  ;;  %v11620_v58 = vor.u32 %v12671_v56, %v11619_v17  ;;  %v11331_v32 = vld [vmem:[%s18638_s9 + $0x680] sm:$0xf] }
 0x3e7   :  { %7032 = vmatpush.bf16.msra.mxu0 %v11364_v22  ;;  %v12475_v23 = vld [vmem:[%s18638_s9 + $0x2c4] sm:$0xf] }
 0x3e8   :  { %7006 = vmatpush.bf16.msra.mxu1 %v10852_v61  ;;  %7022 = vmatpush.bf16.msrb.mxu2 %v11012_v3  ;;  %v11332_v61 = vor.u32 %v12599_v60, %v11331_v32  ;;  %v10568_v3 = vor.u32 %v12403_v0, %v10565_v19  ;;  %v10853_v20 = vld [vmem:[%s18638_s9 + $0x2e0] sm:$0xf0] }
 0x3e9   :  { %v12563_v56 = vld [vmem:[%s18638_s9 + $0x584] sm:$0xf] }
 0x3ea   :  { %6994 = vmatpush.bf16.msrb.mxu3 %v10564_v54  ;;  %v10600_v54 = vor.u32 %v12411_v47, %v10597_v48  ;;  %v11240_v47 = vor.u32 %v12571_v55, %v11237_v1  ;;  %v10856_v48 = vor.u32 %v12475_v23, %v10853_v20  ;;  %v12635_v60 = vld [vmem:[%s18638_s9 + $0x7c4] sm:$0xf] }
 0x3eb   :  { %7033 = vmatpush.bf16.msra.mxu0 %v11332_v61  ;;  %v12467_v0 = vld [vmem:[%s18638_s9 + $0x284] sm:$0xf] }
 0x3ec   :  { %7067 = vmatpush.bf16.msra.mxu2 %v10728_v8  ;;  %7007 = vmatpush.bf16.msra.mxu1 %v10820_v10  ;;  %v10533_v8 = vld [vmem:[%s18638_s9 + $0x60] sm:$0xf0]  ;;  %v11267_v10 = vld [vmem:[%s18638_s9 + $0x600] sm:$0xf] }
 0x3ed   :  { %v11268_v13 = vor.u32 %v12583_v11, %v11267_v10  ;;  %v10821_v19 = vld [vmem:[%s18638_s9 + $0x2a0] sm:$0xf0]  ;;  %v10792_v11 = vor.u32 %v12459_v42, %v10789_v9  ;;  %v4552_v9 = vperm.slane %v16809_v53, 5 }
 0x3ee   :  { %6995 = vmatpush.bf16.msrb.mxu3 %v10532_v57  ;;  %v6306_v57 = vunpack.c.l.b16 %v16733_v50  ;;  %v11717_v55 = vld [vmem:[%s18638_s9 + $0x9a0] sm:$0xf0] }
 0x3ef   :  { %7034 = vmatpush.bf16.msra.mxu0 %v11300_v44  ;;  %v12531_v1 = vld [vmem:[%s18638_s9 + $0x484] sm:$0xf] }
 0x3f0   :  { %7068 = vmatpush.bf16.msra.mxu2 %v10696_v59  ;;  %7008 = vmatpush.bf16.msra.mxu1 %v10788_v49  ;;  %v6634_v62 = vpack.c.b16 %v6306_v57, %v6306_v57  ;;  %v10984_v59 = vor.u32 %v12507_v14, %v10981_v16  ;;  %v11524_v49 = vor.u32 %v12647_v51, %v11523_v28  ;;  %v11205_v57 = vld [vmem:[%s18638_s9 + $0x5a0] sm:$0xf0] }
 0x3f1   :  { %v11141_v14 = vld [vmem:[%s18638_s9 + $0x520] sm:$0xf0] }
 0x3f2   :  { %6996 = vmatpush.bf16.msrb.mxu3 %v10500_v7  ;;  %v6966_v2 = vsel %vm4454_vm1, %v6634_v62, 0  ;;  %v11588_v7 = vor.u32 %v12663_v5, %v11587_v15  ;;  %v11493_v62 = vld [vmem:[%s18638_s9 + $0x7e0] sm:$0xf0]  ;;  %v10824_v15 = vor.u32 %v12467_v0, %v10821_v19 }
 0x3f3   :  { %7035 = vmatpush.bf16.msra.mxu0 %v11268_v13  ;;  %v11496_v44 = vor.u32 %v12635_v60, %v11493_v62  ;;  %v12547_v13 = vld [vmem:[%s18638_s9 + $0x504] sm:$0xf] }
 0x3f4   :  { %7069 = vmatpush.bf16.msra.mxu2 %v10664_v24  ;;  %7009 = vmatpush.bf16.msra.mxu1 %v10756_v39  ;;  %v4548_v24 = vperm.slane %v16809_v53, 1  ;;  %v12483_v39 = vld [vmem:[%s18638_s9 + $0x304] sm:$0xf]  ;;  %v11144_v29 = vor.u32 %v12547_v13, %v11141_v14 }
 0x3f5   :  { %v10888_v18 = vor.u32 %v12483_v39, %v10885_v40  ;;  %v11429_v28 = vld [vmem:[%s18638_s9 + $0x760] sm:$0xf0] }
 0x3f6   :  { %7041 = vmatpush.bf16.msra.mxu3 %v11748_v38  ;;  %v10536_v38 = vor.u32 %v12395_v63, %v10533_v8  ;;  %v12627_v63 = vld [vmem:[%s18638_s9 + $0x784] sm:$0xf] }
 0x3f7   :  { %7080 = vmatpush.bf16.msrb.mxu0 %v10984_v59  ;;  %v12451_v51 = vld [vmem:[%s18638_s9 + $0x204] sm:$0xf] }
 0x3f8   :  { %7070 = vmatpush.bf16.msra.mxu2 %v10632_v52  ;;  %7061 = vmatpush.bf16.msrb.mxu1 %v6966_v2  ;;  %v4547_v52 = vperm.slane %v16809_v53, 0  ;;  %v11397_v39 = vld [vmem:[%s18638_s9 + $0x720] sm:$0xf0] }
 0x3f9   :  { %v11685_v60 = vld [vmem:[%s18638_s9 + $0x960] sm:$0xf0] }
 0x3fa   :  { %7042 = vmatpush.bf16.msra.mxu3 %v11716_v27  ;;  %v10504_v27 = vor.u32 %v12387_v21, %v10501_v25  ;;  %v12619_v25 = vld [vmem:[%s18638_s9 + $0x744] sm:$0xf] }
 0x3fb   :  { %7081 = vmatpush.bf16.msrb.mxu0 %v10952_v30  ;;  %v11045_v62 = vld [vmem:[%s18638_s9 + $0x460] sm:$0xf0] }
 0x3fc   :  { %7071 = vmatpush.bf16.msra.mxu2 %v10600_v54  ;;  %v12595_v19 = vld [vmem:[%s18638_s9 + $0x684] sm:$0xf] }
 0x3fe   :  { %7043 = vmatpush.bf16.msra.mxu3 %v11684_v34  ;;  %v10920_v34 = vor.u32 %v12491_v31, %v10917_v33  ;;  %v11749_v31 = vld [vmem:[%s18638_s9 + $0x9e0] sm:$0xf0] }
 0x3ff   :  { %v12539_v33 = vld [vmem:[%s18638_s9 + $0x4c4] sm:$0xf] }
 0x400   :  { %7072 = vmatpush.bf16.msra.mxu2 %v10568_v3  ;;  %7082 = vmatpush.bf16.msrb.mxu0 %v10920_v34  ;;  %v11208_v3 = vor.u32 %v12563_v56, %v11205_v57  ;;  %v11109_v34 = vld [vmem:[%s18638_s9 + $0x4e0] sm:$0xf0] }
 0x402   :  { %7044 = vmatpush.bf16.msra.mxu3 %v11652_v46 }
 0x404   :  { %7073 = vmatpush.bf16.msra.mxu2 %v10536_v38  ;;  %7083 = vmatpush.bf16.msrb.mxu0 %v10888_v18  ;;  %v11461_v38 = vld [vmem:[%s18638_s9 + $0x7a0] sm:$0xf0] }
 0x405   :  { %v11464_v21 = vor.u32 %v12627_v63, %v11461_v38  ;;  %v12691_v18 = vld [vmem:[%s18638_s9 + $0x984] sm:$0xf] }
 0x406   :  { %7045 = vmatpush.bf16.msra.mxu3 %v11620_v58  ;;  %v11720_v57 = vor.u32 %v12691_v18, %v11717_v55  ;;  %v12515_v63 = vld [vmem:[%s18638_s9 + $0x404] sm:$0xf] }
 0x407   :  { %v12651_v55 = vld [vmem:[%s18638_s9 + $0x844] sm:$0xf] }
 0x408   :  { %7074 = vmatpush.bf16.msra.mxu2 %v10504_v27  ;;  %7084 = vmatpush.bf16.msrb.mxu0 %v10856_v48  ;;  %v11365_v48 = vld [vmem:[%s18638_s9 + $0x6e0] sm:$0xf0] }
 0x40a   :  { %7046 = vmatpush.bf16.msra.mxu3 %v11588_v7  ;;  %v11173_v7 = vld [vmem:[%s18638_s9 + $0x560] sm:$0xf0] }
 0x40b   :  { %v11176_v10 = vor.u32 %v12555_v6, %v11173_v7  ;;  %v12675_v6 = vld [vmem:[%s18638_s9 + $0x904] sm:$0xf] }
 0x40c   :  { %7085 = vmatpush.bf16.msrb.mxu0 %v10824_v15 }
 0x40e   :  { %7047 = vmatpush.bf16.msra.mxu3 %v11556_v26 }
 0x410   :  { %7086 = vmatpush.bf16.msrb.mxu0 %v10792_v11  ;;  %v11301_v11 = vld [vmem:[%s18638_s9 + $0x660] sm:$0xf0] }
 0x412   :  { %7048 = vmatpush.bf16.msra.mxu3 %v11524_v49  ;;  %v10757_v49 = vld [vmem:[%s18638_s9 + $0x220] sm:$0xf0] }
 0x413   :  { %v10760_v30 = vor.u32 %v12451_v51, %v10757_v49 }
 0x415   :  { %7087 = vmatpush.bf16.msrb.mxu0 %v10760_v30 }
 0x432   :  { %v4880_v12 = vpop.f32.mrf.mxu1 }
 0x438   :  { %v4854_v35 = vpop.f32.mrf.mxu3  ;;  %v4867_v36 = vpop.f32.mrf.mxu0 }
 0x439   :  { %v4868_v37 = vadd.f32 %v4867_v36, %v4548_v24 }
 0x43a   :  { %v4882_v43 = vpop.f32.mrf.mxu1 }
 0x43b   :  { %v4881_v45 = vadd.f32 %v4880_v12, %v4868_v37  ;;  %v12699_v12 = vld [vmem:[%s18638_s9 + $0x9c4] sm:$0xf] }
 0x43c   :  { %v12611_v37 = vld [vmem:[%s18638_s9 + $0x704] sm:$0xf]  ;;  %v11752_v43 = vor.u32 %v12699_v12, %v11749_v31 }
 0x43d   :  { %v4989_v46 = vmax.f32 %v4881_v45, 0.0  ;;  %v11112_v45 = vor.u32 %v12539_v33, %v11109_v34  ;;  %v12579_v12 = vld [vmem:[%s18638_s9 + $0x604] sm:$0xf] }
 0x43e   :  { %v4841_v22 = vpop.f32.mrf.mxu2  ;;  %v11589_v34 = vld [vmem:[%s18638_s9 + $0x8a0] sm:$0xf0] }
 0x43f   :  { %v16840_v54 = vpack.c.bf16 %v4989_v46, %v4989_v46  ;;  %v4842_v17 = vadd.f32 %v4841_v22, %v4547_v52  ;;  %v11077_v46 = vld [vmem:[%s18638_s9 + $0x4a0] sm:$0xf0]  ;;  %v11400_v22 = vor.u32 %v12611_v37, %v11397_v39 }
 0x440   :  { %v4856_v58 = vpop.f32.mrf.mxu3  ;;  %v4869_v32 = vpop.f32.mrf.mxu0 }
 0x441   :  { %v4855_v61 = vadd.f32 %v4854_v35, %v4842_v17  ;;  %7010 = vmatmul.bf16.vlgmr.msra.gmra.mxu1 %v16840_v54  ;;  %v11432_v35 = vor.u32 %v12619_v25, %v11429_v28  ;;  %v4550_v17 = vperm.slane %v16809_v53, 3  ;;  %v12683_v58 = vld [vmem:[%s18638_s9 + $0x944] sm:$0xf]  ;;  %v11080_v32 = vor.u32 %v12531_v1, %v11077_v46 }
 0x442   :  { %v4906_v2 = vpop.f32.mrf.mxu1  ;;  %7093 = vmatpush.bf16.msra.mxu1 %v11240_v47  ;;  %v12603_v47 = vld [vmem:[%s18638_s9 + $0x6c4] sm:$0xf] }
 0x443   :  { %v4988_v5 = vmax.f32 %v4855_v61, 0.0  ;;  %v12523_v61 = vld [vmem:[%s18638_s9 + $0x444] sm:$0xf]  ;;  %v11368_v0 = vor.u32 %v12603_v47, %v11365_v48 }
 0x444   :  { %v11048_v7 = vor.u32 %v12523_v61, %v11045_v62  ;;  %v11621_v28 = vld [vmem:[%s18638_s9 + $0x8e0] sm:$0xf0]  ;;  %v11499_v61 = vld [vmem:[%s18638_s9 + $0x7c8] sm:$0xf] }
 0x445   :  { %v16871_v8 = vpack.c.bf16 %v4988_v5, %v4988_v5  ;;  %v11688_v5 = vor.u32 %v12683_v58, %v11685_v60  ;;  %v11557_v46 = vld [vmem:[%s18638_s9 + $0x860] sm:$0xf0]  ;;  %v10667_v58 = vld [vmem:[%s18638_s9 + $0x148] sm:$0xf] }
 0x446   :  { %v4843_v26 = vpop.f32.mrf.mxu2  ;;  %7094 = vmatpush.bf16.msra.mxu1 %v11208_v3  ;;  %v6307_v3 = vunpack.c.h.b16 %v16733_v50  ;;  %v11013_v50 = vld [vmem:[%s18638_s9 + $0x420] sm:$0xf0] }
 0x447   :  { %6997 = vmatmul.bf16.vlgmr.msrb.gmra.mxu3 %v16871_v8  ;;  %v12643_v48 = vld [vmem:[%s18638_s9 + $0x804] sm:$0xf] }
 0x448   :  { %v4893_v16 = vpop.f32.mrf.mxu3  ;;  %v16889_v59 = vpop.f32.mrf.mxu0  ;;  %7106 = vmatpush.bf16.msrb.mxu3 %v11496_v44  ;;  %v11653_v44 = vld [vmem:[%s18638_s9 + $0x920] sm:$0xf0]  ;;  %v6635_v13 = vpack.c.b16 %v6307_v3, %v6307_v3 }
 0x449   :  { %v4894_v27 = vadd.f32 %v4893_v16, %v4549_v41  ;;  %v11656_v16 = vor.u32 %v12675_v6, %v11653_v44  ;;  %v4972_v49 = vadd.f32 %v16889_v59, %v4552_v9  ;;  %v12659_v59 = vld [vmem:[%s18638_s9 + $0x884] sm:$0xf]  ;;  %v12424_v44 = vld [vmem:[%s18638_s9 + $0x124] sm:$0xf0] }
 0x44a   :  { %v4908_v4 = vpop.f32.mrf.mxu1  ;;  %7095 = vmatpush.bf16.msra.mxu1 %v11176_v10  ;;  %v12587_v10 = vld [vmem:[%s18638_s9 + $0x644] sm:$0xf]  ;;  %v6969_v30 = vsel %vm4454_vm1, %v6635_v13, 0  ;;  %v11592_v18 = vor.u32 %v12659_v59, %v11589_v34  ;;  %v11211_v13 = vld [vmem:[%s18638_s9 + $0x588] sm:$0xf] }
 0x44b   :  { %v4907_v24 = vadd.f32 %v4906_v2, %v4894_v27  ;;  %v11333_v2 = vld [vmem:[%s18638_s9 + $0x6a0] sm:$0xf0]  ;;  %v11304_v51 = vor.u32 %v12587_v10, %v11301_v11  ;;  %v12504_v10 = vld [vmem:[%s18638_s9 + $0x3a4] sm:$0xf0] }
 0x44c   :  { %7107 = vmatpush.bf16.msrb.mxu3 %v11464_v21  ;;  %v11336_v42 = vor.u32 %v12595_v19, %v11333_v2  ;;  %v11016_v21 = vor.u32 %v12515_v63, %v11013_v50  ;;  %v12667_v27 = vld [vmem:[%s18638_s9 + $0x8c4] sm:$0xf]  ;;  %v12512_v19 = vld [vmem:[%s18638_s9 + $0x3e4] sm:$0xf0] }
 0x44d   :  { %v4990_v36 = vmax.f32 %v4907_v24, 0.0  ;;  %v11624_v31 = vor.u32 %v12667_v27, %v11621_v28  ;;  %v11467_v50 = vld [vmem:[%s18638_s9 + $0x788] sm:$0xf] }
 0x44e   :  { %v4919_v40 = vpop.f32.mrf.mxu2  ;;  %7096 = vmatpush.bf16.msra.mxu1 %v11144_v29  ;;  %v11269_v29 = vld [vmem:[%s18638_s9 + $0x620] sm:$0xf0]  ;;  %v12560_v59 = vld [vmem:[%s18638_s9 + $0x564] sm:$0xf0] }
 0x44f   :  { %v16924_v52 = vpack.c.bf16 %v4990_v36, %v4990_v36  ;;  %v4920_v41 = vadd.f32 %v4919_v40, %v4550_v17  ;;  %v12448_v36 = vld [vmem:[%s18638_s9 + $0x1e4] sm:$0xf0]  ;;  %v11272_v39 = vor.u32 %v12579_v12, %v11269_v29 }
 0x450   :  { %v4895_v23 = vpop.f32.mrf.mxu3  ;;  %v4973_v20 = vpop.f32.mrf.mxu0  ;;  %7108 = vmatpush.bf16.msrb.mxu3 %v11432_v35  ;;  %v10731_v35 = vld [vmem:[%s18638_s9 + $0x1c8] sm:$0xf] }
 0x451   :  { %7023 = vmatmul.bf16.vlgmr.msrb.gmra.mxu2 %v16924_v52  ;;  %v10699_v23 = vld [vmem:[%s18638_s9 + $0x188] sm:$0xf] }
 0x452   :  { %7119 = vmatpush.bf16.msrb.mxu2 %v11752_v43  ;;  %v16943_v56 = vpop.f32.mrf.mxu1  ;;  %7097 = vmatpush.bf16.msra.mxu1 %v11112_v45  ;;  %v4551_v43 = vperm.slane %v16809_v53, 4  ;;  %v10732_v45 = vor.u32 %v12448_v36, %v10731_v35  ;;  %v12440_v53 = vld [vmem:[%s18638_s9 + $0x1a4] sm:$0xf0] }
 0x453   :  { %v10700_v47 = vor.u32 %v12440_v53, %v10699_v23  ;;  %v10923_v29 = vld [vmem:[%s18638_s9 + $0x348] sm:$0xf] }
 0x454   :  { %7109 = vmatpush.bf16.msrb.mxu3 %v11400_v22  ;;  %v11560_v22 = vor.u32 %v12651_v55, %v11557_v46  ;;  %v4946_v17 = vadd.f32 %v16943_v56, %v4551_v43  ;;  %v12640_v56 = vld [vmem:[%s18638_s9 + $0x7e4] sm:$0xf0] }
 0x455   :  { %v10571_v34 = vld [vmem:[%s18638_s9 + $0x88] sm:$0xf] }
 0x456   :  { %7120 = vmatpush.bf16.msrb.mxu2 %v11720_v57  ;;  %v4921_v15 = vpop.f32.mrf.mxu2  ;;  %7098 = vmatpush.bf16.msra.mxu1 %v11080_v32  ;;  %v11525_v57 = vld [vmem:[%s18638_s9 + $0x820] sm:$0xf0]  ;;  %v12432_v32 = vld [vmem:[%s18638_s9 + $0x164] sm:$0xf0] }
 0x457   :  { %v11528_v2 = vor.u32 %v12643_v48, %v11525_v57  ;;  %v10668_v3 = vor.u32 %v12432_v32, %v10667_v58  ;;  %v11243_v15 = vld [vmem:[%s18638_s9 + $0x5c8] sm:$0xf] }
 0x458   :  { %v4932_v38 = vpop.f32.mrf.mxu3  ;;  %7110 = vmatpush.bf16.msrb.mxu3 %v11368_v0  ;;  %v10987_v0 = vld [vmem:[%s18638_s9 + $0x3c8] sm:$0xf] }
 0x459   :  { %v4933_v26 = vadd.f32 %v4932_v38, %v4920_v41  ;;  %v10635_v41 = vld [vmem:[%s18638_s9 + $0x108] sm:$0xf]  ;;  %v10988_v63 = vor.u32 %v12512_v19, %v10987_v0 }
 0x45a   :  { %7121 = vmatpush.bf16.msrb.mxu2 %v11688_v5  ;;  %v4947_v14 = vpop.f32.mrf.mxu1  ;;  %7099 = vmatpush.bf16.msra.mxu1 %v11048_v7  ;;  %v12576_v5 = vld [vmem:[%s18638_s9 + $0x5e4] sm:$0xf0]  ;;  %v11500_v7 = vor.u32 %v12640_v56, %v11499_v61  ;;  %v10636_v11 = vor.u32 %v12424_v44, %v10635_v41 }
 0x45b   :  { %v4991_v25 = vmax.f32 %v4933_v26, 0.0  ;;  %v12632_v38 = vld [vmem:[%s18638_s9 + $0x7a4] sm:$0xf0]  ;;  %v11244_v9 = vor.u32 %v12576_v5, %v11243_v15 }
 0x45c   :  { %7111 = vmatpush.bf16.msrb.mxu3 %v11336_v42  ;;  %v10955_v26 = vld [vmem:[%s18638_s9 + $0x388] sm:$0xf] }
 0x45d   :  { %v16990_v4 = vpack.c.bf16 %v4991_v25, %v4991_v25  ;;  %v12568_v14 = vld [vmem:[%s18638_s9 + $0x5a4] sm:$0xf0]  ;;  %v10956_v28 = vor.u32 %v12504_v10, %v10955_v26 }
 0x45e   :  { %7122 = vmatpush.bf16.msrb.mxu2 %v11656_v16  ;;  %v4984_v24 = vpop.f32.mrf.mxu2  ;;  %7100 = vmatpush.bf16.msra.mxu1 %v11016_v21  ;;  %v11468_v16 = vor.u32 %v12632_v38, %v11467_v50  ;;  %v10603_v21 = vld [vmem:[%s18638_s9 + $0xc8] sm:$0xf]  ;;  %v11212_v12 = vor.u32 %v12568_v14, %v11211_v13 }
 0x45f   :  { %v4985_v33 = vadd.f32 %v4984_v24, %v4972_v49  ;;  %7036 = vmatmul.bf16.vlgmr.msra.gmra.mxu0 %v16990_v4  ;;  %v12416_v25 = vld [vmem:[%s18638_s9 + $0xe4] sm:$0xf0] }
 0x460   :  { %v4934_v37 = vpop.f32.mrf.mxu3  ;;  %7112 = vmatpush.bf16.msrb.mxu3 %v11304_v51  ;;  %7139 = vmatpush.bf16.msra.mxu0 %v6969_v30  ;;  %v11435_v51 = vld [vmem:[%s18638_s9 + $0x748] sm:$0xf]  ;;  %v10604_v24 = vor.u32 %v12416_v25, %v10603_v21 }
 0x461   :  { %v4993_v40 = vmax.f32 %v4985_v33, 0.0  ;;  %7075 = vmatmul.bf16.vlgmr.msra.gmra.mxu2 %v16871_v8  ;;  %v12624_v49 = vld [vmem:[%s18638_s9 + $0x764] sm:$0xf0] }
 0x462   :  { %7123 = vmatpush.bf16.msrb.mxu2 %v11624_v31  ;;  %v12496_v30 = vld [vmem:[%s18638_s9 + $0x364] sm:$0xf0]  ;;  %v11436_v33 = vor.u32 %v12624_v49, %v11435_v51 }
 0x463   :  { %v17017_v1 = vpack.c.bf16 %v4993_v40, %v4993_v40  ;;  %v11179_v31 = vld [vmem:[%s18638_s9 + $0x548] sm:$0xf]  ;;  %v10924_v36 = vor.u32 %v12496_v30, %v10923_v29 }
 0x464   :  { %7113 = vmatpush.bf16.msrb.mxu3 %v11272_v39  ;;  %v12408_v35 = vld [vmem:[%s18638_s9 + $0xa4] sm:$0xf0]  ;;  %v11180_v40 = vor.u32 %v12560_v59, %v11179_v31 }
 0x465   :  { %11777 = vmatmul.msk.bf16.vlgmr.msrb.gmra.mxu1 %vm4450_vm2, %v17017_v1  ;;  %v11403_v37 = vld [vmem:[%s18638_s9 + $0x708] sm:$0xf] }
 0x466   :  { %7124 = vmatpush.bf16.msrb.mxu2 %v11592_v18  ;;  %7145 = vmatpush.bf16.msrb.mxu1 %v10732_v45  ;;  %v4986_v20 = vpop.f32.mrf.mxu2  ;;  %v12616_v39 = vld [vmem:[%s18638_s9 + $0x724] sm:$0xf0]  ;;  %v10572_v45 = vor.u32 %v12408_v35, %v10571_v34 }
 0x467   :  { %v10891_v43 = vld [vmem:[%s18638_s9 + $0x308] sm:$0xf]  ;;  %v11404_v23 = vor.u32 %v12616_v39, %v11403_v37  ;;  %v12508_v37 = vld [vmem:[%s18638_s9 + $0x3cc] sm:$0xf] }
 0x468   :  { %v4958_v60 = vpop.f32.mrf.mxu3  ;;  %v12488_v18 = vld [vmem:[%s18638_s9 + $0x324] sm:$0xf0]  ;;  %v10989_v39 = vld [vmem:[%s18638_s9 + $0x3e8] sm:$0xf0] }
 0x469   :  { %v4959_v62 = vadd.f32 %v4958_v60, %v4946_v17  ;;  %v11147_v55 = vld [vmem:[%s18638_s9 + $0x508] sm:$0xf] }
 0x46a   :  { %7125 = vmatpush.bf16.msrb.mxu2 %v11560_v22  ;;  %7146 = vmatpush.bf16.msrb.mxu1 %v10700_v47  ;;  %v12552_v46 = vld [vmem:[%s18638_s9 + $0x524] sm:$0xf0]  ;;  %v10892_v22 = vor.u32 %v12488_v18, %v10891_v43 }
 0x46b   :  { %v4992_v6 = vmax.f32 %v4959_v62, 0.0  ;;  %v10539_v53 = vld [vmem:[%s18638_s9 + $0x48] sm:$0xf]  ;;  %v11148_v17 = vor.u32 %v12552_v46, %v11147_v55  ;;  %v12444_v46 = vld [vmem:[%s18638_s9 + $0x1cc] sm:$0xf] }
 0x46c   :  { %v12400_v20 = vld [vmem:[%s18638_s9 + $0x64] sm:$0xf0] }
 0x46d   :  { %v17073_v42 = vpack.c.bf16 %v4992_v6, %v4992_v6  ;;  %v11371_v47 = vld [vmem:[%s18638_s9 + $0x6c8] sm:$0xf]  ;;  %v10540_v32 = vor.u32 %v12400_v20, %v10539_v53  ;;  %v10992_v20 = vor.u32 %v12508_v37, %v10989_v39  ;;  %v12412_v37 = vld [vmem:[%s18638_s9 + $0xcc] sm:$0xf] }
 0x46e   :  { %7126 = vmatpush.bf16.msrb.mxu2 %v11528_v2  ;;  %7147 = vmatpush.bf16.msrb.mxu1 %v10668_v3  ;;  %v12608_v48 = vld [vmem:[%s18638_s9 + $0x6e4] sm:$0xf0]  ;;  %v10605_v39 = vld [vmem:[%s18638_s9 + $0xe8] sm:$0xf0] }
 0x46f   :  { %7049 = vmatmul.bf16.vlgmr.msra.gmra.mxu3 %v17073_v42  ;;  %7088 = vmatmul.bf16.vlgmr.msrb.gmra.mxu0 %v16840_v54  ;;  %v10859_v57 = vld [vmem:[%s18638_s9 + $0x2c8] sm:$0xf]  ;;  %v11372_v56 = vor.u32 %v12608_v48, %v11371_v47 }
 0x470   :  { %7158 = vmatpush.bf16.msra.mxu3 %v10988_v63  ;;  %v4960_v27 = vpop.f32.mrf.mxu3  ;;  %7171 = vmatpush.bf16.msrb.mxu0 %v11244_v9  ;;  %v12480_v58 = vld [vmem:[%s18638_s9 + $0x2e4] sm:$0xf0] }
 0x471   :  { %7127 = vmatmul.bf16.vlgmr.msrb.gmra.mxu2 %v17073_v42  ;;  %v11115_v60 = vld [vmem:[%s18638_s9 + $0x4c8] sm:$0xf]  ;;  %v10860_v2 = vor.u32 %v12480_v58, %v10859_v57  ;;  %v10957_v57 = vld [vmem:[%s18638_s9 + $0x3a8] sm:$0xf0] }
 0x472   :  { %7184 = vmatpush.bf16.msra.mxu2 %v11500_v7  ;;  %7148 = vmatpush.bf16.msrb.mxu1 %v10636_v11  ;;  %v12544_v61 = vld [vmem:[%s18638_s9 + $0x4e4] sm:$0xf0] }
 0x473   :  { %v10507_v62 = vld [vmem:[%s18638_s9 + $0x8] sm:$0xf]  ;;  %v11116_v6 = vor.u32 %v12544_v61, %v11115_v60  ;;  %v12572_v60 = vld [vmem:[%s18638_s9 + $0x5cc] sm:$0xf] }
 0x474   :  { %7159 = vmatpush.bf16.msra.mxu3 %v10956_v28  ;;  %7172 = vmatpush.bf16.msrb.mxu0 %v11212_v12  ;;  %v12392_v0 = vld [vmem:[%s18638_s9 + $0x24] sm:$0xf0]  ;;  %v11245_v61 = vld [vmem:[%s18638_s9 + $0x5e8] sm:$0xf0] }
 0x475   :  { %7101 = vmatmul.bf16.vlgmr.msra.gmra.mxu1 %v16924_v52  ;;  %v11339_v19 = vld [vmem:[%s18638_s9 + $0x688] sm:$0xf]  ;;  %v10508_v44 = vor.u32 %v12392_v0, %v10507_v62  ;;  %v12436_v62 = vld [vmem:[%s18638_s9 + $0x18c] sm:$0xf] }
 0x476   :  { %7185 = vmatpush.bf16.msra.mxu2 %v11468_v16  ;;  %7149 = vmatpush.bf16.msrb.mxu1 %v10604_v24  ;;  %v12600_v3 = vld [vmem:[%s18638_s9 + $0x6a4] sm:$0xf0]  ;;  %v10701_v0 = vld [vmem:[%s18638_s9 + $0x1a8] sm:$0xf0] }
 0x477   :  { %v11755_v15 = vld [vmem:[%s18638_s9 + $0x9c8] sm:$0xf]  ;;  %v11340_v38 = vor.u32 %v12600_v3, %v11339_v19 }
 0x478   :  { %7160 = vmatpush.bf16.msra.mxu3 %v10924_v36  ;;  %7173 = vmatpush.bf16.msrb.mxu0 %v11180_v40  ;;  %v12704_v5 = vld [vmem:[%s18638_s9 + $0x9e4] sm:$0xf0] }
 0x479   :  { %v10827_v7 = vld [vmem:[%s18638_s9 + $0x288] sm:$0xf]  ;;  %v11756_v9 = vor.u32 %v12704_v5, %v11755_v15  ;;  %v11248_v15 = vor.u32 %v12572_v60, %v11245_v61  ;;  %v12492_v5 = vld [vmem:[%s18638_s9 + $0x34c] sm:$0xf] }
 0x47a   :  { %7186 = vmatpush.bf16.msra.mxu2 %v11436_v33  ;;  %7150 = vmatpush.bf16.msrb.mxu1 %v10572_v45  ;;  %v12472_v41 = vld [vmem:[%s18638_s9 + $0x2a4] sm:$0xf0]  ;;  %v12460_v60 = vld [vmem:[%s18638_s9 + $0x24c] sm:$0xf] }
 0x47b   :  { %v11083_v63 = vld [vmem:[%s18638_s9 + $0x488] sm:$0xf]  ;;  %v10828_v11 = vor.u32 %v12472_v41, %v10827_v7  ;;  %v10704_v7 = vor.u32 %v12436_v62, %v10701_v0  ;;  %v12564_v41 = vld [vmem:[%s18638_s9 + $0x58c] sm:$0xf] }
 0x47c   :  { %7161 = vmatpush.bf16.msra.mxu3 %v10892_v22  ;;  %7174 = vmatpush.bf16.msrb.mxu0 %v11148_v17  ;;  %v12536_v50 = vld [vmem:[%s18638_s9 + $0x4a4] sm:$0xf0]  ;;  %v12500_v17 = vld [vmem:[%s18638_s9 + $0x38c] sm:$0xf] }
 0x47d   :  { %v11307_v26 = vld [vmem:[%s18638_s9 + $0x648] sm:$0xf]  ;;  %v11084_v21 = vor.u32 %v12536_v50, %v11083_v63  ;;  %v10960_v19 = vor.u32 %v12500_v17, %v10957_v57  ;;  %v12428_v50 = vld [vmem:[%s18638_s9 + $0x14c] sm:$0xf] }
 0x47e   :  { %7187 = vmatpush.bf16.msra.mxu2 %v11404_v23  ;;  %7151 = vmatpush.bf16.msrb.mxu1 %v10540_v32  ;;  %v17200_v10 = vld [vmem:[%s18638_s9 + $0xa08] sm:$0xff] }
 0x47f   :  { %7114 = vmatmul.bf16.vlgmr.msrb.gmra.mxu3 %v16990_v4  ;;  %11778 = vmatmul.msk.bf16.vlgmr.msra.gmra.mxu0 %vm4450_vm2, %v17017_v1  ;;  %v12592_v13 = vld [vmem:[%s18638_s9 + $0x664] sm:$0xf0]  ;;  %v6308_v49 = vunpack.c.l.b16 %v17200_v10  ;;  %v10733_v23 = vld [vmem:[%s18638_s9 + $0x1e8] sm:$0xf0] }
 0x480   :  { %7162 = vmatpush.bf16.msra.mxu3 %v10860_v2  ;;  %v11723_v14 = vld [vmem:[%s18638_s9 + $0x988] sm:$0xf]  ;;  %7175 = vmatpush.bf16.msrb.mxu0 %v11116_v6  ;;  %v11308_v12 = vor.u32 %v12592_v13, %v11307_v26  ;;  %v10736_v58 = vor.u32 %v12444_v46, %v10733_v23  ;;  %v10925_v6 = vld [vmem:[%s18638_s9 + $0x368] sm:$0xf0] }
 0x481   :  { %v12696_v16 = vld [vmem:[%s18638_s9 + $0x9a4] sm:$0xf0]  ;;  %v6636_v18 = vpack.c.b16 %v6308_v49, %v6308_v49  ;;  %v10637_v49 = vld [vmem:[%s18638_s9 + $0x128] sm:$0xf0] }
 0x482   :  { %7188 = vmatpush.bf16.msra.mxu2 %v11372_v56  ;;  %v10795_v25 = vld [vmem:[%s18638_s9 + $0x248] sm:$0xf]  ;;  %7152 = vmatpush.bf16.msrb.mxu1 %v10508_v44  ;;  %v11724_v29 = vor.u32 %v12696_v16, %v11723_v14  ;;  %v11213_v44 = vld [vmem:[%s18638_s9 + $0x5a8] sm:$0xf0] }
 0x483   :  { %v12464_v27 = vld [vmem:[%s18638_s9 + $0x264] sm:$0xf0]  ;;  %v6972_v32 = vsel %vm4454_vm1, %v6636_v18, 0  ;;  %v11216_v13 = vor.u32 %v12564_v41, %v11213_v44  ;;  %v12484_v14 = vld [vmem:[%s18638_s9 + $0x30c] sm:$0xf] }
 0x484   :  { %v11051_v28 = vld [vmem:[%s18638_s9 + $0x448] sm:$0xf]  ;;  %7163 = vmatpush.bf16.msra.mxu3 %v10828_v11  ;;  %v10796_v31 = vor.u32 %v12464_v27, %v10795_v25  ;;  %7176 = vmatpush.bf16.msrb.mxu0 %v11084_v21  ;;  %v10893_v16 = vld [vmem:[%s18638_s9 + $0x328] sm:$0xf0] }
 0x485   :  { %v12528_v51 = vld [vmem:[%s18638_s9 + $0x464] sm:$0xf0]  ;;  %7153 = vmatmul.bf16.vlgmr.msrb.gmra.mxu1 %v16871_v8  ;;  %v12556_v25 = vld [vmem:[%s18638_s9 + $0x54c] sm:$0xf] }
 0x486   :  { %7189 = vmatpush.bf16.msra.mxu2 %v11340_v38  ;;  %7197 = vmatpush.bf16.msra.mxu1 %v11756_v9  ;;  %v11275_v30 = vld [vmem:[%s18638_s9 + $0x608] sm:$0xf]  ;;  %v11052_v35 = vor.u32 %v12528_v51, %v11051_v28  ;;  %v10669_v38 = vld [vmem:[%s18638_s9 + $0x168] sm:$0xf0]  ;;  %v10928_v9 = vor.u32 %v12492_v5, %v10925_v6 }
 0x487   :  { %v12584_v24 = vld [vmem:[%s18638_s9 + $0x624] sm:$0xf0]  ;;  %v10672_v21 = vor.u32 %v12428_v50, %v10669_v38  ;;  %v11181_v27 = vld [vmem:[%s18638_s9 + $0x568] sm:$0xf0] }
 0x488   :  { %v11691_v59 = vld [vmem:[%s18638_s9 + $0x948] sm:$0xf]  ;;  %v11276_v45 = vor.u32 %v12584_v24, %v11275_v30  ;;  %7164 = vmatpush.bf16.msra.mxu3 %v10796_v31  ;;  %7177 = vmatpush.bf16.msrb.mxu0 %v11052_v35  ;;  %v12420_v51 = vld [vmem:[%s18638_s9 + $0x10c] sm:$0xf]  ;;  %v11184_v24 = vor.u32 %v12556_v25, %v11181_v27 }
 0x489   :  { %v12688_v33 = vld [vmem:[%s18638_s9 + $0x964] sm:$0xf0]  ;;  %v12476_v31 = vld [vmem:[%s18638_s9 + $0x2cc] sm:$0xf] }
 0x48a   :  { %v10763_v34 = vld [vmem:[%s18638_s9 + $0x208] sm:$0xf]  ;;  %7190 = vmatpush.bf16.msra.mxu2 %v11308_v12  ;;  %7198 = vmatpush.bf16.msra.mxu1 %v11724_v29  ;;  %v11692_v55 = vor.u32 %v12688_v33, %v11691_v59  ;;  %v10896_v12 = vor.u32 %v12484_v14, %v10893_v16  ;;  %v10861_v59 = vld [vmem:[%s18638_s9 + $0x2e8] sm:$0xf0]  ;;  %v10640_v33 = vor.u32 %v12420_v51, %v10637_v49 }
 0x48b   :  { %v12456_v36 = vld [vmem:[%s18638_s9 + $0x224] sm:$0xf0]  ;;  %v11149_v35 = vld [vmem:[%s18638_s9 + $0x528] sm:$0xf0] }
 0x48c   :  { %v11019_v40 = vld [vmem:[%s18638_s9 + $0x408] sm:$0xf]  ;;  %v10764_v53 = vor.u32 %v12456_v36, %v10763_v34  ;;  %v12548_v34 = vld [vmem:[%s18638_s9 + $0x50c] sm:$0xf] }
 0x48d   :  { %v12520_v43 = vld [vmem:[%s18638_s9 + $0x424] sm:$0xf0]  ;;  %v10829_v46 = vld [vmem:[%s18638_s9 + $0x2a8] sm:$0xf0] }
 0x48e   :  { %v11659_v22 = vld [vmem:[%s18638_s9 + $0x908] sm:$0xf]  ;;  %v11020_v48 = vor.u32 %v12520_v43, %v11019_v40  ;;  %7191 = vmatpush.bf16.msra.mxu2 %v11276_v45  ;;  %7199 = vmatpush.bf16.msra.mxu1 %v11692_v55  ;;  %v10864_v40 = vor.u32 %v12476_v31, %v10861_v59  ;;  %v12468_v45 = vld [vmem:[%s18638_s9 + $0x28c] sm:$0xf]  ;;  %v11152_v55 = vor.u32 %v12548_v34, %v11149_v35  ;;  %v10739_v35 = vld [vmem:[%s18638_s9 + $0x1d0] sm:$0xf] }
 0x48f   :  { %v12680_v47 = vld [vmem:[%s18638_s9 + $0x924] sm:$0xf0]  ;;  %7165 = vmatpush.bf16.msra.mxu3 %v10764_v53  ;;  %v12636_v23 = vld [vmem:[%s18638_s9 + $0x7cc] sm:$0xf] }
 0x490   :  { %v11660_v56 = vor.u32 %v12680_v47, %v11659_v22  ;;  %v11627_v2 = vld [vmem:[%s18638_s9 + $0x8c8] sm:$0xf]  ;;  %7178 = vmatpush.bf16.msrb.mxu0 %v11020_v48  ;;  %v11501_v53 = vld [vmem:[%s18638_s9 + $0x7e8] sm:$0xf0] }
 0x491   :  { %v12672_v3 = vld [vmem:[%s18638_s9 + $0x8e4] sm:$0xf0]  ;;  %7192 = vmatmul.bf16.vlgmr.msra.gmra.mxu2 %v16990_v4  ;;  %v12540_v22 = vld [vmem:[%s18638_s9 + $0x4cc] sm:$0xf] }
 0x492   :  { %7236 = vmatpush.bf16.msrb.mxu2 %v10992_v20  ;;  %7200 = vmatpush.bf16.msra.mxu1 %v11660_v56  ;;  %v11628_v63 = vor.u32 %v12672_v3, %v11627_v2  ;;  %v11595_v26 = vld [vmem:[%s18638_s9 + $0x888] sm:$0xf]  ;;  %v10608_v20 = vor.u32 %v12412_v37, %v10605_v39  ;;  %v11117_v47 = vld [vmem:[%s18638_s9 + $0x4e8] sm:$0xf0] }
 0x493   :  { %7217 = vmatpush.bf16.msrb.mxu3 %v6972_v32  ;;  %7179 = vmatmul.bf16.vlgmr.msrb.gmra.mxu0 %v16924_v52  ;;  %v12664_v11 = vld [vmem:[%s18638_s9 + $0x8a4] sm:$0xf0]  ;;  %v12404_v17 = vld [vmem:[%s18638_s9 + $0x8c] sm:$0xf]  ;;  %v11504_v32 = vor.u32 %v12636_v23, %v11501_v53  ;;  %v11120_v61 = vor.u32 %v12540_v22, %v11117_v47  ;;  %v11219_v23 = vld [vmem:[%s18638_s9 + $0x590] sm:$0xf] }
 0x494   :  { %7223 = vmatpush.bf16.msra.mxu0 %v10736_v58  ;;  %7166 = vmatmul.bf16.vlgmr.msra.gmra.mxu3 %v16840_v54  ;;  %v11596_v28 = vor.u32 %v12664_v11, %v11595_v26  ;;  %v11563_v29 = vld [vmem:[%s18638_s9 + $0x848] sm:$0xf]  ;;  %v10573_v57 = vld [vmem:[%s18638_s9 + $0xa8] sm:$0xf0]  ;;  %v10832_v58 = vor.u32 %v12468_v45, %v10829_v46  ;;  %v12569_v53 = vld [vmem:[%s18638_s9 + $0x5ac] sm:$0xf0] }
 0x495   :  { %v12656_v30 = vld [vmem:[%s18638_s9 + $0x864] sm:$0xf0]  ;;  %v10797_v56 = vld [vmem:[%s18638_s9 + $0x268] sm:$0xf0]  ;;  %v10707_v22 = vld [vmem:[%s18638_s9 + $0x190] sm:$0xf] }
 0x496   :  { %7237 = vmatpush.bf16.msrb.mxu2 %v10960_v19  ;;  %7201 = vmatpush.bf16.msra.mxu1 %v11628_v63  ;;  %v11564_v36 = vor.u32 %v12656_v30, %v11563_v29  ;;  %v11531_v43 = vld [vmem:[%s18638_s9 + $0x808] sm:$0xf]  ;;  %v12628_v62 = vld [vmem:[%s18638_s9 + $0x78c] sm:$0xf]  ;;  %v10576_v19 = vor.u32 %v12404_v17, %v10573_v57  ;;  %v11251_v29 = vld [vmem:[%s18638_s9 + $0x5d0] sm:$0xf] }
 0x497   :  { %7249 = vmatpush.bf16.msra.mxu3 %v11248_v15  ;;  %v12648_v18 = vld [vmem:[%s18638_s9 + $0x824] sm:$0xf0]  ;;  %v11469_v0 = vld [vmem:[%s18638_s9 + $0x7a8] sm:$0xf0]  ;;  %v6309_v15 = vunpack.c.h.b16 %v17200_v10  ;;  %v12577_v30 = vld [vmem:[%s18638_s9 + $0x5ec] sm:$0xf0] }
 0x498   :  { %7224 = vmatpush.bf16.msra.mxu0 %v10704_v7  ;;  %v11532_v48 = vor.u32 %v12648_v18, %v11531_v43  ;;  %v12532_v2 = vld [vmem:[%s18638_s9 + $0x48c] sm:$0xf]  ;;  %v10800_v7 = vor.u32 %v12460_v60, %v10797_v56  ;;  %v11472_v41 = vor.u32 %v12628_v62, %v11469_v0  ;;  %v11252_v39 = vor.u32 %v12577_v30, %v11251_v29  ;;  %v12441_v47 = vld [vmem:[%s18638_s9 + $0x1ac] sm:$0xf0] }
 0x499   :  { %v11085_v3 = vld [vmem:[%s18638_s9 + $0x4a8] sm:$0xf0]  ;;  %v11187_v56 = vld [vmem:[%s18638_s9 + $0x550] sm:$0xf] }
 0x49a   :  { %7238 = vmatpush.bf16.msrb.mxu2 %v10928_v9  ;;  %7202 = vmatpush.bf16.msra.mxu1 %v11596_v28  ;;  %v12396_v5 = vld [vmem:[%s18638_s9 + $0x4c] sm:$0xf]  ;;  %v11088_v44 = vor.u32 %v12532_v2, %v11085_v3  ;;  %v12561_v62 = vld [vmem:[%s18638_s9 + $0x56c] sm:$0xf0] }
 0x49b   :  { %7250 = vmatpush.bf16.msra.mxu3 %v11216_v13  ;;  %v10541_v6 = vld [vmem:[%s18638_s9 + $0x68] sm:$0xf0]  ;;  %v6637_v13 = vpack.c.b16 %v6309_v15, %v6309_v15  ;;  %v12433_v2 = vld [vmem:[%s18638_s9 + $0x16c] sm:$0xf0] }
 0x49c   :  { %7225 = vmatpush.bf16.msra.mxu0 %v10672_v21  ;;  %v12452_v10 = vld [vmem:[%s18638_s9 + $0x20c] sm:$0xf]  ;;  %v10544_v9 = vor.u32 %v12396_v5, %v10541_v6  ;;  %v11188_v6 = vor.u32 %v12561_v62, %v11187_v56  ;;  %v10611_v29 = vld [vmem:[%s18638_s9 + $0xd0] sm:$0xf] }
 0x49d   :  { %v10765_v63 = vld [vmem:[%s18638_s9 + $0x228] sm:$0xf0]  ;;  %v6975_v31 = vsel %vm4454_vm1, %v6637_v13, 0  ;;  %v12417_v30 = vld [vmem:[%s18638_s9 + $0xec] sm:$0xf0] }
 0x49e   :  { %7239 = vmatpush.bf16.msrb.mxu2 %v10896_v12  ;;  %7203 = vmatpush.bf16.msra.mxu1 %v11564_v36  ;;  %v12620_v50 = vld [vmem:[%s18638_s9 + $0x74c] sm:$0xf]  ;;  %v10768_v21 = vor.u32 %v12452_v10, %v10765_v63  ;;  %v12449_v36 = vld [vmem:[%s18638_s9 + $0x1ec] sm:$0xf0] }
 0x49f   :  { %7251 = vmatpush.bf16.msra.mxu3 %v11184_v24  ;;  %v11437_v38 = vld [vmem:[%s18638_s9 + $0x768] sm:$0xf0]  ;;  %v10740_v46 = vor.u32 %v12449_v36, %v10739_v35  ;;  %v12553_v63 = vld [vmem:[%s18638_s9 + $0x52c] sm:$0xf0]  ;;  %v10612_v36 = vor.u32 %v12417_v30, %v10611_v29  ;;  %v10709_v30 = vld [vmem:[%s18638_s9 + $0x1b0] sm:$0xf0] }
 0x4a0   :  { %7226 = vmatpush.bf16.msra.mxu0 %v10640_v33  ;;  %v12524_v26 = vld [vmem:[%s18638_s9 + $0x44c] sm:$0xf]  ;;  %v11440_v25 = vor.u32 %v12620_v50, %v11437_v38  ;;  %v10643_v38 = vld [vmem:[%s18638_s9 + $0x110] sm:$0xf] }
 0x4a1   :  { %v11053_v11 = vld [vmem:[%s18638_s9 + $0x468] sm:$0xf0]  ;;  %v11091_v35 = vld [vmem:[%s18638_s9 + $0x490] sm:$0xf] }
 0x4a2   :  { %7240 = vmatpush.bf16.msrb.mxu2 %v10864_v40  ;;  %7204 = vmatpush.bf16.msra.mxu1 %v11532_v48  ;;  %v12388_v14 = vld [vmem:[%s18638_s9 + $0xc] sm:$0xf]  ;;  %v11056_v49 = vor.u32 %v12524_v26, %v11053_v11 }
 0x4a3   :  { %7252 = vmatpush.bf16.msra.mxu3 %v11152_v55  ;;  %v10509_v16 = vld [vmem:[%s18638_s9 + $0x28] sm:$0xf0] }
 0x4a4   :  { %7227 = vmatpush.bf16.msra.mxu0 %v10608_v20  ;;  %11779 = vmatmul.msk.bf16.vlgmr.msrb.gmra.mxu3 %vm4450_vm2, %v17017_v1  ;;  %v12700_v27 = vld [vmem:[%s18638_s9 + $0x9cc] sm:$0xf]  ;;  %v10512_v24 = vor.u32 %v12388_v14, %v10509_v16 }
 0x4a5   :  { %7205 = vmatmul.bf16.vlgmr.msra.gmra.mxu1 %v17073_v42  ;;  %v11757_v28 = vld [vmem:[%s18638_s9 + $0x9e8] sm:$0xf0] }
 0x4a6   :  { %7241 = vmatpush.bf16.msrb.mxu2 %v10832_v58  ;;  %7262 = vmatpush.bf16.msrb.mxu1 %v11504_v32  ;;  %v12612_v51 = vld [vmem:[%s18638_s9 + $0x70c] sm:$0xf]  ;;  %v11760_v34 = vor.u32 %v12700_v27, %v11757_v28  ;;  %v11220_v58 = vor.u32 %v12569_v53, %v11219_v23  ;;  %v12545_v28 = vld [vmem:[%s18638_s9 + $0x4ec] sm:$0xf0] }
 0x4a7   :  { %7253 = vmatpush.bf16.msra.mxu3 %v11120_v61  ;;  %v11405_v12 = vld [vmem:[%s18638_s9 + $0x728] sm:$0xf0]  ;;  %v10708_v61 = vor.u32 %v12441_v47, %v10707_v22 }
 0x4a8   :  { %7228 = vmatpush.bf16.msra.mxu0 %v10576_v19  ;;  %v12516_v59 = vld [vmem:[%s18638_s9 + $0x40c] sm:$0xf]  ;;  %v11408_v37 = vor.u32 %v12612_v51, %v11405_v12  ;;  %v10675_v19 = vld [vmem:[%s18638_s9 + $0x150] sm:$0xf] }
 0x4a9   :  { %v11021_v33 = vld [vmem:[%s18638_s9 + $0x428] sm:$0xf0]  ;;  %v10676_v10 = vor.u32 %v12433_v2, %v10675_v19  ;;  %v10995_v51 = vld [vmem:[%s18638_s9 + $0x3d0] sm:$0xf] }
 0x4aa   :  { %7242 = vmatpush.bf16.msrb.mxu2 %v10800_v7  ;;  %7263 = vmatpush.bf16.msrb.mxu1 %v11472_v41  ;;  %v12692_v40 = vld [vmem:[%s18638_s9 + $0x98c] sm:$0xf]  ;;  %v11024_v18 = vor.u32 %v12516_v59, %v11021_v33  ;;  %v11507_v19 = vld [vmem:[%s18638_s9 + $0x7d0] sm:$0xf] }
 0x4ab   :  { %7254 = vmatpush.bf16.msra.mxu3 %v11088_v44  ;;  %v11725_v43 = vld [vmem:[%s18638_s9 + $0x9a8] sm:$0xf0]  ;;  %v11155_v44 = vld [vmem:[%s18638_s9 + $0x510] sm:$0xf] }
 0x4ac   :  { %7229 = vmatpush.bf16.msra.mxu0 %v10544_v9  ;;  %v12604_v45 = vld [vmem:[%s18638_s9 + $0x6cc] sm:$0xf]  ;;  %v11728_v20 = vor.u32 %v12692_v40, %v11725_v43  ;;  %v12425_v9 = vld [vmem:[%s18638_s9 + $0x12c] sm:$0xf0]  ;;  %v11156_v14 = vor.u32 %v12553_v63, %v11155_v44  ;;  %v12445_v63 = vld [vmem:[%s18638_s9 + $0x1d4] sm:$0xf] }
 0x4ad   :  { %v11373_v55 = vld [vmem:[%s18638_s9 + $0x6e8] sm:$0xf0]  ;;  %v10644_v27 = vor.u32 %v12425_v9, %v10643_v38  ;;  %v12505_v40 = vld [vmem:[%s18638_s9 + $0x3ac] sm:$0xf0]  ;;  %v10741_v38 = vld [vmem:[%s18638_s9 + $0x1f0] sm:$0xf0] }
 0x4ae   :  { %7243 = vmatpush.bf16.msrb.mxu2 %v10768_v21  ;;  %7264 = vmatpush.bf16.msrb.mxu1 %v11440_v25  ;;  %v11376_v48 = vor.u32 %v12604_v45, %v11373_v55  ;;  %v12684_v17 = vld [vmem:[%s18638_s9 + $0x94c] sm:$0xf]  ;;  %v11123_v25 = vld [vmem:[%s18638_s9 + $0x4d0] sm:$0xf] }
 0x4af   :  { %7255 = vmatpush.bf16.msra.mxu3 %v11056_v49  ;;  %v11693_v57 = vld [vmem:[%s18638_s9 + $0x968] sm:$0xf0]  ;;  %v12513_v49 = vld [vmem:[%s18638_s9 + $0x3ec] sm:$0xf0]  ;;  %v11124_v33 = vor.u32 %v12545_v28, %v11123_v25 }
 0x4b0   :  { %7230 = vmatpush.bf16.msra.mxu0 %v10512_v24  ;;  %v12596_v32 = vld [vmem:[%s18638_s9 + $0x68c] sm:$0xf]  ;;  %v11696_v0 = vor.u32 %v12684_v17, %v11693_v57  ;;  %v12409_v45 = vld [vmem:[%s18638_s9 + $0xac] sm:$0xf0] }
 0x4b1   :  { %7244 = vmatmul.bf16.vlgmr.msrb.gmra.mxu2 %v16840_v54  ;;  %v11341_v60 = vld [vmem:[%s18638_s9 + $0x6a8] sm:$0xf0]  ;;  %v10931_v17 = vld [vmem:[%s18638_s9 + $0x350] sm:$0xf] }
 0x4b2   :  { %7295 = vmatpush.bf16.msra.mxu2 %v6975_v31  ;;  %7265 = vmatpush.bf16.msrb.mxu1 %v11408_v37  ;;  %v11344_v3 = vor.u32 %v12596_v32, %v11341_v60  ;;  %v12676_v15 = vld [vmem:[%s18638_s9 + $0x90c] sm:$0xf]  ;;  %v12537_v37 = vld [vmem:[%s18638_s9 + $0x4ac] sm:$0xf0] }
 0x4b3   :  { %7231 = vmatmul.bf16.vlgmr.msra.gmra.mxu0 %v16871_v8  ;;  %7256 = vmatpush.bf16.msra.mxu3 %v11024_v18  ;;  %v11661_v5 = vld [vmem:[%s18638_s9 + $0x928] sm:$0xf0]  ;;  %v10579_v18 = vld [vmem:[%s18638_s9 + $0x90] sm:$0xf]  ;;  %v11092_v23 = vor.u32 %v12537_v37, %v11091_v35 }
 0x4b4   :  { %7275 = vmatpush.bf16.msrb.mxu0 %v11760_v34  ;;  %v12588_v7 = vld [vmem:[%s18638_s9 + $0x64c] sm:$0xf]  ;;  %v11664_v50 = vor.u32 %v12676_v15, %v11661_v5  ;;  %v10996_v34 = vor.u32 %v12513_v49, %v10995_v51  ;;  %v10580_v47 = vor.u32 %v12409_v45, %v10579_v18  ;;  %v12497_v57 = vld [vmem:[%s18638_s9 + $0x36c] sm:$0xf0]  ;;  %v10744_v51 = vor.u32 %v12445_v63, %v10741_v38  ;;  %v10677_v18 = vld [vmem:[%s18638_s9 + $0x170] sm:$0xf0] }
 0x4b5   :  { %v11309_v41 = vld [vmem:[%s18638_s9 + $0x668] sm:$0xf0]  ;;  %v10547_v32 = vld [vmem:[%s18638_s9 + $0x50] sm:$0xf]  ;;  %v10613_v38 = vld [vmem:[%s18638_s9 + $0xf0] sm:$0xf0] }
 0x4b6   :  { %7327 = vmatpush.bf16.msrb.mxu2 %v11252_v39  ;;  %7257 = vmatmul.bf16.vlgmr.msra.gmra.mxu3 %v16924_v52  ;;  %v11312_v26 = vor.u32 %v12588_v7, %v11309_v41  ;;  %v12668_v11 = vld [vmem:[%s18638_s9 + $0x8cc] sm:$0xf]  ;;  %v10963_v39 = vld [vmem:[%s18638_s9 + $0x390] sm:$0xf] }
 0x4b7   :  { %7301 = vmatpush.bf16.msrb.mxu3 %v10740_v46  ;;  %7266 = vmatpush.bf16.msrb.mxu1 %v11376_v48  ;;  %v11629_v13 = vld [vmem:[%s18638_s9 + $0x8e8] sm:$0xf0]  ;;  %v10964_v53 = vor.u32 %v12505_v40, %v10963_v39  ;;  %v12529_v48 = vld [vmem:[%s18638_s9 + $0x46c] sm:$0xf0] }
 0x4b8   :  { %7276 = vmatpush.bf16.msrb.mxu0 %v11728_v20  ;;  %v12580_v16 = vld [vmem:[%s18638_s9 + $0x60c] sm:$0xf]  ;;  %v11632_v12 = vor.u32 %v12668_v11, %v11629_v13  ;;  %v11059_v20 = vld [vmem:[%s18638_s9 + $0x450] sm:$0xf] }
 0x4b9   :  { %v11277_v21 = vld [vmem:[%s18638_s9 + $0x628] sm:$0xf0]  ;;  %v12401_v60 = vld [vmem:[%s18638_s9 + $0x6c] sm:$0xf0]  ;;  %v11060_v62 = vor.u32 %v12529_v48, %v11059_v20 }
 0x4ba   :  { %7328 = vmatpush.bf16.msrb.mxu2 %v11220_v58  ;;  %v11280_v24 = vor.u32 %v12580_v16, %v11277_v21  ;;  %v12660_v31 = vld [vmem:[%s18638_s9 + $0x88c] sm:$0xf]  ;;  %v12641_v2 = vld [vmem:[%s18638_s9 + $0x7ec] sm:$0xf0]  ;;  %v10548_v15 = vor.u32 %v12401_v60, %v10547_v32  ;;  %v12421_v32 = vld [vmem:[%s18638_s9 + $0x114] sm:$0xf] }
 0x4bb   :  { %7302 = vmatpush.bf16.msrb.mxu3 %v10708_v61  ;;  %7267 = vmatpush.bf16.msrb.mxu1 %v11344_v3  ;;  %v11597_v59 = vld [vmem:[%s18638_s9 + $0x8a8] sm:$0xf0]  ;;  %v11027_v3 = vld [vmem:[%s18638_s9 + $0x410] sm:$0xf] }
 0x4bc   :  { %7277 = vmatpush.bf16.msrb.mxu0 %v11696_v0  ;;  %v11600_v43 = vor.u32 %v12660_v31, %v11597_v59  ;;  %v12652_v55 = vld [vmem:[%s18638_s9 + $0x84c] sm:$0xf]  ;;  %v10932_v0 = vor.u32 %v12497_v57, %v10931_v17  ;;  %v12521_v5 = vld [vmem:[%s18638_s9 + $0x42c] sm:$0xf0] }
 0x4bd   :  { %v11565_v46 = vld [vmem:[%s18638_s9 + $0x868] sm:$0xf0]  ;;  %v12489_v7 = vld [vmem:[%s18638_s9 + $0x32c] sm:$0xf0]  ;;  %v11028_v11 = vor.u32 %v12521_v5, %v11027_v3 }
 0x4be   :  { %7329 = vmatpush.bf16.msrb.mxu2 %v11188_v6  ;;  %v17616_v22 = vpop.f32.mrf.mxu1  ;;  %v11568_v58 = vor.u32 %v12652_v55, %v11565_v46  ;;  %v12644_v61 = vld [vmem:[%s18638_s9 + $0x80c] sm:$0xf]  ;;  %v10899_v6 = vld [vmem:[%s18638_s9 + $0x310] sm:$0xf] }
 0x4bf   :  { %7303 = vmatpush.bf16.msrb.mxu3 %v10676_v10  ;;  %7268 = vmatpush.bf16.msrb.mxu1 %v11312_v26  ;;  %v11533_v56 = vld [vmem:[%s18638_s9 + $0x828] sm:$0xf0]  ;;  %v10515_v10 = vld [vmem:[%s18638_s9 + $0x10] sm:$0xf]  ;;  %v10900_v13 = vor.u32 %v12489_v7, %v10899_v6 }
 0x4c0   :  { %7278 = vmatpush.bf16.msrb.mxu0 %v11664_v50  ;;  %v11536_v41 = vor.u32 %v12644_v61, %v11533_v56  ;;  %v12393_v44 = vld [vmem:[%s18638_s9 + $0x2c] sm:$0xf0]  ;;  %v11508_v50 = vor.u32 %v12641_v2, %v11507_v19  ;;  %v10645_v56 = vld [vmem:[%s18638_s9 + $0x130] sm:$0xf0] }
 0x4c1   :  { %11780 = vmatmul.msk.bf16.vlgmr.msra.gmra.mxu2 %vm4450_vm2, %v17017_v1  ;;  %v11763_v9 = vld [vmem:[%s18638_s9 + $0x9d0] sm:$0xf]  ;;  %v10516_v25 = vor.u32 %v12393_v44, %v10515_v10  ;;  %v10648_v7 = vor.u32 %v12421_v32, %v10645_v56  ;;  %v12413_v10 = vld [vmem:[%s18638_s9 + $0xd4] sm:$0xf]  ;;  %v17858_v32 = vld [vmem:[%s18640_s10] sm:$0xff] }
 0x4c2   :  { %7330 = vmatpush.bf16.msrb.mxu2 %v11156_v14  ;;  %v12705_v26 = vld [vmem:[%s18638_s9 + $0x9ec] sm:$0xf0]  ;;  %v12389_v56 = vld [vmem:[%s18638_s9 + $0x14] sm:$0xf] }
 0x4c3   :  { %7304 = vmatpush.bf16.msrb.mxu3 %v10644_v27  ;;  %7269 = vmatpush.bf16.msrb.mxu1 %v11280_v24  ;;  %v11475_v14 = vld [vmem:[%s18638_s9 + $0x790] sm:$0xf]  ;;  %v11764_v49 = vor.u32 %v12705_v26, %v11763_v9 }
 0x4c4   :  { %7279 = vmatpush.bf16.msrb.mxu0 %v11632_v12  ;;  %v12633_v16 = vld [vmem:[%s18638_s9 + $0x7ac] sm:$0xf0]  ;;  %v12437_v12 = vld [vmem:[%s18638_s9 + $0x194] sm:$0xf] }
 0x4c5   :  { %v10867_v27 = vld [vmem:[%s18638_s9 + $0x2d0] sm:$0xf]  ;;  %v11476_v29 = vor.u32 %v12633_v16, %v11475_v14  ;;  %v10712_v39 = vor.u32 %v12437_v12, %v10709_v30  ;;  %v12573_v16 = vld [vmem:[%s18638_s9 + $0x5d4] sm:$0xf] }
 0x4c6   :  { %7331 = vmatpush.bf16.msrb.mxu2 %v11124_v33  ;;  %7270 = vmatmul.bf16.vlgmr.msrb.gmra.mxu1 %v16990_v4  ;;  %v7013_v21 = vpop.f32.mrf.mxu1  ;;  %v12481_v28 = vld [vmem:[%s18638_s9 + $0x2ec] sm:$0xf0]  ;;  %v10581_v12 = vld [vmem:[%s18638_s9 + $0xb0] sm:$0xf0] }
 0x4c7   :  { %7314 = vmatpush.bf16.msra.mxu1 %v10996_v34  ;;  %7305 = vmatpush.bf16.msrb.mxu3 %v10612_v36  ;;  %v11731_v24 = vld [vmem:[%s18638_s9 + $0x990] sm:$0xf]  ;;  %v10868_v59 = vor.u32 %v12481_v28, %v10867_v27  ;;  %v11253_v21 = vld [vmem:[%s18638_s9 + $0x5f0] sm:$0xf0] }
 0x4c8   :  { %7280 = vmatpush.bf16.msrb.mxu0 %v11600_v43  ;;  %v12697_v31 = vld [vmem:[%s18638_s9 + $0x9ac] sm:$0xf0]  ;;  %v12429_v43 = vld [vmem:[%s18638_s9 + $0x154] sm:$0xf] }
 0x4c9   :  { %v11443_v33 = vld [vmem:[%s18638_s9 + $0x750] sm:$0xf]  ;;  %v11732_v40 = vor.u32 %v12697_v31, %v11731_v24  ;;  %v10680_v57 = vor.u32 %v12429_v43, %v10677_v18  ;;  %v11256_v24 = vor.u32 %v12573_v16, %v11253_v21 }
 0x4ca   :  { %7332 = vmatpush.bf16.msrb.mxu2 %v11092_v23  ;;  %v12625_v34 = vld [vmem:[%s18638_s9 + $0x76c] sm:$0xf0]  ;;  %v17707_v35 = vpop.f32.mrf.mxu3 }
 0x4cb   :  { %7315 = vmatpush.bf16.msra.mxu1 %v10964_v53  ;;  %7306 = vmatpush.bf16.msrb.mxu3 %v10580_v47  ;;  %v10835_v36 = vld [vmem:[%s18638_s9 + $0x290] sm:$0xf]  ;;  %v11444_v45 = vor.u32 %v12625_v34, %v11443_v33  ;;  %v12565_v33 = vld [vmem:[%s18638_s9 + $0x594] sm:$0xf] }
 0x4cc   :  { %7281 = vmatpush.bf16.msrb.mxu0 %v11568_v58  ;;  %v12473_v37 = vld [vmem:[%s18638_s9 + $0x2ac] sm:$0xf0]  ;;  %v11221_v34 = vld [vmem:[%s18638_s9 + $0x5b0] sm:$0xf0] }
 0x4cd   :  { %v11699_v55 = vld [vmem:[%s18638_s9 + $0x950] sm:$0xf]  ;;  %v10836_v53 = vor.u32 %v12473_v37, %v10835_v36 }
 0x4ce   :  { %7333 = vmatpush.bf16.msrb.mxu2 %v11060_v62  ;;  %v12689_v46 = vld [vmem:[%s18638_s9 + $0x96c] sm:$0xf0] }
 0x4cf   :  { %7316 = vmatpush.bf16.msra.mxu1 %v10932_v0  ;;  %7307 = vmatpush.bf16.msrb.mxu3 %v10548_v15  ;;  %v17731_v23 = vld [vmem:[%s18638_s9 + $0xa10] sm:$0xff]  ;;  %v11700_v58 = vor.u32 %v12689_v46, %v11699_v55 }
 0x4d0   :  { %7282 = vmatpush.bf16.msrb.mxu0 %v11536_v41  ;;  %v11411_v20 = vld [vmem:[%s18638_s9 + $0x710] sm:$0xf]  ;;  %v6310_v60 = vunpack.c.l.b16 %v17731_v23 }
 0x4d1   :  { %v12617_v47 = vld [vmem:[%s18638_s9 + $0x72c] sm:$0xf0] }
 0x4d2   :  { %7334 = vmatpush.bf16.msrb.mxu2 %v11028_v11  ;;  %v10803_v48 = vld [vmem:[%s18638_s9 + $0x250] sm:$0xf]  ;;  %v11412_v61 = vor.u32 %v12617_v47, %v11411_v20  ;;  %v7000_v15 = vpop.f32.mrf.mxu3  ;;  %v6638_v44 = vpack.c.b16 %v6310_v60, %v6310_v60 }
 0x4d3   :  { %7317 = vmatpush.bf16.msra.mxu1 %v10900_v13  ;;  %7283 = vmatmul.bf16.vlgmr.msrb.gmra.mxu0 %v17073_v42  ;;  %v12465_v17 = vld [vmem:[%s18638_s9 + $0x26c] sm:$0xf0] }
 0x4d4   :  { %7340 = vmatpush.bf16.msra.mxu0 %v11508_v50  ;;  %7308 = vmatpush.bf16.msrb.mxu3 %v10516_v25  ;;  %v11667_v62 = vld [vmem:[%s18638_s9 + $0x910] sm:$0xf]  ;;  %v10804_v19 = vor.u32 %v12465_v17, %v10803_v48  ;;  %v17774_v63 = vpop.f32.mrf.mxu2  ;;  %v10616_v25 = vor.u32 %v12413_v10, %v10613_v38  ;;  %v6978_v28 = vsel %vm4454_vm1, %v6638_v44, 0  ;;  %v12509_v48 = vld [vmem:[%s18638_s9 + $0x3d4] sm:$0xf] }
 0x4d5   :  { %7335 = vmatmul.bf16.vlgmr.msrb.gmra.mxu2 %v16924_v52  ;;  %v12681_v0 = vld [vmem:[%s18638_s9 + $0x92c] sm:$0xf0]  ;;  %v10997_v17 = vld [vmem:[%s18638_s9 + $0x3f0] sm:$0xf0] }
 0x4d6   :  { %7379 = vmatpush.bf16.msra.mxu2 %v10744_v51  ;;  %v11379_v2 = vld [vmem:[%s18638_s9 + $0x6d0] sm:$0xf]  ;;  %v11668_v41 = vor.u32 %v12681_v0, %v11667_v62  ;;  %v12405_v51 = vld [vmem:[%s18638_s9 + $0x94] sm:$0xf] }
 0x4d7   :  { %7309 = vmatmul.bf16.vlgmr.msrb.gmra.mxu3 %v16871_v8  ;;  %7318 = vmatpush.bf16.msra.mxu1 %v10868_v59  ;;  %v12609_v3 = vld [vmem:[%s18638_s9 + $0x6ec] sm:$0xf0]  ;;  %v10584_v36 = vor.u32 %v12405_v51, %v10581_v12  ;;  %v10517_v0 = vld [vmem:[%s18638_s9 + $0x30] sm:$0xf0] }
 0x4d8   :  { %7353 = vmatpush.bf16.msra.mxu3 %v11764_v49  ;;  %7341 = vmatpush.bf16.msra.mxu0 %v11476_v29  ;;  %v10771_v5 = vld [vmem:[%s18638_s9 + $0x210] sm:$0xf]  ;;  %v11380_v50 = vor.u32 %v12609_v3, %v11379_v2  ;;  %v11000_v3 = vor.u32 %v12509_v48, %v10997_v17  ;;  %v11509_v10 = vld [vmem:[%s18638_s9 + $0x7f0] sm:$0xf0]  ;;  %v10520_v38 = vor.u32 %v12389_v56, %v10517_v0 }
 0x4d9   :  { %v12457_v6 = vld [vmem:[%s18638_s9 + $0x22c] sm:$0xf0]  ;;  %v12501_v44 = vld [vmem:[%s18638_s9 + $0x394] sm:$0xf] }
 0x4da   :  { %7380 = vmatpush.bf16.msra.mxu2 %v10712_v39  ;;  %v11635_v9 = vld [vmem:[%s18638_s9 + $0x8d0] sm:$0xf]  ;;  %v10772_v11 = vor.u32 %v12457_v6, %v10771_v5  ;;  %v12397_v39 = vld [vmem:[%s18638_s9 + $0x54] sm:$0xf] }
 0x4db   :  { %7319 = vmatpush.bf16.msra.mxu1 %v10836_v53  ;;  %v12673_v26 = vld [vmem:[%s18638_s9 + $0x8ec] sm:$0xf0]  ;;  %v11224_v53 = vor.u32 %v12565_v33, %v11221_v34  ;;  %v12701_v5 = vld [vmem:[%s18638_s9 + $0x9d4] sm:$0xf] }
 0x4dc   :  { %7354 = vmatpush.bf16.msra.mxu3 %v11732_v40  ;;  %7342 = vmatpush.bf16.msra.mxu0 %v11444_v45  ;;  %v11347_v13 = vld [vmem:[%s18638_s9 + $0x690] sm:$0xf]  ;;  %v11636_v27 = vor.u32 %v12673_v26, %v11635_v9  ;;  %v7026_v40 = vpop.f32.mrf.mxu2  ;;  %v17826_v43 = vpop.f32.mrf.mxu0  ;;  %v10549_v45 = vld [vmem:[%s18638_s9 + $0x70] sm:$0xf0] }
 0x4dd   :  { %v12601_v14 = vld [vmem:[%s18638_s9 + $0x6ac] sm:$0xf0]  ;;  %v10552_v60 = vor.u32 %v12397_v39, %v10549_v45  ;;  %v11765_v6 = vld [vmem:[%s18638_s9 + $0x9f0] sm:$0xf0] }
 0x4de   :  { %7381 = vmatpush.bf16.msra.mxu2 %v10680_v57  ;;  %v11348_v49 = vor.u32 %v12601_v14, %v11347_v13  ;;  %v11603_v29 = vld [vmem:[%s18638_s9 + $0x890] sm:$0xf]  ;;  %v12557_v57 = vld [vmem:[%s18638_s9 + $0x554] sm:$0xf]  ;;  %v11768_v21 = vor.u32 %v12701_v5, %v11765_v6 }
 0x4df   :  { %7320 = vmatpush.bf16.msra.mxu1 %v10804_v19  ;;  %v12665_v30 = vld [vmem:[%s18638_s9 + $0x8ac] sm:$0xf0]  ;;  %v12549_v9 = vld [vmem:[%s18638_s9 + $0x514] sm:$0xf] }
 0x4e0   :  { %7355 = vmatpush.bf16.msra.mxu3 %v11700_v58  ;;  %7343 = vmatpush.bf16.msra.mxu0 %v11412_v61  ;;  %v11315_v31 = vld [vmem:[%s18638_s9 + $0x650] sm:$0xf]  ;;  %v11604_v37 = vor.u32 %v12665_v30, %v11603_v29  ;;  %v11189_v58 = vld [vmem:[%s18638_s9 + $0x570] sm:$0xf0] }
 0x4e1   :  { %v12593_v59 = vld [vmem:[%s18638_s9 + $0x66c] sm:$0xf0]  ;;  %v11192_v15 = vor.u32 %v12557_v57, %v11189_v58  ;;  %v11157_v26 = vld [vmem:[%s18638_s9 + $0x530] sm:$0xf0] }
 0x4e2   :  { %7382 = vmatpush.bf16.msra.mxu2 %v10648_v7  ;;  %v11316_v18 = vor.u32 %v12593_v59, %v11315_v31  ;;  %v11571_v55 = vld [vmem:[%s18638_s9 + $0x850] sm:$0xf]  ;;  %v12637_v7 = vld [vmem:[%s18638_s9 + $0x7d4] sm:$0xf]  ;;  %v11160_v12 = vor.u32 %v12549_v9, %v11157_v26 }
 0x4e3   :  { %7321 = vmatpush.bf16.msra.mxu1 %v10772_v11  ;;  %v12657_v46 = vld [vmem:[%s18638_s9 + $0x86c] sm:$0xf0]  ;;  %v5326_v11 = vperm.slane %v17858_v32, 0  ;;  %v11733_v51 = vld [vmem:[%s18638_s9 + $0x9b0] sm:$0xf0] }
 0x4e4   :  { %7356 = vmatpush.bf16.msra.mxu3 %v11668_v41  ;;  %7344 = vmatpush.bf16.msra.mxu0 %v11380_v50  ;;  %v11283_v20 = vld [vmem:[%s18638_s9 + $0x610] sm:$0xf]  ;;  %v11572_v61 = vor.u32 %v12657_v46, %v11571_v55  ;;  %v17881_v41 = vpop.f32.mrf.mxu1  ;;  %v10965_v50 = vld [vmem:[%s18638_s9 + $0x3b0] sm:$0xf0]  ;;  %v7039_v13 = vpop.f32.mrf.mxu0 }
 0x4e5   :  { %v12585_v47 = vld [vmem:[%s18638_s9 + $0x62c] sm:$0xf0]  ;;  %v17899_v14 = vpop.f32.mrf.mxu2  ;;  %v11477_v29 = vld [vmem:[%s18638_s9 + $0x7b0] sm:$0xf0]  ;;  %v6999_v34 = vadd.f32 %v17707_v35, %v5326_v11 }
 0x4e6   :  { %7383 = vmatpush.bf16.msra.mxu2 %v10616_v25  ;;  %7322 = vmatmul.bf16.vlgmr.msra.gmra.mxu1 %v16840_v54  ;;  %v11284_v62 = vor.u32 %v12585_v47, %v11283_v20  ;;  %v11539_v19 = vld [vmem:[%s18638_s9 + $0x810] sm:$0xf]  ;;  %v11512_v25 = vor.u32 %v12637_v7, %v11509_v10  ;;  %v12493_v30 = vld [vmem:[%s18638_s9 + $0x354] sm:$0xf] }
 0x4e7   :  { %7373 = vmatpush.bf16.msrb.mxu1 %v6978_v28  ;;  %v12649_v2 = vld [vmem:[%s18638_s9 + $0x82c] sm:$0xf0]  ;;  %v12693_v28 = vld [vmem:[%s18638_s9 + $0x994] sm:$0xf]  ;;  %v7012_v57 = vadd.f32 %v17616_v22, %v6999_v34 }
 0x4e8   :  { %7357 = vmatpush.bf16.msra.mxu3 %v11636_v27  ;;  %7345 = vmatpush.bf16.msra.mxu0 %v11348_v49  ;;  %v11540_v16 = vor.u32 %v12649_v2, %v11539_v19  ;;  %v10968_v27 = vor.u32 %v12501_v44, %v10965_v50  ;;  %v12629_v49 = vld [vmem:[%s18638_s9 + $0x794] sm:$0xf]  ;;  %v11736_v33 = vor.u32 %v12693_v28, %v11733_v51 }
 0x4e9   :  { %v12541_v31 = vld [vmem:[%s18638_s9 + $0x4d4] sm:$0xf] }
 0x4ea   :  { %7384 = vmatpush.bf16.msra.mxu2 %v10584_v36  ;;  %v11125_v59 = vld [vmem:[%s18638_s9 + $0x4f0] sm:$0xf0]  ;;  %v11480_v36 = vor.u32 %v12629_v49, %v11477_v29  ;;  %v12450_v29 = vld [vmem:[%s18638_s9 + $0x1f4] sm:$0xf0] }
 0x4eb   :  { %7405 = vmatpush.bf16.msra.mxu1 %v11256_v24  ;;  %v10933_v24 = vld [vmem:[%s18638_s9 + $0x370] sm:$0xf0]  ;;  %v11128_v45 = vor.u32 %v12541_v31, %v11125_v59 }
 0x4ec   :  { %7358 = vmatpush.bf16.msra.mxu3 %v11604_v37  ;;  %7346 = vmatpush.bf16.msra.mxu0 %v11316_v18  ;;  %v10936_v37 = vor.u32 %v12493_v30, %v10933_v24  ;;  %v12685_v39 = vld [vmem:[%s18638_s9 + $0x954] sm:$0xf]  ;;  %v7065_v35 = vpop.f32.mrf.mxu1  ;;  %v17956_v58 = vpop.f32.mrf.mxu0 }
 0x4ed   :  { %v11701_v40 = vld [vmem:[%s18638_s9 + $0x970] sm:$0xf0]  ;;  %v7078_v48 = vpop.f32.mrf.mxu2 }
 0x4ee   :  { %7385 = vmatpush.bf16.msra.mxu2 %v10552_v60  ;;  %v12621_v18 = vld [vmem:[%s18638_s9 + $0x754] sm:$0xf]  ;;  %v11704_v17 = vor.u32 %v12685_v39, %v11701_v40 }
 0x4ef   :  { %7406 = vmatpush.bf16.msra.mxu1 %v11224_v53  ;;  %v11445_v55 = vld [vmem:[%s18638_s9 + $0x770] sm:$0xf0] }
 0x4f0   :  { %7359 = vmatpush.bf16.msra.mxu3 %v11572_v61  ;;  %7347 = vmatpush.bf16.msra.mxu0 %v11284_v62  ;;  %v12485_v46 = vld [vmem:[%s18638_s9 + $0x314] sm:$0xf]  ;;  %v11448_v60 = vor.u32 %v12621_v18, %v11445_v55  ;;  %v6311_v18 = vunpack.c.h.b16 %v17731_v23 }
 0x4f1   :  { %v10901_v53 = vld [vmem:[%s18638_s9 + $0x330] sm:$0xf0] }
 0x4f2   :  { %7386 = vmatpush.bf16.msra.mxu2 %v10520_v38  ;;  %v12533_v20 = vld [vmem:[%s18638_s9 + $0x494] sm:$0xf]  ;;  %v10904_v61 = vor.u32 %v12485_v46, %v10901_v53  ;;  %v7050_v26 = vpop.f32.mrf.mxu3  ;;  %v10715_v46 = vld [vmem:[%s18638_s9 + $0x198] sm:$0xf] }
 0x4f3   :  { %7407 = vmatpush.bf16.msra.mxu1 %v11192_v15  ;;  %7348 = vmatmul.bf16.vlgmr.msra.gmra.mxu0 %v16990_v4  ;;  %v11093_v47 = vld [vmem:[%s18638_s9 + $0x4b0] sm:$0xf0]  ;;  %v7025_v15 = vadd.f32 %v17774_v63, %v7012_v57  ;;  %v12442_v53 = vld [vmem:[%s18638_s9 + $0x1b4] sm:$0xf0] }
 0x4f4   :  { %7392 = vmatpush.bf16.msrb.mxu0 %v11000_v3  ;;  %7360 = vmatpush.bf16.msra.mxu3 %v11540_v16  ;;  %v12677_v56 = vld [vmem:[%s18638_s9 + $0x914] sm:$0xf]  ;;  %v11096_v22 = vor.u32 %v12533_v20, %v11093_v47  ;;  %v17993_v11 = vpop.f32.mrf.mxu1  ;;  %v7091_v24 = vpop.f32.mrf.mxu0 }
 0x4f5   :  { %7387 = vmatmul.bf16.vlgmr.msra.gmra.mxu2 %v16871_v8  ;;  %v11669_v62 = vld [vmem:[%s18638_s9 + $0x930] sm:$0xf0]  ;;  %v7038_v10 = vadd.f32 %v17826_v43, %v7025_v15  ;;  %v18010_v51 = vpop.f32.mrf.mxu2 }
 0x4f6   :  { %7431 = vmatpush.bf16.msrb.mxu2 %v11768_v21  ;;  %11781 = vmatmul.msk.bf16.vlgmr.msrb.gmra.mxu1 %vm4450_vm2, %v17017_v1  ;;  %v12613_v0 = vld [vmem:[%s18638_s9 + $0x714] sm:$0xf]  ;;  %v11672_v7 = vor.u32 %v12677_v56, %v11669_v62 }
 0x4f7   :  { %7408 = vmatpush.bf16.msra.mxu1 %v11160_v12  ;;  %7361 = vmatmul.bf16.vlgmr.msra.gmra.mxu3 %v17073_v42  ;;  %v11413_v19 = vld [vmem:[%s18638_s9 + $0x730] sm:$0xf0]  ;;  %v10747_v12 = vld [vmem:[%s18638_s9 + $0x1d8] sm:$0xf] }
 0x4f8   :  { %7418 = vmatpush.bf16.msrb.mxu3 %v11512_v25  ;;  %7393 = vmatpush.bf16.msrb.mxu0 %v10968_v27  ;;  %v12477_v2 = vld [vmem:[%s18638_s9 + $0x2d4] sm:$0xf]  ;;  %v11416_v44 = vor.u32 %v12613_v0, %v11413_v19  ;;  %v7051_v25 = vadd.f32 %v7050_v26, %v7038_v10  ;;  %v10748_v35 = vor.u32 %v12450_v29, %v10747_v12  ;;  %v11515_v26 = vld [vmem:[%s18638_s9 + $0x7d8] sm:$0xf] }
 0x4f9   :  { %v10869_v3 = vld [vmem:[%s18638_s9 + $0x2f0] sm:$0xf0]  ;;  %v6639_v0 = vpack.c.b16 %v6311_v18, %v6311_v18  ;;  %v12426_v12 = vld [vmem:[%s18638_s9 + $0x134] sm:$0xf0] }
 0x4fa   :  { %7432 = vmatpush.bf16.msrb.mxu2 %v11736_v33  ;;  %v12525_v5 = vld [vmem:[%s18638_s9 + $0x454] sm:$0xf]  ;;  %v10872_v50 = vor.u32 %v12477_v2, %v10869_v3  ;;  %v7064_v30 = vadd.f32 %v17881_v41, %v7051_v25  ;;  %v7052_v57 = vpop.f32.mrf.mxu3  ;;  %v12514_v25 = vld [vmem:[%s18638_s9 + $0x3f4] sm:$0xf0] }
 0x4fb   :  { %7409 = vmatpush.bf16.msra.mxu1 %v11128_v45  ;;  %v11061_v6 = vld [vmem:[%s18638_s9 + $0x470] sm:$0xf0]  ;;  %v5327_v45 = vperm.slane %v17858_v32, 1  ;;  %v11227_v18 = vld [vmem:[%s18638_s9 + $0x598] sm:$0xf] }
 0x4fc   :  { %7419 = vmatpush.bf16.msrb.mxu3 %v11480_v36  ;;  %7394 = vmatpush.bf16.msrb.mxu0 %v10936_v37  ;;  %v12669_v63 = vld [vmem:[%s18638_s9 + $0x8d4] sm:$0xf]  ;;  %v11064_v43 = vor.u32 %v12525_v5, %v11061_v6  ;;  %12711 = vtanh.f32 %v7064_v30  ;;  %v10683_v5 = vld [vmem:[%s18638_s9 + $0x158] sm:$0xf] }
 0x4fd   :  { %v11637_v38 = vld [vmem:[%s18638_s9 + $0x8f0] sm:$0xf0]  ;;  %v7130_v2 = vpop.f32.mrf.mxu2  ;;  %v12434_v6 = vld [vmem:[%s18638_s9 + $0x174] sm:$0xf0]  ;;  %v7077_v10 = vadd.f32 %v17899_v14, %v5327_v45  ;;  %v6981_v14 = vsel %vm4454_vm1, %v6639_v0, 0 }
 0x4fe   :  { %7433 = vmatpush.bf16.msrb.mxu2 %v11704_v17  ;;  %v12605_v9 = vld [vmem:[%s18638_s9 + $0x6d4] sm:$0xf]  ;;  %v11640_v49 = vor.u32 %v12669_v63, %v11637_v38  ;;  %v10619_v45 = vld [vmem:[%s18638_s9 + $0xd8] sm:$0xf] }
 0x4ff   :  { %7410 = vmatpush.bf16.msra.mxu1 %v11096_v22  ;;  %v11381_v13 = vld [vmem:[%s18638_s9 + $0x6f0] sm:$0xf0]  ;;  %v10716_v22 = vor.u32 %v12442_v53, %v10715_v46  ;;  %v10587_v0 = vld [vmem:[%s18638_s9 + $0x98] sm:$0xf] }
 0x500   :  { %7420 = vmatpush.bf16.msrb.mxu3 %v11448_v60  ;;  %7395 = vmatpush.bf16.msrb.mxu0 %v10904_v61  ;;  %v12469_v16 = vld [vmem:[%s18638_s9 + $0x294] sm:$0xf]  ;;  %v11384_v31 = vor.u32 %v12605_v9, %v11381_v13  ;;  %v7104_v60 = vpop.f32.mrf.mxu1  ;;  %v11003_v13 = vld [vmem:[%s18638_s9 + $0x3d8] sm:$0xf] }
 0x501   :  { %v10837_v21 = vld [vmem:[%s18638_s9 + $0x2b0] sm:$0xf0] }
 0x502   :  { %v12517_v27 = vld [vmem:[%s18638_s9 + $0x414] sm:$0xf]  ;;  %7434 = vmatpush.bf16.msrb.mxu2 %v11672_v7  ;;  %v10840_v59 = vor.u32 %v12469_v16, %v10837_v21  ;;  %v12712_v7 = vpop.eup %12711  ;;  %v7090_v16 = vadd.f32 %v17956_v58, %v7077_v10  ;;  %v10684_v21 = vor.u32 %v12434_v6, %v10683_v5  ;;  %v10651_v58 = vld [vmem:[%s18638_s9 + $0x118] sm:$0xf] }
 0x503   :  { %v11029_v28 = vld [vmem:[%s18638_s9 + $0x430] sm:$0xf0]  ;;  %7411 = vmatpush.bf16.msra.mxu1 %v11064_v43  ;;  %7621 = vst [vmem:[%s18641_s11] sm:$0xff] %v12712_v7  ;;  %v12642_v43 = vld [vmem:[%s18638_s9 + $0x7f4] sm:$0xf0] }
 0x504   :  { %7421 = vmatpush.bf16.msrb.mxu3 %v11416_v44  ;;  %7396 = vmatpush.bf16.msrb.mxu0 %v10872_v50  ;;  %v12661_v33 = vld [vmem:[%s18638_s9 + $0x894] sm:$0xf]  ;;  %v11032_v37 = vor.u32 %v12517_v27, %v11029_v28  ;;  %v7141_v44 = vpop.f32.mrf.mxu0  ;;  %v11259_v27 = vld [vmem:[%s18638_s9 + $0x5d8] sm:$0xf]  ;;  %v7103_v29 = vadd.f32 %v17993_v11, %v7090_v16  ;;  %v11516_v24 = vor.u32 %v12642_v43, %v11515_v26 }
 0x505   :  { %v11605_v34 = vld [vmem:[%s18638_s9 + $0x8b0] sm:$0xf0]  ;;  %v12578_v28 = vld [vmem:[%s18638_s9 + $0x5f4] sm:$0xf0] }
 0x506   :  { %v12597_v36 = vld [vmem:[%s18638_s9 + $0x694] sm:$0xf]  ;;  %7435 = vmatpush.bf16.msrb.mxu2 %v11640_v49  ;;  %v11608_v55 = vor.u32 %v12661_v33, %v11605_v34  ;;  %v11004_v33 = vor.u32 %v12514_v25, %v11003_v13  ;;  %v11260_v34 = vor.u32 %v12578_v28, %v11259_v27  ;;  %v10971_v11 = vld [vmem:[%s18638_s9 + $0x398] sm:$0xf] }
 0x507   :  { %v11349_v41 = vld [vmem:[%s18638_s9 + $0x6b0] sm:$0xf0]  ;;  %7412 = vmatpush.bf16.msra.mxu1 %v11032_v37  ;;  %v12634_v37 = vld [vmem:[%s18638_s9 + $0x7b4] sm:$0xf0] }
 0x508   :  { %v12461_v39 = vld [vmem:[%s18638_s9 + $0x254] sm:$0xf]  ;;  %7422 = vmatpush.bf16.msrb.mxu3 %v11384_v31  ;;  %7397 = vmatpush.bf16.msrb.mxu0 %v10840_v59  ;;  %v11352_v20 = vor.u32 %v12597_v36, %v11349_v41  ;;  %v7115_v31 = vpop.f32.mrf.mxu3  ;;  %v18113_v59 = vpop.f32.mrf.mxu1  ;;  %v11483_v36 = vld [vmem:[%s18638_s9 + $0x798] sm:$0xf] }
 0x509   :  { %v10805_v40 = vld [vmem:[%s18638_s9 + $0x270] sm:$0xf0]  ;;  %v7116_v41 = vadd.f32 %v7115_v31, %v7103_v29  ;;  %v11419_v6 = vld [vmem:[%s18638_s9 + $0x718] sm:$0xf]  ;;  %v5328_v31 = vperm.slane %v17858_v32, 2 }
 0x50a   :  { %v10808_v47 = vor.u32 %v12461_v39, %v10805_v40  ;;  %v12653_v23 = vld [vmem:[%s18638_s9 + $0x854] sm:$0xf]  ;;  %7436 = vmatpush.bf16.msrb.mxu2 %v11608_v55  ;;  %7413 = vmatmul.bf16.vlgmr.msra.gmra.mxu1 %v16924_v52  ;;  %v10652_v39 = vor.u32 %v12426_v12, %v10651_v58  ;;  %v12506_v40 = vld [vmem:[%s18638_s9 + $0x3b4] sm:$0xf0] }
 0x50b   :  { %v11573_v48 = vld [vmem:[%s18638_s9 + $0x870] sm:$0xf0]  ;;  %7457 = vmatpush.bf16.msrb.mxu1 %v10748_v35  ;;  %v12570_v35 = vld [vmem:[%s18638_s9 + $0x5b4] sm:$0xf0]  ;;  %v7129_v46 = vadd.f32 %v18010_v51, %v7116_v41 }
 0x50c   :  { %v12589_v17 = vld [vmem:[%s18638_s9 + $0x654] sm:$0xf]  ;;  %v11576_v3 = vor.u32 %v12653_v23, %v11573_v48  ;;  %7423 = vmatpush.bf16.msrb.mxu3 %v11352_v20  ;;  %7398 = vmatpush.bf16.msrb.mxu0 %v10808_v47  ;;  %v12418_v55 = vld [vmem:[%s18638_s9 + $0xf4] sm:$0xf0]  ;;  %v7143_v53 = vpop.f32.mrf.mxu0  ;;  %v11484_v20 = vor.u32 %v12634_v37, %v11483_v36  ;;  %v10972_v47 = vor.u32 %v12506_v40, %v10971_v11 }
 0x50d   :  { %v11317_v61 = vld [vmem:[%s18638_s9 + $0x670] sm:$0xf0]  ;;  %v11228_v23 = vor.u32 %v12570_v35, %v11227_v18  ;;  %v11451_v48 = vld [vmem:[%s18638_s9 + $0x758] sm:$0xf]  ;;  %v7142_v57 = vadd.f32 %v7141_v44, %v7129_v46  ;;  %v10620_v60 = vor.u32 %v12418_v55, %v10619_v45 }
 0x50e   :  { %v12453_v56 = vld [vmem:[%s18638_s9 + $0x214] sm:$0xf]  ;;  %v11320_v50 = vor.u32 %v12589_v17, %v11317_v61  ;;  %7437 = vmatpush.bf16.msrb.mxu2 %v11576_v3  ;;  %v12626_v17 = vld [vmem:[%s18638_s9 + $0x774] sm:$0xf0] }
 0x50f   :  { %v10773_v62 = vld [vmem:[%s18638_s9 + $0x230] sm:$0xf0]  ;;  %7458 = vmatpush.bf16.msrb.mxu1 %v10716_v22  ;;  %v10939_v51 = vld [vmem:[%s18638_s9 + $0x358] sm:$0xf]  ;;  %12713 = vtanh.f32 %v7142_v57 }
 0x510   :  { %v12645_v19 = vld [vmem:[%s18638_s9 + $0x814] sm:$0xf]  ;;  %v10776_v63 = vor.u32 %v12453_v56, %v10773_v62  ;;  %7424 = vmatpush.bf16.msrb.mxu3 %v11320_v50  ;;  %v12498_v61 = vld [vmem:[%s18638_s9 + $0x374] sm:$0xf0]  ;;  %v7117_v2 = vpop.f32.mrf.mxu3  ;;  %v7156_v3 = vpop.f32.mrf.mxu1 }
 0x511   :  { %v11541_v15 = vld [vmem:[%s18638_s9 + $0x830] sm:$0xf0]  ;;  %v11195_v56 = vld [vmem:[%s18638_s9 + $0x558] sm:$0xf] }
 0x512   :  { %v12581_v38 = vld [vmem:[%s18638_s9 + $0x614] sm:$0xf]  ;;  %v11544_v49 = vor.u32 %v12645_v19, %v11541_v15  ;;  %7399 = vmatpush.bf16.msrb.mxu0 %v10776_v63  ;;  %v12562_v62 = vld [vmem:[%s18638_s9 + $0x574] sm:$0xf0]  ;;  %v11452_v19 = vor.u32 %v12626_v17, %v11451_v48  ;;  %v10940_v15 = vor.u32 %v12498_v61, %v10939_v51 }
 0x513   :  { %v11285_v9 = vld [vmem:[%s18638_s9 + $0x630] sm:$0xf0]  ;;  %7459 = vmatpush.bf16.msrb.mxu1 %v10684_v21  ;;  %v12410_v22 = vld [vmem:[%s18638_s9 + $0xb4] sm:$0xf0]  ;;  %v11196_v5 = vor.u32 %v12562_v62, %v11195_v56 }
 0x514   :  { %v11288_v30 = vor.u32 %v12581_v38, %v11285_v9  ;;  %7438 = vmatpush.bf16.msrb.mxu2 %v11544_v49  ;;  %v12618_v7 = vld [vmem:[%s18638_s9 + $0x734] sm:$0xf0]  ;;  %v10588_v44 = vor.u32 %v12410_v22, %v10587_v0 }
 0x515   :  { %7400 = vmatmul.bf16.vlgmr.msrb.gmra.mxu0 %v16840_v54  ;;  %v10907_v10 = vld [vmem:[%s18638_s9 + $0x318] sm:$0xf]  ;;  %v11420_v43 = vor.u32 %v12618_v7, %v11419_v6  ;;  %v12714_v28 = vpop.eup %12713 }
 0x516   :  { %7451 = vmatpush.bf16.msra.mxu0 %v6981_v14  ;;  %7425 = vmatpush.bf16.msrb.mxu3 %v11288_v30  ;;  %v12490_v50 = vld [vmem:[%s18638_s9 + $0x334] sm:$0xf0]  ;;  %v18191_v14 = vpop.f32.mrf.mxu0  ;;  %7622 = vst [vmem:[%s18641_s11 + $0x8] sm:$0xff] %v12714_v28  ;;  %v12446_v28 = vld [vmem:[%s18638_s9 + $0x1dc] sm:$0xf] }
 0x517   :  { %7439 = vmatmul.bf16.vlgmr.msrb.gmra.mxu2 %v17073_v42  ;;  %7460 = vmatpush.bf16.msrb.mxu1 %v10652_v39  ;;  %v11163_v63 = vld [vmem:[%s18638_s9 + $0x518] sm:$0xf]  ;;  %v10908_v13 = vor.u32 %v12490_v50, %v10907_v10 }
 0x518   :  { %7496 = vmatpush.bf16.msra.mxu2 %v11516_v24  ;;  %v12554_v38 = vld [vmem:[%s18638_s9 + $0x534] sm:$0xf0]  ;;  %v7167_v11 = vpop.f32.mrf.mxu3 }
 0x519   :  { %7426 = vmatmul.bf16.vlgmr.msrb.gmra.mxu3 %v16990_v4  ;;  %v10555_v9 = vld [vmem:[%s18638_s9 + $0x58] sm:$0xf]  ;;  %v11164_v16 = vor.u32 %v12554_v38, %v11163_v63 }
 0x51a   :  { %7470 = vmatpush.bf16.msra.mxu3 %v11004_v33  ;;  %7483 = vmatpush.bf16.msrb.mxu0 %v11260_v34  ;;  %v12402_v26 = vld [vmem:[%s18638_s9 + $0x74] sm:$0xf0]  ;;  %v18221_v33 = vpop.f32.mrf.mxu2 }
 0x51b   :  { %7461 = vmatpush.bf16.msrb.mxu1 %v10620_v60  ;;  %v11387_v21 = vld [vmem:[%s18638_s9 + $0x6d8] sm:$0xf]  ;;  %v10556_v49 = vor.u32 %v12402_v26, %v10555_v9 }
 0x51c   :  { %7497 = vmatpush.bf16.msra.mxu2 %v11484_v20  ;;  %v12610_v25 = vld [vmem:[%s18638_s9 + $0x6f4] sm:$0xf0] }
 0x51d   :  { %v10875_v27 = vld [vmem:[%s18638_s9 + $0x2d8] sm:$0xf]  ;;  %v11388_v34 = vor.u32 %v12610_v25, %v11387_v21  ;;  %v12510_v21 = vld [vmem:[%s18638_s9 + $0x3dc] sm:$0xf] }
 0x51e   :  { %7471 = vmatpush.bf16.msra.mxu3 %v10972_v47  ;;  %7484 = vmatpush.bf16.msrb.mxu0 %v11228_v23  ;;  %v12482_v58 = vld [vmem:[%s18638_s9 + $0x2f4] sm:$0xf0]  ;;  %v7155_v47 = vadd.f32 %v18113_v59, %v5328_v31  ;;  %v7182_v23 = vpop.f32.mrf.mxu0 }
 0x51f   :  { %7462 = vmatpush.bf16.msrb.mxu1 %v10588_v44  ;;  %v11131_v12 = vld [vmem:[%s18638_s9 + $0x4d8] sm:$0xf]  ;;  %v10876_v41 = vor.u32 %v12482_v58, %v10875_v27 }
 0x520   :  { %7498 = vmatpush.bf16.msra.mxu2 %v11452_v19  ;;  %v12546_v29 = vld [vmem:[%s18638_s9 + $0x4f4] sm:$0xf0]  ;;  %v7168_v62 = vadd.f32 %v7167_v11, %v7155_v47  ;;  %v7169_v44 = vpop.f32.mrf.mxu3 }
 0x521   :  { %v10523_v30 = vld [vmem:[%s18638_s9 + $0x18] sm:$0xf]  ;;  %v11132_v39 = vor.u32 %v12546_v29, %v11131_v12 }
 0x522   :  { %7472 = vmatpush.bf16.msra.mxu3 %v10940_v15  ;;  %7485 = vmatpush.bf16.msrb.mxu0 %v11196_v5  ;;  %v12394_v24 = vld [vmem:[%s18638_s9 + $0x34] sm:$0xf0]  ;;  %v7195_v15 = vpop.f32.mrf.mxu2 }
 0x523   :  { %v11771_v36 = vld [vmem:[%s18638_s9 + $0x9d8] sm:$0xf]  ;;  %7463 = vmatpush.bf16.msrb.mxu1 %v10556_v49  ;;  %v10524_v45 = vor.u32 %v12394_v24, %v10523_v30  ;;  %v10749_v49 = vld [vmem:[%s18638_s9 + $0x1f8] sm:$0xf0] }
 0x524   :  { %7499 = vmatpush.bf16.msra.mxu2 %v11420_v43  ;;  %v12706_v37 = vld [vmem:[%s18638_s9 + $0x9f4] sm:$0xf0]  ;;  %v7181_v43 = vadd.f32 %v18191_v14, %v7168_v62  ;;  %v11005_v14 = vld [vmem:[%s18638_s9 + $0x3f8] sm:$0xf0] }
 0x525   :  { %v11355_v40 = vld [vmem:[%s18638_s9 + $0x698] sm:$0xf]  ;;  %11782 = vmatmul.msk.bf16.vlgmr.msra.gmra.mxu0 %vm4450_vm2, %v17017_v1  ;;  %v11772_v20 = vor.u32 %v12706_v37, %v11771_v36  ;;  %v11008_v36 = vor.u32 %v12510_v21, %v11005_v14  ;;  %v10752_v37 = vor.u32 %v12446_v28, %v10749_v49  ;;  %v12430_v62 = vld [vmem:[%s18638_s9 + $0x15c] sm:$0xf] }
 0x526   :  { %7473 = vmatpush.bf16.msra.mxu3 %v10908_v13  ;;  %7486 = vmatpush.bf16.msrb.mxu0 %v11164_v16  ;;  %v12602_v18 = vld [vmem:[%s18638_s9 + $0x6b4] sm:$0xf0]  ;;  %v7194_v31 = vadd.f32 %v18221_v33, %v7181_v43  ;;  %v11261_v33 = vld [vmem:[%s18638_s9 + $0x5f8] sm:$0xf0] }
 0x527   :  { %v10843_v35 = vld [vmem:[%s18638_s9 + $0x298] sm:$0xf]  ;;  %v11356_v48 = vor.u32 %v12602_v18, %v11355_v40  ;;  %7464 = vmatpush.bf16.msrb.mxu1 %v10524_v45  ;;  %v12574_v18 = vld [vmem:[%s18638_s9 + $0x5dc] sm:$0xf] }
 0x528   :  { %v12474_v55 = vld [vmem:[%s18638_s9 + $0x2b4] sm:$0xf0]  ;;  %7500 = vmatpush.bf16.msra.mxu2 %v11388_v34  ;;  %v7206_v34 = vpop.f32.mrf.mxu1  ;;  %v12478_v14 = vld [vmem:[%s18638_s9 + $0x2dc] sm:$0xf] }
 0x529   :  { %v11099_v46 = vld [vmem:[%s18638_s9 + $0x498] sm:$0xf]  ;;  %v10844_v57 = vor.u32 %v12474_v55, %v10843_v35  ;;  %v12438_v35 = vld [vmem:[%s18638_s9 + $0x19c] sm:$0xf]  ;;  %v7207_v45 = vadd.f32 %v7206_v34, %v7194_v31 }
 0x52a   :  { %v12538_v53 = vld [vmem:[%s18638_s9 + $0x4b4] sm:$0xf0]  ;;  %7474 = vmatpush.bf16.msra.mxu3 %v10876_v41  ;;  %7487 = vmatpush.bf16.msrb.mxu0 %v11132_v39  ;;  %v12502_v41 = vld [vmem:[%s18638_s9 + $0x39c] sm:$0xf] }
 0x52b   :  { %v11739_v17 = vld [vmem:[%s18638_s9 + $0x998] sm:$0xf]  ;;  %v11100_v60 = vor.u32 %v12538_v53, %v11099_v46  ;;  %7509 = vmatpush.bf16.msra.mxu1 %v11772_v20  ;;  %v10973_v39 = vld [vmem:[%s18638_s9 + $0x3b8] sm:$0xf0]  ;;  %v7219_v20 = vpop.f32.mrf.mxu3 }
 0x52c   :  { %v12698_v51 = vld [vmem:[%s18638_s9 + $0x9b4] sm:$0xf0]  ;;  %7501 = vmatpush.bf16.msra.mxu2 %v11356_v48  ;;  %7465 = vmatmul.bf16.vlgmr.msrb.gmra.mxu1 %v16871_v8  ;;  %v10717_v55 = vld [vmem:[%s18638_s9 + $0x1b8] sm:$0xf0]  ;;  %v7220_v47 = vadd.f32 %v7219_v20, %v7207_v45  ;;  %v10976_v48 = vor.u32 %v12502_v41, %v10973_v39 }
 0x52d   :  { %v11323_v61 = vld [vmem:[%s18638_s9 + $0x658] sm:$0xf]  ;;  %v11740_v2 = vor.u32 %v12698_v51, %v11739_v17  ;;  %v11264_v17 = vor.u32 %v12574_v18, %v11261_v33  ;;  %v12494_v51 = vld [vmem:[%s18638_s9 + $0x35c] sm:$0xf] }
 0x52e   :  { %v12594_v59 = vld [vmem:[%s18638_s9 + $0x674] sm:$0xf0]  ;;  %7475 = vmatpush.bf16.msra.mxu3 %v10844_v57  ;;  %7488 = vmatpush.bf16.msrb.mxu0 %v11100_v60  ;;  %v10941_v57 = vld [vmem:[%s18638_s9 + $0x378] sm:$0xf0]  ;;  %v10720_v60 = vor.u32 %v12438_v35, %v10717_v55  ;;  %12715 = vtanh.f32 %v7220_v47 }
 0x52f   :  { %v10811_v56 = vld [vmem:[%s18638_s9 + $0x258] sm:$0xf]  ;;  %v11324_v5 = vor.u32 %v12594_v59, %v11323_v61  ;;  %7510 = vmatpush.bf16.msra.mxu1 %v11740_v2  ;;  %v12566_v59 = vld [vmem:[%s18638_s9 + $0x59c] sm:$0xf]  ;;  %v10944_v15 = vor.u32 %v12494_v51, %v10941_v57 }
 0x530   :  { %v12466_v0 = vld [vmem:[%s18638_s9 + $0x274] sm:$0xf0]  ;;  %v7208_v2 = vpop.f32.mrf.mxu1  ;;  %v10877_v28 = vld [vmem:[%s18638_s9 + $0x2f8] sm:$0xf0] }
 0x531   :  { %v11067_v22 = vld [vmem:[%s18638_s9 + $0x458] sm:$0xf]  ;;  %v10812_v50 = vor.u32 %v12466_v0, %v10811_v56  ;;  %7502 = vmatpush.bf16.msra.mxu2 %v11324_v5  ;;  %v11229_v56 = vld [vmem:[%s18638_s9 + $0x5b8] sm:$0xf0]  ;;  %v10880_v41 = vor.u32 %v12478_v14, %v10877_v28 }
 0x532   :  { %v12530_v19 = vld [vmem:[%s18638_s9 + $0x474] sm:$0xf0]  ;;  %v10685_v0 = vld [vmem:[%s18638_s9 + $0x178] sm:$0xf0]  ;;  %v11232_v5 = vor.u32 %v12566_v59, %v11229_v56 }
 0x533   :  { %v18277_v3 = vld [vmem:[%s18638_s9 + $0xa18] sm:$0xff]  ;;  %v11068_v63 = vor.u32 %v12530_v19, %v11067_v22  ;;  %7476 = vmatpush.bf16.msra.mxu3 %v10812_v50 }
 0x534   :  { %v11291_v6 = vld [vmem:[%s18638_s9 + $0x618] sm:$0xf]  ;;  %v6312_v25 = vunpack.c.l.b16 %v18277_v3  ;;  %v12558_v50 = vld [vmem:[%s18638_s9 + $0x55c] sm:$0xf]  ;;  %v12716_v21 = vpop.eup %12715  ;;  %v6313_v2 = vunpack.c.h.b16 %v18277_v3 }
 0x535   :  { %v11707_v7 = vld [vmem:[%s18638_s9 + $0x958] sm:$0xf]  ;;  %7489 = vmatpush.bf16.msrb.mxu0 %v11068_v63  ;;  %v11197_v63 = vld [vmem:[%s18638_s9 + $0x578] sm:$0xf0]  ;;  %7623 = vst [vmem:[%s18641_s11 + $0x10] sm:$0xff] %v12716_v21 }
 0x536   :  { %v12690_v10 = vld [vmem:[%s18638_s9 + $0x974] sm:$0xf0]  ;;  %v6640_v11 = vpack.c.b16 %v6312_v25, %v6312_v25  ;;  %v12550_v49 = vld [vmem:[%s18638_s9 + $0x51c] sm:$0xf]  ;;  %v6641_v21 = vpack.c.b16 %v6313_v2, %v6313_v2 }
 0x537   :  { %v12586_v38 = vld [vmem:[%s18638_s9 + $0x634] sm:$0xf0]  ;;  %v11708_v27 = vor.u32 %v12690_v10, %v11707_v7  ;;  %v10909_v7 = vld [vmem:[%s18638_s9 + $0x338] sm:$0xf0]  ;;  %v10688_v10 = vor.u32 %v12430_v62, %v10685_v0 }
 0x538   :  { %v10779_v9 = vld [vmem:[%s18638_s9 + $0x218] sm:$0xf]  ;;  %v11292_v58 = vor.u32 %v12586_v38, %v11291_v6  ;;  %v6984_v23 = vsel %vm4454_vm1, %v6640_v11, 0  ;;  %v12486_v6 = vld [vmem:[%s18638_s9 + $0x31c] sm:$0xf] }
 0x539   :  { %v12458_v26 = vld [vmem:[%s18638_s9 + $0x234] sm:$0xf0]  ;;  %7511 = vmatpush.bf16.msra.mxu1 %v11708_v27  ;;  %v12422_v38 = vld [vmem:[%s18638_s9 + $0x11c] sm:$0xf]  ;;  %v10912_v25 = vor.u32 %v12486_v6, %v10909_v7  ;;  %v11200_v27 = vor.u32 %v12558_v50, %v11197_v63 }
 0x53a   :  { %v11035_v13 = vld [vmem:[%s18638_s9 + $0x418] sm:$0xf]  ;;  %v10780_v30 = vor.u32 %v12458_v26, %v10779_v9  ;;  %7503 = vmatpush.bf16.msra.mxu2 %v11292_v58  ;;  %v10653_v9 = vld [vmem:[%s18638_s9 + $0x138] sm:$0xf0] }
 0x53b   :  { %v12522_v16 = vld [vmem:[%s18638_s9 + $0x434] sm:$0xf0]  ;;  %v10656_v58 = vor.u32 %v12422_v38, %v10653_v9  ;;  %v11517_v11 = vld [vmem:[%s18638_s9 + $0x7f8] sm:$0xf0] }
 0x53c   :  { %v11675_v12 = vld [vmem:[%s18638_s9 + $0x918] sm:$0xf]  ;;  %v11036_v24 = vor.u32 %v12522_v16, %v11035_v13  ;;  %7477 = vmatpush.bf16.msra.mxu3 %v10780_v30  ;;  %v18401_v13 = vpop.f32.mrf.mxu0  ;;  %v7221_v16 = vpop.f32.mrf.mxu3  ;;  %v12414_v30 = vld [vmem:[%s18638_s9 + $0xdc] sm:$0xf] }
 0x53d   :  { %v12682_v29 = vld [vmem:[%s18638_s9 + $0x934] sm:$0xf0]  ;;  %7504 = vmatmul.bf16.vlgmr.msra.gmra.mxu2 %v16990_v4  ;;  %v10845_v35 = vld [vmem:[%s18638_s9 + $0x2b8] sm:$0xf0] }
 0x53e   :  { %v11676_v40 = vor.u32 %v12682_v29, %v11675_v12  ;;  %v11643_v46 = vld [vmem:[%s18638_s9 + $0x8d8] sm:$0xf]  ;;  %7490 = vmatpush.bf16.msrb.mxu0 %v11036_v24  ;;  %7548 = vmatpush.bf16.msrb.mxu2 %v11008_v36  ;;  %v11165_v29 = vld [vmem:[%s18638_s9 + $0x538] sm:$0xf0]  ;;  %v18430_v36 = vpop.f32.mrf.mxu2 }
 0x53f   :  { %v12674_v53 = vld [vmem:[%s18638_s9 + $0x8f4] sm:$0xf0]  ;;  %7478 = vmatmul.bf16.vlgmr.msra.gmra.mxu3 %v16840_v54  ;;  %v10621_v24 = vld [vmem:[%s18638_s9 + $0xf8] sm:$0xf0]  ;;  %v11168_v39 = vor.u32 %v12550_v49, %v11165_v29 }
 0x540   :  { %7512 = vmatpush.bf16.msra.mxu1 %v11676_v40  ;;  %v11644_v61 = vor.u32 %v12674_v53, %v11643_v46  ;;  %v11611_v22 = vld [vmem:[%s18638_s9 + $0x898] sm:$0xf]  ;;  %7529 = vmatpush.bf16.msrb.mxu3 %v6984_v23  ;;  %v12470_v40 = vld [vmem:[%s18638_s9 + $0x29c] sm:$0xf]  ;;  %v10624_v18 = vor.u32 %v12414_v30, %v10621_v24 }
 0x541   :  { %7491 = vmatmul.bf16.vlgmr.msrb.gmra.mxu0 %v16924_v52  ;;  %v12666_v19 = vld [vmem:[%s18638_s9 + $0x8b4] sm:$0xf0]  ;;  %v12542_v45 = vld [vmem:[%s18638_s9 + $0x4dc] sm:$0xf]  ;;  %v10848_v51 = vor.u32 %v12470_v40, %v10845_v35 }
 0x542   :  { %7535 = vmatpush.bf16.msra.mxu0 %v10752_v37  ;;  %7549 = vmatpush.bf16.msrb.mxu2 %v10976_v48  ;;  %v11612_v44 = vor.u32 %v12666_v19, %v11611_v22  ;;  %v11579_v26 = vld [vmem:[%s18638_s9 + $0x858] sm:$0xf]  ;;  %v12638_v37 = vld [vmem:[%s18638_s9 + $0x7dc] sm:$0xf] }
 0x543   :  { %v12658_v43 = vld [vmem:[%s18638_s9 + $0x874] sm:$0xf0]  ;;  %v11133_v55 = vld [vmem:[%s18638_s9 + $0x4f8] sm:$0xf0]  ;;  %v11520_v46 = vor.u32 %v12638_v37, %v11517_v11  ;;  %v7271_v29 = vpop.f32.mrf.mxu1 }
 0x544   :  { %7561 = vmatpush.bf16.msra.mxu3 %v11264_v17  ;;  %7513 = vmatpush.bf16.msra.mxu1 %v11644_v61  ;;  %v11580_v12 = vor.u32 %v12658_v43, %v11579_v26  ;;  %v11547_v31 = vld [vmem:[%s18638_s9 + $0x818] sm:$0xf]  ;;  %v12406_v53 = vld [vmem:[%s18638_s9 + $0x9c] sm:$0xf]  ;;  %v7234_v47 = vpop.f32.mrf.mxu0  ;;  %v18462_v17 = vpop.f32.mrf.mxu3  ;;  %v11136_v57 = vor.u32 %v12542_v45, %v11133_v55 }
 0x545   :  { %v12650_v34 = vld [vmem:[%s18638_s9 + $0x834] sm:$0xf0]  ;;  %v10589_v20 = vld [vmem:[%s18638_s9 + $0xb8] sm:$0xf0] }
 0x546   :  { %7536 = vmatpush.bf16.msra.mxu0 %v10720_v60  ;;  %7550 = vmatpush.bf16.msrb.mxu2 %v10944_v15  ;;  %v11548_v33 = vor.u32 %v12650_v34, %v11547_v31  ;;  %v12630_v23 = vld [vmem:[%s18638_s9 + $0x79c] sm:$0xf]  ;;  %v10592_v61 = vor.u32 %v12406_v53, %v10589_v20  ;;  %v7247_v15 = vpop.f32.mrf.mxu2 }
 0x547   :  { %v11485_v48 = vld [vmem:[%s18638_s9 + $0x7b8] sm:$0xf0] }
 0x548   :  { %7562 = vmatpush.bf16.msra.mxu3 %v11232_v5  ;;  %7514 = vmatpush.bf16.msra.mxu1 %v11612_v44  ;;  %v12462_v60 = vld [vmem:[%s18638_s9 + $0x25c] sm:$0xf]  ;;  %v11488_v0 = vor.u32 %v12630_v23, %v11485_v48 }
 0x549   :  { %v10813_v59 = vld [vmem:[%s18638_s9 + $0x278] sm:$0xf0] }
 0x54a   :  { %7537 = vmatpush.bf16.msra.mxu0 %v10688_v10  ;;  %7551 = vmatpush.bf16.msrb.mxu2 %v10912_v25  ;;  %v12534_v56 = vld [vmem:[%s18638_s9 + $0x49c] sm:$0xf]  ;;  %v10816_v7 = vor.u32 %v12462_v60, %v10813_v59 }
 0x54b   :  { %v11101_v62 = vld [vmem:[%s18638_s9 + $0x4b8] sm:$0xf0] }
 0x54c   :  { %7563 = vmatpush.bf16.msra.mxu3 %v11200_v27  ;;  %7515 = vmatpush.bf16.msra.mxu1 %v11580_v12  ;;  %v12398_v22 = vld [vmem:[%s18638_s9 + $0x5c] sm:$0xf]  ;;  %v11104_v10 = vor.u32 %v12534_v56, %v11101_v62  ;;  %v7260_v28 = vpop.f32.mrf.mxu3  ;;  %v5329_v12 = vperm.slane %v17858_v32, 3  ;;  %v6987_v32 = vsel %vm4454_vm1, %v6641_v21, 0 }
 0x54d   :  { %v10557_v19 = vld [vmem:[%s18638_s9 + $0x78] sm:$0xf0] }
 0x54e   :  { %7538 = vmatpush.bf16.msra.mxu0 %v10656_v58  ;;  %7552 = vmatpush.bf16.msrb.mxu2 %v10880_v41  ;;  %v12622_v5 = vld [vmem:[%s18638_s9 + $0x75c] sm:$0xf]  ;;  %v10560_v3 = vor.u32 %v12398_v22, %v10557_v19  ;;  %v7297_v41 = vpop.f32.mrf.mxu2  ;;  %v7233_v35 = vadd.f32 %v18401_v13, %v5329_v12 }
 0x54f   :  { %11783 = vmatmul.msk.bf16.vlgmr.msrb.gmra.mxu3 %vm4450_vm2, %v17017_v1  ;;  %v11453_v6 = vld [vmem:[%s18638_s9 + $0x778] sm:$0xf0] }
 0x550   :  { %7564 = vmatpush.bf16.msra.mxu3 %v11168_v39  ;;  %7516 = vmatpush.bf16.msra.mxu1 %v11548_v33  ;;  %v12454_v44 = vld [vmem:[%s18638_s9 + $0x21c] sm:$0xf]  ;;  %v11456_v9 = vor.u32 %v12622_v5, %v11453_v6  ;;  %v7246_v53 = vadd.f32 %v18430_v36, %v7233_v35  ;;  %v7273_v36 = vpop.f32.mrf.mxu1  ;;  %v7284_v59 = vpop.f32.mrf.mxu0 }
 0x551   :  { %v10781_v50 = vld [vmem:[%s18638_s9 + $0x238] sm:$0xf0] }
 0x552   :  { %7539 = vmatpush.bf16.msra.mxu0 %v10624_v18  ;;  %7553 = vmatpush.bf16.msrb.mxu2 %v10848_v51  ;;  %v12526_v63 = vld [vmem:[%s18638_s9 + $0x45c] sm:$0xf]  ;;  %v10784_v49 = vor.u32 %v12454_v44, %v10781_v50  ;;  %v7259_v23 = vadd.f32 %v18462_v17, %v7246_v53 }
 0x553   :  { %7517 = vmatmul.bf16.vlgmr.msra.gmra.mxu1 %v17073_v42  ;;  %v11069_v38 = vld [vmem:[%s18638_s9 + $0x478] sm:$0xf0] }
 0x554   :  { %7574 = vmatpush.bf16.msrb.mxu1 %v11520_v46  ;;  %7565 = vmatpush.bf16.msra.mxu3 %v11136_v57  ;;  %v12390_v26 = vld [vmem:[%s18638_s9 + $0x1c] sm:$0xf]  ;;  %v11072_v58 = vor.u32 %v12526_v63, %v11069_v38  ;;  %v7272_v57 = vadd.f32 %v7271_v29, %v7259_v23 }
 0x555   :  { %v10525_v43 = vld [vmem:[%s18638_s9 + $0x38] sm:$0xf0] }
 0x556   :  { %7540 = vmatpush.bf16.msra.mxu0 %v10592_v61  ;;  %v12702_v16 = vld [vmem:[%s18638_s9 + $0x9dc] sm:$0xf]  ;;  %7554 = vmatpush.bf16.msrb.mxu2 %v10816_v7  ;;  %v10528_v30 = vor.u32 %v12390_v26, %v10525_v43  ;;  %v7299_v60 = vpop.f32.mrf.mxu2  ;;  %v7285_v56 = vadd.f32 %v7284_v59, %v7272_v57 }
 0x557   :  { %v11773_v25 = vld [vmem:[%s18638_s9 + $0x9f8] sm:$0xf0] }
 0x558   :  { %7575 = vmatpush.bf16.msrb.mxu1 %v11488_v0  ;;  %v12614_v27 = vld [vmem:[%s18638_s9 + $0x71c] sm:$0xf]  ;;  %7566 = vmatpush.bf16.msra.mxu3 %v11104_v10  ;;  %v11776_v34 = vor.u32 %v12702_v16, %v11773_v25  ;;  %v7298_v22 = vadd.f32 %v7297_v41, %v7285_v56  ;;  %v7286_v44 = vpop.f32.mrf.mxu0 }
 0x559   :  { %v11421_v14 = vld [vmem:[%s18638_s9 + $0x738] sm:$0xf0] }
 0x55a   :  { %7541 = vmatpush.bf16.msra.mxu0 %v10560_v3  ;;  %v12518_v24 = vld [vmem:[%s18638_s9 + $0x41c] sm:$0xf]  ;;  %v11424_v37 = vor.u32 %v12614_v27, %v11421_v14  ;;  %7555 = vmatpush.bf16.msrb.mxu2 %v10784_v49  ;;  %12717 = vtanh.f32 %v7298_v22  ;;  %v7310_v50 = vpop.f32.mrf.mxu3 }
 0x55b   :  { %v11037_v31 = vld [vmem:[%s18638_s9 + $0x438] sm:$0xf0] }
 0x55c   :  { %7576 = vmatpush.bf16.msrb.mxu1 %v11456_v9  ;;  %v12694_v11 = vld [vmem:[%s18638_s9 + $0x99c] sm:$0xf]  ;;  %7567 = vmatpush.bf16.msra.mxu3 %v11072_v58  ;;  %v11040_v33 = vor.u32 %v12518_v24, %v11037_v31 }
 0x55d   :  { %v11741_v39 = vld [vmem:[%s18638_s9 + $0x9b8] sm:$0xf0]  ;;  %7556 = vmatmul.bf16.vlgmr.msrb.gmra.mxu2 %v16840_v54 }
 0x55e   :  { %v12606_v40 = vld [vmem:[%s18638_s9 + $0x6dc] sm:$0xf]  ;;  %7542 = vmatpush.bf16.msra.mxu0 %v10528_v30  ;;  %7607 = vmatpush.bf16.msra.mxu2 %v6987_v32  ;;  %v11744_v45 = vor.u32 %v12694_v11, %v11741_v39  ;;  %v7336_v3 = vpop.f32.mrf.mxu2 }
 0x55f   :  { %v11389_v18 = vld [vmem:[%s18638_s9 + $0x6f8] sm:$0xf0] }
 0x560   :  { %7577 = vmatpush.bf16.msrb.mxu1 %v11424_v37  ;;  %v11392_v55 = vor.u32 %v12606_v40, %v11389_v18  ;;  %v12686_v46 = vld [vmem:[%s18638_s9 + $0x95c] sm:$0xf]  ;;  %7568 = vmatpush.bf16.msra.mxu3 %v11040_v33  ;;  %v12718_v38 = vpop.eup %12717 }
 0x561   :  { %v11709_v20 = vld [vmem:[%s18638_s9 + $0x978] sm:$0xf0]  ;;  %7543 = vmatmul.bf16.vlgmr.msra.gmra.mxu0 %v16871_v8  ;;  %7624 = vst [vmem:[%s18641_s11 + $0x18] sm:$0xff] %v12718_v38 }
 0x562   :  { %7587 = vmatpush.bf16.msrb.mxu0 %v11776_v34  ;;  %v12598_v13 = vld [vmem:[%s18638_s9 + $0x69c] sm:$0xf]  ;;  %v11712_v54 = vor.u32 %v12686_v46, %v11709_v20  ;;  %v7312_v25 = vpop.f32.mrf.mxu3 }
 0x563   :  { %v11357_v47 = vld [vmem:[%s18638_s9 + $0x6b8] sm:$0xf0]  ;;  %7569 = vmatmul.bf16.vlgmr.msra.gmra.mxu3 %v16924_v52  ;;  %v7323_v27 = vpop.f32.mrf.mxu1 }
 0x564   :  { %7578 = vmatpush.bf16.msrb.mxu1 %v11392_v55  ;;  %v11360_v48 = vor.u32 %v12598_v13, %v11357_v47  ;;  %v12678_v51 = vld [vmem:[%s18638_s9 + $0x91c] sm:$0xf] }
 0x565   :  { %v11677_v8 = vld [vmem:[%s18638_s9 + $0x938] sm:$0xf0] }
 0x566   :  { %7588 = vmatpush.bf16.msrb.mxu0 %v11744_v45  ;;  %v12590_v17 = vld [vmem:[%s18638_s9 + $0x65c] sm:$0xf]  ;;  %v11680_v62 = vor.u32 %v12678_v51, %v11677_v8  ;;  %v7338_v21 = vpop.f32.mrf.mxu2 }
 0x567   :  { %v11325_v61 = vld [vmem:[%s18638_s9 + $0x678] sm:$0xf0] }
 0x568   :  { %7579 = vmatpush.bf16.msrb.mxu1 %v11360_v48  ;;  %v11328_v0 = vor.u32 %v12590_v17, %v11325_v61  ;;  %v12670_v52 = vld [vmem:[%s18638_s9 + $0x8dc] sm:$0xf] }
 0x569   :  { %v11645_v19 = vld [vmem:[%s18638_s9 + $0x8f8] sm:$0xf0] }
 0x56a   :  { %7589 = vmatpush.bf16.msrb.mxu0 %v11712_v54  ;;  %v12582_v2 = vld [vmem:[%s18638_s9 + $0x61c] sm:$0xf]  ;;  %v11648_v5 = vor.u32 %v12670_v52, %v11645_v19 }
 0x56b   :  { %v11293_v15 = vld [vmem:[%s18638_s9 + $0x638] sm:$0xf0]  ;;  %v7325_v49 = vpop.f32.mrf.mxu1 }
 0x56c   :  { %7580 = vmatpush.bf16.msrb.mxu1 %v11328_v0  ;;  %v11296_v6 = vor.u32 %v12582_v2, %v11293_v15  ;;  %v12662_v7 = vld [vmem:[%s18638_s9 + $0x89c] sm:$0xf] }
 0x56d   :  { %v11613_v10 = vld [vmem:[%s18638_s9 + $0x8b8] sm:$0xf0]  ;;  %11784 = vmatmul.msk.bf16.vlgmr.msra.gmra.mxu2 %vm4450_vm2, %v17017_v1 }
 0x56e   :  { %7590 = vmatpush.bf16.msrb.mxu0 %v11680_v62  ;;  %v11616_v63 = vor.u32 %v12662_v7, %v11613_v10  ;;  %v12654_v9 = vld [vmem:[%s18638_s9 + $0x85c] sm:$0xf] }
 0x56f   :  { %v11581_v26 = vld [vmem:[%s18638_s9 + $0x878] sm:$0xf0] }
 0x570   :  { %7581 = vmatpush.bf16.msrb.mxu1 %v11296_v6  ;;  %v11584_v43 = vor.u32 %v12654_v9, %v11581_v26  ;;  %v12646_v1 = vld [vmem:[%s18638_s9 + $0x81c] sm:$0xf]  ;;  %v7349_v58 = vpop.f32.mrf.mxu0 }
 0x571   :  { %v11549_v16 = vld [vmem:[%s18638_s9 + $0x838] sm:$0xf0] }
 0x572   :  { %7591 = vmatpush.bf16.msrb.mxu0 %v11648_v5  ;;  %v11552_v14 = vor.u32 %v12646_v1, %v11549_v16 }
 0x573   :  { %7582 = vmatmul.bf16.vlgmr.msrb.gmra.mxu1 %v16990_v4  ;;  %v18612_v4 = vld [vmem:[%s18640_s10] sm:$0xff]  ;;  %v7375_v30 = vpop.f32.mrf.mxu1 }
 0x574   :  { %v5330_v28 = vperm.slane %v18612_v4, 4  ;;  %v5331_v35 = vperm.slane %v18612_v4, 5  ;;  %v5332_v62 = vperm.slane %v18612_v4, 6 }
 0x576   :  { %7592 = vmatpush.bf16.msrb.mxu0 %v11616_v63  ;;  %v7311_v12 = vadd.f32 %v7310_v50, %v5330_v28 }
 0x578   :  { %v7324_v29 = vadd.f32 %v7323_v27, %v7311_v12  ;;  %v7351_v31 = vpop.f32.mrf.mxu0  ;;  %v7388_v37 = vpop.f32.mrf.mxu2 }
 0x579   :  { %v7389_v46 = vadd.f32 %v7388_v37, %v5331_v35 }
 0x57a   :  { %7593 = vmatpush.bf16.msrb.mxu0 %v11584_v43  ;;  %v7337_v24 = vadd.f32 %v7336_v3, %v7324_v29  ;;  %v7362_v11 = vpop.f32.mrf.mxu3 }
 0x57c   :  { %v7350_v34 = vadd.f32 %v7349_v58, %v7337_v24 }
 0x57e   :  { %7594 = vmatpush.bf16.msrb.mxu0 %v11552_v14  ;;  %v7363_v32 = vadd.f32 %v7362_v11, %v7350_v34  ;;  %v5333_v14 = vperm.slane %v18612_v4, 7 }
 0x580   :  { %v7376_v41 = vadd.f32 %v7375_v30, %v7363_v32  ;;  %v7390_v39 = vpop.f32.mrf.mxu2 }
 0x581   :  { %7595 = vmatmul.bf16.vlgmr.msrb.gmra.mxu0 %v17073_v42  ;;  %v7377_v42 = vpop.f32.mrf.mxu1 }
 0x582   :  { %12719 = vtanh.f32 %v7376_v41  ;;  %v7364_v40 = vpop.f32.mrf.mxu3 }
 0x588   :  { %v12720_v18 = vpop.eup %12719 }
 0x589   :  { %7625 = vst [vmem:[%s18641_s11 + $0x20] sm:$0xff] %v12720_v18  ;;  %v7414_v33 = vpop.f32.mrf.mxu1 }
 0x591   :  { %v7416_v55 = vpop.f32.mrf.mxu1 }
 0x592   :  { %v7401_v45 = vpop.f32.mrf.mxu0 }
 0x593   :  { %v7402_v53 = vadd.f32 %v7401_v45, %v7389_v46 }
 0x595   :  { %v7415_v47 = vadd.f32 %v7414_v33, %v7402_v53 }
 0x59a   :  { %v7403_v20 = vpop.f32.mrf.mxu0  ;;  %v7440_v13 = vpop.f32.mrf.mxu2 }
 0x59c   :  { %v7427_v23 = vpop.f32.mrf.mxu3 }
 0x59d   :  { %v7428_v36 = vadd.f32 %v7427_v23, %v7415_v47 }
 0x59f   :  { %v7441_v54 = vadd.f32 %v7440_v13, %v7428_v36 }
 0x5a2   :  { %v7453_v48 = vpop.f32.mrf.mxu0  ;;  %v7442_v51 = vpop.f32.mrf.mxu2 }
 0x5a3   :  { %v7454_v57 = vadd.f32 %v7453_v48, %v7441_v54 }
 0x5a4   :  { %v7429_v60 = vpop.f32.mrf.mxu3 }
 0x5a5   :  { %12721 = vtanh.f32 %v7454_v57 }
 0x5a9   :  { %v7466_v8 = vpop.f32.mrf.mxu1 }
 0x5aa   :  { %v7455_v17 = vpop.f32.mrf.mxu0  ;;  %v7467_v22 = vadd.f32 %v7466_v8, %v5332_v62 }
 0x5ab   :  { %v12722_v61 = vpop.eup %12721 }
 0x5ac   :  { %7626 = vst [vmem:[%s18641_s11 + $0x28] sm:$0xff] %v12722_v61 }
 0x5b1   :  { %v7468_v59 = vpop.f32.mrf.mxu1 }
 0x5be   :  { %v7492_v56 = vpop.f32.mrf.mxu0 }
 0x5c0   :  { %v7505_v0 = vpop.f32.mrf.mxu2 }
 0x5c2   :  { %v7479_v52 = vpop.f32.mrf.mxu3 }
 0x5c3   :  { %v7480_v2 = vadd.f32 %v7479_v52, %v7467_v22 }
 0x5c5   :  { %v7493_v5 = vadd.f32 %v7492_v56, %v7480_v2 }
 0x5c6   :  { %v7494_v19 = vpop.f32.mrf.mxu0 }
 0x5c7   :  { %v7506_v7 = vadd.f32 %v7505_v0, %v7493_v5 }
 0x5c8   :  { %v7507_v15 = vpop.f32.mrf.mxu2 }
 0x5ca   :  { %v7481_v6 = vpop.f32.mrf.mxu3 }
 0x5d0   :  { %v7518_v10 = vpop.f32.mrf.mxu1 }
 0x5d1   :  { %v7519_v44 = vadd.f32 %v7518_v10, %v7506_v7 }
 0x5d2   :  { %v7531_v3 = vpop.f32.mrf.mxu3 }
 0x5d3   :  { %v7532_v50 = vadd.f32 %v7531_v3, %v7519_v44 }
 0x5d5   :  { %12723 = vtanh.f32 %v7532_v50 }
 0x5d8   :  { %v7520_v63 = vpop.f32.mrf.mxu1 }
 0x5da   :  { %v7533_v9 = vpop.f32.mrf.mxu3 }
 0x5db   :  { %v12724_v26 = vpop.eup %12723 }
 0x5dc   :  { %7627 = vst [vmem:[%s18641_s11 + $0x30] sm:$0xff] %v12724_v26 }
 0x5de   :  { %v7544_v38 = vpop.f32.mrf.mxu0 }
 0x5df   :  { %v7545_v49 = vadd.f32 %v7544_v38, %v5333_v14 }
 0x5e0   :  { %v7557_v43 = vpop.f32.mrf.mxu2 }
 0x5e1   :  { %v7558_v58 = vadd.f32 %v7557_v43, %v7545_v49 }
 0x5e6   :  { %v7546_v1 = vpop.f32.mrf.mxu0  ;;  %v7570_v16 = vpop.f32.mrf.mxu3 }
 0x5e7   :  { %v7571_v29 = vadd.f32 %v7570_v16, %v7558_v58 }
 0x5e8   :  { %v7559_v21 = vpop.f32.mrf.mxu2 }
 0x5ee   :  { %v7572_v25 = vpop.f32.mrf.mxu3 }
 0x5f0   :  { %v7583_v27 = vpop.f32.mrf.mxu1  ;;  %v7609_v28 = vpop.f32.mrf.mxu2 }
 0x5f1   :  { %v7584_v30 = vadd.f32 %v7583_v27, %v7571_v29 }
 0x5f8   :  { %v7585_v12 = vpop.f32.mrf.mxu1  ;;  %v7611_v31 = vpop.f32.mrf.mxu2 }
 0x5fe   :  { %v7596_v24 = vpop.f32.mrf.mxu0 }
 0x5ff   :  { %v7597_v34 = vadd.f32 %v7596_v24, %v7584_v30 }
 0x601   :  { %v7610_v37 = vadd.f32 %v7609_v28, %v7597_v34 }
 0x603   :  { %12725 = vtanh.f32 %v7610_v37 }
 0x606   :  { %v7598_v11 = vpop.f32.mrf.mxu0 }
 0x609   :  { %v12726_v32 = vpop.eup %12725 }
 0x60a   :  { %7628 = vst [vmem:[%s18641_s11 + $0x38] sm:$0xff] %v12726_v32 }

</bundles_post_ra>
